<compile_context>
chip_gen: v7x
topology: tpu7x:2x2x1
jax: 0.10.0
libtpu: 0.0.40
codegen_flags: <defaults>
</compile_context>

<pallas_src>
import functools

import jax
import jax.numpy as jnp
import numpy as np
from jax import lax
from jax.experimental import pallas as pl
from jax.experimental.pallas import tpu as pltpu


def _hardswish(x):
    return x * jnp.clip(x + 3.0, 0.0, 6.0) * (1.0 / 6.0)


# ----------------------------------------------------------------------------
# Fused kernel: 7x7 combined depthwise + block-diagonal pointwise + hardswish
# on a lane-dense (G*H, W*C) block (G images per grid step).
# ----------------------------------------------------------------------------
def _aggregator_kernel(x_ref, wv_ref, bd_ref, o_ref, acc_ref, *, C, R, H, G):
    # x_ref  : (G*H, W*C) f32   G images, channels interleaved along the lanes
    # wv_ref : (7, 7, W*C) f32  per-tap lane weights, W-boundary mask folded in
    # bd_ref : (W*C, W*C) bf16  kron(I_W, Pw) block-diagonal pointwise matrix
    # o_ref  : (G*H, W*C) f32
    # acc_ref: (G*H, W*C) f32   VMEM scratch (depthwise result for whole block)
    WC = x_ref.shape[1]

    # Hoisted per-dh H-boundary (SAME padding) row masks — identical for every
    # image in the block, so compute them once per grid step.
    hrow = lax.broadcasted_iota(jnp.int32, (H, 1), 0)
    row_masks = [((hrow + dh >= 0) & (hrow + dh < H)).astype(jnp.float32)
                 for dh in range(-R, R + 1)]

    # Depthwise accumulation per image: bounds vreg live ranges to ~(H, WC)
    # per operand (unrolling all 49 taps over G*H rows would spill the 64-vreg
    # file).  Results go to VMEM scratch so the pointwise matmul runs ONCE with
    # M = G*H rows.
    @pl.loop(0, G)
    def _(g):
        r0 = pl.multiple_of(g * H, H)
        xg = x_ref[pl.ds(r0, H), :].astype(jnp.float32)          # (H, WC)
        acc = jnp.zeros((H, WC), jnp.float32)
        for idh, dh in enumerate(range(-R, R + 1)):
            if dh == 0:
                slab = xg
            else:
                # value at row h+dh, rows falling outside the image zeroed
                slab = pltpu.roll(xg, shift=(-dh) % H, axis=0) * row_masks[idh]
            wv_dh = wv_ref[idh]                                   # (7, WC), one load per dh
            for idw, dw in enumerate(range(-R, R + 1)):
                if dw == 0:
                    shifted = slab
                else:
                    # value at column w+dw (XLU lane roll by dw*C); W-boundary
                    # mask is already folded into wv.
                    shifted = pltpu.roll(slab, shift=(-dw * C) % WC, axis=1)
                acc = acc + shifted * wv_dh[idw:idw + 1, :]       # VPU FMA (f32)
        acc_ref[pl.ds(r0, H), :] = acc

    # One pointwise 1x1 conv for every image / W position in the block: a single
    # MXU matmul with bf16 operands (MXU-native on v5e/v6e/v7x), f32 accumulation,
    # M = G*H (>= 32) instead of 16.
    y = jnp.dot(acc_ref[...].astype(jnp.bfloat16), bd_ref[...],
                preferred_element_type=jnp.float32)
    o_ref[...] = _hardswish(y).astype(o_ref.dtype)
    # TODO(synk): optional further rework for v6e/v7x (MXU has slack): fold the
    # 42 lane rolls + per-tap FMAs into 7 per-dh (WC, WC) matrices
    # A_dh = sum_dw Shift(dw*C) @ diag(wv[dh, dw]) @ kron(I_W, pw) and replace
    # the dw loop with y += rolled_x(dh) @ A_dh; benchmark on v5e first.


# ----------------------------------------------------------------------------
# Wrapper helpers
# ----------------------------------------------------------------------------
def _weight_spec(block_shape, index_map):
    """Resident (constant-index) weight input: single-buffer it so the default
    double-buffer VMEM reservation is not paid for data that never changes."""
    try:
        return pl.BlockSpec(block_shape, index_map, pipeline_mode=pl.Buffered(1))
    except TypeError:  # older JAX without BlockSpec.pipeline_mode
        return pl.BlockSpec(block_shape, index_map)


def _grid_steps(B):
    """v7x has 2 TensorCores/chip: use 2 grid steps (one per TC).  Single-TC
    chips (v5e/v6e): one step amortizes the 512x512 MXU weight push and the
    ~0.35us per-step pipeline overhead and raises the matmul M to B*H."""
    try:
        kind = jax.devices()[0].device_kind.lower().replace(" ", "")
    except Exception:
        kind = ""
    steps = 2 if ("v7" in kind or "tpu7" in kind) else 1
    steps = max(1, min(B, steps))
    while B % steps:
        steps -= 1
    return steps


# ----------------------------------------------------------------------------
# Wrapper: builds the fused weights (parameter-only prep) and calls the kernel.
# ----------------------------------------------------------------------------
def aggregator_forward(x, size, params, dim, seg=4):
    """Fused Pallas implementation of Aggregator.forward.

    x: (B, N, C) with N == H*W and C == dim.  Returns (B, N, C)."""
    B, N, C = x.shape
    H, W = size
    assert N == H * W and C == dim and dim % seg == 0
    seg_dim = dim // seg
    R = 3                       # max radius (7x7)
    T = 2 * R + 1
    WC = W * C
    dtype = x.dtype
    f32 = jnp.float32

    # Fold the three depthwise kernels (+ centre delta for segment 0) into one
    # (7, 7, C) tensor; taps outside a segment's true kernel are zero, so one
    # uniform 7x7 accumulation with zero "virtual padding" reproduces SAME
    # padding for every segment.
    dw_full = jnp.zeros((T, T, C), f32)
    dw_full = dw_full.at[R, R, 0:seg_dim].set(jnp.ones((seg_dim,), f32))
    for i, K in enumerate((3, 5, 7)):
        p = (K - 1) // 2
        s = (i + 1) * seg_dim
        dw_full = dw_full.at[R - p:R + p + 1, R - p:R + p + 1, s:s + seg_dim].set(
            params[f"dw{K}"].astype(f32))

    # Per-tap lane-weight vectors on the (rows, W*C) layout with the W-boundary
    # mask folded in:  wv[dh, dw, w*C + c] = dw_full[dh, dw, c] * (0 <= w+dw < W)
    wcol = jnp.arange(W)
    dws = jnp.arange(-R, R + 1)
    valid_w = ((wcol[None, :] + dws[:, None] >= 0) &
               (wcol[None, :] + dws[:, None] < W)).astype(f32)      # (7, W)
    lane_mask = jnp.repeat(valid_w, C, axis=1)                      # (7, W*C)
    wv = jnp.tile(dw_full, (1, 1, W)) * lane_mask[None, :, :]       # (7, 7, W*C)

    # Block-diagonal pointwise: identity for segment 0, pw3/pw5/pw7 blocks,
    # replicated across the W positions of the lane axis (Kronecker product).
    # Stored bf16 -> MXU-native operands and half the DMA / VMEM footprint.
    pw_full = jnp.zeros((C, C), f32)
    pw_full = pw_full.at[0:seg_dim, 0:seg_dim].set(jnp.eye(seg_dim, dtype=f32))
    for i, K in enumerate((3, 5, 7)):
        s = (i + 1) * seg_dim
        pw_full = pw_full.at[s:s + seg_dim, s:s + seg_dim].set(
            params[f"pw{K}"].astype(f32))
    bd = jnp.kron(jnp.eye(W, dtype=f32), pw_full).astype(jnp.bfloat16)  # (WC, WC)
    # TODO(synk): bd grows as (W*C)^2 — before scaling H/W/C, switch to a
    # lane-tiled pointwise (per-W-group CxC blocks) instead of kron(I_W, pw),
    # and add a row-tile grid axis + bf16 activations at the HBM boundary.

    # Lane-dense view of the token layout: (B, N, C) == (B*H, W*C) row-major
    # (a free reshape; no transpose / concat / pad anywhere in the wrapper).
    xr = x.reshape(B * H, WC)

    steps = _grid_steps(B)
    G = B // steps              # images per grid step
    GH = G * H                  # matmul M per step

    kernel = functools.partial(_aggregator_kernel, C=C, R=R, H=H, G=G)
    out = pl.pallas_call(
        kernel,
        out_shape=jax.ShapeDtypeStruct((B * H, WC), dtype),
        grid_spec=pltpu.PrefetchScalarGridSpec(
            num_scalar_prefetch=0,
            grid=(steps,),
            in_specs=[
                pl.BlockSpec((GH, WC), lambda b: (b, 0)),
                _weight_spec((T, T, WC), lambda b: (0, 0, 0)),   # resident weights
                _weight_spec((WC, WC), lambda b: (0, 0)),        # resident weights
            ],
            out_specs=pl.BlockSpec((GH, WC), lambda b: (b, 0)),
            scratch_shapes=[pltpu.VMEM((GH, WC), jnp.float32)],
        ),
        compiler_params=pltpu.CompilerParams(
            dimension_semantics=("parallel",)),
    )(xr, wv, bd)
    return out.reshape(B, N, C)


# ----------------------------------------------------------------------------
# Pure-JAX reference (correctness check only; HIGHEST precision = true f32)
# ----------------------------------------------------------------------------
def _ref_sepconv_hswish(x_nhwc, dw, pw_t, K):
    C = x_nhwc.shape[-1]
    rhs = dw.reshape(K, K, 1, C)  # HWIO, depthwise
    y = lax.conv_general_dilated(
        x_nhwc, rhs, window_strides=(1, 1), padding="SAME",
        dimension_numbers=("NHWC", "HWIO", "NHWC"), feature_group_count=C,
        precision=lax.Precision.HIGHEST)
    y = jnp.einsum("bhwc,co->bhwo", y, pw_t, precision=lax.Precision.HIGHEST)
    return _hardswish(y)


def aggregator_reference(x, size, params, dim, seg=4):
    B, N, C = x.shape
    H, W = size
    seg_dim = dim // seg
    x_nhwc = x.reshape(B, H, W, C)
    outs = [_hardswish(x_nhwc[..., :seg_dim])]
    for i, K in enumerate((3, 5, 7)):
        s = (i + 1) * seg_dim
        outs.append(_ref_sepconv_hswish(x_nhwc[..., s:s + seg_dim],
                                        params[f"dw{K}"], params[f"pw{K}"], K))
    y = jnp.concatenate(outs, axis=-1)
    return y.reshape(B, H * W, C)


# ----------------------------------------------------------------------------
# Main
# ----------------------------------------------------------------------------
if __name__ == "__main__":
    B, H, W = 4, 16, 16
    dim, seg = 32, 4
    seg_dim = dim // seg
    N = H * W

    key = jax.random.PRNGKey(0)
    k_x, k1, k2, k3, k4, k5, k6 = jax.random.split(key, 7)

    x = jax.random.normal(k_x, (B, N, dim), dtype=jnp.float32)
    params = {
        "dw3": 0.2 * jax.random.normal(k1, (3, 3, seg_dim), dtype=jnp.float32),
        "pw3": 0.2 * jax.random.normal(k2, (seg_dim, seg_dim), dtype=jnp.float32),
        "dw5": 0.2 * jax.random.normal(k3, (5, 5, seg_dim), dtype=jnp.float32),
        "pw5": 0.2 * jax.random.normal(k4, (seg_dim, seg_dim), dtype=jnp.float32),
        "dw7": 0.2 * jax.random.normal(k5, (7, 7, seg_dim), dtype=jnp.float32),
        "pw7": 0.2 * jax.random.normal(k6, (seg_dim, seg_dim), dtype=jnp.float32),
    }

    fwd = jax.jit(lambda xx, pp: aggregator_forward(xx, (H, W), pp, dim, seg))
    out = jax.block_until_ready(fwd(x, params))
    assert out.shape == (B, N, dim)

    ref_fn = jax.jit(lambda xx, pp: aggregator_reference(xx, (H, W), pp, dim, seg))
    ref = jax.block_until_ready(ref_fn(x, params))
    # bf16 MXU operands in the pointwise matmul (~0.4% operand rounding) vs the
    # exact-f32 reference -> relaxed tolerance.  Depthwise path is exact f32.
    np.testing.assert_allclose(np.asarray(out), np.asarray(ref),
                               rtol=3e-2, atol=3e-2)

    print("KERNEL_OK")
</pallas_src>

<mosaic_0001>
module attributes {stable_mosaic.version = 11 : i64} {
  func.func @_aggregator_kernel(%arg0: i32, %arg1: memref<64x512xf32, #tpu.memory_space<vmem>>, %arg2: memref<7x7x512xf32, #tpu.memory_space<vmem>>, %arg3: memref<512x512xbf16, #tpu.memory_space<vmem>>, %arg4: memref<64x512xf32, #tpu.memory_space<vmem>>, %arg5: memref<64x512xf32, #tpu.memory_space<vmem>>) attributes {dimension_semantics = [#tpu.dimension_semantics<parallel>], iteration_bounds = array<i64: 1>, scalar_prefetch = 0 : i64, scratch_operands = 1 : i64, tpu.core_type = #tpu.core_type<tc>, window_params = [{transform_indices = @transform_0, window_bounds = array<i64: 64, 512>}, {pipeline_mode = #tpu.pipeline_mode<synchronous>, transform_indices = @transform_1, window_bounds = array<i64: 7, 7, 512>}, {pipeline_mode = #tpu.pipeline_mode<synchronous>, transform_indices = @transform_2, window_bounds = array<i64: 512, 512>}, {transform_indices = @transform_3, window_bounds = array<i64: 64, 512>}]} {
    %0 = tpu.iota {dimensions = array<i32: 0>} : vector<16x1xi32>
    %c-3_i32 = arith.constant -3 : i32
    %1 = vector.broadcast %c-3_i32 : i32 to vector<16x1xi32>
    %2 = arith.addi %0, %1 : vector<16x1xi32>
    %c0_i32 = arith.constant 0 : i32
    %3 = vector.broadcast %c0_i32 : i32 to vector<16x1xi32>
    %4 = arith.cmpi sge, %2, %3 : vector<16x1xi32>
    %c-3_i32_0 = arith.constant -3 : i32
    %5 = vector.broadcast %c-3_i32_0 : i32 to vector<16x1xi32>
    %6 = arith.addi %0, %5 : vector<16x1xi32>
    %c16_i32 = arith.constant 16 : i32
    %7 = vector.broadcast %c16_i32 : i32 to vector<16x1xi32>
    %8 = arith.cmpi slt, %6, %7 : vector<16x1xi32>
    %9 = arith.andi %4, %8 : vector<16x1xi1>
    %10 = arith.extui %9 : vector<16x1xi1> to vector<16x1xi32>
    %11 = arith.sitofp %10 : vector<16x1xi32> to vector<16x1xf32>
    %c-2_i32 = arith.constant -2 : i32
    %12 = vector.broadcast %c-2_i32 : i32 to vector<16x1xi32>
    %13 = arith.addi %0, %12 : vector<16x1xi32>
    %c0_i32_1 = arith.constant 0 : i32
    %14 = vector.broadcast %c0_i32_1 : i32 to vector<16x1xi32>
    %15 = arith.cmpi sge, %13, %14 : vector<16x1xi32>
    %c-2_i32_2 = arith.constant -2 : i32
    %16 = vector.broadcast %c-2_i32_2 : i32 to vector<16x1xi32>
    %17 = arith.addi %0, %16 : vector<16x1xi32>
    %c16_i32_3 = arith.constant 16 : i32
    %18 = vector.broadcast %c16_i32_3 : i32 to vector<16x1xi32>
    %19 = arith.cmpi slt, %17, %18 : vector<16x1xi32>
    %20 = arith.andi %15, %19 : vector<16x1xi1>
    %21 = arith.extui %20 : vector<16x1xi1> to vector<16x1xi32>
    %22 = arith.sitofp %21 : vector<16x1xi32> to vector<16x1xf32>
    %c-1_i32 = arith.constant -1 : i32
    %23 = vector.broadcast %c-1_i32 : i32 to vector<16x1xi32>
    %24 = arith.addi %0, %23 : vector<16x1xi32>
    %c0_i32_4 = arith.constant 0 : i32
    %25 = vector.broadcast %c0_i32_4 : i32 to vector<16x1xi32>
    %26 = arith.cmpi sge, %24, %25 : vector<16x1xi32>
    %c-1_i32_5 = arith.constant -1 : i32
    %27 = vector.broadcast %c-1_i32_5 : i32 to vector<16x1xi32>
    %28 = arith.addi %0, %27 : vector<16x1xi32>
    %c16_i32_6 = arith.constant 16 : i32
    %29 = vector.broadcast %c16_i32_6 : i32 to vector<16x1xi32>
    %30 = arith.cmpi slt, %28, %29 : vector<16x1xi32>
    %31 = arith.andi %26, %30 : vector<16x1xi1>
    %32 = arith.extui %31 : vector<16x1xi1> to vector<16x1xi32>
    %33 = arith.sitofp %32 : vector<16x1xi32> to vector<16x1xf32>
    %c1_i32 = arith.constant 1 : i32
    %34 = vector.broadcast %c1_i32 : i32 to vector<16x1xi32>
    %35 = arith.addi %0, %34 : vector<16x1xi32>
    %c0_i32_7 = arith.constant 0 : i32
    %36 = vector.broadcast %c0_i32_7 : i32 to vector<16x1xi32>
    %37 = arith.cmpi sge, %35, %36 : vector<16x1xi32>
    %c1_i32_8 = arith.constant 1 : i32
    %38 = vector.broadcast %c1_i32_8 : i32 to vector<16x1xi32>
    %39 = arith.addi %0, %38 : vector<16x1xi32>
    %c16_i32_9 = arith.constant 16 : i32
    %40 = vector.broadcast %c16_i32_9 : i32 to vector<16x1xi32>
    %41 = arith.cmpi slt, %39, %40 : vector<16x1xi32>
    %42 = arith.andi %37, %41 : vector<16x1xi1>
    %43 = arith.extui %42 : vector<16x1xi1> to vector<16x1xi32>
    %44 = arith.sitofp %43 : vector<16x1xi32> to vector<16x1xf32>
    %c2_i32 = arith.constant 2 : i32
    %45 = vector.broadcast %c2_i32 : i32 to vector<16x1xi32>
    %46 = arith.addi %0, %45 : vector<16x1xi32>
    %c0_i32_10 = arith.constant 0 : i32
    %47 = vector.broadcast %c0_i32_10 : i32 to vector<16x1xi32>
    %48 = arith.cmpi sge, %46, %47 : vector<16x1xi32>
    %c2_i32_11 = arith.constant 2 : i32
    %49 = vector.broadcast %c2_i32_11 : i32 to vector<16x1xi32>
    %50 = arith.addi %0, %49 : vector<16x1xi32>
    %c16_i32_12 = arith.constant 16 : i32
    %51 = vector.broadcast %c16_i32_12 : i32 to vector<16x1xi32>
    %52 = arith.cmpi slt, %50, %51 : vector<16x1xi32>
    %53 = arith.andi %48, %52 : vector<16x1xi1>
    %54 = arith.extui %53 : vector<16x1xi1> to vector<16x1xi32>
    %55 = arith.sitofp %54 : vector<16x1xi32> to vector<16x1xf32>
    %c3_i32 = arith.constant 3 : i32
    %56 = vector.broadcast %c3_i32 : i32 to vector<16x1xi32>
    %57 = arith.addi %0, %56 : vector<16x1xi32>
    %c0_i32_13 = arith.constant 0 : i32
    %58 = vector.broadcast %c0_i32_13 : i32 to vector<16x1xi32>
    %59 = arith.cmpi sge, %57, %58 : vector<16x1xi32>
    %c3_i32_14 = arith.constant 3 : i32
    %60 = vector.broadcast %c3_i32_14 : i32 to vector<16x1xi32>
    %61 = arith.addi %0, %60 : vector<16x1xi32>
    %c16_i32_15 = arith.constant 16 : i32
    %62 = vector.broadcast %c16_i32_15 : i32 to vector<16x1xi32>
    %63 = arith.cmpi slt, %61, %62 : vector<16x1xi32>
    %64 = arith.andi %59, %63 : vector<16x1xi1>
    %65 = arith.extui %64 : vector<16x1xi1> to vector<16x1xi32>
    %66 = arith.sitofp %65 : vector<16x1xi32> to vector<16x1xf32>
    %c0_i32_16 = arith.constant 0 : i32
    %c4_i32 = arith.constant 4 : i32
    %67 = arith.addi %c0_i32_16, %c4_i32 : i32
    %c1_i32_17 = arith.constant 1 : i32
    scf.for %arg6 = %c0_i32_16 to %67 step %c1_i32_17  : i32 {
      %c1_i32_28 = arith.constant 1 : i32
      %82 = arith.muli %arg6, %c1_i32_28 : i32
      %c0_i32_29 = arith.constant 0 : i32
      %83 = arith.addi %c0_i32_29, %82 : i32
      %c16_i32_30 = arith.constant 16 : i32
      %84 = arith.muli %83, %c16_i32_30 : i32
      %85 = tpu.assume_multiple %84, 16 : i32
      %86 = arith.index_cast %85 : i32 to index
      %c0_31 = arith.constant 0 : index
      %87 = vector.load %arg1[%86, %c0_31] : memref<64x512xf32, #tpu.memory_space<vmem>>, vector<16x512xf32>
      %cst_32 = arith.constant 0.000000e+00 : f32
      %88 = vector.broadcast %cst_32 : f32 to vector<16x512xf32>
      %c3_i32_33 = arith.constant 3 : i32
      %89 = tpu.dynamic_rotate %87 by %c3_i32_33 dim 0 : vector<16x512xf32>, i32 -> vector<16x512xf32>
      %90 = vector.broadcast %11 : vector<16x1xf32> to vector<16x512xf32>
      %91 = arith.mulf %89, %90 : vector<16x512xf32>
      %c0_34 = arith.constant 0 : index
      %c0_35 = arith.constant 0 : index
      %c0_36 = arith.constant 0 : index
      %92 = vector.load %arg2[%c0_34, %c0_35, %c0_36] : memref<7x7x512xf32, #tpu.memory_space<vmem>>, vector<1x7x512xf32>
      %93 = vector.shape_cast %92 : vector<1x7x512xf32> to vector<7x512xf32>
      %c96_i32 = arith.constant 96 : i32
      %94 = tpu.dynamic_rotate %91 by %c96_i32 dim 1 : vector<16x512xf32>, i32 -> vector<16x512xf32>
      %95 = vector.extract_strided_slice %93 {offsets = [0, 0], sizes = [1, 512], strides = [1, 1]} : vector<7x512xf32> to vector<1x512xf32>
      %96 = vector.broadcast %95 : vector<1x512xf32> to vector<16x512xf32>
      %97 = arith.mulf %94, %96 : vector<16x512xf32>
      %98 = arith.addf %88, %97 : vector<16x512xf32>
      %c64_i32 = arith.constant 64 : i32
      %99 = tpu.dynamic_rotate %91 by %c64_i32 dim 1 : vector<16x512xf32>, i32 -> vector<16x512xf32>
      %100 = vector.extract_strided_slice %93 {offsets = [1, 0], sizes = [1, 512], strides = [1, 1]} : vector<7x512xf32> to vector<1x512xf32>
      %101 = vector.broadcast %100 : vector<1x512xf32> to vector<16x512xf32>
      %102 = arith.mulf %99, %101 : vector<16x512xf32>
      %103 = arith.addf %98, %102 : vector<16x512xf32>
      %c32_i32 = arith.constant 32 : i32
      %104 = tpu.dynamic_rotate %91 by %c32_i32 dim 1 : vector<16x512xf32>, i32 -> vector<16x512xf32>
      %105 = vector.extract_strided_slice %93 {offsets = [2, 0], sizes = [1, 512], strides = [1, 1]} : vector<7x512xf32> to vector<1x512xf32>
      %106 = vector.broadcast %105 : vector<1x512xf32> to vector<16x512xf32>
      %107 = arith.mulf %104, %106 : vector<16x512xf32>
      %108 = arith.addf %103, %107 : vector<16x512xf32>
      %109 = vector.extract_strided_slice %93 {offsets = [3, 0], sizes = [1, 512], strides = [1, 1]} : vector<7x512xf32> to vector<1x512xf32>
      %110 = vector.broadcast %109 : vector<1x512xf32> to vector<16x512xf32>
      %111 = arith.mulf %91, %110 : vector<16x512xf32>
      %112 = arith.addf %108, %111 : vector<16x512xf32>
      %c480_i32 = arith.constant 480 : i32
      %113 = tpu.dynamic_rotate %91 by %c480_i32 dim 1 : vector<16x512xf32>, i32 -> vector<16x512xf32>
      %114 = vector.extract_strided_slice %93 {offsets = [4, 0], sizes = [1, 512], strides = [1, 1]} : vector<7x512xf32> to vector<1x512xf32>
      %115 = vector.broadcast %114 : vector<1x512xf32> to vector<16x512xf32>
      %116 = arith.mulf %113, %115 : vector<16x512xf32>
      %117 = arith.addf %112, %116 : vector<16x512xf32>
      %c448_i32 = arith.constant 448 : i32
      %118 = tpu.dynamic_rotate %91 by %c448_i32 dim 1 : vector<16x512xf32>, i32 -> vector<16x512xf32>
      %119 = vector.extract_strided_slice %93 {offsets = [5, 0], sizes = [1, 512], strides = [1, 1]} : vector<7x512xf32> to vector<1x512xf32>
      %120 = vector.broadcast %119 : vector<1x512xf32> to vector<16x512xf32>
      %121 = arith.mulf %118, %120 : vector<16x512xf32>
      %122 = arith.addf %117, %121 : vector<16x512xf32>
      %c416_i32 = arith.constant 416 : i32
      %123 = tpu.dynamic_rotate %91 by %c416_i32 dim 1 : vector<16x512xf32>, i32 -> vector<16x512xf32>
      %124 = vector.extract_strided_slice %93 {offsets = [6, 0], sizes = [1, 512], strides = [1, 1]} : vector<7x512xf32> to vector<1x512xf32>
      %125 = vector.broadcast %124 : vector<1x512xf32> to vector<16x512xf32>
      %126 = arith.mulf %123, %125 : vector<16x512xf32>
      %127 = arith.addf %122, %126 : vector<16x512xf32>
      %c2_i32_37 = arith.constant 2 : i32
      %128 = tpu.dynamic_rotate %87 by %c2_i32_37 dim 0 : vector<16x512xf32>, i32 -> vector<16x512xf32>
      %129 = vector.broadcast %22 : vector<16x1xf32> to vector<16x512xf32>
      %130 = arith.mulf %128, %129 : vector<16x512xf32>
      %c1 = arith.constant 1 : index
      %c0_38 = arith.constant 0 : index
      %c0_39 = arith.constant 0 : index
      %131 = vector.load %arg2[%c1, %c0_38, %c0_39] : memref<7x7x512xf32, #tpu.memory_space<vmem>>, vector<1x7x512xf32>
      %132 = vector.shape_cast %131 : vector<1x7x512xf32> to vector<7x512xf32>
      %c96_i32_40 = arith.constant 96 : i32
      %133 = tpu.dynamic_rotate %130 by %c96_i32_40 dim 1 : vector<16x512xf32>, i32 -> vector<16x512xf32>
      %134 = vector.extract_strided_slice %132 {offsets = [0, 0], sizes = [1, 512], strides = [1, 1]} : vector<7x512xf32> to vector<1x512xf32>
      %135 = vector.broadcast %134 : vector<1x512xf32> to vector<16x512xf32>
      %136 = arith.mulf %133, %135 : vector<16x512xf32>
      %137 = arith.addf %127, %136 : vector<16x512xf32>
      %c64_i32_41 = arith.constant 64 : i32
      %138 = tpu.dynamic_rotate %130 by %c64_i32_41 dim 1 : vector<16x512xf32>, i32 -> vector<16x512xf32>
      %139 = vector.extract_strided_slice %132 {offsets = [1, 0], sizes = [1, 512], strides = [1, 1]} : vector<7x512xf32> to vector<1x512xf32>
      %140 = vector.broadcast %139 : vector<1x512xf32> to vector<16x512xf32>
      %141 = arith.mulf %138, %140 : vector<16x512xf32>
      %142 = arith.addf %137, %141 : vector<16x512xf32>
      %c32_i32_42 = arith.constant 32 : i32
      %143 = tpu.dynamic_rotate %130 by %c32_i32_42 dim 1 : vector<16x512xf32>, i32 -> vector<16x512xf32>
      %144 = vector.extract_strided_slice %132 {offsets = [2, 0], sizes = [1, 512], strides = [1, 1]} : vector<7x512xf32> to vector<1x512xf32>
      %145 = vector.broadcast %144 : vector<1x512xf32> to vector<16x512xf32>
      %146 = arith.mulf %143, %145 : vector<16x512xf32>
      %147 = arith.addf %142, %146 : vector<16x512xf32>
      %148 = vector.extract_strided_slice %132 {offsets = [3, 0], sizes = [1, 512], strides = [1, 1]} : vector<7x512xf32> to vector<1x512xf32>
      %149 = vector.broadcast %148 : vector<1x512xf32> to vector<16x512xf32>
      %150 = arith.mulf %130, %149 : vector<16x512xf32>
      %151 = arith.addf %147, %150 : vector<16x512xf32>
      %c480_i32_43 = arith.constant 480 : i32
      %152 = tpu.dynamic_rotate %130 by %c480_i32_43 dim 1 : vector<16x512xf32>, i32 -> vector<16x512xf32>
      %153 = vector.extract_strided_slice %132 {offsets = [4, 0], sizes = [1, 512], strides = [1, 1]} : vector<7x512xf32> to vector<1x512xf32>
      %154 = vector.broadcast %153 : vector<1x512xf32> to vector<16x512xf32>
      %155 = arith.mulf %152, %154 : vector<16x512xf32>
      %156 = arith.addf %151, %155 : vector<16x512xf32>
      %c448_i32_44 = arith.constant 448 : i32
      %157 = tpu.dynamic_rotate %130 by %c448_i32_44 dim 1 : vector<16x512xf32>, i32 -> vector<16x512xf32>
      %158 = vector.extract_strided_slice %132 {offsets = [5, 0], sizes = [1, 512], strides = [1, 1]} : vector<7x512xf32> to vector<1x512xf32>
      %159 = vector.broadcast %158 : vector<1x512xf32> to vector<16x512xf32>
      %160 = arith.mulf %157, %159 : vector<16x512xf32>
      %161 = arith.addf %156, %160 : vector<16x512xf32>
      %c416_i32_45 = arith.constant 416 : i32
      %162 = tpu.dynamic_rotate %130 by %c416_i32_45 dim 1 : vector<16x512xf32>, i32 -> vector<16x512xf32>
      %163 = vector.extract_strided_slice %132 {offsets = [6, 0], sizes = [1, 512], strides = [1, 1]} : vector<7x512xf32> to vector<1x512xf32>
      %164 = vector.broadcast %163 : vector<1x512xf32> to vector<16x512xf32>
      %165 = arith.mulf %162, %164 : vector<16x512xf32>
      %166 = arith.addf %161, %165 : vector<16x512xf32>
      %c1_i32_46 = arith.constant 1 : i32
      %167 = tpu.dynamic_rotate %87 by %c1_i32_46 dim 0 : vector<16x512xf32>, i32 -> vector<16x512xf32>
      %168 = vector.broadcast %33 : vector<16x1xf32> to vector<16x512xf32>
      %169 = arith.mulf %167, %168 : vector<16x512xf32>
      %c2 = arith.constant 2 : index
      %c0_47 = arith.constant 0 : index
      %c0_48 = arith.constant 0 : index
      %170 = vector.load %arg2[%c2, %c0_47, %c0_48] : memref<7x7x512xf32, #tpu.memory_space<vmem>>, vector<1x7x512xf32>
      %171 = vector.shape_cast %170 : vector<1x7x512xf32> to vector<7x512xf32>
      %c96_i32_49 = arith.constant 96 : i32
      %172 = tpu.dynamic_rotate %169 by %c96_i32_49 dim 1 : vector<16x512xf32>, i32 -> vector<16x512xf32>
      %173 = vector.extract_strided_slice %171 {offsets = [0, 0], sizes = [1, 512], strides = [1, 1]} : vector<7x512xf32> to vector<1x512xf32>
      %174 = vector.broadcast %173 : vector<1x512xf32> to vector<16x512xf32>
      %175 = arith.mulf %172, %174 : vector<16x512xf32>
      %176 = arith.addf %166, %175 : vector<16x512xf32>
      %c64_i32_50 = arith.constant 64 : i32
      %177 = tpu.dynamic_rotate %169 by %c64_i32_50 dim 1 : vector<16x512xf32>, i32 -> vector<16x512xf32>
      %178 = vector.extract_strided_slice %171 {offsets = [1, 0], sizes = [1, 512], strides = [1, 1]} : vector<7x512xf32> to vector<1x512xf32>
      %179 = vector.broadcast %178 : vector<1x512xf32> to vector<16x512xf32>
      %180 = arith.mulf %177, %179 : vector<16x512xf32>
      %181 = arith.addf %176, %180 : vector<16x512xf32>
      %c32_i32_51 = arith.constant 32 : i32
      %182 = tpu.dynamic_rotate %169 by %c32_i32_51 dim 1 : vector<16x512xf32>, i32 -> vector<16x512xf32>
      %183 = vector.extract_strided_slice %171 {offsets = [2, 0], sizes = [1, 512], strides = [1, 1]} : vector<7x512xf32> to vector<1x512xf32>
      %184 = vector.broadcast %183 : vector<1x512xf32> to vector<16x512xf32>
      %185 = arith.mulf %182, %184 : vector<16x512xf32>
      %186 = arith.addf %181, %185 : vector<16x512xf32>
      %187 = vector.extract_strided_slice %171 {offsets = [3, 0], sizes = [1, 512], strides = [1, 1]} : vector<7x512xf32> to vector<1x512xf32>
      %188 = vector.broadcast %187 : vector<1x512xf32> to vector<16x512xf32>
      %189 = arith.mulf %169, %188 : vector<16x512xf32>
      %190 = arith.addf %186, %189 : vector<16x512xf32>
      %c480_i32_52 = arith.constant 480 : i32
      %191 = tpu.dynamic_rotate %169 by %c480_i32_52 dim 1 : vector<16x512xf32>, i32 -> vector<16x512xf32>
      %192 = vector.extract_strided_slice %171 {offsets = [4, 0], sizes = [1, 512], strides = [1, 1]} : vector<7x512xf32> to vector<1x512xf32>
      %193 = vector.broadcast %192 : vector<1x512xf32> to vector<16x512xf32>
      %194 = arith.mulf %191, %193 : vector<16x512xf32>
      %195 = arith.addf %190, %194 : vector<16x512xf32>
      %c448_i32_53 = arith.constant 448 : i32
      %196 = tpu.dynamic_rotate %169 by %c448_i32_53 dim 1 : vector<16x512xf32>, i32 -> vector<16x512xf32>
      %197 = vector.extract_strided_slice %171 {offsets = [5, 0], sizes = [1, 512], strides = [1, 1]} : vector<7x512xf32> to vector<1x512xf32>
      %198 = vector.broadcast %197 : vector<1x512xf32> to vector<16x512xf32>
      %199 = arith.mulf %196, %198 : vector<16x512xf32>
      %200 = arith.addf %195, %199 : vector<16x512xf32>
      %c416_i32_54 = arith.constant 416 : i32
      %201 = tpu.dynamic_rotate %169 by %c416_i32_54 dim 1 : vector<16x512xf32>, i32 -> vector<16x512xf32>
      %202 = vector.extract_strided_slice %171 {offsets = [6, 0], sizes = [1, 512], strides = [1, 1]} : vector<7x512xf32> to vector<1x512xf32>
      %203 = vector.broadcast %202 : vector<1x512xf32> to vector<16x512xf32>
      %204 = arith.mulf %201, %203 : vector<16x512xf32>
      %205 = arith.addf %200, %204 : vector<16x512xf32>
      %c3 = arith.constant 3 : index
      %c0_55 = arith.constant 0 : index
      %c0_56 = arith.constant 0 : index
      %206 = vector.load %arg2[%c3, %c0_55, %c0_56] : memref<7x7x512xf32, #tpu.memory_space<vmem>>, vector<1x7x512xf32>
      %207 = vector.shape_cast %206 : vector<1x7x512xf32> to vector<7x512xf32>
      %c96_i32_57 = arith.constant 96 : i32
      %208 = tpu.dynamic_rotate %87 by %c96_i32_57 dim 1 : vector<16x512xf32>, i32 -> vector<16x512xf32>
      %209 = vector.extract_strided_slice %207 {offsets = [0, 0], sizes = [1, 512], strides = [1, 1]} : vector<7x512xf32> to vector<1x512xf32>
      %210 = vector.broadcast %209 : vector<1x512xf32> to vector<16x512xf32>
      %211 = arith.mulf %208, %210 : vector<16x512xf32>
      %212 = arith.addf %205, %211 : vector<16x512xf32>
      %c64_i32_58 = arith.constant 64 : i32
      %213 = tpu.dynamic_rotate %87 by %c64_i32_58 dim 1 : vector<16x512xf32>, i32 -> vector<16x512xf32>
      %214 = vector.extract_strided_slice %207 {offsets = [1, 0], sizes = [1, 512], strides = [1, 1]} : vector<7x512xf32> to vector<1x512xf32>
      %215 = vector.broadcast %214 : vector<1x512xf32> to vector<16x512xf32>
      %216 = arith.mulf %213, %215 : vector<16x512xf32>
      %217 = arith.addf %212, %216 : vector<16x512xf32>
      %c32_i32_59 = arith.constant 32 : i32
      %218 = tpu.dynamic_rotate %87 by %c32_i32_59 dim 1 : vector<16x512xf32>, i32 -> vector<16x512xf32>
      %219 = vector.extract_strided_slice %207 {offsets = [2, 0], sizes = [1, 512], strides = [1, 1]} : vector<7x512xf32> to vector<1x512xf32>
      %220 = vector.broadcast %219 : vector<1x512xf32> to vector<16x512xf32>
      %221 = arith.mulf %218, %220 : vector<16x512xf32>
      %222 = arith.addf %217, %221 : vector<16x512xf32>
      %223 = vector.extract_strided_slice %207 {offsets = [3, 0], sizes = [1, 512], strides = [1, 1]} : vector<7x512xf32> to vector<1x512xf32>
      %224 = vector.broadcast %223 : vector<1x512xf32> to vector<16x512xf32>
      %225 = arith.mulf %87, %224 : vector<16x512xf32>
      %226 = arith.addf %222, %225 : vector<16x512xf32>
      %c480_i32_60 = arith.constant 480 : i32
      %227 = tpu.dynamic_rotate %87 by %c480_i32_60 dim 1 : vector<16x512xf32>, i32 -> vector<16x512xf32>
      %228 = vector.extract_strided_slice %207 {offsets = [4, 0], sizes = [1, 512], strides = [1, 1]} : vector<7x512xf32> to vector<1x512xf32>
      %229 = vector.broadcast %228 : vector<1x512xf32> to vector<16x512xf32>
      %230 = arith.mulf %227, %229 : vector<16x512xf32>
      %231 = arith.addf %226, %230 : vector<16x512xf32>
      %c448_i32_61 = arith.constant 448 : i32
      %232 = tpu.dynamic_rotate %87 by %c448_i32_61 dim 1 : vector<16x512xf32>, i32 -> vector<16x512xf32>
      %233 = vector.extract_strided_slice %207 {offsets = [5, 0], sizes = [1, 512], strides = [1, 1]} : vector<7x512xf32> to vector<1x512xf32>
      %234 = vector.broadcast %233 : vector<1x512xf32> to vector<16x512xf32>
      %235 = arith.mulf %232, %234 : vector<16x512xf32>
      %236 = arith.addf %231, %235 : vector<16x512xf32>
      %c416_i32_62 = arith.constant 416 : i32
      %237 = tpu.dynamic_rotate %87 by %c416_i32_62 dim 1 : vector<16x512xf32>, i32 -> vector<16x512xf32>
      %238 = vector.extract_strided_slice %207 {offsets = [6, 0], sizes = [1, 512], strides = [1, 1]} : vector<7x512xf32> to vector<1x512xf32>
      %239 = vector.broadcast %238 : vector<1x512xf32> to vector<16x512xf32>
      %240 = arith.mulf %237, %239 : vector<16x512xf32>
      %241 = arith.addf %236, %240 : vector<16x512xf32>
      %c15_i32 = arith.constant 15 : i32
      %242 = tpu.dynamic_rotate %87 by %c15_i32 dim 0 : vector<16x512xf32>, i32 -> vector<16x512xf32>
      %243 = vector.broadcast %44 : vector<16x1xf32> to vector<16x512xf32>
      %244 = arith.mulf %242, %243 : vector<16x512xf32>
      %c4 = arith.constant 4 : index
      %c0_63 = arith.constant 0 : index
      %c0_64 = arith.constant 0 : index
      %245 = vector.load %arg2[%c4, %c0_63, %c0_64] : memref<7x7x512xf32, #tpu.memory_space<vmem>>, vector<1x7x512xf32>
      %246 = vector.shape_cast %245 : vector<1x7x512xf32> to vector<7x512xf32>
      %c96_i32_65 = arith.constant 96 : i32
      %247 = tpu.dynamic_rotate %244 by %c96_i32_65 dim 1 : vector<16x512xf32>, i32 -> vector<16x512xf32>
      %248 = vector.extract_strided_slice %246 {offsets = [0, 0], sizes = [1, 512], strides = [1, 1]} : vector<7x512xf32> to vector<1x512xf32>
      %249 = vector.broadcast %248 : vector<1x512xf32> to vector<16x512xf32>
      %250 = arith.mulf %247, %249 : vector<16x512xf32>
      %251 = arith.addf %241, %250 : vector<16x512xf32>
      %c64_i32_66 = arith.constant 64 : i32
      %252 = tpu.dynamic_rotate %244 by %c64_i32_66 dim 1 : vector<16x512xf32>, i32 -> vector<16x512xf32>
      %253 = vector.extract_strided_slice %246 {offsets = [1, 0], sizes = [1, 512], strides = [1, 1]} : vector<7x512xf32> to vector<1x512xf32>
      %254 = vector.broadcast %253 : vector<1x512xf32> to vector<16x512xf32>
      %255 = arith.mulf %252, %254 : vector<16x512xf32>
      %256 = arith.addf %251, %255 : vector<16x512xf32>
      %c32_i32_67 = arith.constant 32 : i32
      %257 = tpu.dynamic_rotate %244 by %c32_i32_67 dim 1 : vector<16x512xf32>, i32 -> vector<16x512xf32>
      %258 = vector.extract_strided_slice %246 {offsets = [2, 0], sizes = [1, 512], strides = [1, 1]} : vector<7x512xf32> to vector<1x512xf32>
      %259 = vector.broadcast %258 : vector<1x512xf32> to vector<16x512xf32>
      %260 = arith.mulf %257, %259 : vector<16x512xf32>
      %261 = arith.addf %256, %260 : vector<16x512xf32>
      %262 = vector.extract_strided_slice %246 {offsets = [3, 0], sizes = [1, 512], strides = [1, 1]} : vector<7x512xf32> to vector<1x512xf32>
      %263 = vector.broadcast %262 : vector<1x512xf32> to vector<16x512xf32>
      %264 = arith.mulf %244, %263 : vector<16x512xf32>
      %265 = arith.addf %261, %264 : vector<16x512xf32>
      %c480_i32_68 = arith.constant 480 : i32
      %266 = tpu.dynamic_rotate %244 by %c480_i32_68 dim 1 : vector<16x512xf32>, i32 -> vector<16x512xf32>
      %267 = vector.extract_strided_slice %246 {offsets = [4, 0], sizes = [1, 512], strides = [1, 1]} : vector<7x512xf32> to vector<1x512xf32>
      %268 = vector.broadcast %267 : vector<1x512xf32> to vector<16x512xf32>
      %269 = arith.mulf %266, %268 : vector<16x512xf32>
      %270 = arith.addf %265, %269 : vector<16x512xf32>
      %c448_i32_69 = arith.constant 448 : i32
      %271 = tpu.dynamic_rotate %244 by %c448_i32_69 dim 1 : vector<16x512xf32>, i32 -> vector<16x512xf32>
      %272 = vector.extract_strided_slice %246 {offsets = [5, 0], sizes = [1, 512], strides = [1, 1]} : vector<7x512xf32> to vector<1x512xf32>
      %273 = vector.broadcast %272 : vector<1x512xf32> to vector<16x512xf32>
      %274 = arith.mulf %271, %273 : vector<16x512xf32>
      %275 = arith.addf %270, %274 : vector<16x512xf32>
      %c416_i32_70 = arith.constant 416 : i32
      %276 = tpu.dynamic_rotate %244 by %c416_i32_70 dim 1 : vector<16x512xf32>, i32 -> vector<16x512xf32>
      %277 = vector.extract_strided_slice %246 {offsets = [6, 0], sizes = [1, 512], strides = [1, 1]} : vector<7x512xf32> to vector<1x512xf32>
      %278 = vector.broadcast %277 : vector<1x512xf32> to vector<16x512xf32>
      %279 = arith.mulf %276, %278 : vector<16x512xf32>
      %280 = arith.addf %275, %279 : vector<16x512xf32>
      %c14_i32 = arith.constant 14 : i32
      %281 = tpu.dynamic_rotate %87 by %c14_i32 dim 0 : vector<16x512xf32>, i32 -> vector<16x512xf32>
      %282 = vector.broadcast %55 : vector<16x1xf32> to vector<16x512xf32>
      %283 = arith.mulf %281, %282 : vector<16x512xf32>
      %c5 = arith.constant 5 : index
      %c0_71 = arith.constant 0 : index
      %c0_72 = arith.constant 0 : index
      %284 = vector.load %arg2[%c5, %c0_71, %c0_72] : memref<7x7x512xf32, #tpu.memory_space<vmem>>, vector<1x7x512xf32>
      %285 = vector.shape_cast %284 : vector<1x7x512xf32> to vector<7x512xf32>
      %c96_i32_73 = arith.constant 96 : i32
      %286 = tpu.dynamic_rotate %283 by %c96_i32_73 dim 1 : vector<16x512xf32>, i32 -> vector<16x512xf32>
      %287 = vector.extract_strided_slice %285 {offsets = [0, 0], sizes = [1, 512], strides = [1, 1]} : vector<7x512xf32> to vector<1x512xf32>
      %288 = vector.broadcast %287 : vector<1x512xf32> to vector<16x512xf32>
      %289 = arith.mulf %286, %288 : vector<16x512xf32>
      %290 = arith.addf %280, %289 : vector<16x512xf32>
      %c64_i32_74 = arith.constant 64 : i32
      %291 = tpu.dynamic_rotate %283 by %c64_i32_74 dim 1 : vector<16x512xf32>, i32 -> vector<16x512xf32>
      %292 = vector.extract_strided_slice %285 {offsets = [1, 0], sizes = [1, 512], strides = [1, 1]} : vector<7x512xf32> to vector<1x512xf32>
      %293 = vector.broadcast %292 : vector<1x512xf32> to vector<16x512xf32>
      %294 = arith.mulf %291, %293 : vector<16x512xf32>
      %295 = arith.addf %290, %294 : vector<16x512xf32>
      %c32_i32_75 = arith.constant 32 : i32
      %296 = tpu.dynamic_rotate %283 by %c32_i32_75 dim 1 : vector<16x512xf32>, i32 -> vector<16x512xf32>
      %297 = vector.extract_strided_slice %285 {offsets = [2, 0], sizes = [1, 512], strides = [1, 1]} : vector<7x512xf32> to vector<1x512xf32>
      %298 = vector.broadcast %297 : vector<1x512xf32> to vector<16x512xf32>
      %299 = arith.mulf %296, %298 : vector<16x512xf32>
      %300 = arith.addf %295, %299 : vector<16x512xf32>
      %301 = vector.extract_strided_slice %285 {offsets = [3, 0], sizes = [1, 512], strides = [1, 1]} : vector<7x512xf32> to vector<1x512xf32>
      %302 = vector.broadcast %301 : vector<1x512xf32> to vector<16x512xf32>
      %303 = arith.mulf %283, %302 : vector<16x512xf32>
      %304 = arith.addf %300, %303 : vector<16x512xf32>
      %c480_i32_76 = arith.constant 480 : i32
      %305 = tpu.dynamic_rotate %283 by %c480_i32_76 dim 1 : vector<16x512xf32>, i32 -> vector<16x512xf32>
      %306 = vector.extract_strided_slice %285 {offsets = [4, 0], sizes = [1, 512], strides = [1, 1]} : vector<7x512xf32> to vector<1x512xf32>
      %307 = vector.broadcast %306 : vector<1x512xf32> to vector<16x512xf32>
      %308 = arith.mulf %305, %307 : vector<16x512xf32>
      %309 = arith.addf %304, %308 : vector<16x512xf32>
      %c448_i32_77 = arith.constant 448 : i32
      %310 = tpu.dynamic_rotate %283 by %c448_i32_77 dim 1 : vector<16x512xf32>, i32 -> vector<16x512xf32>
      %311 = vector.extract_strided_slice %285 {offsets = [5, 0], sizes = [1, 512], strides = [1, 1]} : vector<7x512xf32> to vector<1x512xf32>
      %312 = vector.broadcast %311 : vector<1x512xf32> to vector<16x512xf32>
      %313 = arith.mulf %310, %312 : vector<16x512xf32>
      %314 = arith.addf %309, %313 : vector<16x512xf32>
      %c416_i32_78 = arith.constant 416 : i32
      %315 = tpu.dynamic_rotate %283 by %c416_i32_78 dim 1 : vector<16x512xf32>, i32 -> vector<16x512xf32>
      %316 = vector.extract_strided_slice %285 {offsets = [6, 0], sizes = [1, 512], strides = [1, 1]} : vector<7x512xf32> to vector<1x512xf32>
      %317 = vector.broadcast %316 : vector<1x512xf32> to vector<16x512xf32>
      %318 = arith.mulf %315, %317 : vector<16x512xf32>
      %319 = arith.addf %314, %318 : vector<16x512xf32>
      %c13_i32 = arith.constant 13 : i32
      %320 = tpu.dynamic_rotate %87 by %c13_i32 dim 0 : vector<16x512xf32>, i32 -> vector<16x512xf32>
      %321 = vector.broadcast %66 : vector<16x1xf32> to vector<16x512xf32>
      %322 = arith.mulf %320, %321 : vector<16x512xf32>
      %c6 = arith.constant 6 : index
      %c0_79 = arith.constant 0 : index
      %c0_80 = arith.constant 0 : index
      %323 = vector.load %arg2[%c6, %c0_79, %c0_80] : memref<7x7x512xf32, #tpu.memory_space<vmem>>, vector<1x7x512xf32>
      %324 = vector.shape_cast %323 : vector<1x7x512xf32> to vector<7x512xf32>
      %c96_i32_81 = arith.constant 96 : i32
      %325 = tpu.dynamic_rotate %322 by %c96_i32_81 dim 1 : vector<16x512xf32>, i32 -> vector<16x512xf32>
      %326 = vector.extract_strided_slice %324 {offsets = [0, 0], sizes = [1, 512], strides = [1, 1]} : vector<7x512xf32> to vector<1x512xf32>
      %327 = vector.broadcast %326 : vector<1x512xf32> to vector<16x512xf32>
      %328 = arith.mulf %325, %327 : vector<16x512xf32>
      %329 = arith.addf %319, %328 : vector<16x512xf32>
      %c64_i32_82 = arith.constant 64 : i32
      %330 = tpu.dynamic_rotate %322 by %c64_i32_82 dim 1 : vector<16x512xf32>, i32 -> vector<16x512xf32>
      %331 = vector.extract_strided_slice %324 {offsets = [1, 0], sizes = [1, 512], strides = [1, 1]} : vector<7x512xf32> to vector<1x512xf32>
      %332 = vector.broadcast %331 : vector<1x512xf32> to vector<16x512xf32>
      %333 = arith.mulf %330, %332 : vector<16x512xf32>
      %334 = arith.addf %329, %333 : vector<16x512xf32>
      %c32_i32_83 = arith.constant 32 : i32
      %335 = tpu.dynamic_rotate %322 by %c32_i32_83 dim 1 : vector<16x512xf32>, i32 -> vector<16x512xf32>
      %336 = vector.extract_strided_slice %324 {offsets = [2, 0], sizes = [1, 512], strides = [1, 1]} : vector<7x512xf32> to vector<1x512xf32>
      %337 = vector.broadcast %336 : vector<1x512xf32> to vector<16x512xf32>
      %338 = arith.mulf %335, %337 : vector<16x512xf32>
      %339 = arith.addf %334, %338 : vector<16x512xf32>
      %340 = vector.extract_strided_slice %324 {offsets = [3, 0], sizes = [1, 512], strides = [1, 1]} : vector<7x512xf32> to vector<1x512xf32>
      %341 = vector.broadcast %340 : vector<1x512xf32> to vector<16x512xf32>
      %342 = arith.mulf %322, %341 : vector<16x512xf32>
      %343 = arith.addf %339, %342 : vector<16x512xf32>
      %c480_i32_84 = arith.constant 480 : i32
      %344 = tpu.dynamic_rotate %322 by %c480_i32_84 dim 1 : vector<16x512xf32>, i32 -> vector<16x512xf32>
      %345 = vector.extract_strided_slice %324 {offsets = [4, 0], sizes = [1, 512], strides = [1, 1]} : vector<7x512xf32> to vector<1x512xf32>
      %346 = vector.broadcast %345 : vector<1x512xf32> to vector<16x512xf32>
      %347 = arith.mulf %344, %346 : vector<16x512xf32>
      %348 = arith.addf %343, %347 : vector<16x512xf32>
      %c448_i32_85 = arith.constant 448 : i32
      %349 = tpu.dynamic_rotate %322 by %c448_i32_85 dim 1 : vector<16x512xf32>, i32 -> vector<16x512xf32>
      %350 = vector.extract_strided_slice %324 {offsets = [5, 0], sizes = [1, 512], strides = [1, 1]} : vector<7x512xf32> to vector<1x512xf32>
      %351 = vector.broadcast %350 : vector<1x512xf32> to vector<16x512xf32>
      %352 = arith.mulf %349, %351 : vector<16x512xf32>
      %353 = arith.addf %348, %352 : vector<16x512xf32>
      %c416_i32_86 = arith.constant 416 : i32
      %354 = tpu.dynamic_rotate %322 by %c416_i32_86 dim 1 : vector<16x512xf32>, i32 -> vector<16x512xf32>
      %355 = vector.extract_strided_slice %324 {offsets = [6, 0], sizes = [1, 512], strides = [1, 1]} : vector<7x512xf32> to vector<1x512xf32>
      %356 = vector.broadcast %355 : vector<1x512xf32> to vector<16x512xf32>
      %357 = arith.mulf %354, %356 : vector<16x512xf32>
      %358 = arith.addf %353, %357 : vector<16x512xf32>
      %359 = arith.index_cast %85 : i32 to index
      %c0_87 = arith.constant 0 : index
      %360 = vector.load %arg5[%359, %c0_87] : memref<64x512xf32, #tpu.memory_space<vmem>>, vector<16x512xf32>
      tpu.vector_store %arg5[%359, %c0_87], %358 {strides = array<i32>} : memref<64x512xf32, #tpu.memory_space<vmem>>, vector<16x512xf32>,
    }
    %c4_i32_18 = arith.constant 4 : i32
    %c0 = arith.constant 0 : index
    %c0_19 = arith.constant 0 : index
    %68 = vector.load %arg5[%c0, %c0_19] : memref<64x512xf32, #tpu.memory_space<vmem>>, vector<64x512xf32>
    %69 = arith.truncf %68 : vector<64x512xf32> to vector<64x512xbf16>
    %c0_20 = arith.constant 0 : index
    %c0_21 = arith.constant 0 : index
    %70 = vector.load %arg3[%c0_20, %c0_21] : memref<512x512xbf16, #tpu.memory_space<vmem>>, vector<512x512xbf16>
    %cst = arith.constant dense<0.000000e+00> : vector<64x512xf32>
    %71 = tpu.matmul %69, %70, %cst {dimension_numbers = #tpu.dot_dimension_numbers<[1], [0], [0], [1], [0, 0, 1, 1], [], []>} : vector<64x512xbf16>, vector<512x512xbf16>, vector<64x512xf32> -> vector<64x512xf32>
    %cst_22 = arith.constant 3.000000e+00 : f32
    %72 = vector.broadcast %cst_22 : f32 to vector<64x512xf32>
    %73 = arith.addf %71, %72 : vector<64x512xf32>
    %cst_23 = arith.constant 0.000000e+00 : f32
    %cst_24 = arith.constant 6.000000e+00 : f32
    %74 = vector.broadcast %cst_23 : f32 to vector<64x512xf32>
    %75 = arith.maximumf %74, %73 : vector<64x512xf32>
    %76 = vector.broadcast %cst_24 : f32 to vector<64x512xf32>
    %77 = arith.minimumf %76, %75 : vector<64x512xf32>
    %78 = arith.mulf %71, %77 : vector<64x512xf32>
    %cst_25 = arith.constant 0.166666672 : f32
    %79 = vector.broadcast %cst_25 : f32 to vector<64x512xf32>
    %80 = arith.mulf %78, %79 : vector<64x512xf32>
    %c0_26 = arith.constant 0 : index
    %c0_27 = arith.constant 0 : index
    %81 = vector.load %arg4[%c0_26, %c0_27] : memref<64x512xf32, #tpu.memory_space<vmem>>, vector<64x512xf32>
    tpu.vector_store %arg4[%c0_26, %c0_27], %80 {strides = array<i32>} : memref<64x512xf32, #tpu.memory_space<vmem>>, vector<64x512xf32>,
    return
  }
  func.func @transform_0(%arg0: i32) -> (i32, i32) {
    %c0_i32 = arith.constant 0 : i32
    %c0_i32_0 = arith.constant 0 : i32
    return %arg0, %c0_i32 : i32, i32
  }
  func.func @transform_1(%arg0: i32) -> (i32, i32, i32) {
    %c0_i32 = arith.constant 0 : i32
    %c0_i32_0 = arith.constant 0 : i32
    %c0_i32_1 = arith.constant 0 : i32
    %c0_i32_2 = arith.constant 0 : i32
    return %c0_i32, %c0_i32_0, %c0_i32_1 : i32, i32, i32
  }
  func.func @transform_2(%arg0: i32) -> (i32, i32) {
    %c0_i32 = arith.constant 0 : i32
    %c0_i32_0 = arith.constant 0 : i32
    %c0_i32_1 = arith.constant 0 : i32
    return %c0_i32, %c0_i32_0 : i32, i32
  }
  func.func @transform_3(%arg0: i32) -> (i32, i32) {
    %c0_i32 = arith.constant 0 : i32
    %c0_i32_0 = arith.constant 0 : i32
    return %arg0, %c0_i32 : i32, i32
  }
}

</mosaic_0001>

<bundles_post_ra>
// kernel: tile.9
= control target key start
LH: loop header
LB: loop body
LE: loop exit
PB: predicated region body
PF: predicated region fallthrough
CT: control target
= control target key end

     0   :  { %s173_s6 = smov 3  ;;  %s176_s7 = smov 12  ;;  %vm178_vm0 = vcmask 1043458   ;;  %vm183_vm1 = vcmask 1045508   ;;  %vm188_vm2 = vcmask 1047558   ;;  %vm3_vm3 = vcmask 261120   ;;  %s4572_s0 = inlined_call_operand.vmem [shape: f32[7,7,16,32], index: 0, kind: input, shape index: {}]   ;;  %s4573_s1 = inlined_call_operand.vmem [shape: f32[7,7,512], index: 1, kind: output, shape index: {}]  }
   0x1   :  { %v2079_v0 = vld [vmem:[%s4572_s0 + $0x3] ss:$16 sm:%s173_s6]   ;;  %s181_s12 = smov 48  ;;  %s186_s13 = smov 192  ;;  %v2_v49 = vld [vmem:[%s4572_s0] ss:$4 sm:$0xff]  }
   0x2   :  { %v2080_v1 = vld [vmem:[%s4572_s0 + $0x3] ss:$16 sm:%s176_s7]   ;;  %s222_s18 = smov 3  ;;  %s225_s21 = smov 12  ;;  %v2026_v55 = vld [vmem:[%s4572_s0 + $0xe0] ss:$4 sm:$0xff]  }
   0x3   :  { %v179_v2 = vsel %vm178_vm0, %v2080_v1, %v2079_v0  ;;  %v2081_v3 = vld [vmem:[%s4572_s0 + $0x3] ss:$16 sm:%s181_s12]   ;;  %s230_s22 = smov 48  ;;  %s235_s27 = smov 192  ;;  %v2015_v1 = vld [vmem:[%s4572_s0 + $0x60] ss:$4 sm:$0xff]  }
   0x4   :  { %v2082_v4 = vld [vmem:[%s4572_s0 + $0x28b] ss:$-92 sm:%s186_s13]   ;;  %v184_v5 = vsel %vm183_vm1, %v2081_v3, %v179_v2  ;;  %s197_s28 = smov 3  ;;  %s2520_s29 = smov 96   ;;  %vm192_vm4 = vcmask 1048320   ;;  %vm804_vm5 = vcmask 785920  }
   0x5   :  { %v2090_v6 = vld [vmem:[%s4572_s0 + $0xe3] ss:$16 sm:%s222_s18]   ;;  %v189_v7 = vsel %vm188_vm2, %v2082_v4, %v184_v5  ;;  %s200_s3 = smov 12  ;;  %s205_s4 = smov 48  ;;  %vm1416_vm6 = vcmask 523520  }
   0x6   :  { %v2091_v8 = vld [vmem:[%s4572_s0 + $0xe3] ss:$16 sm:%s225_s21]   ;;  %190 = vrot.lane.b32.xlu0 %v189_v7, %s2520_s29  ;;  %s210_s9 = smov 192  ;;  %s247_s10 = smov 3  ;;  %v2035_v7 = vld [vmem:[%s4572_s0 + $0x140] ss:$4 sm:$0xff]  }
   0x7   :  { %v2092_v9 = vld [vmem:[%s4572_s0 + $0xe3] ss:$16 sm:%s230_s22]   ;;  %v228_v10 = vsel %vm178_vm0, %v2091_v8, %v2090_v6  ;;  %s250_s15 = smov 12  ;;  %s255_s16 = smov 48 }
   0x8   :  { %v2093_v11 = vld [vmem:[%s4572_s0 + $0x36b] ss:$-92 sm:%s235_s27]   ;;  %v233_v12 = vsel %vm183_vm1, %v2092_v9, %v228_v10  ;;  %s260_s19 = smov 192  ;;  %s272_s20 = smov 3 }
   0x9   :  { %v2084_v13 = vld [vmem:[%s4572_s0 + $0x73] ss:$16 sm:%s197_s28]   ;;  %v238_v15 = vsel %vm188_vm2, %v2093_v11, %v233_v12  ;;  %s275_s25 = smov 12  ;;  %s280_s26 = smov 48 }
   0xa   :  { %v2085_v14 = vld [vmem:[%s4572_s0 + $0x73] ss:$16 sm:%s200_s3]   ;;  %239 = vrot.lane.b32.xlu1 %v238_v15, %s2520_s29  ;;  %s285_s30 = smov 192  ;;  %s297_s2 = smov 3 }
   0xb   :  { %v203_v16 = vsel %vm178_vm0, %v2085_v14, %v2084_v13  ;;  %v2086_v17 = vld [vmem:[%s4572_s0 + $0x73] ss:$16 sm:%s205_s4]   ;;  %s300_s7 = smov 12  ;;  %s305_s8 = smov 48 }
   0xc   :  { %v2087_v18 = vld [vmem:[%s4572_s0 + $0x2fb] ss:$-92 sm:%s210_s9]   ;;  %v208_v19 = vsel %vm183_vm1, %v2086_v17, %v203_v16  ;;  %s310_s13 = smov 192  ;;  %s325_s17 = smov 12  ;;  %v2047_v17 = vld [vmem:[%s4572_s0 + $0x1c0] ss:$4 sm:$0xff]  }
   0xd   :  { %v2096_v20 = vld [vmem:[%s4572_s0 + $0x153] ss:$16 sm:%s247_s10]   ;;  %v213_v21 = vsel %vm188_vm2, %v2087_v18, %v208_v19  ;;  %s330_s22 = smov 48  ;;  %s335_s23 = smov 192 }
   0xe   :  { %v2097_v22 = vld [vmem:[%s4572_s0 + $0x153] ss:$16 sm:%s250_s15]   ;;  %214 = vrot.lane.b32.xlu0 %v213_v21, %s2520_s29  ;;  %s350_s27 = smov 12  ;;  %s355_s4 = smov 48 }
   0xf   :  { %v2098_v23 = vld [vmem:[%s4572_s0 + $0x153] ss:$16 sm:%s255_s16]   ;;  %v253_v24 = vsel %vm178_vm0, %v2097_v22, %v2096_v20  ;;  %s322_s16 = smov 3  ;;  %s360_s9 = smov 192  ;;  %v2121_v51 = vld [vmem:[%s4572_s0 + $0x17] ss:$16 sm:%s350_s27]  }
  0x10   :  { %v2099_v25 = vld [vmem:[%s4572_s0 + $0x3db] ss:$-92 sm:%s260_s19]   ;;  %v258_v26 = vsel %vm183_vm1, %v2098_v23, %v253_v24  ;;  %s372_s12 = smov 3  ;;  %s385_s21 = smov 192  ;;  %v2056_v23 = vld [vmem:[%s4572_s0 + $0x220] ss:$4 sm:$0xff]  }
  0x11   :  { %v2102_v27 = vld [vmem:[%s4572_s0 + $0x1c3] ss:$16 sm:%s272_s20]   ;;  %v263_v29 = vsel %vm188_vm2, %v2099_v25, %v258_v26  ;;  %v2122_v52 = vld [vmem:[%s4572_s0 + $0x17] ss:$16 sm:%s355_s4]   ;;  %s380_s20 = smov 48  ;;  %s397_s28 = smov 3 }
  0x12   :  { %v2103_v28 = vld [vmem:[%s4572_s0 + $0x1c3] ss:$16 sm:%s275_s25]   ;;  %264 = vrot.lane.b32.xlu1 %v263_v29, %s2520_s29  ;;  %4 = vst.msk [vmem:[%s4573_s1] ss:$8 sm:$0xf] %vm3_vm3, %v2_v49   ;;  %s450_s15 = smov 12 }
  0x13   :  { %v278_v30 = vsel %vm178_vm0, %v2103_v28, %v2102_v27  ;;  %v2104_v31 = vld [vmem:[%s4572_s0 + $0x1c3] ss:$16 sm:%s280_s26]   ;;  %s347_s26 = smov 3  ;;  %2008 = vst.msk [vmem:[%s4573_s1 - $0x1f] ss:$8 sm:$0xf0] %vm3_vm3, %v2_v49  }
  0x14   :  { %v2105_v32 = vld [vmem:[%s4572_s0 + $0x44b] ss:$-92 sm:%s285_s30]   ;;  %v283_v33 = vsel %vm183_vm1, %v2104_v31, %v278_v30  ;;  %2027 = vst.msk [vmem:[%s4573_s1 + $0x40] ss:$8 sm:$0xf] %vm3_vm3, %v2026_v55   ;;  %s435_s30 = smov 192 }
  0x15   :  { %v2108_v34 = vld [vmem:[%s4572_s0 + $0x233] ss:$16 sm:%s297_s2]   ;;  %v288_v35 = vsel %vm188_vm2, %v2105_v32, %v283_v33  ;;  %v2120_v48 = vld [vmem:[%s4572_s0 + $0x17] ss:$16 sm:%s347_s26]   ;;  %s460_s25 = smov 192  ;;  %s505_s24 = smov 48 }
  0x16   :  { %v2109_v36 = vld [vmem:[%s4572_s0 + $0x233] ss:$16 sm:%s300_s7]   ;;  %289 = vrot.lane.b32.xlu0 %v288_v35, %s2520_s29  ;;  %v353_v53 = vsel %vm178_vm0, %v2121_v51, %v2120_v48  ;;  %s400_s7 = smov 12  ;;  %2028 = vst.msk [vmem:[%s4573_s1 + $0x21] ss:$8 sm:$0xf0] %vm3_vm3, %v2026_v55  }
  0x17   :  { %v2110_v37 = vld [vmem:[%s4572_s0 + $0x233] ss:$16 sm:%s305_s8]   ;;  %v303_v38 = vsel %vm178_vm0, %v2109_v36, %v2108_v34  ;;  %v2123_v54 = vld [vmem:[%s4572_s0 - $0x55] ss:$16 sm:%s360_s9]   ;;  %v358_v56 = vsel %vm183_vm1, %v2122_v52, %v353_v53  ;;  %s405_s8 = smov 48  ;;  %s485_s9 = smov 192 }
  0x18   :  { %v2111_v39 = vld [vmem:[%s4572_s0 + $0x4bb] ss:$-92 sm:%s310_s13]   ;;  %v308_v40 = vsel %vm183_vm1, %v2110_v37, %v303_v38  ;;  %s375_s13 = smov 12  ;;  %v363_v59 = vsel %vm188_vm2, %v2123_v54, %v358_v56  ;;  %2016 = vst.msk [vmem:[%s4573_s1 + $0x6] ss:$8 sm:$0xf] %vm3_vm3, %v2015_v1  }
  0x19   :  { %v2114_v41 = vld [vmem:[%s4572_s0 + $0x2a3] ss:$16 sm:%s322_s16]   ;;  %v313_v43 = vsel %vm188_vm2, %v2111_v39, %v308_v40  ;;  %v2126_v57 = vld [vmem:[%s4572_s0 + $0x87] ss:$16 sm:%s372_s12]   ;;  %s455_s16 = smov 48  ;;  %s510_s5 = smov 192 }
  0x1a   :  { %v2115_v42 = vld [vmem:[%s4572_s0 + $0x2a3] ss:$16 sm:%s325_s17]   ;;  %314 = vrot.lane.b32.xlu1 %v313_v43, %s2520_s29  ;;  %s410_s17 = smov 192  ;;  %26 = vst.msk [vmem:[%s4573_s1] ss:$8 sm:$0xf0] %vm3_vm3, %v2015_v1  }
  0x1b   :  { %v328_v44 = vsel %vm178_vm0, %v2115_v42, %v2114_v41  ;;  %v2116_v45 = vld [vmem:[%s4572_s0 + $0x2a3] ss:$16 sm:%s330_s22]   ;;  %v2127_v58 = vld [vmem:[%s4572_s0 + $0x87] ss:$16 sm:%s375_s13]   ;;  %s550_s3 = smov 12  ;;  %s555_s4 = smov 48 }
  0x1c   :  { %v2117_v46 = vld [vmem:[%s4572_s0 + $0x52b] ss:$-92 sm:%s335_s23]   ;;  %v333_v47 = vsel %vm183_vm1, %v2116_v45, %v328_v44  ;;  %v378_v60 = vsel %vm178_vm0, %v2127_v58, %v2126_v57  ;;  %2036 = vst.msk [vmem:[%s4573_s1 + $0x46] ss:$8 sm:$0xf] %vm3_vm3, %v2035_v7   ;;  %s500_s23 = smov 12 }
  0x1d   :  { %v338_v50 = vsel %vm188_vm2, %v2117_v46, %v333_v47  ;;  %v2128_v61 = vld [vmem:[%s4572_s0 + $0x87] ss:$16 sm:%s380_s20]   ;;  %v2129_v62 = vld [vmem:[%s4572_s0 + $0x1b] ss:$16 sm:%s385_s21]   ;;  %s422_s20 = smov 3  ;;  %s425_s21 = smov 12 }
  0x1e   :  { %339 = vrot.lane.b32.xlu0 %v338_v50, %s2520_s29  ;;  %364 = vrot.lane.b32.xlu1 %v363_v59, %s2520_s29  ;;  %v383_v63 = vsel %vm183_vm1, %v2128_v61, %v378_v60  ;;  %v2132_v0 = vld [vmem:[%s4572_s0 + $0xf7] ss:$16 sm:%s397_s28]   ;;  %s430_s28 = smov 48  ;;  %s560_s13 = smov 192 }
  0x1f   :  { %v388_v2 = vsel %vm188_vm2, %v2129_v62, %v383_v63  ;;  %v2133_v3 = vld [vmem:[%s4572_s0 + $0xf7] ss:$16 sm:%s400_s7]   ;;  %v2135_v6 = vld [vmem:[%s4572_s0 + $0x8b] ss:$16 sm:%s410_s17]   ;;  %s535_s17 = smov 192  ;;  %s600_s11 = smov 12 }
  0x20   :  { %v2134_v4 = vld [vmem:[%s4572_s0 + $0xf7] ss:$16 sm:%s405_s8]   ;;  %v403_v5 = vsel %vm178_vm0, %v2133_v3, %v2132_v0  ;;  %s447_s8 = smov 3  ;;  %2037 = vst.msk [vmem:[%s4573_s1 + $0x40] ss:$8 sm:$0xf0] %vm3_vm3, %v2035_v7  }
  0x21   :  { %v408_v8 = vsel %vm183_vm1, %v2134_v4, %v403_v5  ;;  %v2138_v9 = vld [vmem:[%s4572_s0 + $0x167] ss:$16 sm:%s422_s20]   ;;  %v2141_v14 = vld [vmem:[%s4572_s0 + $0xfb] ss:$16 sm:%s435_s30]   ;;  %s475_s30 = smov 12  ;;  %s605_s12 = smov 48 }
  0x22   :  { %389 = vrot.lane.b32.xlu0 %v388_v2, %s2520_s29  ;;  %v2139_v10 = vld [vmem:[%s4572_s0 + $0x167] ss:$16 sm:%s425_s21]   ;;  %v413_v11 = vsel %vm188_vm2, %v2135_v6, %v408_v8  ;;  %2048 = vst.msk [vmem:[%s4573_s1 + $0x80] ss:$8 sm:$0xf] %vm3_vm3, %v2047_v17   ;;  %s610_s21 = smov 192 }
  0x23   :  { %v428_v12 = vsel %vm178_vm0, %v2139_v10, %v2138_v9  ;;  %v2140_v13 = vld [vmem:[%s4572_s0 + $0x167] ss:$16 sm:%s430_s28]   ;;  %414 = vrot.lane.b32.xlu1 %v413_v11, %s2520_s29  ;;  %s472_s28 = smov 3  ;;  %2049 = vst.msk [vmem:[%s4573_s1 + $0x61] ss:$8 sm:$0xf0] %vm3_vm3, %v2047_v17  }
  0x24   :  { %v433_v15 = vsel %vm183_vm1, %v2140_v13, %v428_v12  ;;  %v2144_v16 = vld [vmem:[%s4572_s0 + $0x1d7] ss:$16 sm:%s447_s8]   ;;  %s480_s8 = smov 48  ;;  %v2147_v22 = vld [vmem:[%s4572_s0 + $0x16b] ss:$16 sm:%s460_s25]   ;;  %s585_s25 = smov 192 }
  0x25   :  { %v438_v18 = vsel %vm188_vm2, %v2141_v14, %v433_v15  ;;  %v2145_v19 = vld [vmem:[%s4572_s0 + $0x1d7] ss:$16 sm:%s450_s15]   ;;  %2057 = vst.msk [vmem:[%s4573_s1 + $0x86] ss:$8 sm:$0xf] %vm3_vm3, %v2056_v23   ;;  %s650_s19 = smov 12 }
  0x26   :  { %v2146_v20 = vld [vmem:[%s4572_s0 + $0x1d7] ss:$16 sm:%s455_s16]   ;;  %439 = vrot.lane.b32.xlu0 %v438_v18, %s2520_s29  ;;  %v453_v21 = vsel %vm178_vm0, %v2145_v19, %v2144_v16  ;;  %s497_s16 = smov 3  ;;  %2058 = vst.msk [vmem:[%s4573_s1 + $0x80] ss:$8 sm:$0xf0] %vm3_vm3, %v2056_v23  }
  0x27   :  { %v458_v24 = vsel %vm183_vm1, %v2146_v20, %v453_v21  ;;  %v2150_v25 = vld [vmem:[%s4572_s0 + $0x247] ss:$16 sm:%s472_s28]   ;;  %v2153_v30 = vld [vmem:[%s4572_s0 + $0x1db] ss:$16 sm:%s485_s9]   ;;  %s525_s9 = smov 12  ;;  %s655_s20 = smov 48 }
  0x28   :  { %v2151_v26 = vld [vmem:[%s4572_s0 + $0x247] ss:$16 sm:%s475_s30]   ;;  %v463_v27 = vsel %vm188_vm2, %v2147_v22, %v458_v24  ;;  %v2068_v33 = vld [vmem:[%s4572_s0 + $0x2a0] ss:$4 sm:$0xff]   ;;  %s660_s30 = smov 192  ;;  %s700_s27 = smov 12 }
  0x29   :  { %v478_v28 = vsel %vm178_vm0, %v2151_v26, %v2150_v25  ;;  %v2152_v29 = vld [vmem:[%s4572_s0 + $0x247] ss:$16 sm:%s480_s8]   ;;  %464 = vrot.lane.b32.xlu1 %v463_v27, %s2520_s29  ;;  %s522_s8 = smov 3  ;;  %2069 = vst.msk [vmem:[%s4573_s1 + $0xc0] ss:$8 sm:$0xf] %vm3_vm3, %v2068_v33  }
  0x2a   :  { %v483_v31 = vsel %vm183_vm1, %v2152_v29, %v478_v28  ;;  %v2156_v32 = vld [vmem:[%s4572_s0 + $0x2b7] ss:$16 sm:%s497_s16]   ;;  %s530_s16 = smov 48  ;;  %2070 = vst.msk [vmem:[%s4573_s1 + $0xa1] ss:$8 sm:$0xf0] %vm3_vm3, %v2068_v33  }
  0x2b   :  { %v488_v34 = vsel %vm188_vm2, %v2153_v30, %v483_v31  ;;  %v2157_v35 = vld [vmem:[%s4572_s0 + $0x2b7] ss:$16 sm:%s500_s23]   ;;  %v2159_v38 = vld [vmem:[%s4572_s0 + $0x24b] ss:$16 sm:%s510_s5]   ;;  %s635_s5 = smov 192  ;;  %s705_s28 = smov 48 }
  0x2c   :  { %v2158_v36 = vld [vmem:[%s4572_s0 + $0x2b7] ss:$16 sm:%s505_s24]   ;;  %489 = vrot.lane.b32.xlu0 %v488_v34, %s2520_s29  ;;  %v503_v37 = vsel %vm178_vm0, %v2157_v35, %v2156_v32  ;;  %s547_s24 = smov 3  ;;  %v2017_v39 = vld [vmem:[%s4572_s0 + $0x80] ss:$4 sm:$0xff]   ;;  %s750_s7 = smov 12 }
  0x2d   :  { %v508_v40 = vsel %vm183_vm1, %v2158_v36, %v503_v37  ;;  %v2162_v41 = vld [vmem:[%s4572_s0 + $0x2b] ss:$16 sm:%s522_s8]   ;;  %2018 = vst.msk [vmem:[%s4573_s1 + $0x21] ss:$8 sm:$0xf] %vm3_vm3, %v2017_v39   ;;  %s755_s8 = smov 48 }
  0x2e   :  { %v2163_v42 = vld [vmem:[%s4572_s0 + $0x2b] ss:$16 sm:%s525_s9]   ;;  %2019 = vst.msk [vmem:[%s4573_s1 + $0x2] ss:$8 sm:$0xf0] %vm3_vm3, %v2017_v39   ;;  %v513_v43 = vsel %vm188_vm2, %v2159_v38, %v508_v40  ;;  %s710_s9 = smov 192 }
  0x2f   :  { %v528_v44 = vsel %vm178_vm0, %v2163_v42, %v2162_v41  ;;  %v2164_v45 = vld [vmem:[%s4572_s0 + $0x1db] ss:$-92 sm:%s530_s16]   ;;  %514 = vrot.lane.b32.xlu1 %v513_v43, %s2520_s29  ;;  %s572_s16 = smov 3  ;;  %v2038_v49 = vld [vmem:[%s4572_s0 + $0x160] ss:$4 sm:$0xff]   ;;  %s809_s18 = smov 3 }
  0x30   :  { %v2165_v46 = vld [vmem:[%s4572_s0 - $0x41] ss:$16 sm:%s535_s17]   ;;  %v533_v47 = vsel %vm183_vm1, %v2164_v45, %v528_v44  ;;  %v2168_v48 = vld [vmem:[%s4572_s0 + $0x9b] ss:$16 sm:%s547_s24]   ;;  %s575_s17 = smov 12  ;;  %s580_s24 = smov 48 }
  0x31   :  { %v538_v50 = vsel %vm188_vm2, %v2165_v46, %v533_v47  ;;  %v2169_v51 = vld [vmem:[%s4572_s0 + $0x9b] ss:$16 sm:%s550_s3]   ;;  %2039 = vst.msk [vmem:[%s4573_s1 + $0x61] ss:$8 sm:$0xf] %vm3_vm3, %v2038_v49   ;;  %s817_s22 = smov 48 }
  0x32   :  { %v2170_v52 = vld [vmem:[%s4572_s0 + $0x24b] ss:$-92 sm:%s555_s4]   ;;  %2040 = vst.msk [vmem:[%s4573_s1 + $0x42] ss:$8 sm:$0xf0] %vm3_vm3, %v2038_v49   ;;  %539 = vrot.lane.b32.xlu0 %v538_v50, %s2520_s29  ;;  %v553_v53 = vsel %vm178_vm0, %v2169_v51, %v2168_v48  ;;  %s597_s4 = smov 3 }
  0x33   :  { %v2171_v54 = vld [vmem:[%s4572_s0 + $0x2f] ss:$16 sm:%s560_s13]   ;;  %v2059_v55 = vld [vmem:[%s4572_s0 + $0x240] ss:$4 sm:$0xff]   ;;  %v558_v56 = vsel %vm183_vm1, %v2170_v52, %v553_v53  ;;  %s685_s13 = smov 192  ;;  %s822_s23 = smov 192 }
  0x34   :  { %v2174_v57 = vld [vmem:[%s4572_s0 + $0x10b] ss:$16 sm:%s572_s16]   ;;  %2060 = vst.msk [vmem:[%s4573_s1 + $0xa1] ss:$8 sm:$0xf] %vm3_vm3, %v2059_v55   ;;  %v563_v59 = vsel %vm188_vm2, %v2171_v54, %v558_v56  ;;  %s837_s10 = smov 12 }
  0x35   :  { %v2175_v58 = vld [vmem:[%s4572_s0 + $0x10b] ss:$16 sm:%s575_s17]   ;;  %2061 = vst.msk [vmem:[%s4573_s1 + $0x82] ss:$8 sm:$0xf0] %vm3_vm3, %v2059_v55   ;;  %564 = vrot.lane.b32.xlu1 %v563_v59, %s2520_s29  ;;  %s760_s17 = smov 192 }
  0x36   :  { %v578_v60 = vsel %vm178_vm0, %v2175_v58, %v2174_v57  ;;  %v2176_v61 = vld [vmem:[%s4572_s0 + $0x2bb] ss:$-92 sm:%s580_s24]   ;;  %s622_s24 = smov 3  ;;  %v2009_v1 = vld [vmem:[%s4572_s0 + $0x20] ss:$4 sm:$0xff]   ;;  %s867_s3 = smov 48 }
  0x37   :  { %v2177_v62 = vld [vmem:[%s4572_s0 + $0x9f] ss:$16 sm:%s585_s25]   ;;  %v583_v63 = vsel %vm183_vm1, %v2176_v61, %v578_v60  ;;  %v2180_v0 = vld [vmem:[%s4572_s0 + $0x17b] ss:$16 sm:%s597_s4]   ;;  %s625_s25 = smov 12  ;;  %s630_s4 = smov 48 }
  0x38   :  { %v588_v2 = vsel %vm188_vm2, %v2177_v62, %v583_v63  ;;  %v2181_v3 = vld [vmem:[%s4572_s0 + $0x17b] ss:$16 sm:%s600_s11]   ;;  %2010 = vst.msk [vmem:[%s4573_s1 + $0x2] ss:$8 sm:$0xf] %vm3_vm3, %v2009_v1   ;;  %s842_s11 = smov 48 }
  0x39   :  { %v2182_v4 = vld [vmem:[%s4572_s0 + $0x32b] ss:$-92 sm:%s605_s12]   ;;  %2011 = vst.msk [vmem:[%s4573_s1 - $0x1d] ss:$8 sm:$0xf0] %vm3_vm3, %v2009_v1   ;;  %589 = vrot.lane.b32.xlu0 %v588_v2, %s2520_s29  ;;  %v603_v5 = vsel %vm178_vm0, %v2181_v3, %v2180_v0  ;;  %s647_s12 = smov 3 }
  0x3a   :  { %v2183_v6 = vld [vmem:[%s4572_s0 + $0x10f] ss:$16 sm:%s610_s21]   ;;  %v2012_v7 = vld [vmem:[%s4572_s0 + $0x40] ss:$4 sm:$0xff]   ;;  %v608_v8 = vsel %vm183_vm1, %v2182_v4, %v603_v5  ;;  %s735_s21 = smov 192  ;;  %s937_s26 = smov 12 }
  0x3b   :  { %v2186_v9 = vld [vmem:[%s4572_s0 + $0x1eb] ss:$16 sm:%s622_s24]   ;;  %2013 = vst.msk [vmem:[%s4573_s1 + $0x4] ss:$8 sm:$0xf] %vm3_vm3, %v2012_v7   ;;  %v613_v11 = vsel %vm188_vm2, %v2183_v6, %v608_v8  ;;  %s859_s24 = smov 3 }
  0x3c   :  { %v2187_v10 = vld [vmem:[%s4572_s0 + $0x1eb] ss:$16 sm:%s625_s25]   ;;  %2014 = vst.msk [vmem:[%s4573_s1 - $0x1b] ss:$8 sm:$0xf0] %vm3_vm3, %v2012_v7   ;;  %614 = vrot.lane.b32.xlu1 %v613_v11, %s2520_s29  ;;  %s862_s25 = smov 12 }
  0x3d   :  { %v628_v12 = vsel %vm178_vm0, %v2187_v10, %v2186_v9  ;;  %v2188_v13 = vld [vmem:[%s4572_s0 + $0x39b] ss:$-92 sm:%s630_s4]   ;;  %s672_s4 = smov 3  ;;  %v2020_v17 = vld [vmem:[%s4572_s0 + $0xa0] ss:$4 sm:$0xff]   ;;  %s1012_s14 = smov 12 }
  0x3e   :  { %v2189_v14 = vld [vmem:[%s4572_s0 + $0x17f] ss:$16 sm:%s635_s5]   ;;  %v633_v15 = vsel %vm183_vm1, %v2188_v13, %v628_v12  ;;  %v2192_v16 = vld [vmem:[%s4572_s0 + $0x25b] ss:$16 sm:%s647_s12]   ;;  %s675_s5 = smov 12  ;;  %s680_s12 = smov 48 }
  0x3f   :  { %v638_v18 = vsel %vm188_vm2, %v2189_v14, %v633_v15  ;;  %v2193_v19 = vld [vmem:[%s4572_s0 + $0x25b] ss:$16 sm:%s650_s19]   ;;  %2021 = vst.msk [vmem:[%s4573_s1 + $0x23] ss:$8 sm:$0xf] %vm3_vm3, %v2020_v17   ;;  %s812_s19 = smov 12 }
  0x40   :  { %v2194_v20 = vld [vmem:[%s4572_s0 + $0x40b] ss:$-92 sm:%s655_s20]   ;;  %2022 = vst.msk [vmem:[%s4573_s1 + $0x4] ss:$8 sm:$0xf0] %vm3_vm3, %v2020_v17   ;;  %639 = vrot.lane.b32.xlu0 %v638_v18, %s2520_s29  ;;  %v653_v21 = vsel %vm178_vm0, %v2193_v19, %v2192_v16  ;;  %s697_s20 = smov 3 }
  0x41   :  { %v2195_v22 = vld [vmem:[%s4572_s0 + $0x1ef] ss:$16 sm:%s660_s30]   ;;  %v2023_v23 = vld [vmem:[%s4572_s0 + $0xc0] ss:$4 sm:$0xff]   ;;  %v658_v24 = vsel %vm183_vm1, %v2194_v20, %v653_v21  ;;  %s788_s30 = smov 12  ;;  %s1047_s6 = smov 192 }
  0x42   :  { %v2198_v25 = vld [vmem:[%s4572_s0 + $0x2cb] ss:$16 sm:%s672_s4]   ;;  %2024 = vst.msk [vmem:[%s4573_s1 + $0x25] ss:$8 sm:$0xf] %vm3_vm3, %v2023_v23   ;;  %v663_v27 = vsel %vm188_vm2, %v2195_v22, %v658_v24  ;;  %s872_s4 = smov 192 }
  0x43   :  { %v2199_v26 = vld [vmem:[%s4572_s0 + $0x2cb] ss:$16 sm:%s675_s5]   ;;  %2025 = vst.msk [vmem:[%s4573_s1 + $0x6] ss:$8 sm:$0xf0] %vm3_vm3, %v2023_v23   ;;  %664 = vrot.lane.b32.xlu1 %v663_v27, %s2520_s29  ;;  %s992_s5 = smov 48 }
  0x44   :  { %v678_v28 = vsel %vm178_vm0, %v2199_v26, %v2198_v25  ;;  %v2200_v29 = vld [vmem:[%s4572_s0 + $0x47b] ss:$-92 sm:%s680_s12]   ;;  %s722_s12 = smov 3  ;;  %v2029_v33 = vld [vmem:[%s4572_s0 + $0x100] ss:$4 sm:$0xff]   ;;  %s1067_s15 = smov 48 }
  0x45   :  { %v2201_v30 = vld [vmem:[%s4572_s0 + $0x25f] ss:$16 sm:%s685_s13]   ;;  %v683_v31 = vsel %vm183_vm1, %v2200_v29, %v678_v28  ;;  %s725_s13 = smov 12  ;;  %2030 = vst.msk [vmem:[%s4573_s1 + $0x42] ss:$8 sm:$0xf] %vm3_vm3, %v2029_v33  }
  0x46   :  { %v2204_v32 = vld [vmem:[%s4572_s0 + $0x3f] ss:$16 sm:%s697_s20]   ;;  %v688_v34 = vsel %vm188_vm2, %v2201_v30, %v683_v31  ;;  %s730_s20 = smov 48  ;;  %2031 = vst.msk [vmem:[%s4573_s1 + $0x23] ss:$8 sm:$0xf0] %vm3_vm3, %v2029_v33  }
  0x47   :  { %v2205_v35 = vld [vmem:[%s4572_s0 + $0x3f] ss:$16 sm:%s700_s27]   ;;  %689 = vrot.lane.b32.xlu0 %v688_v34, %s2520_s29  ;;  %v2032_v39 = vld [vmem:[%s4572_s0 + $0x120] ss:$4 sm:$0xff]   ;;  %s834_s27 = smov 3  ;;  %s1072_s16 = smov 192 }
  0x48   :  { %v2206_v36 = vld [vmem:[%s4572_s0 + $0x6f] ss:$16 sm:%s705_s28]   ;;  %v703_v37 = vsel %vm178_vm0, %v2205_v35, %v2204_v32  ;;  %s747_s28 = smov 3  ;;  %2033 = vst.msk [vmem:[%s4573_s1 + $0x44] ss:$8 sm:$0xf] %vm3_vm3, %v2032_v39  }
  0x49   :  { %v2207_v38 = vld [vmem:[%s4572_s0 + $0x6f] ss:$16 sm:%s710_s9]   ;;  %v708_v40 = vsel %vm183_vm1, %v2206_v36, %v703_v37  ;;  %2034 = vst.msk [vmem:[%s4573_s1 + $0x25] ss:$8 sm:$0xf0] %vm3_vm3, %v2032_v39   ;;  %s1059_s9 = smov 3 }
  0x4a   :  { %v2210_v41 = vld [vmem:[%s4572_s0 + $0x11f] ss:$16 sm:%s722_s12]   ;;  %v713_v43 = vsel %vm188_vm2, %v2207_v38, %v708_v40  ;;  %v2041_v49 = vld [vmem:[%s4572_s0 + $0x180] ss:$4 sm:$0xff]   ;;  %s922_s12 = smov 192  ;;  %s1097_s2 = smov 192 }
  0x4b   :  { %v2211_v42 = vld [vmem:[%s4572_s0 + $0x11f] ss:$16 sm:%s725_s13]   ;;  %714 = vrot.lane.b32.xlu1 %v713_v43, %s2520_s29  ;;  %2042 = vst.msk [vmem:[%s4573_s1 + $0x63] ss:$8 sm:$0xf] %vm3_vm3, %v2041_v49   ;;  %s798_s13 = smov 192 }
  0x4c   :  { %v728_v44 = vsel %vm178_vm0, %v2211_v42, %v2210_v41  ;;  %v2212_v45 = vld [vmem:[%s4572_s0 + $0x14f] ss:$16 sm:%s730_s20]   ;;  %s772_s20 = smov 3  ;;  %2043 = vst.msk [vmem:[%s4573_s1 + $0x44] ss:$8 sm:$0xf0] %vm3_vm3, %v2041_v49  }
  0x4d   :  { %v2213_v46 = vld [vmem:[%s4572_s0 + $0x14f] ss:$16 sm:%s735_s21]   ;;  %v733_v47 = vsel %vm183_vm1, %v2212_v45, %v728_v44  ;;  %s775_s21 = smov 12  ;;  %v2226_v61 = vld [vmem:[%s4572_s0 + $0x2] ss:$16 sm:%s788_s30]   ;;  %s1042_s30 = smov 48 }
  0x4e   :  { %v2216_v48 = vld [vmem:[%s4572_s0 + $0x1ff] ss:$16 sm:%s747_s28]   ;;  %v738_v50 = vsel %vm188_vm2, %v2213_v46, %v733_v47  ;;  %s785_s28 = smov 3  ;;  %v2044_v0 = vld [vmem:[%s4572_s0 + $0x1a0] ss:$4 sm:$0xff]  }
  0x4f   :  { %v2217_v51 = vld [vmem:[%s4572_s0 + $0x1ff] ss:$16 sm:%s750_s7]   ;;  %739 = vrot.lane.b32.xlu0 %v738_v50, %s2520_s29  ;;  %2045 = vst.msk [vmem:[%s4573_s1 + $0x65] ss:$8 sm:$0xf] %vm3_vm3, %v2044_v0   ;;  %s1167_s7 = smov 48 }
  0x50   :  { %v2218_v52 = vld [vmem:[%s4572_s0 + $0x22f] ss:$16 sm:%s755_s8]   ;;  %v753_v53 = vsel %vm178_vm0, %v2217_v51, %v2216_v48  ;;  %s793_s8 = smov 48  ;;  %v2225_v60 = vld [vmem:[%s4572_s0 + $0x2] ss:$16 sm:%s785_s28]   ;;  %s897_s28 = smov 192 }
  0x51   :  { %v2219_v54 = vld [vmem:[%s4572_s0 + $0x22f] ss:$16 sm:%s760_s17]   ;;  %v758_v55 = vsel %vm183_vm1, %v2218_v52, %v753_v53  ;;  %v791_v62 = vsel %vm178_vm0, %v2226_v61, %v2225_v60  ;;  %v2227_v63 = vld [vmem:[%s4572_s0 + $0x2] ss:$16 sm:%s793_s8]   ;;  %s947_s8 = smov 192  ;;  %s1192_s17 = smov 48 }
  0x52   :  { %v2222_v56 = vld [vmem:[%s4572_s0 + $0x2df] ss:$16 sm:%s772_s20]   ;;  %v763_v58 = vsel %vm188_vm2, %v2219_v54, %v758_v55  ;;  %v796_v1 = vsel %vm183_vm1, %v2227_v63, %v791_v62  ;;  %v2228_v2 = vld [vmem:[%s4572_s0 + $0x28a] ss:$-92 sm:%s798_s13]   ;;  %s847_s20 = smov 192  ;;  %s1009_s13 = smov 3 }
  0x53   :  { %v2223_v57 = vld [vmem:[%s4572_s0 + $0x2df] ss:$16 sm:%s775_s21]   ;;  %764 = vrot.lane.b32.xlu1 %v763_v58, %s2520_s29  ;;  %2046 = vst.msk [vmem:[%s4573_s1 + $0x46] ss:$8 sm:$0xf0] %vm3_vm3, %v2044_v0   ;;  %v801_v4 = vsel %vm188_vm2, %v2228_v2, %v796_v1  ;;  %s2521_s21 = smov 64  }
  0x54   :  { %v778_v59 = vsel %vm178_vm0, %v2223_v57, %v2222_v56  ;;  %v2050_v3 = vld [vmem:[%s4572_s0 + $0x1e0] ss:$4 sm:$0xff]   ;;  %v2230_v5 = vld [vmem:[%s4572_s0 + $0x72] ss:$16 sm:%s809_s18]   ;;  %s887_s18 = smov 12 }
  0x55   :  { %779 = vrot.lane.b32.xlu0 %v778_v59, %s2520_s29  ;;  %v2231_v6 = vld [vmem:[%s4572_s0 + $0x72] ss:$16 sm:%s812_s19]   ;;  %2051 = vst.msk [vmem:[%s4573_s1 + $0x82] ss:$8 sm:$0xf] %vm3_vm3, %v2050_v3   ;;  %s892_s19 = smov 48 }
  0x56   :  { %2052 = vst.msk [vmem:[%s4573_s1 + $0x63] ss:$8 sm:$0xf0] %vm3_vm3, %v2050_v3   ;;  %v815_v7 = vsel %vm178_vm0, %v2231_v6, %v2230_v5  ;;  %v2232_v8 = vld [vmem:[%s4572_s0 + $0x72] ss:$16 sm:%s817_s22]   ;;  %s1092_s29 = smov 48 }
  0x57   :  { %v2233_v9 = vld [vmem:[%s4572_s0 + $0x2fa] ss:$-92 sm:%s822_s23]   ;;  %802 = vrot.lane.b32.xlu1 %v801_v4, %s2521_s21  ;;  %v820_v10 = vsel %vm183_vm1, %v2232_v8, %v815_v7  ;;  %v2053_v12 = vld [vmem:[%s4572_s0 + $0x200] ss:$4 sm:$0xff]   ;;  %s1142_s22 = smov 48  ;;  %s1197_s23 = smov 192 }
  0x58   :  { %v2236_v11 = vld [vmem:[%s4572_s0 + $0xe2] ss:$16 sm:%s834_s27]   ;;  %v825_v13 = vsel %vm188_vm2, %v2233_v9, %v820_v10  ;;  %2054 = vst.msk [vmem:[%s4573_s1 + $0x84] ss:$8 sm:$0xf] %vm3_vm3, %v2053_v12   ;;  %s942_s27 = smov 48 }
  0x59   :  { %v2237_v14 = vld [vmem:[%s4572_s0 + $0xe2] ss:$16 sm:%s837_s10]   ;;  %2055 = vst.msk [vmem:[%s4573_s1 + $0x65] ss:$8 sm:$0xf0] %vm3_vm3, %v2053_v12   ;;  %826 = vrot.lane.b32.xlu0 %v825_v13, %s2521_s21  ;;  %s997_s10 = smov 192 }
  0x5a   :  { %v2238_v15 = vld [vmem:[%s4572_s0 + $0xe2] ss:$16 sm:%s842_s11]   ;;  %v840_v16 = vsel %vm178_vm0, %v2237_v14, %v2236_v11  ;;  %s884_s11 = smov 3  ;;  %v2062_v18 = vld [vmem:[%s4572_s0 + $0x260] ss:$4 sm:$0xff]  }
  0x5b   :  { %v2239_v17 = vld [vmem:[%s4572_s0 + $0x36a] ss:$-92 sm:%s847_s20]   ;;  %v845_v19 = vsel %vm183_vm1, %v2238_v15, %v840_v16  ;;  %2063 = vst.msk [vmem:[%s4573_s1 + $0xa3] ss:$8 sm:$0xf] %vm3_vm3, %v2062_v18   ;;  %s972_s20 = smov 192 }
  0x5c   :  { %v2242_v20 = vld [vmem:[%s4572_s0 + $0x152] ss:$16 sm:%s859_s24]   ;;  %2064 = vst.msk [vmem:[%s4573_s1 + $0x84] ss:$8 sm:$0xf0] %vm3_vm3, %v2062_v18   ;;  %v850_v22 = vsel %vm188_vm2, %v2239_v17, %v845_v19  ;;  %s1034_s24 = smov 3 }
  0x5d   :  { %v2243_v21 = vld [vmem:[%s4572_s0 + $0x152] ss:$16 sm:%s862_s25]   ;;  %851 = vrot.lane.b32.xlu1 %v850_v22, %s2521_s21  ;;  %v2065_v28 = vld [vmem:[%s4572_s0 + $0x280] ss:$4 sm:$0xff]   ;;  %s1087_s25 = smov 12 }
  0x5e   :  { %v865_v23 = vsel %vm178_vm0, %v2243_v21, %v2242_v20  ;;  %v2244_v24 = vld [vmem:[%s4572_s0 + $0x152] ss:$16 sm:%s867_s3]   ;;  %s909_s3 = smov 3  ;;  %2066 = vst.msk [vmem:[%s4573_s1 + $0xa5] ss:$8 sm:$0xf] %vm3_vm3, %v2065_v28  }
  0x5f   :  { %v2245_v25 = vld [vmem:[%s4572_s0 + $0x3da] ss:$-92 sm:%s872_s4]   ;;  %v870_v26 = vsel %vm183_vm1, %v2244_v24, %v865_v23  ;;  %s912_s4 = smov 12  ;;  %2067 = vst.msk [vmem:[%s4573_s1 + $0x86] ss:$8 sm:$0xf0] %vm3_vm3, %v2065_v28  }
  0x60   :  { %v2248_v27 = vld [vmem:[%s4572_s0 + $0x1c2] ss:$16 sm:%s884_s11]   ;;  %v875_v29 = vsel %vm188_vm2, %v2245_v25, %v870_v26  ;;  %s917_s11 = smov 48  ;;  %v2071_v34 = vld [vmem:[%s4572_s0 + $0x2c0] ss:$4 sm:$0xff]  }
  0x61   :  { %v2249_v30 = vld [vmem:[%s4572_s0 + $0x1c2] ss:$16 sm:%s887_s18]   ;;  %876 = vrot.lane.b32.xlu0 %v875_v29, %s2521_s21  ;;  %2072 = vst.msk [vmem:[%s4573_s1 + $0xc2] ss:$8 sm:$0xf] %vm3_vm3, %v2071_v34   ;;  %s1247_s18 = smov 192 }
  0x62   :  { %v2250_v31 = vld [vmem:[%s4572_s0 + $0x1c2] ss:$16 sm:%s892_s19]   ;;  %v890_v32 = vsel %vm178_vm0, %v2249_v30, %v2248_v27  ;;  %s934_s19 = smov 3  ;;  %2073 = vst.msk [vmem:[%s4573_s1 + $0xa3] ss:$8 sm:$0xf0] %vm3_vm3, %v2071_v34  }
  0x63   :  { %v2251_v33 = vld [vmem:[%s4572_s0 + $0x44a] ss:$-92 sm:%s897_s28]   ;;  %v895_v35 = vsel %vm183_vm1, %v2250_v31, %v890_v32  ;;  %v2074_v44 = vld [vmem:[%s4572_s0 + $0x2e0] ss:$4 sm:$0xff]   ;;  %s1037_s28 = smov 12 }
  0x64   :  { %v2254_v36 = vld [vmem:[%s4572_s0 + $0x232] ss:$16 sm:%s909_s3]   ;;  %v900_v38 = vsel %vm188_vm2, %v2251_v33, %v895_v35  ;;  %2075 = vst.msk [vmem:[%s4573_s1 + $0xc4] ss:$8 sm:$0xf] %vm3_vm3, %v2074_v44   ;;  %s1217_s3 = smov 48 }
  0x65   :  { %v2255_v37 = vld [vmem:[%s4572_s0 + $0x232] ss:$16 sm:%s912_s4]   ;;  %901 = vrot.lane.b32.xlu1 %v900_v38, %s2521_s21  ;;  %2076 = vst.msk [vmem:[%s4573_s1 + $0xa5] ss:$8 sm:$0xf0] %vm3_vm3, %v2074_v44   ;;  %s987_s4 = smov 12 }
  0x66   :  { %v915_v39 = vsel %vm178_vm0, %v2255_v37, %v2254_v36  ;;  %v2256_v40 = vld [vmem:[%s4572_s0 + $0x232] ss:$16 sm:%s917_s11]   ;;  %s959_s11 = smov 3  ;;  %v2269_v56 = vld [vmem:[%s4572_s0 - $0x56] ss:$16 sm:%s972_s20]   ;;  %s1022_s20 = smov 192 }
  0x67   :  { %v2257_v41 = vld [vmem:[%s4572_s0 + $0x4ba] ss:$-92 sm:%s922_s12]   ;;  %v920_v42 = vsel %vm183_vm1, %v2256_v40, %v915_v39  ;;  %s962_s12 = smov 12 }
  0x68   :  { %v2260_v43 = vld [vmem:[%s4572_s0 + $0x2a2] ss:$16 sm:%s934_s19]   ;;  %v925_v45 = vsel %vm188_vm2, %v2257_v41, %v920_v42  ;;  %s967_s19 = smov 48  ;;  %v2266_v51 = vld [vmem:[%s4572_s0 + $0x16] ss:$16 sm:%s959_s11]   ;;  %s1117_s11 = smov 48 }
  0x69   :  { %v2261_v46 = vld [vmem:[%s4572_s0 + $0x2a2] ss:$16 sm:%s937_s26]   ;;  %926 = vrot.lane.b32.xlu0 %v925_v45, %s2521_s21  ;;  %s1147_s26 = smov 192 }
  0x6a   :  { %v2262_v47 = vld [vmem:[%s4572_s0 + $0x2a2] ss:$16 sm:%s942_s27]   ;;  %v940_v48 = vsel %vm178_vm0, %v2261_v46, %v2260_v43  ;;  %s984_s27 = smov 3  ;;  %v2267_v52 = vld [vmem:[%s4572_s0 + $0x16] ss:$16 sm:%s962_s12]   ;;  %s1122_s12 = smov 192 }
  0x6b   :  { %v2263_v49 = vld [vmem:[%s4572_s0 + $0x52a] ss:$-92 sm:%s947_s8]   ;;  %v945_v50 = vsel %vm183_vm1, %v2262_v47, %v940_v48  ;;  %v965_v54 = vsel %vm178_vm0, %v2267_v52, %v2266_v51  ;;  %s1172_s8 = smov 192 }
  0x6c   :  { %v950_v53 = vsel %vm188_vm2, %v2263_v49, %v945_v50  ;;  %v2268_v55 = vld [vmem:[%s4572_s0 + $0x16] ss:$16 sm:%s967_s19]   ;;  %s1017_s19 = smov 48  ;;  %v2275_v63 = vld [vmem:[%s4572_s0 + $0x1a] ss:$16 sm:%s997_s10]   ;;  %s1062_s10 = smov 12 }
  0x6d   :  { %951 = vrot.lane.b32.xlu1 %v950_v53, %s2521_s21  ;;  %v970_v57 = vsel %vm183_vm1, %v2268_v55, %v965_v54  ;;  %v2272_v58 = vld [vmem:[%s4572_s0 + $0x86] ss:$16 sm:%s984_s27]   ;;  %s1267_s27 = smov 48 }
  0x6e   :  { %v975_v59 = vsel %vm188_vm2, %v2269_v56, %v970_v57  ;;  %v2273_v60 = vld [vmem:[%s4572_s0 + $0x86] ss:$16 sm:%s987_s4]   ;;  %v2281_v6 = vld [vmem:[%s4572_s0 + $0x8a] ss:$16 sm:%s1022_s20]   ;;  %s1137_s20 = smov 12  ;;  %s1222_s4 = smov 192 }
  0x6f   :  { %v2274_v61 = vld [vmem:[%s4572_s0 + $0x86] ss:$16 sm:%s992_s5]   ;;  %976 = vrot.lane.b32.xlu0 %v975_v59, %s2521_s21  ;;  %v990_v62 = vsel %vm178_vm0, %v2273_v60, %v2272_v58  ;;  %s1109_s5 = smov 3 }
  0x70   :  { %v995_v0 = vsel %vm183_vm1, %v2274_v61, %v990_v62  ;;  %v2278_v1 = vld [vmem:[%s4572_s0 + $0xf6] ss:$16 sm:%s1009_s13]   ;;  %v2287_v13 = vld [vmem:[%s4572_s0 + $0xfa] ss:$16 sm:%s1047_s6]   ;;  %s1112_s6 = smov 12  ;;  %s1242_s13 = smov 48 }
  0x71   :  { %v2279_v2 = vld [vmem:[%s4572_s0 + $0xf6] ss:$16 sm:%s1012_s14]   ;;  %v1000_v3 = vsel %vm188_vm2, %v2275_v63, %v995_v0  ;;  %v2293_v20 = vld [vmem:[%s4572_s0 + $0x16a] ss:$16 sm:%s1072_s16]   ;;  %s1187_s16 = smov 12  ;;  %s1297_s14 = smov 192 }
  0x72   :  { %v1015_v4 = vsel %vm178_vm0, %v2279_v2, %v2278_v1  ;;  %v2280_v5 = vld [vmem:[%s4572_s0 + $0xf6] ss:$16 sm:%s1017_s19]   ;;  %1001 = vrot.lane.b32.xlu1 %v1000_v3, %s2521_s21  ;;  %s1084_s19 = smov 3 }
  0x73   :  { %v1020_v7 = vsel %vm183_vm1, %v2280_v5, %v1015_v4  ;;  %v2284_v8 = vld [vmem:[%s4572_s0 + $0x166] ss:$16 sm:%s1034_s24]   ;;  %v2299_v27 = vld [vmem:[%s4572_s0 + $0x1da] ss:$16 sm:%s1097_s2]   ;;  %s1162_s2 = smov 12  ;;  %s1317_s24 = smov 48 }
  0x74   :  { %v1025_v9 = vsel %vm188_vm2, %v2281_v6, %v1020_v7  ;;  %v2285_v10 = vld [vmem:[%s4572_s0 + $0x166] ss:$16 sm:%s1037_s28]   ;;  %v2305_v34 = vld [vmem:[%s4572_s0 + $0x24a] ss:$16 sm:%s1122_s12]   ;;  %s1237_s12 = smov 12  ;;  %s1272_s28 = smov 192 }
  0x75   :  { %v2286_v11 = vld [vmem:[%s4572_s0 + $0x166] ss:$16 sm:%s1042_s30]   ;;  %1026 = vrot.lane.b32.xlu0 %v1025_v9, %s2521_s21  ;;  %v1040_v12 = vsel %vm178_vm0, %v2285_v10, %v2284_v8  ;;  %s1159_s30 = smov 3 }
  0x76   :  { %v1045_v14 = vsel %vm183_vm1, %v2286_v11, %v1040_v12  ;;  %v2290_v15 = vld [vmem:[%s4572_s0 + $0x1d6] ss:$16 sm:%s1059_s9]   ;;  %v2309_v38 = vld [vmem:[%s4572_s0 + $0x2a] ss:$16 sm:%s1137_s20]   ;;  %s1292_s9 = smov 48  ;;  %s1372_s20 = smov 192 }
  0x77   :  { %v2291_v16 = vld [vmem:[%s4572_s0 + $0x1d6] ss:$16 sm:%s1062_s10]   ;;  %v1050_v17 = vsel %vm188_vm2, %v2287_v13, %v1045_v14  ;;  %v2311_v41 = vld [vmem:[%s4572_s0 - $0x42] ss:$16 sm:%s1147_s26]   ;;  %s1212_s26 = smov 12  ;;  %s1347_s10 = smov 192 }
  0x78   :  { %v1065_v18 = vsel %vm178_vm0, %v2291_v16, %v2290_v15  ;;  %v2292_v19 = vld [vmem:[%s4572_s0 + $0x1d6] ss:$16 sm:%s1067_s15]   ;;  %1051 = vrot.lane.b32.xlu1 %v1050_v17, %s2521_s21  ;;  %s1134_s15 = smov 3 }
  0x79   :  { %v1070_v21 = vsel %vm183_vm1, %v2292_v19, %v1065_v18  ;;  %v2296_v22 = vld [vmem:[%s4572_s0 + $0x246] ss:$16 sm:%s1084_s19]   ;;  %v2308_v36 = vld [vmem:[%s4572_s0 + $0x2a] ss:$16 sm:%s1134_s15]   ;;  %s1367_s19 = smov 48  ;;  %s1499_s15 = smov 12 }
  0x7a   :  { %v1075_v23 = vsel %vm188_vm2, %v2293_v20, %v1070_v21  ;;  %v2297_v24 = vld [vmem:[%s4572_s0 + $0x246] ss:$16 sm:%s1087_s25]   ;;  %v1140_v40 = vsel %vm178_vm0, %v2309_v38, %v2308_v36  ;;  %v2314_v43 = vld [vmem:[%s4572_s0 + $0x9a] ss:$16 sm:%s1159_s30]   ;;  %s1322_s25 = smov 192  ;;  %s1397_s30 = smov 3 }
  0x7b   :  { %v2298_v25 = vld [vmem:[%s4572_s0 + $0x246] ss:$16 sm:%s1092_s29]   ;;  %1076 = vrot.lane.b32.xlu0 %v1075_v23, %s2521_s21  ;;  %v1090_v26 = vsel %vm178_vm0, %v2297_v24, %v2296_v22  ;;  %s1209_s29 = smov 3 }
  0x7c   :  { %v1095_v28 = vsel %vm183_vm1, %v2298_v25, %v1090_v26  ;;  %v2302_v29 = vld [vmem:[%s4572_s0 + $0x2b6] ss:$16 sm:%s1109_s5]   ;;  %v2315_v44 = vld [vmem:[%s4572_s0 + $0x9a] ss:$16 sm:%s1162_s2]   ;;  %s1342_s5 = smov 48  ;;  %s1474_s2 = smov 12 }
  0x7d   :  { %v2303_v30 = vld [vmem:[%s4572_s0 + $0x2b6] ss:$16 sm:%s1112_s6]   ;;  %v1100_v31 = vsel %vm188_vm2, %v2299_v27, %v1095_v28  ;;  %v1165_v46 = vsel %vm178_vm0, %v2315_v44, %v2314_v43  ;;  %v2317_v48 = vld [vmem:[%s4572_s0 + $0x2e] ss:$16 sm:%s1172_s8]   ;;  %s1287_s8 = smov 12  ;;  %v240_v44 = vpop.permute.xlu1 %239   ;;  %s1524_s6 = smov 12 }
  0x7e   :  { %v1115_v32 = vsel %vm178_vm0, %v2303_v30, %v2302_v29  ;;  %v2304_v33 = vld [vmem:[%s4572_s0 + $0x2b6] ss:$16 sm:%s1117_s11]   ;;  %1101 = vrot.lane.b32.xlu1 %v1100_v31, %s2521_s21  ;;  %s1184_s11 = smov 3  ;;  %2095 = vst.msk [vmem:[%s4573_s1 + $0x41] sm:$0x80] %vm192_vm4, %v240_v44  }
  0x7f   :  { %v1120_v35 = vsel %vm183_vm1, %v2304_v33, %v1115_v32  ;;  %v2310_v39 = vld [vmem:[%s4572_s0 + $0x1da] ss:$-92 sm:%s1142_s22]   ;;  %s1259_s22 = smov 3  ;;  %2094 = vst.msk [vmem:[%s4573_s1 + $0x40] sm:$0x7f] %vm192_vm4, %v240_v44  }
  0x80   :  { %v1125_v37 = vsel %vm188_vm2, %v2305_v34, %v1120_v35  ;;  %v1145_v42 = vsel %vm183_vm1, %v2310_v39, %v1140_v40  ;;  %v2316_v47 = vld [vmem:[%s4572_s0 + $0x24a] ss:$-92 sm:%s1167_s7]   ;;  %s1234_s7 = smov 3  ;;  %v191_v34 = vpop.permute.xlu0 %190  }
  0x81   :  { %1126 = vrot.lane.b32.xlu0 %v1125_v37, %s2521_s21  ;;  %v1150_v45 = vsel %vm188_vm2, %v2311_v41, %v1145_v42  ;;  %v1170_v49 = vsel %vm183_vm1, %v2316_v47, %v1165_v46  ;;  %v2320_v50 = vld [vmem:[%s4572_s0 + $0x10a] ss:$16 sm:%s1184_s11]   ;;  %2083 = vst.msk [vmem:[%s4573_s1 + $0x1] sm:$0x80] %vm192_vm4, %v191_v34   ;;  %s1449_s11 = smov 12 }
  0x82   :  { %1151 = vrot.lane.b32.xlu1 %v1150_v45, %s2521_s21  ;;  %v1175_v51 = vsel %vm188_vm2, %v2317_v48, %v1170_v49  ;;  %v2321_v52 = vld [vmem:[%s4572_s0 + $0x10a] ss:$16 sm:%s1187_s16]   ;;  %193 = vst.msk [vmem:[%s4573_s1] sm:$0x7f] %vm192_vm4, %v191_v34   ;;  %s1454_s16 = smov 48 }
  0x83   :  { %v2322_v53 = vld [vmem:[%s4572_s0 + $0x2ba] ss:$-92 sm:%s1192_s17]   ;;  %v1190_v54 = vsel %vm178_vm0, %v2321_v52, %v2320_v50  ;;  %s1309_s17 = smov 3  ;;  %v2371_v47 = vld [vmem:[%s4572_s0 + $0x1] ss:$16 sm:%s1397_s30]   ;;  %s1871_s30 = smov 3 }
  0x84   :  { %v2323_v55 = vld [vmem:[%s4572_s0 + $0x9e] ss:$16 sm:%s1197_s23]   ;;  %v1195_v56 = vsel %vm183_vm1, %v2322_v53, %v1190_v54  ;;  %v2326_v57 = vld [vmem:[%s4572_s0 + $0x17a] ss:$16 sm:%s1209_s29]   ;;  %s1262_s23 = smov 12  ;;  %v215_v50 = vpop.permute.xlu0 %214   ;;  %s1521_s29 = smov 3 }
  0x85   :  { %1176 = vrot.lane.b32.xlu0 %v1175_v51, %s2521_s21  ;;  %v2327_v58 = vld [vmem:[%s4572_s0 + $0x17a] ss:$16 sm:%s1212_s26]   ;;  %v1200_v59 = vsel %vm188_vm2, %v2323_v55, %v1195_v56  ;;  %s1424_s26 = smov 12  ;;  %2089 = vst.msk [vmem:[%s4573_s1 + $0x21] sm:$0x80] %vm192_vm4, %v215_v50  }
  0x86   :  { %v1215_v60 = vsel %vm178_vm0, %v2327_v58, %v2326_v57  ;;  %v2328_v61 = vld [vmem:[%s4572_s0 + $0x32a] ss:$-92 sm:%s1217_s3]   ;;  %1201 = vrot.lane.b32.xlu1 %v1200_v59, %s2521_s21  ;;  %s1284_s3 = smov 3  ;;  %2088 = vst.msk [vmem:[%s4573_s1 + $0x20] sm:$0x7f] %vm192_vm4, %v215_v50   ;;  %v265_v59 = vpop.permute.xlu1 %264  }
  0x87   :  { %v2329_v62 = vld [vmem:[%s4572_s0 + $0x10e] ss:$16 sm:%s1222_s4]   ;;  %v1220_v63 = vsel %vm183_vm1, %v2328_v61, %v1215_v60  ;;  %v2332_v0 = vld [vmem:[%s4572_s0 + $0x1ea] ss:$16 sm:%s1234_s7]   ;;  %s1337_s4 = smov 12  ;;  %s1529_s7 = smov 48 }
  0x88   :  { %v1225_v1 = vsel %vm188_vm2, %v2329_v62, %v1220_v63  ;;  %v2333_v2 = vld [vmem:[%s4572_s0 + $0x1ea] ss:$16 sm:%s1237_s12]   ;;  %v2335_v5 = vld [vmem:[%s4572_s0 + $0x17e] ss:$16 sm:%s1247_s18]   ;;  %s1312_s18 = smov 12  ;;  %s1629_s12 = smov 48 }
  0x89   :  { %v2334_v3 = vld [vmem:[%s4572_s0 + $0x39a] ss:$-92 sm:%s1242_s13]   ;;  %1226 = vrot.lane.b32.xlu0 %v1225_v1, %s2521_s21  ;;  %v1240_v4 = vsel %vm178_vm0, %v2333_v2, %v2332_v0  ;;  %s1359_s13 = smov 3  ;;  %2101 = vst.msk [vmem:[%s4573_s1 + $0x61] sm:$0x80] %vm192_vm4, %v265_v59   ;;  %v290_v1 = vpop.permute.xlu0 %289  }
  0x8a   :  { %v1245_v6 = vsel %vm183_vm1, %v2334_v3, %v1240_v4  ;;  %v2338_v7 = vld [vmem:[%s4572_s0 + $0x25a] ss:$16 sm:%s1259_s22]   ;;  %v2341_v12 = vld [vmem:[%s4572_s0 + $0x1ee] ss:$16 sm:%s1272_s28]   ;;  %s1387_s28 = smov 12  ;;  %s1471_s22 = smov 3 }
  0x8b   :  { %v2339_v8 = vld [vmem:[%s4572_s0 + $0x25a] ss:$16 sm:%s1262_s23]   ;;  %v1250_v9 = vsel %vm188_vm2, %v2335_v5, %v1245_v6  ;;  %v2347_v19 = vld [vmem:[%s4572_s0 + $0x25e] ss:$16 sm:%s1297_s14]   ;;  %s1362_s14 = smov 12  ;;  %s1509_s23 = smov 192 }
  0x8c   :  { %v1265_v10 = vsel %vm178_vm0, %v2339_v8, %v2338_v7  ;;  %v2340_v11 = vld [vmem:[%s4572_s0 + $0x40a] ss:$-92 sm:%s1267_s27]   ;;  %1251 = vrot.lane.b32.xlu1 %v1250_v9, %s2521_s21  ;;  %s1334_s27 = smov 3  ;;  %2100 = vst.msk [vmem:[%s4573_s1 + $0x60] sm:$0x7f] %vm192_vm4, %v265_v59  }
  0x8d   :  { %v1270_v13 = vsel %vm183_vm1, %v2340_v11, %v1265_v10  ;;  %v2344_v14 = vld [vmem:[%s4572_s0 + $0x2ca] ss:$16 sm:%s1284_s3]   ;;  %v2350_v21 = vld [vmem:[%s4572_s0 + $0x3e] ss:$16 sm:%s1309_s17]   ;;  %s1459_s17 = smov 192  ;;  %s1479_s3 = smov 48  ;;  %v315_v11 = vpop.permute.xlu1 %314  }
  0x8e   :  { %v1275_v15 = vsel %vm188_vm2, %v2341_v12, %v1270_v13  ;;  %v2345_v16 = vld [vmem:[%s4572_s0 + $0x2ca] ss:$16 sm:%s1287_s8]   ;;  %v2351_v22 = vld [vmem:[%s4572_s0 + $0x3e] ss:$16 sm:%s1312_s18]   ;;  %s2522_s18 = smov 32   ;;  %s1484_s8 = smov 192 }
  0x8f   :  { %v2346_v17 = vld [vmem:[%s4572_s0 + $0x47a] ss:$-92 sm:%s1292_s9]   ;;  %1276 = vrot.lane.b32.xlu0 %v1275_v15, %s2521_s21  ;;  %v1290_v18 = vsel %vm178_vm0, %v2345_v16, %v2344_v14  ;;  %v1315_v24 = vsel %vm178_vm0, %v2351_v22, %v2350_v21  ;;  %2107 = vst.msk [vmem:[%s4573_s1 + $0x81] sm:$0x80] %vm192_vm4, %v290_v1   ;;  %s1874_s9 = smov 12 }
  0x90   :  { %v1295_v20 = vsel %vm183_vm1, %v2346_v17, %v1290_v18  ;;  %v2352_v25 = vld [vmem:[%s4572_s0 + $0x6e] ss:$16 sm:%s1317_s24]   ;;  %s1384_s24 = smov 3  ;;  %v2377_v57 = vld [vmem:[%s4572_s0 + $0x71] ss:$16 sm:%s1424_s26]   ;;  %v3697_v17 = vpop.permute.xlu0 %339   ;;  %s1649_s26 = smov 12 }
  0x91   :  { %v1300_v23 = vsel %vm188_vm2, %v2347_v19, %v1295_v20  ;;  %v2353_v26 = vld [vmem:[%s4572_s0 + $0x6e] ss:$16 sm:%s1322_s25]   ;;  %v1320_v27 = vsel %vm183_vm1, %v2352_v25, %v1315_v24  ;;  %v2383_v0 = vld [vmem:[%s4572_s0 + $0xe1] ss:$16 sm:%s1449_s11]   ;;  %s1534_s11 = smov 192  ;;  %s1559_s25 = smov 192 }
  0x92   :  { %1301 = vrot.lane.b32.xlu1 %v1300_v23, %s2521_s21  ;;  %v2356_v28 = vld [vmem:[%s4572_s0 + $0x11e] ss:$16 sm:%s1334_s27]   ;;  %v1325_v29 = vsel %vm188_vm2, %v2353_v26, %v1320_v27  ;;  %s1429_s27 = smov 48  ;;  %2106 = vst.msk [vmem:[%s4573_s1 + $0x80] sm:$0x7f] %vm192_vm4, %v290_v1   ;;  %v365_v27 = vpop.permute.xlu1 %364  }
  0x93   :  { %v2357_v30 = vld [vmem:[%s4572_s0 + $0x11e] ss:$16 sm:%s1337_s4]   ;;  %1326 = vrot.lane.b32.xlu0 %v1325_v29, %s2521_s21  ;;  %s1434_s4 = smov 192  ;;  %2113 = vst.msk [vmem:[%s4573_s1 + $0xa1] sm:$0x80] %vm192_vm4, %v315_v11  }
  0x94   :  { %v2358_v31 = vld [vmem:[%s4572_s0 + $0x14e] ss:$16 sm:%s1342_s5]   ;;  %v1340_v32 = vsel %vm178_vm0, %v2357_v30, %v2356_v28  ;;  %v2378_v58 = vld [vmem:[%s4572_s0 + $0x71] ss:$16 sm:%s1429_s27]   ;;  %s1571_s27 = smov 3  ;;  %s1921_s5 = smov 3 }
  0x95   :  { %v2359_v33 = vld [vmem:[%s4572_s0 + $0x14e] ss:$16 sm:%s1347_s10]   ;;  %v1345_v35 = vsel %vm183_vm1, %v2358_v31, %v1340_v32  ;;  %s1400_s10 = smov 12  ;;  %v2379_v61 = vld [vmem:[%s4572_s0 + $0x2f9] ss:$-92 sm:%s1434_s4]   ;;  %s1659_s4 = smov 192 }
  0x96   :  { %v2362_v36 = vld [vmem:[%s4572_s0 + $0x1fe] ss:$16 sm:%s1359_s13]   ;;  %v1350_v38 = vsel %vm188_vm2, %v2359_v33, %v1345_v35  ;;  %s1405_s13 = smov 48  ;;  %v2372_v49 = vld [vmem:[%s4572_s0 + $0x1] ss:$16 sm:%s1400_s10]   ;;  %s1446_s10 = smov 3  ;;  %v390_v33 = vpop.permute.xlu0 %389  }
  0x97   :  { %v2363_v37 = vld [vmem:[%s4572_s0 + $0x1fe] ss:$16 sm:%s1362_s14]   ;;  %1351 = vrot.lane.b32.xlu1 %v1350_v38, %s2521_s21  ;;  %s1410_s14 = smov 192  ;;  %v1403_v51 = vsel %vm178_vm0, %v2372_v49, %v2371_v47  ;;  %2112 = vst.msk [vmem:[%s4573_s1 + $0xa0] sm:$0x7f] %vm192_vm4, %v315_v11  }
  0x98   :  { %v1365_v39 = vsel %vm178_vm0, %v2363_v37, %v2362_v36  ;;  %v2364_v40 = vld [vmem:[%s4572_s0 + $0x22e] ss:$16 sm:%s1367_s19]   ;;  %s1421_s19 = smov 3  ;;  %v2373_v52 = vld [vmem:[%s4572_s0 + $0x1] ss:$16 sm:%s1405_s13]   ;;  %s1584_s13 = smov 192 }
  0x99   :  { %v2365_v41 = vld [vmem:[%s4572_s0 + $0x22e] ss:$16 sm:%s1372_s20]   ;;  %v1370_v42 = vsel %vm183_vm1, %v2364_v40, %v1365_v39  ;;  %v2374_v53 = vld [vmem:[%s4572_s0 + $0x289] ss:$-92 sm:%s1410_s14]   ;;  %v1408_v54 = vsel %vm183_vm1, %v2373_v52, %v1403_v51  ;;  %s1496_s14 = smov 3  ;;  %s1849_s20 = smov 12 }
  0x9a   :  { %v2368_v43 = vld [vmem:[%s4572_s0 + $0x2de] ss:$16 sm:%s1384_s24]   ;;  %v1375_v45 = vsel %vm188_vm2, %v2365_v41, %v1370_v42  ;;  %v2376_v55 = vld [vmem:[%s4572_s0 + $0x71] ss:$16 sm:%s1421_s19]   ;;  %v1413_v56 = vsel %vm188_vm2, %v2374_v53, %v1408_v54  ;;  %s1554_s24 = smov 48  ;;  %v440_v49 = vpop.permute.xlu0 %439   ;;  %s1679_s19 = smov 48 }
  0x9b   :  { %v2369_v46 = vld [vmem:[%s4572_s0 + $0x2de] ss:$16 sm:%s1387_s28]   ;;  %1376 = vrot.lane.b32.xlu0 %v1375_v45, %s2521_s21  ;;  %v1427_v60 = vsel %vm178_vm0, %v2377_v57, %v2376_v55  ;;  %2119 = vst.msk [vmem:[%s4573_s1 + $0xc1] sm:$0x80] %vm192_vm4, %v3697_v17   ;;  %s1609_s28 = smov 192 }
  0x9c   :  { %v1390_v48 = vsel %vm178_vm0, %v2369_v46, %v2368_v43  ;;  %v1432_v62 = vsel %vm183_vm1, %v2378_v58, %v1427_v60  ;;  %v2382_v63 = vld [vmem:[%s4572_s0 + $0xe1] ss:$16 sm:%s1446_s10]   ;;  %2125 = vst.msk [vmem:[%s4573_s1 + $0xa] sm:$0xc0] %vm192_vm4, %v365_v27   ;;  %2124 = vst.msk [vmem:[%s4573_s1 + $0x9] sm:$0x3f] %vm192_vm4, %v365_v27   ;;  %v415_v43 = vpop.permute.xlu1 %414  }
  0x9d   :  { %1391 = vrot.lane.b32.xlu1 %v1390_v48, %s2521_s21  ;;  %v1437_v2 = vsel %vm188_vm2, %v2379_v61, %v1432_v62  ;;  %v1452_v3 = vsel %vm178_vm0, %v2383_v0, %v2382_v63  ;;  %v2384_v4 = vld [vmem:[%s4572_s0 + $0xe1] ss:$16 sm:%s1454_s16]   ;;  %s1546_s16 = smov 3  ;;  %s1579_s21 = smov 48  ;;  %2131 = vst.msk [vmem:[%s4573_s1 + $0x2a] sm:$0xc0] %vm192_vm4, %v390_v33  }
  0x9e   :  { %v2385_v5 = vld [vmem:[%s4572_s0 + $0x369] ss:$-92 sm:%s1459_s17]   ;;  %v1457_v6 = vsel %vm183_vm1, %v2384_v4, %v1452_v3  ;;  %s1549_s17 = smov 12  ;;  %2130 = vst.msk [vmem:[%s4573_s1 + $0x29] sm:$0x3f] %vm192_vm4, %v390_v33   ;;  %s1746_s10 = smov 3 }
  0x9f   :  { %1414 = vrot.lane.b32.xlu0 %v1413_v56, %s2522_s18  ;;  %v2388_v7 = vld [vmem:[%s4572_s0 + $0x151] ss:$16 sm:%s1471_s22]   ;;  %v1462_v8 = vsel %vm188_vm2, %v2385_v5, %v1457_v6  ;;  %s1504_s22 = smov 48  ;;  %2137 = vst.msk [vmem:[%s4573_s1 + $0x4a] sm:$0xc0] %vm192_vm4, %v415_v43  }
  0xa0   :  { %v2389_v9 = vld [vmem:[%s4572_s0 + $0x151] ss:$16 sm:%s1474_s2]   ;;  %v2412_v39 = vld [vmem:[%s4572_s0 + $0x15] ss:$16 sm:%s1571_s27]   ;;  %s1604_s27 = smov 48  ;;  %v465_v59 = vpop.permute.xlu1 %464   ;;  %s1774_s2 = smov 12 }
  0xa1   :  { %1438 = vrot.lane.b32.xlu1 %v1437_v2, %s2522_s18  ;;  %v2390_v10 = vld [vmem:[%s4572_s0 + $0x151] ss:$16 sm:%s1479_s3]   ;;  %v1477_v12 = vsel %vm178_vm0, %v2389_v9, %v2388_v7  ;;  %s1621_s3 = smov 3  ;;  %2136 = vst.msk [vmem:[%s4573_s1 + $0x49] sm:$0x3f] %vm192_vm4, %v415_v43   ;;  %v490_v2 = vpop.permute.xlu0 %489  }
  0xa2   :  { %v2391_v13 = vld [vmem:[%s4572_s0 + $0x3d9] ss:$-92 sm:%s1484_s8]   ;;  %v1482_v14 = vsel %vm183_vm1, %v2390_v10, %v1477_v12  ;;  %s1574_s8 = smov 12  ;;  %2143 = vst.msk [vmem:[%s4573_s1 + $0x6a] sm:$0xc0] %vm192_vm4, %v440_v49  }
  0xa3   :  { %1463 = vrot.lane.b32.xlu0 %v1462_v8, %s2522_s18  ;;  %v2394_v15 = vld [vmem:[%s4572_s0 + $0x1c1] ss:$16 sm:%s1496_s14]   ;;  %v1487_v18 = vsel %vm188_vm2, %v2391_v13, %v1482_v14  ;;  %2142 = vst.msk [vmem:[%s4573_s1 + $0x69] sm:$0x3f] %vm192_vm4, %v440_v49   ;;  %s1796_s14 = smov 3 }
  0xa4   :  { %v2395_v16 = vld [vmem:[%s4572_s0 + $0x1c1] ss:$16 sm:%s1499_s15]   ;;  %v2413_v41 = vld [vmem:[%s4572_s0 + $0x15] ss:$16 sm:%s1574_s8]   ;;  %s1699_s8 = smov 12  ;;  %v515_v12 = vpop.permute.xlu1 %514   ;;  %s1799_s15 = smov 12 }
  0xa5   :  { %v1502_v19 = vsel %vm178_vm0, %v2395_v16, %v2394_v15  ;;  %v2396_v20 = vld [vmem:[%s4572_s0 + $0x1c1] ss:$16 sm:%s1504_s22]   ;;  %1488 = vrot.lane.b32.xlu1 %v1487_v18, %s2522_s18  ;;  %s1596_s22 = smov 3  ;;  %v1577_v44 = vsel %vm178_vm0, %v2413_v41, %v2412_v39  ;;  %2149 = vst.msk [vmem:[%s4573_s1 + $0x8a] sm:$0xc0] %vm192_vm4, %v465_v59   ;;  %v540_v18 = vpop.permute.xlu0 %539  }
  0xa6   :  { %v2397_v21 = vld [vmem:[%s4572_s0 + $0x449] ss:$-92 sm:%s1509_s23]   ;;  %v1507_v22 = vsel %vm183_vm1, %v2396_v20, %v1502_v19  ;;  %s1599_s23 = smov 12  ;;  %2148 = vst.msk [vmem:[%s4573_s1 + $0x89] sm:$0x3f] %vm192_vm4, %v465_v59  }
  0xa7   :  { %v2400_v23 = vld [vmem:[%s4572_s0 + $0x231] ss:$16 sm:%s1521_s29]   ;;  %v1512_v24 = vsel %vm188_vm2, %v2397_v21, %v1507_v22  ;;  %v2414_v42 = vld [vmem:[%s4572_s0 + $0x15] ss:$16 sm:%s1579_s21]   ;;  %s1646_s29 = smov 3  ;;  %s1971_s21 = smov 3 }
  0xa8   :  { %v2401_v25 = vld [vmem:[%s4572_s0 + $0x231] ss:$16 sm:%s1524_s6]   ;;  %1513 = vrot.lane.b32.xlu0 %v1512_v24, %s2522_s18  ;;  %v1582_v46 = vsel %vm183_vm1, %v2414_v42, %v1577_v44  ;;  %v2077_v62 = vld [vmem:[%s4572_s0 + $0x300] ss:$4 sm:$0xf]   ;;  %s1824_s6 = smov 12 }
  0xa9   :  { %v2402_v26 = vld [vmem:[%s4572_s0 + $0x231] ss:$16 sm:%s1529_s7]   ;;  %v1527_v28 = vsel %vm178_vm0, %v2401_v25, %v2400_v23  ;;  %v2415_v45 = vld [vmem:[%s4572_s0 - $0x57] ss:$16 sm:%s1584_s13]   ;;  %s1671_s7 = smov 3  ;;  %s1709_s13 = smov 192 }
  0xaa   :  { %v2403_v29 = vld [vmem:[%s4572_s0 + $0x4b9] ss:$-92 sm:%s1534_s11]   ;;  %v1532_v30 = vsel %vm183_vm1, %v2402_v26, %v1527_v28  ;;  %s1624_s11 = smov 12  ;;  %v1587_v50 = vsel %vm188_vm2, %v2415_v45, %v1582_v46  ;;  %2078 = vst.msk [vmem:[%s4573_s1 + $0xc6] ss:$8 sm:$0xf] %vm3_vm3, %v2077_v62   ;;  %v565_v28 = vpop.permute.xlu1 %564  }
  0xab   :  { %v2406_v31 = vld [vmem:[%s4572_s0 + $0x2a1] ss:$16 sm:%s1546_s16]   ;;  %v1537_v34 = vsel %vm188_vm2, %v2403_v29, %v1532_v30  ;;  %v2418_v47 = vld [vmem:[%s4572_s0 + $0x85] ss:$16 sm:%s1596_s22]   ;;  %s1721_s16 = smov 3  ;;  %s1771_s22 = smov 3 }
  0xac   :  { %v2407_v32 = vld [vmem:[%s4572_s0 + $0x2a1] ss:$16 sm:%s1549_s17]   ;;  %1538 = vrot.lane.b32.xlu1 %v1537_v34, %s2522_s18  ;;  %s1634_s17 = smov 192  ;;  %2155 = vst.msk [vmem:[%s4573_s1 + $0xaa] sm:$0xc0] %vm192_vm4, %v490_v2   ;;  %v590_v34 = vpop.permute.xlu0 %589  }
  0xad   :  { %v1552_v35 = vsel %vm178_vm0, %v2407_v32, %v2406_v31  ;;  %v2408_v36 = vld [vmem:[%s4572_s0 + $0x2a1] ss:$16 sm:%s1554_s24]   ;;  %v2419_v48 = vld [vmem:[%s4572_s0 + $0x85] ss:$16 sm:%s1599_s23]   ;;  %s1809_s23 = smov 192  ;;  %s1896_s24 = smov 3 }
  0xae   :  { %v2409_v37 = vld [vmem:[%s4572_s0 + $0x529] ss:$-92 sm:%s1559_s25]   ;;  %v1557_v38 = vsel %vm183_vm1, %v2408_v36, %v1552_v35  ;;  %v1602_v51 = vsel %vm178_vm0, %v2419_v48, %v2418_v47  ;;  %2154 = vst.msk [vmem:[%s4573_s1 + $0xa9] sm:$0x3f] %vm192_vm4, %v490_v2   ;;  %2118 = vst.msk [vmem:[%s4573_s1 + $0xc0] sm:$0x7f] %vm192_vm4, %v3697_v17   ;;  %v615_v44 = vpop.permute.xlu1 %614  }
  0xaf   :  { %v1562_v40 = vsel %vm188_vm2, %v2409_v37, %v1557_v38  ;;  %v2420_v52 = vld [vmem:[%s4572_s0 + $0x85] ss:$16 sm:%s1604_s27]   ;;  %v2421_v53 = vld [vmem:[%s4572_s0 + $0x19] ss:$16 sm:%s1609_s28]   ;;  %s1729_s27 = smov 48  ;;  %s1899_s25 = smov 12 }
  0xb0   :  { %1563 = vrot.lane.b32.xlu0 %v1562_v40, %s2522_s18  ;;  %1588 = vrot.lane.b32.xlu1 %v1587_v50, %s2522_s18  ;;  %v1607_v54 = vsel %vm183_vm1, %v2420_v52, %v1602_v51  ;;  %v2424_v55 = vld [vmem:[%s4572_s0 + $0xf5] ss:$16 sm:%s1621_s3]   ;;  %s1654_s3 = smov 48  ;;  %s1949_s28 = smov 12 }
  0xb1   :  { %v1612_v56 = vsel %vm188_vm2, %v2421_v53, %v1607_v54  ;;  %v2425_v57 = vld [vmem:[%s4572_s0 + $0xf5] ss:$16 sm:%s1624_s11]   ;;  %v2427_v61 = vld [vmem:[%s4572_s0 + $0x89] ss:$16 sm:%s1634_s17]   ;;  %s1674_s17 = smov 12  ;;  %s1749_s11 = smov 12 }
  0xb2   :  { %v2426_v58 = vld [vmem:[%s4572_s0 + $0xf5] ss:$16 sm:%s1629_s12]   ;;  %v1627_v60 = vsel %vm178_vm0, %v2425_v57, %v2424_v55  ;;  %v2433_v6 = vld [vmem:[%s4572_s0 + $0xf9] ss:$16 sm:%s1659_s4]   ;;  %s1704_s12 = smov 48  ;;  %s1734_s4 = smov 192  ;;  %v640_v50 = vpop.permute.xlu0 %639  }
  0xb3   :  { %v1632_v63 = vsel %vm183_vm1, %v2426_v58, %v1627_v60  ;;  %v2430_v0 = vld [vmem:[%s4572_s0 + $0x165] ss:$16 sm:%s1646_s29]   ;;  %2161 = vst.msk [vmem:[%s4573_s1 + $0xca] sm:$0xc0] %vm192_vm4, %v515_v12   ;;  %2160 = vst.msk [vmem:[%s4573_s1 + $0xc9] sm:$0x3f] %vm192_vm4, %v515_v12  }
  0xb4   :  { %1613 = vrot.lane.b32.xlu0 %v1612_v56, %s2522_s18  ;;  %v2431_v1 = vld [vmem:[%s4572_s0 + $0x165] ss:$16 sm:%s1649_s26]   ;;  %v1637_v3 = vsel %vm188_vm2, %v2427_v61, %v1632_v63  ;;  %s1684_s26 = smov 192  ;;  %2166 = vst.msk [vmem:[%s4573_s1 + $0x12] sm:$0x1f] %vm192_vm4, %v540_v18   ;;  %s1821_s29 = smov 3 }
  0xb5   :  { %v1652_v4 = vsel %vm178_vm0, %v2431_v1, %v2430_v0  ;;  %v2432_v5 = vld [vmem:[%s4572_s0 + $0x165] ss:$16 sm:%s1654_s3]   ;;  %1638 = vrot.lane.b32.xlu1 %v1637_v3, %s2522_s18  ;;  %2167 = vst.msk [vmem:[%s4573_s1 + $0x13] sm:$0xe0] %vm192_vm4, %v540_v18   ;;  %s1779_s3 = smov 48  ;;  %v665_v60 = vpop.permute.xlu1 %664  }
  0xb6   :  { %v1657_v7 = vsel %vm183_vm1, %v2432_v5, %v1652_v4  ;;  %v2436_v8 = vld [vmem:[%s4572_s0 + $0x1d5] ss:$16 sm:%s1671_s7]   ;;  %s1696_s7 = smov 3  ;;  %v2439_v14 = vld [vmem:[%s4572_s0 + $0x169] ss:$16 sm:%s1684_s26]   ;;  %s1724_s26 = smov 12 }
  0xb7   :  { %v1662_v9 = vsel %vm188_vm2, %v2433_v6, %v1657_v7  ;;  %v2437_v10 = vld [vmem:[%s4572_s0 + $0x1d5] ss:$16 sm:%s1674_s17]   ;;  %v2445_v22 = vld [vmem:[%s4572_s0 + $0x1d9] ss:$16 sm:%s1709_s13]   ;;  %s1759_s17 = smov 192  ;;  %s1924_s13 = smov 12 }
  0xb8   :  { %v2438_v11 = vld [vmem:[%s4572_s0 + $0x1d5] ss:$16 sm:%s1679_s19]   ;;  %1663 = vrot.lane.b32.xlu0 %v1662_v9, %s2522_s18  ;;  %v1677_v13 = vsel %vm178_vm0, %v2437_v10, %v2436_v8  ;;  %2173 = vst.msk [vmem:[%s4573_s1 + $0x33] sm:$0xe0] %vm192_vm4, %v565_v28   ;;  %s1846_s19 = smov 3 }
  0xb9   :  { %v1682_v15 = vsel %vm183_vm1, %v2438_v11, %v1677_v13  ;;  %v2442_v16 = vld [vmem:[%s4572_s0 + $0x245] ss:$16 sm:%s1696_s7]   ;;  %v2451_v30 = vld [vmem:[%s4572_s0 + $0x249] ss:$16 sm:%s1734_s4]   ;;  %s1829_s7 = smov 48  ;;  %v690_v2 = vpop.permute.xlu0 %689  }
  0xba   :  { %v2443_v17 = vld [vmem:[%s4572_s0 + $0x245] ss:$16 sm:%s1699_s8]   ;;  %v1687_v19 = vsel %vm188_vm2, %v2439_v14, %v1682_v15  ;;  %2172 = vst.msk [vmem:[%s4573_s1 + $0x32] sm:$0x1f] %vm192_vm4, %v565_v28   ;;  %s1784_s8 = smov 192 }
  0xbb   :  { %v1702_v20 = vsel %vm178_vm0, %v2443_v17, %v2442_v16  ;;  %v2444_v21 = vld [vmem:[%s4572_s0 + $0x245] ss:$16 sm:%s1704_s12]   ;;  %1688 = vrot.lane.b32.xlu1 %v1687_v19, %s2522_s18  ;;  %2178 = vst.msk [vmem:[%s4573_s1 + $0x52] sm:$0x1f] %vm192_vm4, %v590_v34  }
  0xbc   :  { %v1707_v23 = vsel %vm183_vm1, %v2444_v21, %v1702_v20  ;;  %v2448_v24 = vld [vmem:[%s4572_s0 + $0x2b5] ss:$16 sm:%s1721_s16]   ;;  %s1754_s16 = smov 48  ;;  %v2454_v32 = vld [vmem:[%s4572_s0 + $0x29] ss:$16 sm:%s1746_s10]   ;;  %s1879_s10 = smov 48 }
  0xbd   :  { %v1712_v25 = vsel %vm188_vm2, %v2445_v22, %v1707_v23  ;;  %v2449_v26 = vld [vmem:[%s4572_s0 + $0x2b5] ss:$16 sm:%s1724_s26]   ;;  %v2455_v33 = vld [vmem:[%s4572_s0 + $0x29] ss:$16 sm:%s1749_s11]   ;;  %s1834_s11 = smov 192  ;;  %s1859_s26 = smov 192  ;;  %v715_v12 = vpop.permute.xlu1 %714  }
  0xbe   :  { %v2450_v27 = vld [vmem:[%s4572_s0 + $0x2b5] ss:$16 sm:%s1729_s27]   ;;  %1713 = vrot.lane.b32.xlu0 %v1712_v25, %s2522_s18  ;;  %v1727_v29 = vsel %vm178_vm0, %v2449_v26, %v2448_v24  ;;  %v1752_v36 = vsel %vm178_vm0, %v2455_v33, %v2454_v32  ;;  %2179 = vst.msk [vmem:[%s4573_s1 + $0x53] sm:$0xe0] %vm192_vm4, %v590_v34   ;;  %s1946_s27 = smov 3 }
  0xbf   :  { %v1732_v31 = vsel %vm183_vm1, %v2450_v27, %v1727_v29  ;;  %v2456_v37 = vld [vmem:[%s4572_s0 + $0x1d9] ss:$-92 sm:%s1754_s16]   ;;  %2185 = vst.msk [vmem:[%s4573_s1 + $0x73] sm:$0xe0] %vm192_vm4, %v615_v44   ;;  %2184 = vst.msk [vmem:[%s4573_s1 + $0x72] sm:$0x1f] %vm192_vm4, %v615_v44  }
  0xc0   :  { %v1737_v35 = vsel %vm188_vm2, %v2451_v30, %v1732_v31  ;;  %v2457_v38 = vld [vmem:[%s4572_s0 - $0x43] ss:$16 sm:%s1759_s17]   ;;  %v1757_v39 = vsel %vm183_vm1, %v2456_v37, %v1752_v36  ;;  %v2460_v40 = vld [vmem:[%s4572_s0 + $0x99] ss:$16 sm:%s1771_s22]   ;;  %s1804_s22 = smov 48  ;;  %s1974_s17 = smov 12 }
  0xc1   :  { %1738 = vrot.lane.b32.xlu1 %v1737_v35, %s2522_s18  ;;  %v1762_v41 = vsel %vm188_vm2, %v2457_v38, %v1757_v39  ;;  %v2461_v42 = vld [vmem:[%s4572_s0 + $0x99] ss:$16 sm:%s1774_s2]   ;;  %2190 = vst.msk [vmem:[%s4573_s1 + $0x92] sm:$0x1f] %vm192_vm4, %v640_v50   ;;  %s1909_s2 = smov 192  ;;  %v740_v18 = vpop.permute.xlu0 %739  }
  0xc2   :  { %v2462_v43 = vld [vmem:[%s4572_s0 + $0x249] ss:$-92 sm:%s1779_s3]   ;;  %1763 = vrot.lane.b32.xlu0 %v1762_v41, %s2522_s18  ;;  %v1777_v45 = vsel %vm178_vm0, %v2461_v42, %v2460_v40  ;;  %2191 = vst.msk [vmem:[%s4573_s1 + $0x93] sm:$0xe0] %vm192_vm4, %v640_v50  }
  0xc3   :  { %v2463_v46 = vld [vmem:[%s4572_s0 + $0x2d] ss:$16 sm:%s1784_s8]   ;;  %v1782_v47 = vsel %vm183_vm1, %v2462_v43, %v1777_v45  ;;  %v2466_v48 = vld [vmem:[%s4572_s0 + $0x109] ss:$16 sm:%s1796_s14]   ;;  %s1929_s14 = smov 48 }
  0xc4   :  { %v2467_v49 = vld [vmem:[%s4572_s0 + $0x109] ss:$16 sm:%s1799_s15]   ;;  %v1787_v51 = vsel %vm188_vm2, %v2463_v46, %v1782_v47  ;;  %v2469_v54 = vld [vmem:[%s4572_s0 + $0x9d] ss:$16 sm:%s1809_s23]   ;;  %s1884_s15 = smov 192 }
  0xc5   :  { %v1802_v52 = vsel %vm178_vm0, %v2467_v49, %v2466_v48  ;;  %v2468_v53 = vld [vmem:[%s4572_s0 + $0x2b9] ss:$-92 sm:%s1804_s22]   ;;  %1788 = vrot.lane.b32.xlu1 %v1787_v51, %s2522_s18  ;;  %2197 = vst.msk [vmem:[%s4573_s1 + $0xb3] sm:$0xe0] %vm192_vm4, %v665_v60   ;;  %v765_v28 = vpop.permute.xlu1 %764  }
  0xc6   :  { %v1807_v55 = vsel %vm183_vm1, %v2468_v53, %v1802_v52  ;;  %v2472_v56 = vld [vmem:[%s4572_s0 + $0x179] ss:$16 sm:%s1821_s29]   ;;  %s1854_s29 = smov 48  ;;  %v2475_v62 = vld [vmem:[%s4572_s0 + $0x10d] ss:$16 sm:%s1834_s11]  }
  0xc7   :  { %v1812_v57 = vsel %vm188_vm2, %v2469_v54, %v1807_v55  ;;  %v2473_v58 = vld [vmem:[%s4572_s0 + $0x179] ss:$16 sm:%s1824_s6]   ;;  %2196 = vst.msk [vmem:[%s4573_s1 + $0xb2] sm:$0x1f] %vm192_vm4, %v665_v60   ;;  %2202 = vst.msk [vmem:[%s4573_s1 + $0xd2] sm:$0x1f] %vm192_vm4, %v690_v2   ;;  %v780_v31 = vpop.permute.xlu0 %779  }
  0xc8   :  { %v2474_v59 = vld [vmem:[%s4572_s0 + $0x329] ss:$-92 sm:%s1829_s7]   ;;  %1813 = vrot.lane.b32.xlu0 %v1812_v57, %s2522_s18  ;;  %v1827_v61 = vsel %vm178_vm0, %v2473_v58, %v2472_v56  ;;  %2203 = vst.msk [vmem:[%s4573_s1 + $0xd3] sm:$0xe0] %vm192_vm4, %v690_v2   ;;  %s1959_s6 = smov 192 }
  0xc9   :  { %v1832_v63 = vsel %vm183_vm1, %v2474_v59, %v1827_v61  ;;  %v2478_v0 = vld [vmem:[%s4572_s0 + $0x1e9] ss:$16 sm:%s1846_s19]   ;;  %v2481_v6 = vld [vmem:[%s4572_s0 + $0x17d] ss:$16 sm:%s1859_s26]   ;;  %s1979_s19 = smov 48  ;;  %s1984_s26 = smov 192  ;;  %v803_v41 = vpop.permute.xlu1 %802  }
  0xca   :  { %v2479_v1 = vld [vmem:[%s4572_s0 + $0x1e9] ss:$16 sm:%s1849_s20]   ;;  %v1837_v3 = vsel %vm188_vm2, %v2475_v62, %v1832_v63  ;;  %v2487_v14 = vld [vmem:[%s4572_s0 + $0x1ed] ss:$16 sm:%s1884_s15]   ;;  %s1934_s20 = smov 192 }
  0xcb   :  { %v1852_v4 = vsel %vm178_vm0, %v2479_v1, %v2478_v0  ;;  %v2480_v5 = vld [vmem:[%s4572_s0 + $0x399] ss:$-92 sm:%s1854_s29]   ;;  %1838 = vrot.lane.b32.xlu1 %v1837_v3, %s2522_s18  ;;  %2208 = vst.msk [vmem:[%s4573_s1 + $0x1b] sm:$0xf] %vm192_vm4, %v715_v12   ;;  %v827_v47 = vpop.permute.xlu0 %826  }
  0xcc   :  { %v1857_v7 = vsel %vm183_vm1, %v2480_v5, %v1852_v4  ;;  %v2484_v8 = vld [vmem:[%s4572_s0 + $0x259] ss:$16 sm:%s1871_s30]   ;;  %s1904_s30 = smov 48  ;;  %2209 = vst.msk [vmem:[%s4573_s1 + $0x37] sm:$0xf0] %vm192_vm4, %v715_v12  }
  0xcd   :  { %v1862_v9 = vsel %vm188_vm2, %v2481_v6, %v1857_v7  ;;  %v2485_v10 = vld [vmem:[%s4572_s0 + $0x259] ss:$16 sm:%s1874_s9]   ;;  %v2493_v22 = vld [vmem:[%s4572_s0 + $0x25d] ss:$16 sm:%s1909_s2]   ;;  %s1999_s2 = smov 12 }
  0xce   :  { %v2486_v11 = vld [vmem:[%s4572_s0 + $0x409] ss:$-92 sm:%s1879_s10]   ;;  %1863 = vrot.lane.b32.xlu0 %v1862_v9, %s2522_s18  ;;  %v1877_v13 = vsel %vm178_vm0, %v2485_v10, %v2484_v8  ;;  %2214 = vst.msk [vmem:[%s4573_s1 + $0x5b] sm:$0xf] %vm192_vm4, %v740_v18  }
  0xcf   :  { %v1882_v15 = vsel %vm183_vm1, %v2486_v11, %v1877_v13  ;;  %v2490_v16 = vld [vmem:[%s4572_s0 + $0x2c9] ss:$16 sm:%s1896_s24]   ;;  %2215 = vst.msk [vmem:[%s4573_s1 + $0x77] sm:$0xf0] %vm192_vm4, %v740_v18   ;;  %2220 = vst.msk [vmem:[%s4573_s1 + $0x9b] sm:$0xf] %vm192_vm4, %v765_v28   ;;  %v852_v53 = vpop.permute.xlu1 %851  }
  0xd0   :  { %v2491_v17 = vld [vmem:[%s4572_s0 + $0x2c9] ss:$16 sm:%s1899_s25]   ;;  %v1887_v19 = vsel %vm188_vm2, %v2487_v14, %v1882_v15  ;;  %v2496_v24 = vld [vmem:[%s4572_s0 + $0x3d] ss:$16 sm:%s1921_s5]   ;;  %s1954_s5 = smov 48 }
  0xd1   :  { %v1902_v20 = vsel %vm178_vm0, %v2491_v17, %v2490_v16  ;;  %v2492_v21 = vld [vmem:[%s4572_s0 + $0x479] ss:$-92 sm:%s1904_s30]   ;;  %1888 = vrot.lane.b32.xlu1 %v1887_v19, %s2522_s18  ;;  %2221 = vst.msk [vmem:[%s4573_s1 + $0xb7] sm:$0xf0] %vm192_vm4, %v765_v28   ;;  %s1996_s30 = smov 3 }
  0xd2   :  { %v1907_v23 = vsel %vm183_vm1, %v2492_v21, %v1902_v20  ;;  %v2497_v26 = vld [vmem:[%s4572_s0 + $0x3d] ss:$16 sm:%s1924_s13]   ;;  %2224 = vst.msk [vmem:[%s4573_s1 + $0xdb] sm:$0xf] %vm192_vm4, %v780_v31  }
  0xd3   :  { %v1912_v25 = vsel %vm188_vm2, %v2493_v22, %v1907_v23  ;;  %v2498_v27 = vld [vmem:[%s4572_s0 + $0x6d] ss:$16 sm:%s1929_s14]   ;;  %v1927_v29 = vsel %vm178_vm0, %v2497_v26, %v2496_v24  ;;  %805 = vst.msk [vmem:[%s4573_s1] sm:$0x7f] %vm804_vm5, %v803_v41   ;;  %2229 = vst.msk [vmem:[%s4573_s1 + $0x1] sm:$0x80] %vm804_vm5, %v803_v41   ;;  %v877_v54 = vpop.permute.xlu0 %876  }
  0xd4   :  { %1913 = vrot.lane.b32.xlu0 %v1912_v25, %s2522_s18  ;;  %v2499_v30 = vld [vmem:[%s4572_s0 + $0x6d] ss:$16 sm:%s1934_s20]   ;;  %v1932_v32 = vsel %vm183_vm1, %v2498_v27, %v1927_v29  ;;  %2234 = vst.msk [vmem:[%s4573_s1 + $0x20] sm:$0x7f] %vm804_vm5, %v827_v47  }
  0xd5   :  { %v2502_v33 = vld [vmem:[%s4572_s0 + $0x11d] ss:$16 sm:%s1946_s27]   ;;  %v1937_v35 = vsel %vm188_vm2, %v2499_v30, %v1932_v32  ;;  %2235 = vst.msk [vmem:[%s4573_s1 + $0x21] sm:$0x80] %vm804_vm5, %v827_v47   ;;  %2240 = vst.msk [vmem:[%s4573_s1 + $0x40] sm:$0x7f] %vm804_vm5, %v852_v53  }
  0xd6   :  { %v2503_v34 = vld [vmem:[%s4572_s0 + $0x11d] ss:$16 sm:%s1949_s28]   ;;  %1938 = vrot.lane.b32.xlu1 %v1937_v35, %s2522_s18  ;;  %2241 = vst.msk [vmem:[%s4573_s1 + $0x41] sm:$0x80] %vm804_vm5, %v852_v53  }
  0xd7   :  { %v1952_v36 = vsel %vm178_vm0, %v2503_v34, %v2502_v33  ;;  %v2504_v37 = vld [vmem:[%s4572_s0 + $0x14d] ss:$16 sm:%s1954_s5]   ;;  %2246 = vst.msk [vmem:[%s4573_s1 + $0x60] sm:$0x7f] %vm804_vm5, %v877_v54   ;;  %2247 = vst.msk [vmem:[%s4573_s1 + $0x61] sm:$0x80] %vm804_vm5, %v877_v54   ;;  %v902_v55 = vpop.permute.xlu1 %901  }
  0xd8   :  { %v2505_v38 = vld [vmem:[%s4572_s0 + $0x14d] ss:$16 sm:%s1959_s6]   ;;  %v1957_v39 = vsel %vm183_vm1, %v2504_v37, %v1952_v36  ;;  %2252 = vst.msk [vmem:[%s4573_s1 + $0x80] sm:$0x7f] %vm804_vm5, %v902_v55   ;;  %2253 = vst.msk [vmem:[%s4573_s1 + $0x81] sm:$0x80] %vm804_vm5, %v902_v55  }
  0xd9   :  { %v2508_v40 = vld [vmem:[%s4572_s0 + $0x1fd] ss:$16 sm:%s1971_s21]   ;;  %v1962_v42 = vsel %vm188_vm2, %v2505_v38, %v1957_v39 }
  0xda   :  { %v2509_v43 = vld [vmem:[%s4572_s0 + $0x1fd] ss:$16 sm:%s1974_s17]   ;;  %1963 = vrot.lane.b32.xlu0 %v1962_v42, %s2522_s18 }
  0xdb   :  { %v2510_v44 = vld [vmem:[%s4572_s0 + $0x22d] ss:$16 sm:%s1979_s19]   ;;  %v1977_v45 = vsel %vm178_vm0, %v2509_v43, %v2508_v40  ;;  %v927_v56 = vpop.permute.xlu0 %926  }
  0xdc   :  { %v2511_v46 = vld [vmem:[%s4572_s0 + $0x22d] ss:$16 sm:%s1984_s26]   ;;  %v1982_v48 = vsel %vm183_vm1, %v2510_v44, %v1977_v45  ;;  %2258 = vst.msk [vmem:[%s4573_s1 + $0xa0] sm:$0x7f] %vm804_vm5, %v927_v56   ;;  %2259 = vst.msk [vmem:[%s4573_s1 + $0xa1] sm:$0x80] %vm804_vm5, %v927_v56  }
  0xdd   :  { %v2514_v49 = vld [vmem:[%s4572_s0 + $0x2dd] ss:$16 sm:%s1996_s30]   ;;  %v1987_v51 = vsel %vm188_vm2, %v2511_v46, %v1982_v48 }
  0xde   :  { %v2515_v50 = vld [vmem:[%s4572_s0 + $0x2dd] ss:$16 sm:%s1999_s2]   ;;  %1988 = vrot.lane.b32.xlu1 %v1987_v51, %s2522_s18 }
  0xdf   :  { %v2002_v52 = vsel %vm178_vm0, %v2515_v50, %v2514_v49  ;;  %v952_v57 = vpop.permute.xlu1 %951  }
  0xe0   :  { %2003 = vrot.lane.b32.xlu0 %v2002_v52, %s2522_s18  ;;  %2264 = vst.msk [vmem:[%s4573_s1 + $0xc0] sm:$0x7f] %vm804_vm5, %v952_v57   ;;  %2265 = vst.msk [vmem:[%s4573_s1 + $0xc1] sm:$0x80] %vm804_vm5, %v952_v57  }
  0xe1   :  { %v977_v58 = vpop.permute.xlu0 %976  }
  0xe2   :  { %2270 = vst.msk [vmem:[%s4573_s1 + $0x9] sm:$0x3f] %vm804_vm5, %v977_v58   ;;  %2271 = vst.msk [vmem:[%s4573_s1 + $0xa] sm:$0xc0] %vm804_vm5, %v977_v58  }
  0xe4   :  { %v1002_v59 = vpop.permute.xlu1 %1001  }
  0xe5   :  { %2276 = vst.msk [vmem:[%s4573_s1 + $0x29] sm:$0x3f] %vm804_vm5, %v1002_v59   ;;  %2277 = vst.msk [vmem:[%s4573_s1 + $0x2a] sm:$0xc0] %vm804_vm5, %v1002_v59  }
  0xe7   :  { %v1027_v60 = vpop.permute.xlu0 %1026  }
  0xe8   :  { %2282 = vst.msk [vmem:[%s4573_s1 + $0x49] sm:$0x3f] %vm804_vm5, %v1027_v60   ;;  %2283 = vst.msk [vmem:[%s4573_s1 + $0x4a] sm:$0xc0] %vm804_vm5, %v1027_v60  }
  0xea   :  { %v1052_v61 = vpop.permute.xlu1 %1051  }
  0xeb   :  { %2288 = vst.msk [vmem:[%s4573_s1 + $0x69] sm:$0x3f] %vm804_vm5, %v1052_v61   ;;  %2289 = vst.msk [vmem:[%s4573_s1 + $0x6a] sm:$0xc0] %vm804_vm5, %v1052_v61  }
  0xed   :  { %v1077_v62 = vpop.permute.xlu0 %1076  }
  0xee   :  { %2294 = vst.msk [vmem:[%s4573_s1 + $0x89] sm:$0x3f] %vm804_vm5, %v1077_v62   ;;  %2295 = vst.msk [vmem:[%s4573_s1 + $0x8a] sm:$0xc0] %vm804_vm5, %v1077_v62  }
  0xf0   :  { %v1102_v63 = vpop.permute.xlu1 %1101  }
  0xf1   :  { %2300 = vst.msk [vmem:[%s4573_s1 + $0xa9] sm:$0x3f] %vm804_vm5, %v1102_v63   ;;  %2301 = vst.msk [vmem:[%s4573_s1 + $0xaa] sm:$0xc0] %vm804_vm5, %v1102_v63  }
  0xf3   :  { %v1127_v0 = vpop.permute.xlu0 %1126  }
  0xf4   :  { %2306 = vst.msk [vmem:[%s4573_s1 + $0xc9] sm:$0x3f] %vm804_vm5, %v1127_v0   ;;  %2307 = vst.msk [vmem:[%s4573_s1 + $0xca] sm:$0xc0] %vm804_vm5, %v1127_v0   ;;  %v1152_v1 = vpop.permute.xlu1 %1151  }
  0xf5   :  { %2312 = vst.msk [vmem:[%s4573_s1 + $0x12] sm:$0x1f] %vm804_vm5, %v1152_v1   ;;  %2313 = vst.msk [vmem:[%s4573_s1 + $0x13] sm:$0xe0] %vm804_vm5, %v1152_v1  }
  0xf7   :  { %v1177_v2 = vpop.permute.xlu0 %1176  }
  0xf8   :  { %2318 = vst.msk [vmem:[%s4573_s1 + $0x32] sm:$0x1f] %vm804_vm5, %v1177_v2   ;;  %2319 = vst.msk [vmem:[%s4573_s1 + $0x33] sm:$0xe0] %vm804_vm5, %v1177_v2   ;;  %v1202_v3 = vpop.permute.xlu1 %1201  }
  0xf9   :  { %2324 = vst.msk [vmem:[%s4573_s1 + $0x52] sm:$0x1f] %vm804_vm5, %v1202_v3   ;;  %2325 = vst.msk [vmem:[%s4573_s1 + $0x53] sm:$0xe0] %vm804_vm5, %v1202_v3  }
  0xfb   :  { %v1227_v4 = vpop.permute.xlu0 %1226  }
  0xfc   :  { %2330 = vst.msk [vmem:[%s4573_s1 + $0x72] sm:$0x1f] %vm804_vm5, %v1227_v4   ;;  %2331 = vst.msk [vmem:[%s4573_s1 + $0x73] sm:$0xe0] %vm804_vm5, %v1227_v4  }
  0xfe   :  { %v1252_v5 = vpop.permute.xlu1 %1251  }
  0xff   :  { %2336 = vst.msk [vmem:[%s4573_s1 + $0x92] sm:$0x1f] %vm804_vm5, %v1252_v5   ;;  %2337 = vst.msk [vmem:[%s4573_s1 + $0x93] sm:$0xe0] %vm804_vm5, %v1252_v5  }
 0x101   :  { %v1277_v6 = vpop.permute.xlu0 %1276  }
 0x102   :  { %2342 = vst.msk [vmem:[%s4573_s1 + $0xb2] sm:$0x1f] %vm804_vm5, %v1277_v6   ;;  %2343 = vst.msk [vmem:[%s4573_s1 + $0xb3] sm:$0xe0] %vm804_vm5, %v1277_v6  }
 0x104   :  { %v1302_v7 = vpop.permute.xlu1 %1301  }
 0x105   :  { %2348 = vst.msk [vmem:[%s4573_s1 + $0xd2] sm:$0x1f] %vm804_vm5, %v1302_v7   ;;  %2349 = vst.msk [vmem:[%s4573_s1 + $0xd3] sm:$0xe0] %vm804_vm5, %v1302_v7   ;;  %v1327_v8 = vpop.permute.xlu0 %1326  }
 0x106   :  { %2354 = vst.msk [vmem:[%s4573_s1 + $0x1b] sm:$0xf] %vm804_vm5, %v1327_v8   ;;  %2355 = vst.msk [vmem:[%s4573_s1 + $0x37] sm:$0xf0] %vm804_vm5, %v1327_v8  }
 0x109   :  { %v1352_v9 = vpop.permute.xlu1 %1351  }
 0x10a   :  { %2360 = vst.msk [vmem:[%s4573_s1 + $0x5b] sm:$0xf] %vm804_vm5, %v1352_v9   ;;  %2361 = vst.msk [vmem:[%s4573_s1 + $0x77] sm:$0xf0] %vm804_vm5, %v1352_v9  }
 0x10d   :  { %v1377_v10 = vpop.permute.xlu0 %1376  }
 0x10e   :  { %2366 = vst.msk [vmem:[%s4573_s1 + $0x9b] sm:$0xf] %vm804_vm5, %v1377_v10   ;;  %2367 = vst.msk [vmem:[%s4573_s1 + $0xb7] sm:$0xf0] %vm804_vm5, %v1377_v10  }
 0x10f   :  { %v1392_v11 = vpop.permute.xlu1 %1391  }
 0x110   :  { %2370 = vst.msk [vmem:[%s4573_s1 + $0xdb] sm:$0xf] %vm804_vm5, %v1392_v11  }
 0x111   :  { %v1415_v12 = vpop.permute.xlu0 %1414  }
 0x112   :  { %1417 = vst.msk [vmem:[%s4573_s1] sm:$0x7f] %vm1416_vm6, %v1415_v12   ;;  %2375 = vst.msk [vmem:[%s4573_s1 + $0x1] sm:$0x80] %vm1416_vm6, %v1415_v12  }
 0x113   :  { %v1439_v13 = vpop.permute.xlu1 %1438  }
 0x114   :  { %2380 = vst.msk [vmem:[%s4573_s1 + $0x20] sm:$0x7f] %vm1416_vm6, %v1439_v13   ;;  %2381 = vst.msk [vmem:[%s4573_s1 + $0x21] sm:$0x80] %vm1416_vm6, %v1439_v13  }
 0x115   :  { %v1464_v14 = vpop.permute.xlu0 %1463  }
 0x116   :  { %2386 = vst.msk [vmem:[%s4573_s1 + $0x40] sm:$0x7f] %vm1416_vm6, %v1464_v14   ;;  %2387 = vst.msk [vmem:[%s4573_s1 + $0x41] sm:$0x80] %vm1416_vm6, %v1464_v14  }
 0x117   :  { %v1489_v15 = vpop.permute.xlu1 %1488  }
 0x118   :  { %2392 = vst.msk [vmem:[%s4573_s1 + $0x60] sm:$0x7f] %vm1416_vm6, %v1489_v15   ;;  %2393 = vst.msk [vmem:[%s4573_s1 + $0x61] sm:$0x80] %vm1416_vm6, %v1489_v15  }
 0x11a   :  { %v1514_v16 = vpop.permute.xlu0 %1513  }
 0x11b   :  { %2398 = vst.msk [vmem:[%s4573_s1 + $0x80] sm:$0x7f] %vm1416_vm6, %v1514_v16   ;;  %2399 = vst.msk [vmem:[%s4573_s1 + $0x81] sm:$0x80] %vm1416_vm6, %v1514_v16  }
 0x11e   :  { %v1539_v17 = vpop.permute.xlu1 %1538  }
 0x11f   :  { %2404 = vst.msk [vmem:[%s4573_s1 + $0xa0] sm:$0x7f] %vm1416_vm6, %v1539_v17   ;;  %2405 = vst.msk [vmem:[%s4573_s1 + $0xa1] sm:$0x80] %vm1416_vm6, %v1539_v17  }
 0x122   :  { %v1564_v18 = vpop.permute.xlu0 %1563   ;;  %v1589_v19 = vpop.permute.xlu1 %1588  }
 0x123   :  { %2410 = vst.msk [vmem:[%s4573_s1 + $0xc0] sm:$0x7f] %vm1416_vm6, %v1564_v18   ;;  %2411 = vst.msk [vmem:[%s4573_s1 + $0xc1] sm:$0x80] %vm1416_vm6, %v1564_v18  }
 0x124   :  { %2416 = vst.msk [vmem:[%s4573_s1 + $0x9] sm:$0x3f] %vm1416_vm6, %v1589_v19   ;;  %2417 = vst.msk [vmem:[%s4573_s1 + $0xa] sm:$0xc0] %vm1416_vm6, %v1589_v19  }
 0x126   :  { %v1614_v20 = vpop.permute.xlu0 %1613  }
 0x127   :  { %2422 = vst.msk [vmem:[%s4573_s1 + $0x29] sm:$0x3f] %vm1416_vm6, %v1614_v20   ;;  %2423 = vst.msk [vmem:[%s4573_s1 + $0x2a] sm:$0xc0] %vm1416_vm6, %v1614_v20   ;;  %v1639_v21 = vpop.permute.xlu1 %1638  }
 0x128   :  { %2428 = vst.msk [vmem:[%s4573_s1 + $0x49] sm:$0x3f] %vm1416_vm6, %v1639_v21   ;;  %2429 = vst.msk [vmem:[%s4573_s1 + $0x4a] sm:$0xc0] %vm1416_vm6, %v1639_v21  }
 0x12a   :  { %v1664_v22 = vpop.permute.xlu0 %1663  }
 0x12b   :  { %2434 = vst.msk [vmem:[%s4573_s1 + $0x69] sm:$0x3f] %vm1416_vm6, %v1664_v22   ;;  %2435 = vst.msk [vmem:[%s4573_s1 + $0x6a] sm:$0xc0] %vm1416_vm6, %v1664_v22  }
 0x12d   :  { %v1689_v23 = vpop.permute.xlu1 %1688  }
 0x12e   :  { %2440 = vst.msk [vmem:[%s4573_s1 + $0x89] sm:$0x3f] %vm1416_vm6, %v1689_v23   ;;  %2441 = vst.msk [vmem:[%s4573_s1 + $0x8a] sm:$0xc0] %vm1416_vm6, %v1689_v23  }
 0x130   :  { %v1714_v24 = vpop.permute.xlu0 %1713  }
 0x131   :  { %2446 = vst.msk [vmem:[%s4573_s1 + $0xa9] sm:$0x3f] %vm1416_vm6, %v1714_v24   ;;  %2447 = vst.msk [vmem:[%s4573_s1 + $0xaa] sm:$0xc0] %vm1416_vm6, %v1714_v24  }
 0x133   :  { %v1739_v25 = vpop.permute.xlu1 %1738  }
 0x134   :  { %2452 = vst.msk [vmem:[%s4573_s1 + $0xc9] sm:$0x3f] %vm1416_vm6, %v1739_v25   ;;  %2453 = vst.msk [vmem:[%s4573_s1 + $0xca] sm:$0xc0] %vm1416_vm6, %v1739_v25   ;;  %v1764_v26 = vpop.permute.xlu0 %1763  }
 0x135   :  { %2458 = vst.msk [vmem:[%s4573_s1 + $0x12] sm:$0x1f] %vm1416_vm6, %v1764_v26   ;;  %2459 = vst.msk [vmem:[%s4573_s1 + $0x13] sm:$0xe0] %vm1416_vm6, %v1764_v26  }
 0x137   :  { %v1789_v27 = vpop.permute.xlu1 %1788  }
 0x138   :  { %2464 = vst.msk [vmem:[%s4573_s1 + $0x32] sm:$0x1f] %vm1416_vm6, %v1789_v27   ;;  %2465 = vst.msk [vmem:[%s4573_s1 + $0x33] sm:$0xe0] %vm1416_vm6, %v1789_v27  }
 0x13a   :  { %v1814_v28 = vpop.permute.xlu0 %1813  }
 0x13b   :  { %2470 = vst.msk [vmem:[%s4573_s1 + $0x52] sm:$0x1f] %vm1416_vm6, %v1814_v28   ;;  %2471 = vst.msk [vmem:[%s4573_s1 + $0x53] sm:$0xe0] %vm1416_vm6, %v1814_v28  }
 0x13d   :  { %v1839_v29 = vpop.permute.xlu1 %1838  }
 0x13e   :  { %2476 = vst.msk [vmem:[%s4573_s1 + $0x72] sm:$0x1f] %vm1416_vm6, %v1839_v29   ;;  %2477 = vst.msk [vmem:[%s4573_s1 + $0x73] sm:$0xe0] %vm1416_vm6, %v1839_v29  }
 0x140   :  { %v1864_v30 = vpop.permute.xlu0 %1863  }
 0x141   :  { %2482 = vst.msk [vmem:[%s4573_s1 + $0x92] sm:$0x1f] %vm1416_vm6, %v1864_v30   ;;  %2483 = vst.msk [vmem:[%s4573_s1 + $0x93] sm:$0xe0] %vm1416_vm6, %v1864_v30  }
 0x143   :  { %v1889_v31 = vpop.permute.xlu1 %1888  }
 0x144   :  { %2488 = vst.msk [vmem:[%s4573_s1 + $0xb2] sm:$0x1f] %vm1416_vm6, %v1889_v31   ;;  %2489 = vst.msk [vmem:[%s4573_s1 + $0xb3] sm:$0xe0] %vm1416_vm6, %v1889_v31  }
 0x146   :  { %v1914_v32 = vpop.permute.xlu0 %1913  }
 0x147   :  { %2494 = vst.msk [vmem:[%s4573_s1 + $0xd2] sm:$0x1f] %vm1416_vm6, %v1914_v32   ;;  %2495 = vst.msk [vmem:[%s4573_s1 + $0xd3] sm:$0xe0] %vm1416_vm6, %v1914_v32  }
 0x148   :  { %v1939_v33 = vpop.permute.xlu1 %1938  }
 0x149   :  { %2500 = vst.msk [vmem:[%s4573_s1 + $0x1b] sm:$0xf] %vm1416_vm6, %v1939_v33   ;;  %2501 = vst.msk [vmem:[%s4573_s1 + $0x37] sm:$0xf0] %vm1416_vm6, %v1939_v33  }
 0x14c   :  { %v1964_v34 = vpop.permute.xlu0 %1963  }
 0x14d   :  { %2506 = vst.msk [vmem:[%s4573_s1 + $0x5b] sm:$0xf] %vm1416_vm6, %v1964_v34   ;;  %2507 = vst.msk [vmem:[%s4573_s1 + $0x77] sm:$0xf0] %vm1416_vm6, %v1964_v34  }
 0x150   :  { %v1989_v35 = vpop.permute.xlu1 %1988  }
 0x151   :  { %2512 = vst.msk [vmem:[%s4573_s1 + $0x9b] sm:$0xf] %vm1416_vm6, %v1989_v35   ;;  %2513 = vst.msk [vmem:[%s4573_s1 + $0xb7] sm:$0xf0] %vm1416_vm6, %v1989_v35  }
 0x152   :  { %v2004_v36 = vpop.permute.xlu0 %2003  }
 0x153   :  { %2516 = vst.msk [vmem:[%s4573_s1 + $0xdb] sm:$0xf] %vm1416_vm6, %v2004_v36  }

// kernel: mul.19
= control target key start
LH: loop header
LB: loop body
LE: loop exit
PB: predicated region body
PF: predicated region fallthrough
CT: control target
= control target key end

     0   :  { %vm32_vm0 = vcmask 1043458   ;;  %s101_s6 = smov 3  ;;  %vm37_vm1 = vcmask 1045508   ;;  %s104_s9 = smov 12  ;;  %vm42_vm2 = vcmask 1047558   ;;  %vm3_vm3 = vcmask 261120   ;;  %s639_s0 = inlined_call_operand.vmem [shape: f32[7,16,32], index: 0, kind: input, shape index: {}]   ;;  %s640_s1 = inlined_call_operand.vmem [shape: f32[7,512], index: 1, kind: output, shape index: {}]  }
   0x1   :  { %v313_v0 = vld [vmem:[%s639_s0 + $0x3f] ss:$16 sm:%s101_s6]   ;;  %s27_s10 = smov 3  ;;  %s30_s15 = smov 12  ;;  %v2_v8 = vld [vmem:[%s639_s0] ss:$4 sm:$0xff]  }
   0x2   :  { %v314_v1 = vld [vmem:[%s639_s0 + $0x3f] ss:$16 sm:%s104_s9]   ;;  %v296_v2 = vld [vmem:[%s639_s0 + $0x3] ss:$16 sm:%s27_s10]   ;;  %s35_s16 = smov 48  ;;  %s40_s21 = smov 192 }
   0x3   :  { %v107_v3 = vsel %vm32_vm0, %v314_v1, %v313_v0  ;;  %v297_v4 = vld [vmem:[%s639_s0 + $0x3] ss:$16 sm:%s30_s15]   ;;  %s76_s22 = smov 3  ;;  %s359_s23 = smov 96   ;;  %v288_v18 = vld [vmem:[%s639_s0 + $0x20] ss:$4 sm:$0xff]  }
   0x4   :  { %v298_v5 = vld [vmem:[%s639_s0 + $0x3] ss:$16 sm:%s35_s16]   ;;  %108 = vrot.lane.b32.xlu1 %v107_v3, %s359_s23  ;;  %v33_v6 = vsel %vm32_vm0, %v297_v4, %v296_v2  ;;  %s79_s26 = smov 12  ;;  %s84_s27 = smov 48  ;;  %v291_v24 = vld [vmem:[%s639_s0 + $0x40] ss:$4 sm:$0xff]  }
   0x5   :  { %v299_v7 = vld [vmem:[%s639_s0 + $0x28b] ss:$-92 sm:%s40_s21]   ;;  %v38_v9 = vsel %vm37_vm1, %v298_v5, %v33_v6  ;;  %s89_s5 = smov 192  ;;  %s51_s6 = smov 3  ;;  %vm46_vm4 = vcmask 1048320   ;;  %vm133_vm5 = vcmask 785920  }
   0x6   :  { %v307_v10 = vld [vmem:[%s639_s0 + $0x2b] ss:$16 sm:%s76_s22]   ;;  %4 = vst.msk [vmem:[%s640_s1] ss:$8 sm:$0xf] %vm3_vm3, %v2_v8   ;;  %v43_v12 = vsel %vm42_vm2, %v299_v7, %v38_v9  ;;  %s54_s15 = smov 12 }
   0x7   :  { %v308_v11 = vld [vmem:[%s639_s0 + $0x2b] ss:$16 sm:%s79_s26]   ;;  %287 = vst.msk [vmem:[%s640_s1 - $0x1f] ss:$8 sm:$0xf0] %vm3_vm3, %v2_v8   ;;  %s59_s16 = smov 48  ;;  %44 = vrot.lane.b32.xlu0 %v43_v12, %s359_s23 }
   0x8   :  { %v82_v13 = vsel %vm32_vm0, %v308_v11, %v307_v10  ;;  %v309_v14 = vld [vmem:[%s639_s0 + $0x1db] ss:$-92 sm:%s84_s27]   ;;  %s64_s19 = smov 192  ;;  %s138_s27 = smov 3  ;;  %vm220_vm6 = vcmask 523520  }
   0x9   :  { %v310_v15 = vld [vmem:[%s639_s0 - $0x41] ss:$16 sm:%s89_s5]   ;;  %v87_v16 = vsel %vm37_vm1, %v309_v14, %v82_v13  ;;  %v301_v17 = vld [vmem:[%s639_s0 + $0x17] ss:$16 sm:%s51_s6]   ;;  %s141_s28 = smov 12  ;;  %s146_s6 = smov 48 }
   0xa   :  { %v92_v19 = vsel %vm42_vm2, %v310_v15, %v87_v16  ;;  %v302_v20 = vld [vmem:[%s639_s0 + $0x17] ss:$16 sm:%s54_s15]   ;;  %289 = vst.msk [vmem:[%s640_s1 + $0x2] ss:$8 sm:$0xf] %vm3_vm3, %v288_v18   ;;  %s151_s7 = smov 192 }
   0xb   :  { %v303_v21 = vld [vmem:[%s639_s0 + $0x17] ss:$16 sm:%s59_s16]   ;;  %290 = vst.msk [vmem:[%s640_s1 - $0x1d] ss:$8 sm:$0xf0] %vm3_vm3, %v288_v18   ;;  %93 = vrot.lane.b32.xlu1 %v92_v19, %s359_s23  ;;  %v57_v22 = vsel %vm32_vm0, %v302_v20, %v301_v17  ;;  %s114_s14 = smov 3 }
   0xc   :  { %v304_v23 = vld [vmem:[%s639_s0 - $0x55] ss:$16 sm:%s64_s19]   ;;  %v62_v25 = vsel %vm37_vm1, %v303_v21, %v57_v22  ;;  %v321_v26 = vld [vmem:[%s639_s0 + $0x16] ss:$16 sm:%s138_s27]   ;;  %s117_s15 = smov 12  ;;  %s122_s25 = smov 48 }
   0xd   :  { %v322_v27 = vld [vmem:[%s639_s0 + $0x16] ss:$16 sm:%s141_s28]   ;;  %292 = vst.msk [vmem:[%s640_s1 + $0x4] ss:$8 sm:$0xf] %vm3_vm3, %v291_v24   ;;  %v67_v28 = vsel %vm42_vm2, %v304_v23, %v62_v25  ;;  %s127_s26 = smov 192 }
   0xe   :  { %293 = vst.msk [vmem:[%s640_s1 - $0x1b] ss:$8 sm:$0xf0] %vm3_vm3, %v291_v24   ;;  %v144_v29 = vsel %vm32_vm0, %v322_v27, %v321_v26  ;;  %v323_v30 = vld [vmem:[%s639_s0 + $0x16] ss:$16 sm:%s146_s6]   ;;  %68 = vrot.lane.b32.xlu0 %v67_v28, %s359_s23  ;;  %s188_s28 = smov 3 }
   0xf   :  { %v324_v31 = vld [vmem:[%s639_s0 - $0x56] ss:$16 sm:%s151_s7]   ;;  %v149_v32 = vsel %vm37_vm1, %v323_v30, %v144_v29  ;;  %v316_v33 = vld [vmem:[%s639_s0 + $0x2] ss:$16 sm:%s114_s14]   ;;  %s191_s29 = smov 12  ;;  %s163_s5 = smov 3 }
  0x10   :  { %v154_v34 = vsel %vm42_vm2, %v324_v31, %v149_v32  ;;  %v317_v35 = vld [vmem:[%s639_s0 + $0x2] ss:$16 sm:%s117_s15]   ;;  %s166_s6 = smov 12  ;;  %s360_s7 = smov 64   ;;  %v333_v40 = vld [vmem:[%s639_s0 + $0x3e] ss:$16 sm:%s188_s28]  }
  0x11   :  { %v318_v36 = vld [vmem:[%s639_s0 + $0x2] ss:$16 sm:%s122_s25]   ;;  %155 = vrot.lane.b32.xlu1 %v154_v34, %s360_s7  ;;  %v120_v37 = vsel %vm32_vm0, %v317_v35, %v316_v33  ;;  %s171_s10 = smov 48  ;;  %s176_s15 = smov 192 }
  0x12   :  { %v319_v38 = vld [vmem:[%s639_s0 + $0x28a] ss:$-92 sm:%s127_s26]   ;;  %v125_v39 = vsel %vm37_vm1, %v318_v36, %v120_v37  ;;  %s225_s20 = smov 3  ;;  %s228_s21 = smov 12 }
  0x13   :  { %v334_v41 = vld [vmem:[%s639_s0 + $0x3e] ss:$16 sm:%s191_s29]   ;;  %v130_v42 = vsel %vm42_vm2, %v319_v38, %v125_v39  ;;  %v327_v44 = vld [vmem:[%s639_s0 + $0x2a] ss:$16 sm:%s163_s5]   ;;  %s233_s25 = smov 48  ;;  %s238_s26 = smov 192 }
  0x14   :  { %v194_v43 = vsel %vm32_vm0, %v334_v41, %v333_v40  ;;  %v328_v45 = vld [vmem:[%s639_s0 + $0x2a] ss:$16 sm:%s166_s6]   ;;  %131 = vrot.lane.b32.xlu0 %v130_v42, %s360_s7  ;;  %s201_s28 = smov 3  ;;  %s204_s4 = smov 12 }
  0x15   :  { %v169_v46 = vsel %vm32_vm0, %v328_v45, %v327_v44  ;;  %v329_v47 = vld [vmem:[%s639_s0 + $0x1da] ss:$-92 sm:%s171_s10]   ;;  %195 = vrot.lane.b32.xlu1 %v194_v43, %s360_s7  ;;  %s209_s5 = smov 48  ;;  %s214_s11 = smov 192 }
  0x16   :  { %v174_v48 = vsel %vm37_vm1, %v329_v47, %v169_v46  ;;  %v330_v49 = vld [vmem:[%s639_s0 - $0x42] ss:$16 sm:%s176_s15]   ;;  %v341_v51 = vld [vmem:[%s639_s0 + $0x15] ss:$16 sm:%s225_s20]   ;;  %s275_s13 = smov 3  ;;  %s278_s14 = smov 12 }
  0x17   :  { %v179_v50 = vsel %vm42_vm2, %v330_v49, %v174_v48  ;;  %v342_v52 = vld [vmem:[%s639_s0 + $0x15] ss:$16 sm:%s228_s21]   ;;  %v344_v55 = vld [vmem:[%s639_s0 - $0x57] ss:$16 sm:%s238_s26]   ;;  %s250_s19 = smov 3  ;;  %s253_s20 = smov 12 }
  0x18   :  { %v231_v53 = vsel %vm32_vm0, %v342_v52, %v341_v51  ;;  %v343_v54 = vld [vmem:[%s639_s0 + $0x15] ss:$16 sm:%s233_s25]   ;;  %180 = vrot.lane.b32.xlu0 %v179_v50, %s360_s7  ;;  %s361_s21 = smov 32   ;;  %s258_s25 = smov 48 }
  0x19   :  { %v236_v56 = vsel %vm37_vm1, %v343_v54, %v231_v53  ;;  %v336_v57 = vld [vmem:[%s639_s0 + $0x1] ss:$16 sm:%s201_s28]   ;;  %v294_v63 = vld [vmem:[%s639_s0 + $0x60] ss:$4 sm:$0xf]   ;;  %s263_s2 = smov 192 }
  0x1a   :  { %v241_v58 = vsel %vm42_vm2, %v344_v55, %v236_v56  ;;  %v337_v59 = vld [vmem:[%s639_s0 + $0x1] ss:$16 sm:%s204_s4]   ;;  %v353_v1 = vld [vmem:[%s639_s0 + $0x3d] ss:$16 sm:%s275_s13]  }
  0x1b   :  { %v338_v60 = vld [vmem:[%s639_s0 + $0x1] ss:$16 sm:%s209_s5]   ;;  %242 = vrot.lane.b32.xlu1 %v241_v58, %s361_s21  ;;  %v207_v61 = vsel %vm32_vm0, %v337_v59, %v336_v57  ;;  %295 = vst.msk [vmem:[%s640_s1 + $0x6] ss:$8 sm:$0xf] %vm3_vm3, %v294_v63  }
  0x1c   :  { %v339_v62 = vld [vmem:[%s639_s0 + $0x289] ss:$-92 sm:%s214_s11]   ;;  %v212_v0 = vsel %vm37_vm1, %v338_v60, %v207_v61 }
  0x1d   :  { %v354_v2 = vld [vmem:[%s639_s0 + $0x3d] ss:$16 sm:%s278_s14]   ;;  %v217_v3 = vsel %vm42_vm2, %v339_v62, %v212_v0  ;;  %v347_v5 = vld [vmem:[%s639_s0 + $0x29] ss:$16 sm:%s250_s19]  }
  0x1e   :  { %v281_v4 = vsel %vm32_vm0, %v354_v2, %v353_v1  ;;  %v348_v6 = vld [vmem:[%s639_s0 + $0x29] ss:$16 sm:%s253_s20]   ;;  %218 = vrot.lane.b32.xlu0 %v217_v3, %s361_s21 }
  0x1f   :  { %v256_v7 = vsel %vm32_vm0, %v348_v6, %v347_v5  ;;  %v349_v8 = vld [vmem:[%s639_s0 + $0x1d9] ss:$-92 sm:%s258_s25]   ;;  %282 = vrot.lane.b32.xlu1 %v281_v4, %s361_s21 }
  0x20   :  { %v261_v9 = vsel %vm37_vm1, %v349_v8, %v256_v7  ;;  %v350_v10 = vld [vmem:[%s639_s0 - $0x43] ss:$16 sm:%s263_s2]  }
  0x21   :  { %v266_v11 = vsel %vm42_vm2, %v350_v10, %v261_v9 }
  0x22   :  { %267 = vrot.lane.b32.xlu0 %v266_v11, %s361_s21 }
  0x76   :  { %v109_v12 = vpop.permute.xlu1 %108  }
  0x77   :  { %315 = vst.msk [vmem:[%s640_s1 + $0x1b] sm:$0xf] %vm46_vm4, %v109_v12  }
  0x79   :  { %v45_v13 = vpop.permute.xlu0 %44  }
  0x7a   :  { %300 = vst.msk [vmem:[%s640_s1 + $0x1] sm:$0x80] %vm46_vm4, %v45_v13   ;;  %47 = vst.msk [vmem:[%s640_s1] sm:$0x7f] %vm46_vm4, %v45_v13  }
  0x7d   :  { %v94_v14 = vpop.permute.xlu1 %93  }
  0x7e   :  { %311 = vst.msk [vmem:[%s640_s1 + $0x12] sm:$0x1f] %vm46_vm4, %v94_v14   ;;  %312 = vst.msk [vmem:[%s640_s1 + $0x13] sm:$0xe0] %vm46_vm4, %v94_v14  }
  0x80   :  { %v69_v15 = vpop.permute.xlu0 %68  }
  0x81   :  { %306 = vst.msk [vmem:[%s640_s1 + $0xa] sm:$0xc0] %vm46_vm4, %v69_v15   ;;  %305 = vst.msk [vmem:[%s640_s1 + $0x9] sm:$0x3f] %vm46_vm4, %v69_v15  }
  0x83   :  { %v156_v16 = vpop.permute.xlu1 %155  }
  0x84   :  { %325 = vst.msk [vmem:[%s640_s1 + $0x9] sm:$0x3f] %vm133_vm5, %v156_v16   ;;  %326 = vst.msk [vmem:[%s640_s1 + $0xa] sm:$0xc0] %vm133_vm5, %v156_v16  }
  0x86   :  { %v132_v17 = vpop.permute.xlu0 %131  }
  0x87   :  { %134 = vst.msk [vmem:[%s640_s1] sm:$0x7f] %vm133_vm5, %v132_v17   ;;  %320 = vst.msk [vmem:[%s640_s1 + $0x1] sm:$0x80] %vm133_vm5, %v132_v17   ;;  %v196_v18 = vpop.permute.xlu1 %195  }
  0x88   :  { %335 = vst.msk [vmem:[%s640_s1 + $0x1b] sm:$0xf] %vm133_vm5, %v196_v18  }
  0x8a   :  { %v181_v19 = vpop.permute.xlu0 %180  }
  0x8b   :  { %331 = vst.msk [vmem:[%s640_s1 + $0x12] sm:$0x1f] %vm133_vm5, %v181_v19   ;;  %332 = vst.msk [vmem:[%s640_s1 + $0x13] sm:$0xe0] %vm133_vm5, %v181_v19  }
  0x8d   :  { %v243_v20 = vpop.permute.xlu1 %242  }
  0x8e   :  { %345 = vst.msk [vmem:[%s640_s1 + $0x9] sm:$0x3f] %vm220_vm6, %v243_v20   ;;  %346 = vst.msk [vmem:[%s640_s1 + $0xa] sm:$0xc0] %vm220_vm6, %v243_v20  }
  0x90   :  { %v219_v21 = vpop.permute.xlu0 %218  }
  0x91   :  { %221 = vst.msk [vmem:[%s640_s1] sm:$0x7f] %vm220_vm6, %v219_v21   ;;  %340 = vst.msk [vmem:[%s640_s1 + $0x1] sm:$0x80] %vm220_vm6, %v219_v21   ;;  %v283_v22 = vpop.permute.xlu1 %282  }
  0x92   :  { %355 = vst.msk [vmem:[%s640_s1 + $0x1b] sm:$0xf] %vm220_vm6, %v283_v22  }
  0x94   :  { %v268_v23 = vpop.permute.xlu0 %267  }
  0x95   :  { %351 = vst.msk [vmem:[%s640_s1 + $0x12] sm:$0x1f] %vm220_vm6, %v268_v23   ;;  %352 = vst.msk [vmem:[%s640_s1 + $0x13] sm:$0xe0] %vm220_vm6, %v268_v23  }

// kernel: _lambda_.1
= control target key start
LH: loop header
LB: loop body
LE: loop exit
PB: predicated region body
PF: predicated region fallthrough
CT: control target
= control target key end

     0   :  { %v7966_v0 = vlaneseq  ;;  %v4109_v7 = vmov 0.0   ;;  %s4152_s12 = smov 0   ;;  %s7962_s0 = inlined_call_operand.vmem [shape: f32[64,512], index: 0, kind: input, shape index: {}]   ;;  %s7963_s1 = inlined_call_operand.vmem [shape: f32[7,7,512], index: 1, kind: input, shape index: {}]   ;;  %s7964_s2 = inlined_call_operand.vmem [shape: bf16[512,512], index: 2, kind: input, shape index: {}]   ;;  %s7965_s3 = inlined_call_operand.vmem [shape: f32[64,512], index: 3, kind: output, shape index: {}]  }
   0x2   :  { %v4134_v1 = vshrl.u32 %v7966_v0, 7 }
   0x4   :  { %8215 = vst [vmem:[#allocation3_spill] sm:$0xff] %v4134_v1  ;;  %v16_v2 = vadd.s32 8, %v4134_v1  ;;  %v17_v3 = vadd.s32 4294967293, %v4134_v1  ;;  %v29_v4 = vadd.s32 4294967294, %v4134_v1  ;;  %v41_v5 = vadd.s32 4294967295, %v4134_v1 }
   0x6   :  { %vm19_vm0 = vcmp.ge.s32.totalorder %v17_v3, 0  ;;  %vm31_vm1 = vcmp.ge.s32.totalorder %v29_v4, 0  ;;  %vm43_vm2 = vcmp.ge.s32.totalorder %v41_v5, 0  ;;  %v54_v6 = vadd.s32 1, %v16_v2 }
   0x7   :  { %v4140_v8 = vsel %vm19_vm0, 1.0, %v4109_v7  ;;  %v4142_v9 = vsel %vm31_vm1, 1.0, %v4109_v7  ;;  %v4144_v10 = vsel %vm43_vm2, 1.0, %v4109_v7  ;;  %v66_v11 = vadd.s32 2, %v16_v2 }
   0x8   :  { %8216 = vst [vmem:[#allocation4_spill] sm:$0xff] %v4140_v8  ;;  %8217 = vst [vmem:[#allocation5_spill] sm:$0xff] %v4142_v9  ;;  %vm58_vm3 = vcmp.lt.s32.totalorder %v54_v6, 16  ;;  %v78_v12 = vadd.s32 3, %v16_v2 }
   0x9   :  { %8218 = vst [vmem:[#allocation6_spill] sm:$0xff] %v4144_v10  ;;  %v4146_v13 = vsel %vm58_vm3, 1.0, %v4109_v7  ;;  %vm70_vm4 = vcmp.lt.s32.totalorder %v66_v11, 16 }
   0xa   :  { %8219 = vst [vmem:[#allocation7_spill] sm:$0xff] %v4146_v13  ;;  %v4148_v14 = vsel %vm70_vm4, 1.0, %v4109_v7  ;;  %vm82_vm5 = vcmp.lt.s32.totalorder %v78_v12, 16 }
   0xb   :  { %8220 = vst [vmem:[#allocation8_spill] sm:$0xff] %v4148_v14  ;;  %v4150_v15 = vsel %vm82_vm5, 1.0, %v4109_v7 }
   0xc   :  { %8221 = vst [vmem:[#allocation9_spill] sm:$0xff] %v4150_v15 }
   0xd LB: > { %v8222_v1 = vld [vmem:[#allocation3_spill] sm:$0xff]  ;;  %s3699_s13 = sshll.u32 %s4107_s12, 4  ;;  %s4110_s19 = smov 96   ;;  %s4107_s12 = sphi %s4152_s12, %s94_s12  }
   0xe   : > { %s4158_s14 = sshra.s32 %s3699_s13, 3  ;;  %vm117_vm6 = vcmp.lt.s32.totalorder %v8222_v1, 3  ;;  %s4111_s20 = smov 64   ;;  %vm447_vm7 = vcmp.lt.s32.totalorder %v8222_v1, 2  ;;  %vm773_vm8 = vcmp.lt.s32.totalorder %v8222_v1, 1  ;;  %vm1400_vm9 = vcmp.lt.s32.totalorder %v8222_v1, 7 }
   0xf   : > { %v8225_v9 = vld [vmem:[#allocation5_spill] sm:$0xff]  ;;  %v8226_v8 = vld [vmem:[#allocation4_spill] sm:$0xff]  ;;  %s3855_s15 = sshll.u32 %s4158_s14, 5  ;;  %s4112_s21 = smov 32   ;;  %vm1726_vm13 = vcmp.lt.s32.totalorder %v8222_v1, 6 }
  0x10   : > { %v8224_v10 = vld [vmem:[#allocation6_spill] sm:$0xff]  ;;  %s4166_s18 = scalar_lea.vmem %s7962_s0, %s3855_s15  ;;  %s94_s12 = sadd.s32 1, %s4107_s12  }
  0x11   : > { %v8223_v13 = vld [vmem:[#allocation7_spill] sm:$0xff]  ;;  %v4169_v16 = vld [vmem:[%s4166_s18 + $0x8] sm:$0xff]  ;;  %v4185_v23 = vld [vmem:[%s4166_s18 + $0x10] sm:$0xff]  ;;  %p91_p0 = scmp.ge.s32.totalorder %s94_s12, 4  }
  0x12   : > { %v4172_v17 = vld [vmem:[%s4166_s18 + $0x28] sm:$0xff]  ;;  %v4176_v18 = vld [vmem:[%s4166_s18] sm:$0xff]  ;;  %v110_v19 = vrot.slane %v4169_v16, 5  ;;  %v4188_v24 = vld [vmem:[%s4166_s18 + $0x30] sm:$0xff]  ;;  %v111_v26 = vrot.slane %v4185_v23, 5  ;;  %v440_v47 = vrot.slane %v4169_v16, 6 }
  0x13   : > { %v114_v20 = vrot.slane %v4172_v17, 5  ;;  %v4181_v21 = vld [vmem:[%s4166_s18 + $0x20] sm:$0xff]  ;;  %v109_v22 = vrot.slane %v4176_v18, 5  ;;  %v115_v27 = vrot.slane %v4188_v24, 5  ;;  %v4194_v28 = vld [vmem:[%s4166_s18 + $0x18] sm:$0xff]  ;;  %v439_v44 = vrot.slane %v4176_v18, 6 }
  0x14   : > { %v113_v25 = vrot.slane %v4181_v21, 5  ;;  %v4197_v29 = vld [vmem:[%s4166_s18 + $0x38] sm:$0xff]  ;;  %v112_v35 = vrot.slane %v4194_v28, 5  ;;  %v443_v45 = vrot.slane %v4181_v21, 6  ;;  %v444_v48 = vrot.slane %v4172_v17, 6 }
  0x15   : > { %v4201_v30 = vsel %vm117_vm6, %v110_v19, %v114_v20  ;;  %v4215_v33 = vsel %vm117_vm6, %v111_v26, %v115_v27  ;;  %v116_v36 = vrot.slane %v4197_v29, 5  ;;  %v124_v37 = vsel %vm117_vm6, %v115_v27, %v111_v26 }
  0x16   : > { %144 = vrot.lane.b32.xlu1 %v4201_v30, %s4110_s19  ;;  %v4207_v31 = vsel %vm117_vm6, %v109_v22, %v113_v25  ;;  %v122_v32 = vsel %vm117_vm6, %v113_v25, %v109_v22  ;;  %v4233_v39 = vmul.f32 %v8226_v8, %v124_v37  ;;  %v123_v40 = vsel %vm117_vm6, %v114_v20, %v110_v19 }
  0x17   : > { %140 = vrot.lane.b32.xlu0 %v4207_v31, %s4110_s19  ;;  %v4218_v34 = vmul.f32 %v8226_v8, %v122_v32  ;;  %v4230_v38 = vsel %vm117_vm6, %v112_v35, %v116_v36  ;;  %v125_v41 = vsel %vm117_vm6, %v116_v36, %v112_v35  ;;  %v4242_v42 = vmul.f32 %v8226_v8, %v123_v40 }
  0x18   : > { %v4247_v43 = vmul.f32 %v8226_v8, %v125_v41  ;;  %v452_v46 = vsel %vm447_vm7, %v443_v45, %v439_v44  ;;  %v4294_v49 = vsel %vm447_vm7, %v439_v44, %v443_v45  ;;  %v453_v51 = vsel %vm447_vm7, %v444_v48, %v440_v47  ;;  %v4548_v8 = vld [vmem:[%s7963_s1 + $0x30] sm:$0x7f] }
  0x19   : > { %v4297_v50 = vmul.f32 %v8225_v9, %v452_v46  ;;  %v441_v52 = vrot.slane %v4185_v23, 6  ;;  %v445_v53 = vrot.slane %v4188_v24, 6  ;;  %v4309_v54 = vsel %vm447_vm7, %v440_v47, %v444_v48 }
  0x1a   : > { %148 = vrot.lane.b32.xlu1 %v4215_v33, %s4110_s19  ;;  %v4312_v55 = vmul.f32 %v8225_v9, %v453_v51  ;;  %v442_v57 = vrot.slane %v4194_v28, 6  ;;  %v446_v58 = vrot.slane %v4197_v29, 6  ;;  %v765_v2 = vrot.slane %v4176_v18, 7 }
  0x1b   : > { %138 = vrot.lane.b32.xlu0 %v4218_v34, %s4110_s19  ;;  %v454_v56 = vsel %vm447_vm7, %v445_v53, %v441_v52  ;;  %v4324_v59 = vsel %vm447_vm7, %v441_v52, %v445_v53  ;;  %v769_v3 = vrot.slane %v4181_v21, 7  ;;  %v766_v5 = vrot.slane %v4169_v16, 7 }
  0x1c   : > { %v4327_v60 = vmul.f32 %v8225_v9, %v454_v56  ;;  %v455_v61 = vsel %vm447_vm7, %v446_v58, %v442_v57  ;;  %v4337_v62 = vsel %vm447_vm7, %v442_v57, %v446_v58  ;;  %v770_v6 = vrot.slane %v4172_v17, 7 }
  0x1d   : > { %v4340_v63 = vmul.f32 %v8225_v9, %v455_v61  ;;  %v778_v4 = vsel %vm773_vm8, %v769_v3, %v765_v2  ;;  %v4387_v7 = vsel %vm773_vm8, %v765_v2, %v769_v3  ;;  %v767_v19 = vrot.slane %v4185_v23, 7  ;;  %v4485_v61 = vld [vmem:[%s7963_s1 + $0x8] sm:$0x7f]  ;;  %v4492_v2 = vld [vmem:[%s7963_s1] sm:$0x7f] }
  0x1e   : > { %152 = vrot.lane.b32.xlu1 %v4230_v38, %s4110_s19  ;;  %v4390_v11 = vmul.f32 %v8224_v10, %v778_v4  ;;  %v779_v12 = vsel %vm773_vm8, %v770_v6, %v766_v5  ;;  %v771_v20 = vrot.slane %v4188_v24, 7  ;;  %v4402_v22 = vsel %vm773_vm8, %v766_v5, %v770_v6  ;;  %v4497_v3 = vld [vmem:[%s7963_s1 + $0x10] sm:$0x7f]  ;;  %v4502_v4 = vld [vmem:[%s7963_s1 + $0x18] sm:$0x7f] }
  0x1f   : > { %146 = vrot.lane.b32.xlu0 %v4233_v39, %s4110_s19  ;;  %v4405_v25 = vmul.f32 %v8224_v10, %v779_v12  ;;  %v768_v27 = vrot.slane %v4194_v28, 7  ;;  %v772_v32 = vrot.slane %v4197_v29, 7  ;;  %v4476_v56 = vsub.s32 3, %v8222_v1  ;;  %v4517_v12 = vld [vmem:[%s7963_s1 + $0x20] sm:$0x7f] }
  0x20   : > { %8227 = vst [vmem:[#allocation10_spill] sm:$0xff] %v4390_v11  ;;  %v780_v26 = vsel %vm773_vm8, %v771_v20, %v767_v19  ;;  %v4417_v35 = vsel %vm773_vm8, %v767_v19, %v771_v20  ;;  %v4522_v19 = vld [vmem:[%s7963_s1 + $0x28] sm:$0x7f]  ;;  %v4525_v20 = vsub.s32 0, %v8222_v1  ;;  %v4553_v9 = vld [vmem:[%s7963_s1 + $0x38] sm:$0x7f] }
  0x21   : > { %8228 = vst [vmem:[#allocation11_spill] sm:$0xff] %v4405_v25  ;;  %v4420_v36 = vmul.f32 %v8224_v10, %v780_v26  ;;  %v781_v37 = vsel %vm773_vm8, %v772_v32, %v768_v27  ;;  %v4430_v40 = vsel %vm773_vm8, %v768_v27, %v772_v32  ;;  %8238 = vst [vmem:[#allocation21_spill] sm:$0xff] %v4476_v56 }
  0x22   : > { %142 = vrot.lane.b32.xlu1 %v4242_v42, %s4110_s19  ;;  %v4433_v41 = vmul.f32 %v8224_v10, %v781_v37  ;;  %v4508_v5 = vrot.slane %v4485_v61, %v4476_v56  ;;  %v4512_v6 = vrot.slane %v4492_v2, %v4476_v56  ;;  %8241 = vst [vmem:[#allocation24_spill] sm:$0xff] %v4525_v20  ;;  %v4558_v10 = vld [vmem:[%s7963_s1 + $0x40] sm:$0x7f] }
  0x23   : > { %150 = vrot.lane.b32.xlu0 %v4247_v43, %s4110_s19  ;;  %8229 = vst [vmem:[#allocation12_spill] sm:$0xff] %v4420_v36  ;;  %v4531_v27 = vrot.slane %v4497_v3, %v4476_v56  ;;  %v4535_v32 = vrot.slane %v4502_v4, %v4476_v56  ;;  %v4539_v37 = vrot.slane %v4517_v12, %v4476_v56  ;;  %8243 = vst [vmem:[#allocation26_spill] sm:$0xff] %v4558_v10 }
  0x24   : > { %8230 = vst [vmem:[#allocation13_spill] sm:$0xff] %v4433_v41  ;;  %v4543_v0 = vrot.slane %v4522_v19, %v4476_v56 }
  0x26   : > { %199 = vrot.lane.b32.xlu1 %v4207_v31, %s4111_s20 }
  0x27   : > { %197 = vrot.lane.b32.xlu0 %v4218_v34, %s4111_s20 }
  0x2a   : > { %203 = vrot.lane.b32.xlu1 %v4201_v30, %s4111_s20 }
  0x2b   : > { %201 = vrot.lane.b32.xlu0 %v4242_v42, %s4111_s20 }
  0x2e   : > { %207 = vrot.lane.b32.xlu1 %v4215_v33, %s4111_s20 }
  0x2f   : > { %205 = vrot.lane.b32.xlu0 %v4233_v39, %s4111_s20 }
  0x32   : > { %211 = vrot.lane.b32.xlu1 %v4230_v38, %s4111_s20 }
  0x33   : > { %209 = vrot.lane.b32.xlu0 %v4247_v43, %s4111_s20 }
  0x36   : > { %256 = vrot.lane.b32.xlu1 %v4207_v31, %s4112_s21 }
  0x37   : > { %254 = vrot.lane.b32.xlu0 %v4218_v34, %s4112_s21 }
  0x3a   : > { %260 = vrot.lane.b32.xlu1 %v4201_v30, %s4112_s21 }
  0x3b   : > { %258 = vrot.lane.b32.xlu0 %v4242_v42, %s4112_s21 }
  0x3e   : > { %264 = vrot.lane.b32.xlu1 %v4215_v33, %s4112_s21 }
  0x3f   : > { %262 = vrot.lane.b32.xlu0 %v4233_v39, %s4112_s21 }
  0x42   : > { %268 = vrot.lane.b32.xlu1 %v4230_v38, %s4112_s21 }
  0x43   : > { %266 = vrot.lane.b32.xlu0 %v4247_v43, %s4112_s21 }
  0x46   : > { %471 = vrot.lane.b32.xlu1 %v4294_v49, %s4110_s19 }
  0x47   : > { %469 = vrot.lane.b32.xlu0 %v4297_v50, %s4110_s19 }
  0x4a   : > { %475 = vrot.lane.b32.xlu1 %v4309_v54, %s4110_s19 }
  0x4b   : > { %473 = vrot.lane.b32.xlu0 %v4312_v55, %s4110_s19 }
  0x4e   : > { %479 = vrot.lane.b32.xlu1 %v4324_v59, %s4110_s19 }
  0x4f   : > { %477 = vrot.lane.b32.xlu0 %v4327_v60, %s4110_s19 }
  0x52   : > { %483 = vrot.lane.b32.xlu1 %v4337_v62, %s4110_s19 }
  0x53   : > { %481 = vrot.lane.b32.xlu0 %v4340_v63, %s4110_s19 }
  0x56   : > { %527 = vrot.lane.b32.xlu1 %v4294_v49, %s4111_s20 }
  0x57   : > { %525 = vrot.lane.b32.xlu0 %v4297_v50, %s4111_s20 }
  0x5a   : > { %531 = vrot.lane.b32.xlu1 %v4309_v54, %s4111_s20 }
  0x5b   : > { %529 = vrot.lane.b32.xlu0 %v4312_v55, %s4111_s20 }
  0x5e   : > { %535 = vrot.lane.b32.xlu1 %v4324_v59, %s4111_s20 }
  0x5f   : > { %533 = vrot.lane.b32.xlu0 %v4327_v60, %s4111_s20 }
  0x62   : > { %539 = vrot.lane.b32.xlu1 %v4337_v62, %s4111_s20 }
  0x63   : > { %537 = vrot.lane.b32.xlu0 %v4340_v63, %s4111_s20 }
  0x66   : > { %583 = vrot.lane.b32.xlu1 %v4294_v49, %s4112_s21 }
  0x67   : > { %581 = vrot.lane.b32.xlu0 %v4297_v50, %s4112_s21 }
  0x6a   : > { %587 = vrot.lane.b32.xlu1 %v4309_v54, %s4112_s21 }
  0x6b   : > { %585 = vrot.lane.b32.xlu0 %v4312_v55, %s4112_s21 }
  0x6e   : > { %591 = vrot.lane.b32.xlu1 %v4324_v59, %s4112_s21 }
  0x6f   : > { %589 = vrot.lane.b32.xlu0 %v4327_v60, %s4112_s21 }
  0x72   : > { %595 = vrot.lane.b32.xlu1 %v4337_v62, %s4112_s21 }
  0x73   : > { %593 = vrot.lane.b32.xlu0 %v4340_v63, %s4112_s21 }
  0x76   : > { %797 = vrot.lane.b32.xlu1 %v4387_v7, %s4110_s19 }
  0x77   : > { %795 = vrot.lane.b32.xlu0 %v4390_v11, %s4110_s19 }
  0x7a   : > { %801 = vrot.lane.b32.xlu1 %v4402_v22, %s4110_s19 }
  0x7b   : > { %799 = vrot.lane.b32.xlu0 %v4405_v25, %s4110_s19 }
  0x7e   : > { %805 = vrot.lane.b32.xlu1 %v4417_v35, %s4110_s19 }
  0x7f   : > { %803 = vrot.lane.b32.xlu0 %v4420_v36, %s4110_s19 }
  0x82   : > { %809 = vrot.lane.b32.xlu1 %v4430_v40, %s4110_s19 }
  0x83   : > { %807 = vrot.lane.b32.xlu0 %v4433_v41, %s4110_s19 }
  0x86   : > { %853 = vrot.lane.b32.xlu1 %v4387_v7, %s4111_s20 }
  0x87   : > { %851 = vrot.lane.b32.xlu0 %v4390_v11, %s4111_s20 }
  0x88   : > { %v4443_v44 = vpop.permute.xlu1 %144 }
  0x89   : > { %v4445_v45 = vpop.permute.xlu0 %140 }
  0x8a   : > { %8231 = vst [vmem:[#allocation14_spill] sm:$0xff] %v4445_v45  ;;  %857 = vrot.lane.b32.xlu1 %v4402_v22, %s4111_s20  ;;  %v4618_v45 = vrot.slane %v4485_v61, %v4525_v20 }
  0x8b   : > { %855 = vrot.lane.b32.xlu0 %v4405_v25, %s4111_s20 }
  0x8c   : > { %v4451_v46 = vpop.permute.xlu1 %148 }
  0x8d   : > { %8232 = vst [vmem:[#allocation15_spill] sm:$0xff] %v4451_v46  ;;  %v4453_v47 = vpop.permute.xlu0 %138  ;;  %v4614_v46 = vmul.f32 %v4512_v6, %v4207_v31  ;;  %v4635_v31 = vmul.f32 %v4539_v37, %v4294_v49  ;;  %v4655_v49 = vsub.s32 5, %v8222_v1 }
  0x8e   : > { %8233 = vst [vmem:[#allocation16_spill] sm:$0xff] %v4453_v47  ;;  %861 = vrot.lane.b32.xlu1 %v4417_v35, %s4111_s20  ;;  %v4587_v47 = vld [vmem:[%s7963_s1 + $0x58] sm:$0x7f] }
  0x8f   : > { %859 = vrot.lane.b32.xlu0 %v4420_v36, %s4111_s20  ;;  %8248 = vst [vmem:[#allocation31_spill] sm:$0xff] %v4587_v47  ;;  %8253 = vst [vmem:[#allocation35_spill] sm:$0xff] %v4614_v46  ;;  %v4639_v46 = vmul.f32 %v4543_v0, %v4309_v54 }
  0x90   : > { %v4459_v48 = vpop.permute.xlu1 %152  ;;  %8258 = vst [vmem:[#allocation40_spill] sm:$0xff] %v4635_v31  ;;  %8263 = vst [vmem:[#allocation45_spill] sm:$0xff] %v4655_v49 }
  0x91   : > { %8234 = vst [vmem:[#allocation17_spill] sm:$0xff] %v4459_v48  ;;  %v4461_v51 = vpop.permute.xlu0 %146  ;;  %v4610_v48 = vmul.f32 %v4508_v5, %v4201_v30  ;;  %v4631_v30 = vmul.f32 %v4535_v32, %v4230_v38  ;;  %8259 = vst [vmem:[#allocation41_spill] sm:$0xff] %v4639_v46  ;;  %v4652_v38 = vsub.s32 1, %v8222_v1 }
  0x92   : > { %8235 = vst [vmem:[#allocation18_spill] sm:$0xff] %v4461_v51  ;;  %865 = vrot.lane.b32.xlu1 %v4430_v40, %s4111_s20  ;;  %v4572_v51 = vrot.slane %v4558_v10, %v4476_v56 }
  0x93   : > { %863 = vrot.lane.b32.xlu0 %v4433_v41, %s4111_s20  ;;  %8252 = vst [vmem:[#allocation34_spill] sm:$0xff] %v4610_v48  ;;  %8257 = vst [vmem:[#allocation39_spill] sm:$0xff] %v4631_v30  ;;  %v4725_v46 = vrot.slane %v4497_v3, %v4652_v38  ;;  %v4735_v30 = vrot.slane %v4492_v2, %v4652_v38 }
  0x94   : > { %v4467_v52 = vpop.permute.xlu1 %142  ;;  %8245 = vst [vmem:[#allocation28_spill] sm:$0xff] %v4572_v51  ;;  %8262 = vst [vmem:[#allocation44_spill] sm:$0xff] %v4652_v38  ;;  %v4661_v54 = vmul.f32 %v4572_v51, %v4387_v7  ;;  %v4721_v51 = vrot.slane %v4492_v2, %v4655_v49 }
  0x95   : > { %8236 = vst [vmem:[#allocation19_spill] sm:$0xff] %v4467_v52  ;;  %v4469_v53 = vpop.permute.xlu0 %150  ;;  %8273 = vst [vmem:[#allocation55_spill] sm:$0xff] %v4725_v46 }
  0x96   : > { %8237 = vst [vmem:[#allocation20_spill] sm:$0xff] %v4469_v53  ;;  %909 = vrot.lane.b32.xlu1 %v4387_v7, %s4112_s21  ;;  %v4568_v53 = vrot.slane %v4553_v9, %v4476_v56  ;;  %8264 = vst [vmem:[#allocation46_spill] sm:$0xff] %v4661_v54  ;;  %v4683_v7 = vrot.slane %v4497_v3, %v4525_v20  ;;  %v4691_v54 = vsub.s32 6, %v8222_v1 }
  0x97   : > { %907 = vrot.lane.b32.xlu0 %v4390_v11, %s4112_s21  ;;  %v4564_v11 = vrot.slane %v4548_v8, %v4476_v56  ;;  %8272 = vst [vmem:[#allocation54_spill] sm:$0xff] %v4721_v51  ;;  %8275 = vst [vmem:[#allocation57_spill] sm:$0xff] %v4735_v30 }
  0x98   : > { %v4478_v57 = vpop.permute.xlu1 %199  ;;  %8270 = vst [vmem:[#allocation52_spill] sm:$0xff] %v4691_v54 }
  0x99   : > { %8239 = vst [vmem:[#allocation22_spill] sm:$0xff] %v4478_v57  ;;  %v4480_v58 = vpop.permute.xlu0 %197  ;;  %v4577_v57 = vld [vmem:[%s7963_s1 + $0x48] sm:$0x7f] }
  0x9a   : > { %8240 = vst [vmem:[#allocation23_spill] sm:$0xff] %v4480_v58  ;;  %913 = vrot.lane.b32.xlu1 %v4402_v22, %s4112_s21  ;;  %8246 = vst [vmem:[#allocation29_spill] sm:$0xff] %v4577_v57  ;;  %v4593_v52 = vrot.slane %v4577_v57, %v4476_v56  ;;  %v4601_v58 = vrot.slane %v4587_v47, %v4476_v56 }
  0x9b   : > { %911 = vrot.lane.b32.xlu0 %v4405_v25, %s4112_s21 }
  0x9c   : > { %v4527_v26 = vpop.permute.xlu1 %203  ;;  %8250 = vst [vmem:[#allocation33_spill] sm:$0xff] %v4601_v58  ;;  %v4673_v31 = vmul.f32 %v4601_v58, %v4430_v40 }
  0x9d   : > { %8242 = vst [vmem:[#allocation25_spill] sm:$0xff] %v4527_v26  ;;  %v4560_v15 = vpop.permute.xlu0 %201  ;;  %v4582_v26 = vld [vmem:[%s7963_s1 + $0x50] sm:$0x7f] }
  0x9e   : > { %8244 = vst [vmem:[#allocation27_spill] sm:$0xff] %v4560_v15  ;;  %8247 = vst [vmem:[#allocation30_spill] sm:$0xff] %v4582_v26  ;;  %917 = vrot.lane.b32.xlu1 %v4417_v35, %s4112_s21  ;;  %v4597_v25 = vrot.slane %v4582_v26, %v4476_v56  ;;  %v8251_v15 = vlaneseq  ;;  %v4621_v56 = vsub.s32 4, %v8222_v1 }
  0x9f   : > { %915 = vrot.lane.b32.xlu0 %v4420_v36, %s4112_s21  ;;  %v4627_v36 = vmul.f32 %v4531_v27, %v4215_v33  ;;  %v4649_v33 = vmul.f32 %v4568_v53, %v4337_v62  ;;  %8267 = vst [vmem:[#allocation49_spill] sm:$0xff] %v4673_v31  ;;  %v4699_v31 = vrot.slane %v4492_v2, %v4525_v20 }
  0xa0   : > { %8249 = vst [vmem:[#allocation32_spill] sm:$0xff] %v4597_v25  ;;  %v4604_v14 = vand.u32 127, %v8251_v15  ;;  %8254 = vst [vmem:[#allocation36_spill] sm:$0xff] %v4621_v56  ;;  %v4623_v15 = vpop.permute.xlu1 %207  ;;  %v4669_v62 = vmul.f32 %v4597_v25, %v4417_v35  ;;  %v4688_v35 = vsub.s32 2, %v8222_v1  ;;  %v4713_v58 = vrot.slane %v4502_v4, %v4621_v56 }
  0xa1   : > { %8255 = vst [vmem:[#allocation37_spill] sm:$0xff] %v4623_v15  ;;  %8256 = vst [vmem:[#allocation38_spill] sm:$0xff] %v4627_v36  ;;  %v4641_v48 = vpop.permute.xlu0 %205  ;;  %v4645_v15 = vmul.f32 %v4564_v11, %v4324_v59  ;;  %v4665_v59 = vmul.f32 %v4593_v52, %v4402_v22  ;;  %v4731_v25 = vrot.slane %v4485_v61, %v4655_v49 }
  0xa2   : > { %8261 = vst [vmem:[#allocation43_spill] sm:$0xff] %v4649_v33  ;;  %921 = vrot.lane.b32.xlu1 %v4430_v40, %s4112_s21  ;;  %8266 = vst [vmem:[#allocation48_spill] sm:$0xff] %v4669_v62  ;;  %v4679_v33 = vrot.slane %v4492_v2, %v4621_v56  ;;  %v4695_v40 = vrot.slane %v4485_v61, %v4621_v56  ;;  %v4703_v62 = vrot.slane %v4502_v4, %v4525_v20 }
  0xa3   : > { %8260 = vst [vmem:[#allocation42_spill] sm:$0xff] %v4645_v15  ;;  %8265 = vst [vmem:[#allocation47_spill] sm:$0xff] %v4665_v59  ;;  %919 = vrot.lane.b32.xlu0 %v4433_v41, %s4112_s21  ;;  %v4707_v59 = vrot.slane %v4497_v3, %v4621_v56  ;;  %v4717_v41 = vrot.slane %v4485_v61, %v4652_v38  ;;  %v4739_v36 = vrot.slane %v4502_v4, %v4652_v38 }
  0xa4   : > { %v4685_v22 = vpop.permute.xlu1 %211  ;;  %8269 = vst [vmem:[#allocation51_spill] sm:$0xff] %v4688_v35  ;;  %8274 = vst [vmem:[#allocation56_spill] sm:$0xff] %v4731_v25  ;;  %v4755_v30 = vrot.slane %v4485_v61, %v4688_v35  ;;  %v4769_v46 = vrot.slane %v4497_v3, %v4688_v35  ;;  %vm156_vm10 = vcmp.lt.s32.totalorder %v4604_v14, 96  ;;  %vm213_vm11 = vcmp.lt.s32.totalorder %v4604_v14, 64 }
  0xa5   : > { %8268 = vst [vmem:[#allocation50_spill] sm:$0xff] %v4685_v22  ;;  %v4709_v15 = vpop.permute.xlu0 %209  ;;  %8276 = vst [vmem:[#allocation58_spill] sm:$0xff] %v4739_v36  ;;  %v4749_v22 = vrot.slane %v4502_v4, %v4655_v49  ;;  %v4759_v36 = vrot.slane %v4492_v2, %v4691_v54  ;;  %vm270_vm12 = vcmp.lt.s32.totalorder %v4604_v14, 32 }
  0xa6   : > { %8271 = vst [vmem:[#allocation53_spill] sm:$0xff] %v4709_v15  ;;  %1098 = vrot.lane.b32.xlu1 %v4181_v21, %s4110_s19  ;;  %v4743_v15 = vrot.slane %v4497_v3, %v4655_v49  ;;  %8280 = vst [vmem:[#allocation62_spill] sm:$0xff] %v4755_v30  ;;  %v4777_v30 = vmul.f32 %v4531_v27, %v4233_v39  ;;  %v4799_v39 = vmul.f32 %v4512_v6, %v4218_v34 }
  0xa7   : > { %1096 = vrot.lane.b32.xlu0 %v4176_v18, %s4110_s19  ;;  %8278 = vst [vmem:[#allocation60_spill] sm:$0xff] %v4749_v22  ;;  %8281 = vst [vmem:[#allocation63_spill] sm:$0xff] %v4759_v36  ;;  %v4773_v22 = vrot.slane %v4485_v61, %v4691_v54  ;;  %v4781_v36 = vrot.slane %v4492_v2, %v4688_v35  ;;  %v4795_v61 = vrot.slane %v4502_v4, %v4691_v54 }
  0xa8   : > { %8277 = vst [vmem:[#allocation59_spill] sm:$0xff] %v4743_v15  ;;  %v4751_v25 = vpop.permute.xlu1 %256  ;;  %v4763_v15 = vmul.f32 %v4508_v5, %v4242_v42  ;;  %8283 = vst [vmem:[#allocation65_spill] sm:$0xff] %v4769_v46  ;;  %v4787_v42 = vrot.slane %v4502_v4, %v4688_v35  ;;  %v4791_v5 = vrot.slane %v4497_v3, %v4691_v54  ;;  %v1392_v3 = vrot.slane %v4176_v18, 1 }
  0xa9   : > { %8279 = vst [vmem:[#allocation61_spill] sm:$0xff] %v4751_v25  ;;  %v4765_v51 = vpop.permute.xlu0 %254  ;;  %8284 = vst [vmem:[#allocation66_spill] sm:$0xff] %v4773_v22  ;;  %v4805_v2 = vmul.f32 %v4535_v32, %v4247_v43  ;;  %v4809_v27 = vrot.slane %v4522_v19, %v4525_v20  ;;  %v1396_v4 = vrot.slane %v4181_v21, 1  ;;  %v4817_v34 = vrot.slane %v4517_v12, %v4621_v56 }
  0xaa   : > { %8282 = vst [vmem:[#allocation64_spill] sm:$0xff] %v4763_v15  ;;  %8285 = vst [vmem:[#allocation67_spill] sm:$0xff] %v4777_v30  ;;  %1102 = vrot.lane.b32.xlu1 %v4172_v17, %s4110_s19  ;;  %v1393_v6 = vrot.slane %v4169_v16, 1  ;;  %v1397_v43 = vrot.slane %v4172_v17, 1  ;;  %v4842_v22 = vrot.slane %v4553_v9, %v4525_v20  ;;  %v4854_v30 = vrot.slane %v4553_v9, %v4621_v56 }
  0xab   : > { %8286 = vst [vmem:[#allocation68_spill] sm:$0xff] %v4781_v36  ;;  %8287 = vst [vmem:[#allocation69_spill] sm:$0xff] %v4787_v42  ;;  %1100 = vrot.lane.b32.xlu0 %v4169_v16, %s4110_s19  ;;  %v1399_v36 = vrot.slane %v4197_v29, 1  ;;  %v4866_v15 = vrot.slane %v4517_v12, %v4655_v49 }
  0xac   : > { %8288 = vst [vmem:[#allocation70_spill] sm:$0xff] %v4791_v5  ;;  %8289 = vst [vmem:[#allocation71_spill] sm:$0xff] %v4795_v61  ;;  %v4813_v61 = vpop.permute.xlu1 %260  ;;  %v4830_v5 = vrot.slane %v4522_v19, %v4621_v56 }
  0xad   : > { %8290 = vst [vmem:[#allocation72_spill] sm:$0xff] %v4799_v39  ;;  %8291 = vst [vmem:[#allocation73_spill] sm:$0xff] %v4805_v2  ;;  %v4822_v32 = vpop.permute.xlu0 %258  ;;  %v4826_v2 = vrot.slane %v4548_v8, %v4525_v20  ;;  %v4838_v39 = vrot.slane %v4517_v12, %v4525_v20 }
  0xae   : > { %8292 = vst [vmem:[#allocation74_spill] sm:$0xff] %v4809_v27  ;;  %8293 = vst [vmem:[#allocation75_spill] sm:$0xff] %v4813_v61  ;;  %v1394_v27 = vrot.slane %v4185_v23, 1  ;;  %1106 = vrot.lane.b32.xlu1 %v4188_v24, %s4110_s19  ;;  %v4917_v61 = vsel %vm1400_vm9, %v1393_v6, %v1397_v43 }
  0xaf   : > { %8294 = vst [vmem:[#allocation76_spill] sm:$0xff] %v4817_v34  ;;  %8295 = vst [vmem:[#allocation77_spill] sm:$0xff] %v4826_v2  ;;  %v1398_v34 = vrot.slane %v4188_v24, 1  ;;  %v1395_v2 = vrot.slane %v4194_v28, 1  ;;  %1104 = vrot.lane.b32.xlu0 %v4185_v23, %s4110_s19 }
  0xb0   : > { %8296 = vst [vmem:[#allocation78_spill] sm:$0xff] %v4830_v5  ;;  %8297 = vst [vmem:[#allocation79_spill] sm:$0xff] %v4838_v39  ;;  %v4850_v5 = vrot.slane %v4548_v8, %v4621_v56  ;;  %v4858_v39 = vrot.slane %v4522_v19, %v4652_v38  ;;  %v4862_v42 = vpop.permute.xlu1 %264 }
  0xb1   : > { %8298 = vst [vmem:[#allocation80_spill] sm:$0xff] %v4842_v22  ;;  %8300 = vst [vmem:[#allocation82_spill] sm:$0xff] %v4854_v30  ;;  %v1405_v22 = vsel %vm1400_vm9, %v1396_v4, %v1392_v3  ;;  %v4874_v30 = vrot.slane %v4522_v19, %v4655_v49  ;;  %v4879_v46 = vpop.permute.xlu0 %262 }
  0xb2   : > { %8299 = vst [vmem:[#allocation81_spill] sm:$0xff] %v4850_v5  ;;  %8301 = vst [vmem:[#allocation83_spill] sm:$0xff] %v4858_v39  ;;  %v4870_v5 = vrot.slane %v4548_v8, %v4652_v38  ;;  %v1406_v39 = vsel %vm1400_vm9, %v1397_v43, %v1393_v6  ;;  %1110 = vrot.lane.b32.xlu1 %v4197_v29, %s4110_s19  ;;  %v4938_v6 = vsel %vm1400_vm9, %v1394_v27, %v1398_v34 }
  0xb3   : > { %8302 = vst [vmem:[#allocation84_spill] sm:$0xff] %v4862_v42  ;;  %8303 = vst [vmem:[#allocation85_spill] sm:$0xff] %v4866_v15  ;;  %v4883_v42 = vrot.slane %v4517_v12, %v4652_v38  ;;  %v4887_v15 = vrot.slane %v4553_v9, %v4652_v38  ;;  %1108 = vrot.lane.b32.xlu0 %v4194_v28, %s4110_s19  ;;  %v4913_v25 = vmul.f32 %v8223_v13, %v1406_v39 }
  0xb4   : > { %8304 = vst [vmem:[#allocation86_spill] sm:$0xff] %v4870_v5  ;;  %8305 = vst [vmem:[#allocation87_spill] sm:$0xff] %v4874_v30  ;;  %v4891_v5 = vrot.slane %v4548_v8, %v4655_v49  ;;  %v1407_v30 = vsel %vm1400_vm9, %v1398_v34, %v1394_v27  ;;  %v4942_v43 = vrot.slane %v4548_v8, %v4688_v35 }
  0xb5   : > { %8306 = vst [vmem:[#allocation88_spill] sm:$0xff] %v4879_v46  ;;  %8307 = vst [vmem:[#allocation89_spill] sm:$0xff] %v4883_v42  ;;  %v4899_v46 = vrot.slane %v4553_v9, %v4655_v49  ;;  %v4902_v42 = vmul.f32 %v8223_v13, %v1405_v22  ;;  %v4921_v22 = vrot.slane %v4522_v19, %v4688_v35 }
  0xb6   : > { %8308 = vst [vmem:[#allocation90_spill] sm:$0xff] %v4887_v15  ;;  %8309 = vst [vmem:[#allocation91_spill] sm:$0xff] %v4891_v5  ;;  %v4906_v15 = vsel %vm1400_vm9, %v1392_v3, %v1396_v4  ;;  %v1408_v5 = vsel %vm1400_vm9, %v1399_v36, %v1395_v2  ;;  %v4925_v3 = vrot.slane %v4517_v12, %v4691_v54  ;;  %v4927_v4 = vpop.permute.xlu1 %268  ;;  %1154 = vrot.lane.b32.xlu1 %v4181_v21, %s4111_s20 }
  0xb7   : > { %8310 = vst [vmem:[#allocation92_spill] sm:$0xff] %v4899_v46  ;;  %8311 = vst [vmem:[#allocation93_spill] sm:$0xff] %v4902_v42  ;;  %v4931_v46 = vmul.f32 %v4543_v0, %v4312_v55  ;;  %v4934_v39 = vmul.f32 %v8223_v13, %v1407_v30  ;;  %v4952_v0 = vmul.f32 %v4564_v11, %v4327_v60  ;;  %1152 = vrot.lane.b32.xlu0 %v4176_v18, %s4111_s20 }
  0xb8   : > { %8312 = vst [vmem:[#allocation94_spill] sm:$0xff] %v4906_v15  ;;  %8313 = vst [vmem:[#allocation95_spill] sm:$0xff] %v4913_v25  ;;  %v4955_v55 = vmul.f32 %v8223_v13, %v1408_v5  ;;  %v4959_v30 = vsel %vm1400_vm9, %v1395_v2, %v1399_v36  ;;  %v4965_v27 = vrot.slane %v4517_v12, %v4688_v35  ;;  %v1719_v13 = vrot.slane %v4169_v16, 2 }
  0xb9   : > { %8314 = vst [vmem:[#allocation96_spill] sm:$0xff] %v4917_v61  ;;  %8315 = vst [vmem:[#allocation97_spill] sm:$0xff] %v4921_v22  ;;  %v4944_v22 = vpop.permute.xlu0 %266  ;;  %v4973_v60 = vrot.slane %v4548_v8, %v4691_v54  ;;  %v4977_v11 = vrot.slane %v4553_v9, %v4691_v54  ;;  %v4984_v36 = vmul.f32 %v4539_v37, %v4297_v50 }
  0xba   : > { %8316 = vst [vmem:[#allocation98_spill] sm:$0xff] %v4925_v3  ;;  %8317 = vst [vmem:[#allocation99_spill] sm:$0xff] %v4931_v46  ;;  %v4948_v3 = vrot.slane %v4522_v19, %v4691_v54  ;;  %v4969_v19 = vrot.slane %v4553_v9, %v4688_v35  ;;  %v4988_v12 = vmul.f32 %v4568_v53, %v4340_v63  ;;  %v4998_v5 = vpop.permute.xlu1 %471  ;;  %v1718_v63 = vrot.slane %v4176_v18, 2 }
  0xbb   : > { %8318 = vst [vmem:[#allocation100_spill] sm:$0xff] %v4934_v39  ;;  %8319 = vst [vmem:[#allocation101_spill] sm:$0xff] %v4938_v6  ;;  %v4992_v8 = vrot.slane %v4577_v57, %v4525_v20  ;;  %v4996_v9 = vrot.slane %v4558_v10, %v4621_v56  ;;  %v5002_v2 = vrot.slane %v4582_v26, %v4525_v20  ;;  %v1722_v53 = vrot.slane %v4181_v21, 2 }
  0xbc   : > { %8320 = vst [vmem:[#allocation102_spill] sm:$0xff] %v4942_v43  ;;  %8321 = vst [vmem:[#allocation103_spill] sm:$0xff] %v4948_v3  ;;  %v5006_v50 = vrot.slane %v4577_v57, %v4621_v56  ;;  %v5015_v34 = vrot.slane %v4558_v10, %v4525_v20  ;;  %1158 = vrot.lane.b32.xlu1 %v4172_v17, %s4111_s20  ;;  %1156 = vrot.lane.b32.xlu0 %v4169_v16, %s4111_s20  ;;  %v8349_v3 = vld [vmem:[#allocation15_spill] sm:$0xff] }
  0xbd   : > { %8322 = vst [vmem:[#allocation104_spill] sm:$0xff] %v4952_v0  ;;  %8323 = vst [vmem:[#allocation105_spill] sm:$0xff] %v4955_v55  ;;  %v5011_v37 = vpop.permute.xlu0 %469  ;;  %v8370_v0 = vld [vmem:[#allocation22_spill] sm:$0xff]  ;;  %v5189_v46 = vsel %vm270_vm12, %v4765_v51, %v4822_v32  ;;  %v8375_v55 = vld [vmem:[#allocation75_spill] sm:$0xff] }
  0xbe   : > { %8324 = vst [vmem:[#allocation106_spill] sm:$0xff] %v4959_v30  ;;  %8325 = vst [vmem:[#allocation107_spill] sm:$0xff] %v4965_v27 }
  0xbf   : > { %8326 = vst [vmem:[#allocation108_spill] sm:$0xff] %v4969_v19  ;;  %8327 = vst [vmem:[#allocation109_spill] sm:$0xff] %v4973_v60  ;;  %v5060_v60 = vpop.permute.xlu1 %475 }
  0xc0   : > { %8328 = vst [vmem:[#allocation110_spill] sm:$0xff] %v4977_v11  ;;  %8329 = vst [vmem:[#allocation111_spill] sm:$0xff] %v4984_v36  ;;  %v5042_v11 = vrot.slane %v4558_v10, %v4655_v49  ;;  %1162 = vrot.lane.b32.xlu1 %v4188_v24, %s4111_s20  ;;  %1160 = vrot.lane.b32.xlu0 %v4185_v23, %s4111_s20 }
  0xc1   : > { %8330 = vst [vmem:[#allocation112_spill] sm:$0xff] %v4988_v12  ;;  %8331 = vst [vmem:[#allocation113_spill] sm:$0xff] %v4992_v8  ;;  %v5036_v8 = vrot.slane %v4577_v57, %v4652_v38  ;;  %v5080_v12 = vrot.slane %v4587_v47, %v4655_v49 }
  0xc2   : > { %8332 = vst [vmem:[#allocation114_spill] sm:$0xff] %v4996_v9  ;;  %8333 = vst [vmem:[#allocation115_spill] sm:$0xff] %v4998_v5  ;;  %v5028_v9 = vrot.slane %v4582_v26, %v4621_v56 }
  0xc3   : > { %8334 = vst [vmem:[#allocation116_spill] sm:$0xff] %v5002_v2  ;;  %8335 = vst [vmem:[#allocation117_spill] sm:$0xff] %v5006_v50  ;;  %v1723_v2 = vrot.slane %v4172_v17, 2  ;;  %v5024_v50 = vrot.slane %v4587_v47, %v4525_v20  ;;  %v5076_v20 = vpop.permute.xlu0 %473  ;;  %v5119_v19 = vpop.permute.xlu1 %479 }
  0xc4   : > { %8336 = vst [vmem:[#allocation118_spill] sm:$0xff] %v5015_v34  ;;  %8338 = vst [vmem:[#allocation120_spill] sm:$0xff] %v5028_v9  ;;  %v5032_v34 = vrot.slane %v4587_v47, %v4621_v56  ;;  %v5050_v9 = vrot.slane %v4577_v57, %v4655_v49  ;;  %v5054_v56 = vrot.slane %v4558_v10, %v4652_v38  ;;  %1166 = vrot.lane.b32.xlu1 %v4197_v29, %s4111_s20 }
  0xc5   : > { %8337 = vst [vmem:[#allocation119_spill] sm:$0xff] %v5024_v50  ;;  %8340 = vst [vmem:[#allocation122_spill] sm:$0xff] %v5036_v8  ;;  %v5046_v50 = vrot.slane %v4582_v26, %v4652_v38  ;;  %1164 = vrot.lane.b32.xlu0 %v4194_v28, %s4111_s20 }
  0xc6   : > { %8339 = vst [vmem:[#allocation121_spill] sm:$0xff] %v5032_v34  ;;  %8341 = vst [vmem:[#allocation123_spill] sm:$0xff] %v5042_v11  ;;  %v8345_v34 = vld [vmem:[#allocation14_spill] sm:$0xff]  ;;  %v5064_v11 = vrot.slane %v4587_v47, %v4652_v38  ;;  %v5084_v38 = vsel %vm1726_vm13, %v1718_v63, %v1722_v53 }
  0xc7   : > { %8342 = vst [vmem:[#allocation124_spill] sm:$0xff] %v5046_v50  ;;  %8343 = vst [vmem:[#allocation125_spill] sm:$0xff] %v5050_v9  ;;  %v162_v8 = vsel %vm156_vm10, %v8345_v34, %v4443_v44  ;;  %v5068_v50 = vrot.slane %v4582_v26, %v4655_v49  ;;  %v1731_v9 = vsel %vm1726_vm13, %v1722_v53, %v1718_v63  ;;  %v1720_v49 = vrot.slane %v4185_v23, 2 }
  0xc8   : > { %8344 = vst [vmem:[#allocation126_spill] sm:$0xff] %v5054_v56  ;;  %8346 = vst [vmem:[#allocation14_spill] sm:$0xff] %v5060_v60  ;;  %v160_v56 = vsel %vm156_vm10, %v4443_v44, %v8349_v3  ;;  %v1724_v63 = vrot.slane %v4188_v24, 2  ;;  %v186_v53 = vmul.f32 %v4618_v45, %v162_v8  ;;  %1210 = vrot.lane.b32.xlu1 %v4181_v21, %s4112_s21 }
  0xc9   : > { %8347 = vst [vmem:[#allocation127_spill] sm:$0xff] %v5064_v11  ;;  %8348 = vst [vmem:[#allocation128_spill] sm:$0xff] %v5068_v50  ;;  %v1732_v50 = vsel %vm1726_vm13, %v1723_v2, %v1719_v13  ;;  %v8352_v11 = vld [vmem:[#allocation17_spill] sm:$0xff]  ;;  %v5117_v47 = vmul.f32 %v4695_v40, %v160_v56  ;;  %1208 = vrot.lane.b32.xlu0 %v4176_v18, %s4112_s21 }
  0xca   : > { %8350 = vst [vmem:[#allocation15_spill] sm:$0xff] %v5080_v12  ;;  %8351 = vst [vmem:[#allocation129_spill] sm:$0xff] %v5084_v38  ;;  %v158_v36 = vsel %vm156_vm10, %v8349_v3, %v8352_v11  ;;  %v164_v44 = vsel %vm156_vm10, %v8352_v11, %v8345_v34  ;;  %v5102_v12 = vmul.f32 %v4679_v33, %v162_v8  ;;  %v8354_v3 = vld [vmem:[#allocation8_spill] sm:$0xff] }
  0xcb   : > { %v5107_v38 = vmul.f32 %v8354_v3, %v1731_v9  ;;  %v5111_v11 = vrot.slane %v4577_v57, %v4688_v35  ;;  %v5114_v34 = vmul.f32 %v4683_v7, %v160_v56  ;;  %8357 = vst [vmem:[#allocation132_spill] sm:$0xff] %v5119_v19  ;;  %v5123_v8 = vsel %vm1726_vm13, %v1719_v13, %v1723_v2  ;;  %v5138_v56 = vpop.permute.xlu0 %477  ;;  %v8362_v2 = vld [vmem:[#allocation27_spill] sm:$0xff]  ;;  %v8379_v19 = vld [vmem:[#allocation88_spill] sm:$0xff] }
  0xcc   : > { %8353 = vst [vmem:[#allocation17_spill] sm:$0xff] %v5102_v12  ;;  %8358 = vst [vmem:[#allocation133_spill] sm:$0xff] %v5123_v8  ;;  %v5127_v9 = vrot.slane %v4558_v10, %v4691_v54  ;;  %v5136_v57 = vmul.f32 %v4707_v59, %v158_v36  ;;  %v5141_v27 = vmul.f32 %v8354_v3, %v1732_v50  ;;  %v8363_v8 = vld [vmem:[#allocation23_spill] sm:$0xff]  ;;  %v8369_v3 = vld [vmem:[#allocation25_spill] sm:$0xff]  ;;  %1214 = vrot.lane.b32.xlu1 %v4172_v17, %s4112_s21 }
  0xcd   : > { %8355 = vst [vmem:[#allocation130_spill] sm:$0xff] %v5107_v38  ;;  %8356 = vst [vmem:[#allocation131_spill] sm:$0xff] %v5111_v11  ;;  %v5130_v38 = vmul.f32 %v4699_v31, %v164_v44  ;;  %v5133_v11 = vmul.f32 %v4703_v62, %v158_v36  ;;  %v5144_v13 = vmul.f32 %v4713_v58, %v164_v44  ;;  %v8364_v10 = vld [vmem:[#allocation11_spill] sm:$0xff]  ;;  %1212 = vrot.lane.b32.xlu0 %v4169_v16, %s4112_s21 }
  0xce   : > { %8359 = vst [vmem:[#allocation134_spill] sm:$0xff] %v5127_v9  ;;  %8360 = vst [vmem:[#allocation135_spill] sm:$0xff] %v5141_v27  ;;  %v218_v9 = vsel %vm213_vm11, %v8363_v8, %v8362_v2  ;;  %v5154_v36 = vmul.f32 %v4593_v52, %v8364_v10  ;;  %v5158_v54 = vsel %vm1726_vm13, %v1724_v63, %v1720_v49  ;;  %v8367_v50 = vld [vmem:[#allocation19_spill] sm:$0xff]  ;;  %v8368_v27 = vld [vmem:[#allocation16_spill] sm:$0xff] }
  0xcf   : > { %8361 = vst [vmem:[#allocation136_spill] sm:$0xff] %v5144_v13  ;;  %8366 = vst [vmem:[#allocation23_spill] sm:$0xff] %v5158_v54  ;;  %v161_v44 = vsel %vm156_vm10, %v8368_v27, %v8367_v50  ;;  %v219_v30 = vsel %vm213_vm11, %v8370_v0, %v8369_v3  ;;  %v5172_v10 = vsel %vm1726_vm13, %v1720_v49, %v1724_v63  ;;  %v5191_v49 = vpop.permute.xlu1 %483  ;;  %v8374_v52 = vld [vmem:[#allocation20_spill] sm:$0xff]  ;;  %v5205_v6 = vpop.permute.xlu0 %481 }
  0xd0   : > { %8365 = vst [vmem:[#allocation27_spill] sm:$0xff] %v5154_v36  ;;  %8371 = vst [vmem:[#allocation11_spill] sm:$0xff] %v5172_v10  ;;  %v8372_v36 = vld [vmem:[#allocation18_spill] sm:$0xff]  ;;  %v5183_v43 = vsel %vm213_vm11, %v8362_v2, %v4641_v48  ;;  %v239_v10 = vmul.f32 %v4717_v41, %v218_v9  ;;  %v8376_v2 = vld [vmem:[#allocation61_spill] sm:$0xff]  ;;  %v182_v63 = vmul.f32 %v4618_v45, %v161_v44  ;;  %1218 = vrot.lane.b32.xlu1 %v4188_v24, %s4112_s21 }
  0xd1   : > { %v159_v54 = vsel %vm156_vm10, %v8367_v50, %v8372_v36  ;;  %8373 = vst [vmem:[#allocation19_spill] sm:$0xff] %v5191_v49  ;;  %v163_v50 = vsel %vm156_vm10, %v8374_v52, %v8368_v27  ;;  %v5203_v12 = vsel %vm270_vm12, %v8376_v2, %v8375_v55  ;;  %8377 = vst [vmem:[#allocation16_spill] sm:$0xff] %v5205_v6  ;;  %1216 = vrot.lane.b32.xlu0 %v4185_v23, %s4112_s21 }
  0xd2   : > { %v5209_v49 = vrot.slane %v4582_v26, %v4688_v35  ;;  %v157_v27 = vsel %vm156_vm10, %v8372_v36, %v8374_v52  ;;  %v243_v39 = vmul.f32 %v4717_v41, %v219_v30  ;;  %v5221_v5 = vsel %vm270_vm12, %v4822_v32, %v8379_v19  ;;  %v8381_v26 = vld [vmem:[#allocation55_spill] sm:$0xff]  ;;  %v8382_v36 = vld [vmem:[#allocation62_spill] sm:$0xff] }
  0xd3   : > { %v5227_v45 = vmul.f32 %v4679_v33, %v161_v44  ;;  %v240_v35 = vmul.f32 %v8381_v26, %v5183_v43  ;;  %v296_v41 = vmul.f32 %v8382_v36, %v5189_v46  ;;  %v360_v32 = vmul.f32 %v4695_v40, %v159_v54 }
  0xd4   : > { %8378 = vst [vmem:[#allocation25_spill] sm:$0xff] %v5209_v49  ;;  %v183_v49 = vmul.f32 %v4683_v7, %v159_v54  ;;  %v181_v52 = vmul.f32 %v4699_v31, %v163_v50  ;;  %v300_v21 = vmul.f32 %v8382_v36, %v5203_v12  ;;  %v5239_v7 = vpop.permute.xlu1 %527  ;;  %v8384_v33 = vrot.slane %v4194_v28, 2  ;;  %v8388_v54 = vld [vmem:[#allocation65_spill] sm:$0xff]  ;;  %v5256_v36 = vpop.permute.xlu0 %525  ;;  %1222 = vrot.lane.b32.xlu1 %v4197_v29, %s4112_s21 }
  0xd5   : > { %8380 = vst [vmem:[#allocation22_spill] sm:$0xff] %v5227_v45  ;;  %8383 = vst [vmem:[#allocation18_spill] sm:$0xff] %v5239_v7  ;;  %v8385_v44 = vrot.slane %v4197_v29, 2  ;;  %v184_v60 = vmul.f32 %v4703_v62, %v157_v27  ;;  %v247_v18 = vadd.f32 %v239_v10, %v182_v63  ;;  %v8387_v45 = vld [vmem:[#allocation37_spill] sm:$0xff]  ;;  %v297_v40 = vmul.f32 %v8388_v54, %v5221_v5  ;;  %v8390_v10 = vld [vmem:[#allocation50_spill] sm:$0xff] }
  0xd6   : > { %v217_v31 = vsel %vm213_vm11, %v8369_v3, %v8387_v45  ;;  %v361_v7 = vmul.f32 %v4707_v59, %v157_v27  ;;  %v5260_v13 = vmul.f32 %v4713_v58, %v163_v50  ;;  %v248_v62 = vadd.f32 %v240_v35, %v183_v49  ;;  %v8392_v35 = vld [vmem:[#allocation53_spill] sm:$0xff]  ;;  %v8394_v27 = vld [vmem:[#allocation58_spill] sm:$0xff]  ;;  %1220 = vrot.lane.b32.xlu0 %v4194_v28, %s4112_s21 }
  0xd7   : > { %v5247_v6 = vsel %vm1726_vm13, %v8385_v44, %v8384_v33  ;;  %v251_v33 = vadd.f32 %v243_v39, %v186_v53  ;;  %v8389_v44 = vld [vmem:[#allocation54_spill] sm:$0xff]  ;;  %v215_v3 = vsel %vm213_vm11, %v8387_v45, %v8390_v10  ;;  %v304_v63 = vadd.f32 %v296_v41, %v247_v18  ;;  %v8395_v41 = vld [vmem:[#allocation57_spill] sm:$0xff]  ;;  %v8396_v18 = vld [vmem:[#allocation64_spill] sm:$0xff] }
  0xd8   : > { %8386 = vst [vmem:[#allocation20_spill] sm:$0xff] %v5247_v6  ;;  %v5263_v1 = vmul.f32 %v8389_v44, %v219_v30  ;;  %v8391_v6 = vld [vmem:[#allocation84_spill] sm:$0xff]  ;;  %v244_v59 = vmul.f32 %v8381_v26, %v217_v31  ;;  %v221_v17 = vsel %vm213_vm11, %v8390_v10, %v8370_v0  ;;  %v220_v39 = vsel %vm213_vm11, %v8392_v35, %v8363_v8  ;;  %v5286_v53 = vpop.permute.xlu1 %531  ;;  %v5301_v49 = vpop.permute.xlu0 %529 }
  0xd9   : > { %v274_v58 = vsel %vm270_vm12, %v8375_v55, %v8391_v6  ;;  %v308_v30 = vadd.f32 %v300_v21, %v251_v33  ;;  %v5289_v55 = vmul.f32 %v8389_v44, %v218_v9  ;;  %v214_v16 = vsel %vm213_vm11, %v4641_v48, %v8392_v35  ;;  %v8393_v8 = vld [vmem:[#allocation56_spill] sm:$0xff]  ;;  %v8397_v33 = vld [vmem:[#allocation34_spill] sm:$0xff]  ;;  %v8398_v44 = vld [vmem:[#allocation69_spill] sm:$0xff]  ;;  %1424 = vrot.lane.b32.xlu1 %v4902_v42, %s4110_s19 }
  0xda   : > { %v305_v26 = vadd.f32 %v297_v40, %v248_v62  ;;  %v5299_v0 = vsel %vm270_vm12, %v8391_v6, %v4927_v4  ;;  %v396_v50 = vmul.f32 %v8393_v8, %v217_v31  ;;  %v245_v45 = vmul.f32 %v8394_v27, %v215_v3  ;;  %v8399_v35 = vld [vmem:[#allocation67_spill] sm:$0xff]  ;;  %1422 = vrot.lane.b32.xlu0 %v4906_v15, %s4110_s19 }
  0xdb   : > { %v301_v9 = vmul.f32 %v8388_v54, %v274_v58  ;;  %v5310_v48 = vsel %vm270_vm12, %v4944_v22, %v4765_v51  ;;  %v242_v6 = vmul.f32 %v8395_v41, %v221_v17  ;;  %v238_v21 = vmul.f32 %v8395_v41, %v220_v39 }
  0xdc   : > { %v336_v40 = vadd.f32 %v8396_v18, %v304_v63  ;;  %v271_v31 = vsel %vm270_vm12, %v8379_v19, %v4944_v22  ;;  %v252_v51 = vadd.f32 %v244_v59, %v5114_v34  ;;  %v241_v54 = vmul.f32 %v8394_v27, %v214_v16  ;;  %v5328_v10 = vpop.permute.xlu1 %535  ;;  %v8400_v22 = vld [vmem:[#allocation68_spill] sm:$0xff]  ;;  %v5339_v34 = vpop.permute.xlu0 %533 }
  0xdd   : > { %v340_v24 = vadd.f32 %v8397_v33, %v308_v30  ;;  %v302_v62 = vmul.f32 %v8398_v44, %v5299_v0  ;;  %v392_v63 = vmul.f32 %v8393_v8, %v5183_v43  ;;  %v337_v41 = vadd.f32 %v8399_v35, %v305_v26  ;;  %v8401_v30 = vld [vmem:[#allocation59_spill] sm:$0xff]  ;;  %v8402_v8 = vld [vmem:[#allocation60_spill] sm:$0xff]  ;;  %1428 = vrot.lane.b32.xlu1 %v4913_v25, %s4110_s19 }
  0xde   : > { %v278_v23 = vsel %vm270_vm12, %v4927_v4, %v8376_v2  ;;  %v295_v19 = vmul.f32 %v8400_v22, %v5310_v48  ;;  %v253_v59 = vadd.f32 %v245_v45, %v5133_v11  ;;  %v5343_v27 = vmul.f32 %v8401_v30, %v215_v3  ;;  %1426 = vrot.lane.b32.xlu0 %v4917_v61, %s4110_s19 }
  0xdf   : > { %v309_v18 = vadd.f32 %v301_v9, %v252_v51  ;;  %v298_v43 = vmul.f32 %v8398_v44, %v271_v31  ;;  %v250_v26 = vadd.f32 %v242_v6, %v5130_v38  ;;  %v5350_v4 = vmul.f32 %v8402_v8, %v221_v17 }
  0xe0   : > { %v246_v2 = vadd.f32 %v238_v21, %v181_v52  ;;  %v368_v33 = vadd.f32 %v360_v32, %v336_v40  ;;  %v249_v11 = vadd.f32 %v241_v54, %v184_v60  ;;  %v372_v3 = vadd.f32 %v5117_v47, %v340_v24  ;;  %v5356_v51 = vpop.permute.xlu1 %539  ;;  %v5362_v52 = vpop.permute.xlu0 %537  ;;  %v8403_v32 = vld [vmem:[#allocation63_spill] sm:$0xff]  ;;  %v8404_v60 = vld [vmem:[#allocation38_spill] sm:$0xff] }
  0xe1   : > { %v299_v45 = vmul.f32 %v8400_v22, %v278_v23  ;;  %v310_v9 = vadd.f32 %v302_v62, %v253_v59  ;;  %v393_v44 = vmul.f32 %v8401_v30, %v214_v16  ;;  %v5360_v38 = vmul.f32 %v8402_v8, %v220_v39  ;;  %v8405_v39 = vld [vmem:[#allocation66_spill] sm:$0xff] }
  0xe2   : > { %v369_v17 = vadd.f32 %v361_v7, %v337_v41  ;;  %v303_v6 = vadd.f32 %v295_v19, %v246_v2  ;;  %v5366_v21 = vmul.f32 %v8403_v32, %v5203_v12  ;;  %v341_v47 = vadd.f32 %v8404_v60, %v309_v18  ;;  %v8406_v41 = vld [vmem:[#allocation39_spill] sm:$0xff]  ;;  %v8418_v60 = vld [vmem:[#allocation77_spill] sm:$0xff] }
  0xe3   : > { %v306_v40 = vadd.f32 %v298_v43, %v249_v11  ;;  %v5373_v54 = vsel %vm156_vm10, %v5011_v37, %v5076_v20  ;;  %v5379_v7 = vmul.f32 %v8403_v32, %v5189_v46  ;;  %v428_v16 = vmul.f32 %v8405_v39, %v274_v58  ;;  %v8412_v2 = vld [vmem:[#allocation71_spill] sm:$0xff]  ;;  %v8413_v11 = vld [vmem:[#allocation73_spill] sm:$0xff] }
  0xe4   : > { %v400_v12 = vadd.f32 %v392_v63, %v368_v33  ;;  %v424_v24 = vmul.f32 %v8405_v39, %v5221_v5  ;;  %v404_v62 = vadd.f32 %v396_v50, %v372_v3  ;;  %v307_v35 = vadd.f32 %v299_v45, %v250_v26  ;;  %v5393_v46 = vpop.permute.xlu1 %583  ;;  %v8408_v63 = vld [vmem:[#allocation72_spill] sm:$0xff]  ;;  %v8409_v5 = vld [vmem:[#allocation74_spill] sm:$0xff]  ;;  %v5404_v18 = vpop.permute.xlu0 %581 }
  0xe5   : > { %v342_v22 = vadd.f32 %v8406_v41, %v310_v9  ;;  %v5391_v19 = vsel %vm213_vm11, %v5256_v36, %v5301_v49  ;;  %v401_v58 = vadd.f32 %v393_v44, %v369_v17  ;;  %v335_v59 = vadd.f32 %v8408_v63, %v303_v6  ;;  %v8411_v26 = vld [vmem:[#allocation70_spill] sm:$0xff]  ;;  %v8417_v6 = vld [vmem:[#allocation136_spill] sm:$0xff]  ;;  %v8421_v41 = vld [vmem:[#allocation115_spill] sm:$0xff] }
  0xe6   : > { %8407 = vst [vmem:[#allocation75_spill] sm:$0xff] %v5391_v19  ;;  %v510_v30 = vmul.f32 %v8409_v5, %v5373_v54  ;;  %v5402_v50 = vsel %vm156_vm10, %v5076_v20, %v5138_v56  ;;  %v373_v43 = vadd.f32 %v5136_v57, %v341_v47  ;;  %v429_v8 = vmul.f32 %v8411_v26, %v5299_v0  ;;  %v8414_v20 = vld [vmem:[#allocation83_spill] sm:$0xff] }
  0xe7   : > { %8410 = vst [vmem:[#allocation61_spill] sm:$0xff] %v5402_v50  ;;  %v430_v33 = vmul.f32 %v8412_v2, %v278_v23  ;;  %v338_v3 = vadd.f32 %v8413_v11, %v306_v40  ;;  %v432_v45 = vadd.f32 %v424_v24, %v400_v12  ;;  %v425_v9 = vmul.f32 %v8411_v26, %v271_v31  ;;  %v8416_v23 = vld [vmem:[#allocation35_spill] sm:$0xff]  ;;  %v8419_v40 = vld [vmem:[#allocation22_spill] sm:$0xff]  ;;  %v8425_v11 = vld [vmem:[#allocation100_spill] sm:$0xff] }
  0xe8   : > { %v566_v44 = vmul.f32 %v8414_v20, %v5391_v19  ;;  %v5420_v57 = vsel %vm213_vm11, %v5301_v49, %v5339_v34  ;;  %v436_v0 = vadd.f32 %v428_v16, %v404_v62  ;;  %v339_v17 = vadd.f32 %v8416_v23, %v307_v35  ;;  %v5428_v47 = vpop.permute.xlu1 %587  ;;  %v8420_v24 = vld [vmem:[#allocation14_spill] sm:$0xff]  ;;  %v586_v16 = vpop.permute.xlu0 %585  ;;  %v8422_v35 = vld [vmem:[#allocation132_spill] sm:$0xff]  ;;  %1432 = vrot.lane.b32.xlu1 %v8425_v11, %s4110_s19  ;;  %v8427_v23 = vld [vmem:[#allocation101_spill] sm:$0xff] }
  0xe9   : > { %8415 = vst [vmem:[#allocation88_spill] sm:$0xff] %v5420_v57  ;;  %v374_v32 = vadd.f32 %v8417_v6, %v342_v22  ;;  %v511_v31 = vmul.f32 %v8418_v60, %v5402_v50  ;;  %v367_v39 = vadd.f32 %v8419_v40, %v335_v59  ;;  %v433_v12 = vadd.f32 %v425_v9, %v401_v58  ;;  %v8423_v26 = vld [vmem:[#allocation86_spill] sm:$0xff]  ;;  %v8428_v6 = vld [vmem:[#allocation17_spill] sm:$0xff] }
  0xea   : > { %v5435_v49 = vsel %vm156_vm10, %v8421_v41, %v8420_v24  ;;  %v518_v63 = vadd.f32 %v510_v30, %v432_v45  ;;  %v370_v62 = vadd.f32 %v5260_v13, %v338_v3  ;;  %v5442_v22 = vsel %vm156_vm10, %v8420_v24, %v8422_v35  ;;  %v8426_v45 = vld [vmem:[#allocation97_spill] sm:$0xff]  ;;  %1430 = vrot.lane.b32.xlu0 %v8427_v23, %s4110_s19 }
  0xeb   : > { %v567_v59 = vmul.f32 %v8423_v26, %v5420_v57  ;;  %v5449_v58 = vsel %vm270_vm12, %v5404_v18, %v586_v16  ;;  %v405_v30 = vadd.f32 %v5343_v27, %v373_v43  ;;  %v426_v13 = vmul.f32 %v8412_v2, %v5310_v48  ;;  %v8429_v48 = vld [vmem:[#allocation16_spill] sm:$0xff] }
  0xec   : > { %8424 = vst [vmem:[#allocation55_spill] sm:$0xff] %v5449_v58  ;;  %v574_v3 = vadd.f32 %v566_v44, %v518_v63  ;;  %v622_v9 = vmul.f32 %v8426_v45, %v5449_v58  ;;  %v371_v40 = vadd.f32 %v8428_v6, %v339_v17  ;;  %v406_v24 = vadd.f32 %v5350_v4, %v374_v32  ;;  %v592_v50 = vpop.permute.xlu1 %591  ;;  %v590_v44 = vpop.permute.xlu0 %589 }
  0xed   : > { %v514_v57 = vmul.f32 %v8409_v5, %v5435_v49  ;;  %v519_v19 = vadd.f32 %v511_v31, %v433_v12  ;;  %v515_v27 = vmul.f32 %v8418_v60, %v5442_v22  ;;  %v5470_v43 = vsel %vm156_vm10, %v5138_v56, %v8429_v48  ;;  %v8432_v56 = vld [vmem:[#allocation105_spill] sm:$0xff]  ;;  %v8435_v31 = vld [vmem:[#allocation102_spill] sm:$0xff] }
  0xee   : > { %v5476_v2 = vsel %vm156_vm10, %v8429_v48, %v5011_v37  ;;  %v630_v4 = vadd.f32 %v622_v9, %v574_v3  ;;  %v402_v5 = vadd.f32 %v5360_v38, %v370_v62  ;;  %v399_v17 = vadd.f32 %v5289_v55, %v367_v39  ;;  %1436 = vrot.lane.b32.xlu1 %v8432_v56, %s4110_s19  ;;  %v8433_v55 = vld [vmem:[#allocation99_spill] sm:$0xff]  ;;  %v8436_v12 = vld [vmem:[#allocation106_spill] sm:$0xff] }
  0xef   : > { %8430 = vst [vmem:[#allocation62_spill] sm:$0xff] %v5476_v2  ;;  %v575_v32 = vadd.f32 %v567_v59, %v519_v19  ;;  %v5482_v60 = vsel %vm270_vm12, %v586_v16, %v590_v44  ;;  %v5490_v37 = vsel %vm213_vm11, %v5339_v34, %v5362_v52  ;;  %v5496_v38 = vsel %vm213_vm11, %v5362_v52, %v5256_v36  ;;  %v8437_v16 = vld [vmem:[#allocation19_spill] sm:$0xff]  ;;  %v8439_v52 = vld [vmem:[#allocation80_spill] sm:$0xff]  ;;  %v8440_v48 = vld [vmem:[#allocation18_spill] sm:$0xff] }
  0xf0   : > { %8431 = vst [vmem:[#allocation37_spill] sm:$0xff] %v5482_v60  ;;  %v5499_v19 = vadd.f32 %v8433_v55, %v630_v4  ;;  %v623_v39 = vmul.f32 %v8435_v31, %v5482_v60  ;;  %1434 = vrot.lane.b32.xlu0 %v8436_v12, %s4110_s19  ;;  %v437_v63 = vadd.f32 %v429_v8, %v405_v30  ;;  %v8438_v62 = vld [vmem:[#allocation79_spill] sm:$0xff]  ;;  %v596_v3 = vpop.permute.xlu1 %595  ;;  %v594_v4 = vpop.permute.xlu0 %593  ;;  %v8441_v60 = vld [vmem:[#allocation89_spill] sm:$0xff] }
  0xf1   : > { %v5509_v34 = vsel %vm156_vm10, %v8422_v35, %v8437_v16  ;;  %v509_v36 = vmul.f32 %v8438_v62, %v5476_v2  ;;  %v512_v59 = vmul.f32 %v8439_v52, %v5470_v43  ;;  %v438_v9 = vadd.f32 %v430_v33, %v406_v24  ;;  %v8443_v24 = vld [vmem:[#allocation104_spill] sm:$0xff] }
  0xf2   : > { %8434 = vst [vmem:[#allocation65_spill] sm:$0xff] %v5499_v19  ;;  %v403_v6 = vadd.f32 %v5263_v1, %v371_v40  ;;  %v5520_v8 = vsel %vm213_vm11, %v8440_v48, %v5286_v53  ;;  %v631_v30 = vadd.f32 %v623_v39, %v575_v32  ;;  %v434_v35 = vadd.f32 %v426_v13, %v402_v5  ;;  %v8442_v19 = vld [vmem:[#allocation90_spill] sm:$0xff] }
  0xf3   : > { %v431_v55 = vadd.f32 %v5379_v7, %v399_v17  ;;  %v565_v58 = vmul.f32 %v8441_v60, %v5496_v38  ;;  %v568_v2 = vmul.f32 %v8442_v19, %v5490_v37  ;;  %1480 = vrot.lane.b32.xlu1 %v4902_v42, %s4111_s20  ;;  %v522_v1 = vadd.f32 %v514_v57, %v436_v0 }
  0xf4   : > { %v523_v33 = vadd.f32 %v515_v27, %v437_v63  ;;  %v516_v40 = vmul.f32 %v8439_v52, %v5509_v34  ;;  %v5532_v32 = vadd.f32 %v8443_v24, %v631_v30  ;;  %1478 = vrot.lane.b32.xlu0 %v4906_v15, %s4111_s20  ;;  %v520_v13 = vadd.f32 %v512_v59, %v434_v35  ;;  %v5544_v0 = vpop.permute.xlu1 %797  ;;  %v5567_v63 = vpop.permute.xlu0 %795  ;;  %v8444_v52 = vld [vmem:[#allocation107_spill] sm:$0xff] }
  0xf5   : > { %v517_v7 = vadd.f32 %v509_v36, %v431_v55  ;;  %v570_v5 = vmul.f32 %v8414_v20, %v5520_v8  ;;  %v5542_v57 = vsel %vm270_vm12, %v5393_v46, %v5428_v47  ;;  %v5550_v27 = vsel %vm213_vm11, %v5286_v53, %v5328_v10 }
  0xf6   : > { %v5556_v17 = vsel %vm213_vm11, %v5328_v10, %v5356_v51  ;;  %v5560_v20 = vsel %vm270_vm12, %v590_v44, %v594_v4  ;;  %v5565_v39 = vsel %vm270_vm12, %v594_v4, %v5404_v18  ;;  %v5573_v53 = vsel %vm156_vm10, %v8437_v16, %v8421_v41 }
  0xf7   : > { %v573_v36 = vadd.f32 %v565_v58, %v517_v7  ;;  %v576_v10 = vadd.f32 %v568_v2, %v520_v13  ;;  %v621_v59 = vmul.f32 %v8444_v52, %v5565_v39  ;;  %1484 = vrot.lane.b32.xlu1 %v4913_v25, %s4111_s20  ;;  %v626_v18 = vmul.f32 %v8426_v45, %v5542_v57  ;;  %v8445_v58 = vld [vmem:[#allocation108_spill] sm:$0xff] }
  0xf8   : > { %v5584_v44 = vsel %vm270_vm12, %v5428_v47, %v592_v50  ;;  %v5588_v41 = vsel %vm270_vm12, %v592_v50, %v596_v3  ;;  %v624_v2 = vmul.f32 %v8445_v58, %v5560_v20  ;;  %1482 = vrot.lane.b32.xlu0 %v4917_v61, %s4111_s20  ;;  %v571_v16 = vmul.f32 %v8423_v26, %v5550_v27  ;;  %v5604_v30 = vpop.permute.xlu1 %801  ;;  %v5608_v7 = vpop.permute.xlu0 %799 }
  0xf9   : > { %v5600_v45 = vsel %vm213_vm11, %v5356_v51, %v8440_v48  ;;  %v572_v47 = vmul.f32 %v8442_v19, %v5556_v17  ;;  %v629_v50 = vadd.f32 %v621_v59, %v573_v36  ;;  %v513_v4 = vmul.f32 %v8438_v62, %v5573_v53  ;;  %v8446_v48 = vld [vmem:[#allocation111_spill] sm:$0xff] }
  0xfa   : > { %v524_v35 = vadd.f32 %v516_v40, %v438_v9  ;;  %v578_v55 = vadd.f32 %v570_v5, %v522_v1  ;;  %v632_v24 = vadd.f32 %v624_v2, %v576_v10  ;;  %v627_v26 = vmul.f32 %v8435_v31, %v5584_v44  ;;  %v8447_v1 = vld [vmem:[#allocation112_spill] sm:$0xff]  ;;  %v8448_v36 = vld [vmem:[#allocation23_spill] sm:$0xff] }
  0xfb   : > { %v5615_v51 = vsel %vm270_vm12, %v596_v3, %v5393_v46  ;;  %v628_v19 = vmul.f32 %v8445_v58, %v5588_v41  ;;  %v5620_v13 = vadd.f32 %v8446_v48, %v629_v50  ;;  %1488 = vrot.lane.b32.xlu1 %v8425_v11, %s4111_s20  ;;  %v435_v62 = vadd.f32 %v5366_v21, %v403_v6  ;;  %v8449_v10 = vld [vmem:[#allocation8_spill] sm:$0xff]  ;;  %v8452_v21 = vld [vmem:[#allocation29_spill] sm:$0xff] }
  0xfc   : > { %v569_v9 = vmul.f32 %v8441_v60, %v5600_v45  ;;  %v634_v31 = vadd.f32 %v626_v18, %v578_v55  ;;  %v5628_v40 = vadd.f32 %v8447_v1, %v632_v24  ;;  %1486 = vrot.lane.b32.xlu0 %v8427_v23, %s4111_s20  ;;  %v579_v46 = vadd.f32 %v571_v16, %v523_v33  ;;  %v5632_v5 = vpop.permute.xlu1 %805  ;;  %v8451_v58 = vld [vmem:[#allocation52_spill] sm:$0xff]  ;;  %v5644_v2 = vpop.permute.xlu0 %803 }
  0xfd   : > { %v580_v3 = vadd.f32 %v572_v47, %v524_v35  ;;  %v5636_v59 = vmul.f32 %v8449_v10, %v8448_v36  ;;  %v5640_v6 = vrot.slane %v8452_v21, %v8451_v58  ;;  %v521_v60 = vadd.f32 %v513_v4, %v435_v62  ;;  %v8453_v50 = vld [vmem:[#allocation12_spill] sm:$0xff]  ;;  %v8463_v36 = vld [vmem:[#allocation51_spill] sm:$0xff]  ;;  %v8464_v21 = vld [vmem:[#allocation26_spill] sm:$0xff] }
  0xfe   : > { %v625_v18 = vmul.f32 %v8444_v52, %v5615_v51  ;;  %v8454_v55 = vld [vmem:[#allocation32_spill] sm:$0xff]  ;;  %v635_v24 = vadd.f32 %v627_v26, %v579_v46  ;;  %v8459_v52 = vrot.slane %v4197_v29, 2  ;;  %v8460_v48 = vrot.slane %v4194_v28, 2  ;;  %v5676_v26 = vld [vmem:[%s7963_s1 + $0x70] sm:$0x7f]  ;;  %v8467_v28 = vld [vmem:[#allocation31_spill] sm:$0xff] }
  0xff   : > { %8450 = vst [vmem:[#allocation54_spill] sm:$0xff] %v5636_v59  ;;  %v5648_v33 = vmul.f32 %v8454_v55, %v8453_v50  ;;  %v8456_v16 = vld [vmem:[#allocation20_spill] sm:$0xff]  ;;  %v636_v4 = vadd.f32 %v628_v19, %v580_v3  ;;  %1492 = vrot.lane.b32.xlu1 %v8432_v56, %s4111_s20  ;;  %v5671_v50 = vrot.slane %v8464_v21, %v8463_v36  ;;  %8465 = vst [vmem:[#allocation58_spill] sm:$0xff] %v5676_v26  ;;  %v8466_v46 = vld [vmem:[#allocation41_spill] sm:$0xff] }
 0x100   : > { %v5652_v47 = vmul.f32 %v8449_v10, %v8456_v16  ;;  %v5657_v35 = vld [vmem:[%s7963_s1 + $0x68] sm:$0x7f]  ;;  %v5667_v1 = vsel %vm1726_vm13, %v8460_v48, %v8459_v52  ;;  %v577_v19 = vadd.f32 %v569_v9, %v521_v60  ;;  %v666_v3 = vadd.f32 %v8466_v46, %v634_v31  ;;  %1490 = vrot.lane.b32.xlu0 %v8436_v12, %s4111_s20  ;;  %v8468_v55 = vld [vmem:[#allocation30_spill] sm:$0xff]  ;;  %v5694_v48 = vpop.permute.xlu1 %809  ;;  %v8475_v46 = vld [vmem:[#allocation13_spill] sm:$0xff] }
 0x101   : > { %8455 = vst [vmem:[#allocation50_spill] sm:$0xff] %v5648_v33  ;;  %8458 = vst [vmem:[#allocation53_spill] sm:$0xff] %v5657_v35  ;;  %v5683_v29 = vrot.slane %v8467_v28, %v8463_v36  ;;  %v5687_v16 = vrot.slane %v8468_v55, %v8451_v58  ;;  %v5692_v52 = vld [vmem:[%s7963_s1 + $0x78] sm:$0x7f]  ;;  %v5698_v9 = vrot.slane %v8467_v28, %v8451_v58  ;;  %v8473_v60 = vld [vmem:[#allocation28_spill] sm:$0xff]  ;;  %v5719_v33 = vpop.permute.xlu0 %807 }
 0x102   : > { %8457 = vst [vmem:[#allocation84_spill] sm:$0xff] %v5652_v47  ;;  %8462 = vst [vmem:[#allocation56_spill] sm:$0xff] %v5667_v1  ;;  %v8472_v31 = vld [vmem:[#allocation10_spill] sm:$0xff]  ;;  %v8476_v10 = vld [vmem:[#allocation33_spill] sm:$0xff] }
 0x103   : > { %8469 = vst [vmem:[#allocation57_spill] sm:$0xff] %v5687_v16  ;;  %8470 = vst [vmem:[#allocation64_spill] sm:$0xff] %v5692_v52  ;;  %v5702_v21 = vmul.f32 %v8473_v60, %v8472_v31  ;;  %v5706_v36 = vmul.f32 %v8476_v10, %v8475_v46  ;;  %v5711_v55 = vld [vmem:[%s7963_s1 + $0x60] sm:$0x7f]  ;;  %v8479_v62 = vld [vmem:[#allocation24_spill] sm:$0xff]  ;;  %1536 = vrot.lane.b32.xlu1 %v4902_v42, %s4112_s21 }
 0x104   : > { %8471 = vst [vmem:[#allocation34_spill] sm:$0xff] %v5698_v9  ;;  %8478 = vst [vmem:[#allocation68_spill] sm:$0xff] %v5711_v55  ;;  %v5715_v16 = vrot.slane %v5657_v35, %v8479_v62  ;;  %v8481_v28 = vld [vmem:[#allocation78_spill] sm:$0xff]  ;;  %v633_v9 = vadd.f32 %v625_v18, %v577_v19  ;;  %v5723_v31 = vrot.slane %v5676_v26, %v8479_v62  ;;  %v8483_v60 = vld [vmem:[#allocation76_spill] sm:$0xff]  ;;  %1534 = vrot.lane.b32.xlu0 %v4906_v15, %s4112_s21 }
 0x105   : > { %8474 = vst [vmem:[#allocation69_spill] sm:$0xff] %v5702_v21  ;;  %8477 = vst [vmem:[#allocation67_spill] sm:$0xff] %v5706_v36  ;;  %v690_v58 = vmul.f32 %v8481_v28, %v5442_v22  ;;  %v5727_v10 = vrot.slane %v5711_v55, %v8479_v62  ;;  %v689_v46 = vmul.f32 %v8483_v60, %v5435_v49  ;;  %v8484_v36 = vld [vmem:[#allocation42_spill] sm:$0xff]  ;;  %v8487_v19 = vld [vmem:[#allocation61_spill] sm:$0xff] }
 0x106   : > { %8480 = vst [vmem:[#allocation59_spill] sm:$0xff] %v5715_v16  ;;  %v667_v35 = vadd.f32 %v8484_v36, %v635_v24  ;;  %v8485_v16 = vld [vmem:[#allocation43_spill] sm:$0xff]  ;;  %v5737_v22 = vrot.slane %v5692_v52, %v8479_v62  ;;  %v685_v18 = vmul.f32 %v8483_v60, %v5373_v54  ;;  %v686_v26 = vmul.f32 %v8481_v28, %v8487_v19  ;;  %v8488_v55 = vld [vmem:[#allocation81_spill] sm:$0xff]  ;;  %v8489_v24 = vld [vmem:[#allocation82_spill] sm:$0xff]  ;;  %v5755_v28 = vpop.permute.xlu1 %853 }
 0x107   : > { %8482 = vst [vmem:[#allocation60_spill] sm:$0xff] %v5727_v10  ;;  %v668_v21 = vadd.f32 %v8485_v16, %v636_v4  ;;  %v691_v49 = vmul.f32 %v8488_v55, %v5509_v34  ;;  %v698_v10 = vadd.f32 %v690_v58, %v666_v3  ;;  %v692_v4 = vmul.f32 %v8489_v24, %v5573_v53  ;;  %v8490_v16 = vld [vmem:[#allocation62_spill] sm:$0xff]  ;;  %v8491_v54 = vld [vmem:[#allocation85_spill] sm:$0xff]  ;;  %v8492_v19 = vld [vmem:[#allocation75_spill] sm:$0xff] }
 0x108   : > { %8486 = vst [vmem:[#allocation63_spill] sm:$0xff] %v5737_v22  ;;  %v687_v36 = vmul.f32 %v8488_v55, %v5470_v43  ;;  %v688_v42 = vmul.f32 %v8489_v24, %v8490_v16  ;;  %v721_v60 = vmul.f32 %v8491_v54, %v5520_v8  ;;  %v717_v34 = vmul.f32 %v8491_v54, %v8492_v19  ;;  %v8493_v58 = vld [vmem:[#allocation87_spill] sm:$0xff]  ;;  %v8494_v15 = vld [vmem:[#allocation65_spill] sm:$0xff]  ;;  %v8495_v53 = vld [vmem:[#allocation40_spill] sm:$0xff]  ;;  %v5763_v22 = vpop.permute.xlu0 %851 }
 0x109   : > { %v722_v3 = vmul.f32 %v8493_v58, %v5550_v27  ;;  %v694_v62 = vadd.f32 %v686_v26, %v8494_v15  ;;  %v665_v52 = vadd.f32 %v8495_v53, %v633_v9  ;;  %v8496_v43 = vld [vmem:[#allocation88_spill] sm:$0xff]  ;;  %v699_v24 = vadd.f32 %v691_v49, %v667_v35  ;;  %1540 = vrot.lane.b32.xlu1 %v4913_v25, %s4112_s21  ;;  %v8497_v54 = vld [vmem:[#allocation91_spill] sm:$0xff] }
 0x10a   : > { %v718_v55 = vmul.f32 %v8493_v58, %v8496_v43  ;;  %v700_v16 = vadd.f32 %v692_v4, %v668_v21  ;;  %v695_v8 = vadd.f32 %v687_v36, %v5532_v32  ;;  %v723_v19 = vmul.f32 %v8497_v54, %v5556_v17  ;;  %v8498_v27 = vld [vmem:[#allocation92_spill] sm:$0xff]  ;;  %1538 = vrot.lane.b32.xlu0 %v4917_v61, %s4112_s21  ;;  %v8499_v32 = vld [vmem:[#allocation98_spill] sm:$0xff]  ;;  %v8500_v49 = vld [vmem:[#allocation55_spill] sm:$0xff] }
 0x10b   : > { %v724_v15 = vmul.f32 %v8498_v27, %v5600_v45  ;;  %v719_v26 = vmul.f32 %v8497_v54, %v5490_v37  ;;  %v730_v9 = vadd.f32 %v722_v3, %v698_v10  ;;  %v720_v35 = vmul.f32 %v8498_v27, %v5496_v38  ;;  %v5788_v45 = vpop.permute.xlu1 %857  ;;  %v8501_v37 = vld [vmem:[#allocation103_spill] sm:$0xff]  ;;  %v8502_v58 = vld [vmem:[#allocation37_spill] sm:$0xff]  ;;  %v8525_v25 = vld [vmem:[#allocation128_spill] sm:$0xff] }
 0x10c   : > { %v753_v21 = vmul.f32 %v8499_v32, %v5542_v57  ;;  %v749_v4 = vmul.f32 %v8499_v32, %v8500_v49  ;;  %v816_v17 = vsel %vm156_vm10, %v5544_v0, %v5604_v30  ;;  %v754_v10 = vmul.f32 %v8501_v37, %v5584_v44  ;;  %v856_v53 = vpop.permute.xlu0 %855  ;;  %v8503_v44 = vld [vmem:[#allocation109_spill] sm:$0xff] }
 0x10d   : > { %v726_v36 = vadd.f32 %v718_v55, %v694_v62  ;;  %v750_v38 = vmul.f32 %v8501_v37, %v8502_v58  ;;  %v697_v3 = vadd.f32 %v689_v46, %v665_v52  ;;  %v731_v57 = vadd.f32 %v723_v19, %v699_v24  ;;  %1544 = vrot.lane.b32.xlu1 %v8425_v11, %s4112_s21  ;;  %v8504_v55 = vld [vmem:[#allocation110_spill] sm:$0xff]  ;;  %v8505_v52 = vld [vmem:[#allocation113_spill] sm:$0xff] }
 0x10e   : > { %v732_v43 = vadd.f32 %v724_v15, %v700_v16  ;;  %v727_v54 = vadd.f32 %v719_v26, %v695_v8  ;;  %v815_v27 = vsel %vm156_vm10, %v5567_v63, %v5608_v7  ;;  %v762_v32 = vadd.f32 %v754_v10, %v730_v9  ;;  %1542 = vrot.lane.b32.xlu0 %v8427_v23, %s4112_s21  ;;  %v8507_v10 = vld [vmem:[#allocation116_spill] sm:$0xff]  ;;  %v8526_v23 = vld [vmem:[#allocation47_spill] sm:$0xff] }
 0x10f   : > { %v755_v62 = vmul.f32 %v8503_v44, %v5588_v41  ;;  %v756_v49 = vmul.f32 %v8504_v55, %v5615_v51  ;;  %v840_v46 = vmul.f32 %v8505_v52, %v816_v17  ;;  %v693_v24 = vadd.f32 %v685_v18, %v5620_v13  ;;  %v5815_v19 = vpop.permute.xlu1 %861 }
 0x110   : > { %v696_v16 = vadd.f32 %v688_v42, %v5628_v40  ;;  %v751_v8 = vmul.f32 %v8503_v44, %v5560_v20  ;;  %v814_v41 = vsel %vm156_vm10, %v5604_v30, %v5632_v5  ;;  %v758_v51 = vadd.f32 %v750_v38, %v726_v36  ;;  %v5820_v13 = vpop.permute.xlu0 %859  ;;  %v8506_v20 = vld [vmem:[#allocation114_spill] sm:$0xff]  ;;  %v8511_v44 = vld [vmem:[#allocation119_spill] sm:$0xff] }
 0x111   : > { %v752_v15 = vmul.f32 %v8504_v55, %v5565_v39  ;;  %v836_v26 = vmul.f32 %v8505_v52, %v815_v27  ;;  %v729_v9 = vadd.f32 %v721_v60, %v697_v3  ;;  %v763_v42 = vadd.f32 %v755_v62, %v731_v57  ;;  %1548 = vrot.lane.b32.xlu1 %v8432_v56, %s4112_s21 }
 0x112   : > { %v764_v40 = vadd.f32 %v756_v49, %v732_v43  ;;  %v759_v18 = vadd.f32 %v751_v8, %v727_v54  ;;  %v5823_v37 = vmul.f32 %v8506_v20, %v816_v17  ;;  %v848_v30 = vadd.f32 %v840_v46, %v762_v32  ;;  %1546 = vrot.lane.b32.xlu0 %v8436_v12, %s4112_s21  ;;  %v8512_v49 = vld [vmem:[#allocation129_spill] sm:$0xff] }
 0x113   : > { %v841_v36 = vmul.f32 %v8507_v10, %v814_v41  ;;  %v813_v39 = vsel %vm156_vm10, %v5608_v7, %v5644_v2  ;;  %v818_v60 = vsel %vm156_vm10, %v5694_v48, %v5544_v0  ;;  %v728_v17 = vadd.f32 %v720_v35, %v696_v16  ;;  %v866_v3 = vpop.permute.xlu1 %865 }
 0x114   : > { %v812_v58 = vsel %vm156_vm10, %v5632_v5, %v5694_v48  ;;  %v725_v38 = vadd.f32 %v717_v34, %v693_v24  ;;  %v817_v7 = vsel %vm156_vm10, %v5719_v33, %v5567_v63  ;;  %v844_v57 = vadd.f32 %v836_v26, %v758_v51  ;;  %v864_v54 = vpop.permute.xlu0 %863  ;;  %v8508_v48 = vld [vmem:[#allocation118_spill] sm:$0xff] }
 0x115   : > { %v5847_v43 = vmul.f32 %v8506_v20, %v815_v27  ;;  %v761_v0 = vadd.f32 %v753_v21, %v729_v9  ;;  %v811_v35 = vsel %vm156_vm10, %v5644_v2, %v5719_v33  ;;  %v837_v5 = vmul.f32 %v8507_v10, %v813_v39  ;;  %v8509_v27 = vld [vmem:[#allocation130_spill] sm:$0xff]  ;;  %v8510_v2 = vld [vmem:[#allocation117_spill] sm:$0xff]  ;;  %v8514_v10 = vld [vmem:[#allocation120_spill] sm:$0xff] }
 0x116   : > { %v839_v34 = vmul.f32 %v8508_v48, %v818_v60  ;;  %v5859_v63 = vsel %vm213_vm11, %v5755_v28, %v5788_v45  ;;  %v5864_v21 = vsel %vm213_vm11, %v5763_v22, %v856_v53  ;;  %1750 = vrot.lane.b32.xlu1 %v8509_v27, %s4110_s19  ;;  %v5869_v33 = vmul.f32 %v8510_v2, %v814_v41  ;;  %v8513_v41 = vld [vmem:[#allocation122_spill] sm:$0xff] }
 0x117   : > { %v5872_v32 = vmul.f32 %v8510_v2, %v813_v39  ;;  %v842_v62 = vmul.f32 %v8511_v44, %v812_v58  ;;  %v835_v55 = vmul.f32 %v8508_v48, %v817_v7  ;;  %1748 = vrot.lane.b32.xlu0 %v8512_v49, %s4110_s19  ;;  %v760_v52 = vadd.f32 %v752_v15, %v728_v17  ;;  %v5879_v8 = vpop.permute.xlu1 %909  ;;  %v8515_v39 = vld [vmem:[#allocation121_spill] sm:$0xff] }
 0x118   : > { %v849_v46 = vadd.f32 %v841_v36, %v763_v42  ;;  %v757_v24 = vadd.f32 %v749_v4, %v725_v38  ;;  %v838_v16 = vmul.f32 %v8511_v44, %v811_v35  ;;  %v896_v51 = vmul.f32 %v8513_v41, %v5859_v63  ;;  %v5892_v4 = vpop.permute.xlu0 %907  ;;  %v8516_v38 = vld [vmem:[#allocation135_spill] sm:$0xff] }
 0x119   : > { %v892_v26 = vmul.f32 %v8513_v41, %v5864_v21  ;;  %v870_v9 = vsel %vm213_vm11, %v5788_v45, %v5815_v19  ;;  %v869_v15 = vsel %vm213_vm11, %v856_v53, %v5820_v13  ;;  %v845_v42 = vadd.f32 %v837_v5, %v759_v18  ;;  %v8517_v18 = vld [vmem:[#allocation133_spill] sm:$0xff] }
 0x11a   : > { %v847_v20 = vadd.f32 %v839_v34, %v761_v0  ;;  %v5895_v36 = vmul.f32 %v8514_v10, %v812_v58  ;;  %v5898_v17 = vmul.f32 %v8515_v39, %v818_v60  ;;  %1754 = vrot.lane.b32.xlu1 %v8516_v38, %s4110_s19  ;;  %v850_v48 = vadd.f32 %v842_v62, %v764_v40  ;;  %v8518_v58 = vld [vmem:[#allocation124_spill] sm:$0xff] }
 0x11b   : > { %v843_v2 = vadd.f32 %v835_v55, %v757_v24  ;;  %v5903_v45 = vmul.f32 %v8514_v10, %v811_v35  ;;  %v5906_v53 = vmul.f32 %v8515_v39, %v817_v7  ;;  %1752 = vrot.lane.b32.xlu0 %v8517_v18, %s4110_s19  ;;  %v846_v0 = vadd.f32 %v838_v16, %v760_v52  ;;  %v914_v40 = vpop.permute.xlu1 %913  ;;  %v8519_v52 = vld [vmem:[#allocation125_spill] sm:$0xff]  ;;  %v8524_v39 = vld [vmem:[#allocation127_spill] sm:$0xff] }
 0x11c   : > { %v897_v5 = vmul.f32 %v8518_v58, %v870_v9  ;;  %v893_v60 = vmul.f32 %v8518_v58, %v869_v15  ;;  %v874_v34 = vsel %vm213_vm11, %v866_v3, %v5755_v28  ;;  %v904_v44 = vadd.f32 %v896_v51, %v848_v30  ;;  %v912_v55 = vpop.permute.xlu0 %911  ;;  %v8520_v28 = vld [vmem:[#allocation131_spill] sm:$0xff] }
 0x11d   : > { %v900_v62 = vadd.f32 %v892_v26, %v844_v57  ;;  %v868_v7 = vsel %vm213_vm11, %v5815_v19, %v866_v3  ;;  %v5921_v35 = vsel %vm270_vm12, %v5879_v8, %v914_v40  ;;  %v1048_v24 = vmul.f32 %v8519_v52, %v870_v9  ;;  %v8522_v57 = vld [vmem:[#allocation126_spill] sm:$0xff]  ;;  %v8523_v26 = vld [vmem:[#allocation11_spill] sm:$0xff] }
 0x11e   : > { %v5927_v16 = vsel %vm213_vm11, %v864_v54, %v5763_v22  ;;  %v952_v30 = vmul.f32 %v8520_v28, %v5921_v35  ;;  %v5934_v19 = vsel %vm270_vm12, %v5892_v4, %v912_v55  ;;  %1758 = vrot.lane.b32.xlu1 %v5636_v59, %s4110_s19  ;;  %v1044_v3 = vmul.f32 %v8519_v52, %v869_v15 }
 0x11f   : > { %8521 = vst [vmem:[#allocation38_spill] sm:$0xff] %v5934_v19  ;;  %v895_v41 = vmul.f32 %v8522_v57, %v874_v34  ;;  %v867_v22 = vsel %vm213_vm11, %v5820_v13, %v864_v54  ;;  %v948_v51 = vmul.f32 %v8520_v28, %v5934_v19  ;;  %1756 = vrot.lane.b32.xlu0 %v8523_v26, %s4110_s19  ;;  %v918_v11 = vpop.permute.xlu1 %917 }
 0x120   : > { %v905_v9 = vadd.f32 %v897_v5, %v849_v46  ;;  %v901_v10 = vadd.f32 %v893_v60, %v845_v42  ;;  %v898_v58 = vmul.f32 %v8524_v39, %v868_v7  ;;  %v960_v56 = vadd.f32 %v952_v30, %v904_v44  ;;  %v916_v54 = vpop.permute.xlu0 %915  ;;  %v8527_v46 = vld [vmem:[#allocation25_spill] sm:$0xff]  ;;  %v8528_v44 = vld [vmem:[#allocation15_spill] sm:$0xff] }
 0x121   : > { %v1049_v15 = vmul.f32 %v8525_v25, %v868_v7  ;;  %v891_v52 = vmul.f32 %v8522_v57, %v5927_v16  ;;  %v956_v12 = vadd.f32 %v948_v51, %v900_v62  ;;  %v926_v13 = vsel %vm270_vm12, %v914_v40, %v918_v11  ;;  %v8529_v62 = vld [vmem:[#allocation27_spill] sm:$0xff] }
 0x122   : > { %v894_v28 = vmul.f32 %v8524_v39, %v867_v22  ;;  %v992_v61 = vadd.f32 %v8526_v23, %v960_v56  ;;  %v953_v42 = vmul.f32 %v8527_v46, %v926_v13  ;;  %v925_v5 = vsel %vm270_vm12, %v912_v55, %v916_v54  ;;  %1762 = vrot.lane.b32.xlu1 %v5652_v47, %s4110_s19 }
 0x123   : > { %v903_v60 = vadd.f32 %v895_v41, %v847_v20  ;;  %v1050_v7 = vmul.f32 %v8528_v44, %v874_v34  ;;  %v988_v30 = vadd.f32 %v8529_v62, %v956_v12  ;;  %v949_v40 = vmul.f32 %v8527_v46, %v925_v5  ;;  %1760 = vrot.lane.b32.xlu0 %v5667_v1, %s4110_s19  ;;  %v922_v55 = vpop.permute.xlu1 %921  ;;  %v8530_v46 = vld [vmem:[#allocation48_spill] sm:$0xff] }
 0x124   : > { %v906_v57 = vadd.f32 %v898_v58, %v850_v48  ;;  %v1045_v23 = vmul.f32 %v8525_v25, %v867_v22  ;;  %v961_v56 = vadd.f32 %v953_v42, %v905_v9  ;;  %v1024_v51 = vadd.f32 %v5869_v33, %v992_v61  ;;  %v920_v34 = vpop.permute.xlu0 %919  ;;  %v8533_v42 = vld [vmem:[#allocation46_spill] sm:$0xff] }
 0x125   : > { %v899_v39 = vadd.f32 %v891_v52, %v843_v2  ;;  %v957_v19 = vadd.f32 %v949_v40, %v901_v10  ;;  %v924_v20 = vsel %vm270_vm12, %v918_v11, %v922_v55  ;;  %v930_v12 = vsel %vm270_vm12, %v922_v55, %v5879_v8  ;;  %v8531_v11 = vld [vmem:[#allocation50_spill] sm:$0xff]  ;;  %v8532_v52 = vld [vmem:[#allocation57_spill] sm:$0xff] }
 0x126   : > { %v902_v41 = vadd.f32 %v894_v28, %v846_v0  ;;  %v993_v62 = vadd.f32 %v8530_v46, %v961_v56  ;;  %v951_v48 = vmul.f32 %v5671_v50, %v930_v12  ;;  %v954_v25 = vmul.f32 %v5683_v29, %v924_v20  ;;  %1806 = vrot.lane.b32.xlu1 %v8509_v27, %s4111_s20 }
 0x127   : > { %v1080_v61 = vmul.f32 %v5640_v6, %v926_v13  ;;  %v1020_v33 = vadd.f32 %v5872_v32, %v988_v30  ;;  %v989_v2 = vadd.f32 %v8531_v11, %v957_v19  ;;  %v1076_v22 = vmul.f32 %v5640_v6, %v925_v5  ;;  %1804 = vrot.lane.b32.xlu0 %v8512_v49, %s4111_s20  ;;  %v5984_v58 = vpop.permute.xlu1 %1098  ;;  %v8534_v5 = vld [vmem:[#allocation49_spill] sm:$0xff] }
 0x128   : > { %v1056_v8 = vadd.f32 %v1048_v24, %v1024_v51  ;;  %v1025_v0 = vadd.f32 %v5895_v36, %v993_v62  ;;  %v959_v9 = vadd.f32 %v951_v48, %v903_v60  ;;  %v962_v10 = vadd.f32 %v954_v25, %v906_v57  ;;  %v5993_v19 = vpop.permute.xlu0 %1096  ;;  %v8536_v48 = vld [vmem:[#allocation69_spill] sm:$0xff] }
 0x129   : > { %v1081_v28 = vmul.f32 %v8532_v52, %v924_v20  ;;  %v1021_v13 = vadd.f32 %v5903_v45, %v989_v2  ;;  %v923_v32 = vsel %vm270_vm12, %v916_v54, %v920_v34  ;;  %v929_v6 = vsel %vm270_vm12, %v920_v34, %v5892_v4 }
 0x12a   : > { %v1057_v24 = vadd.f32 %v1049_v15, %v1025_v0  ;;  %v991_v36 = vadd.f32 %v8533_v42, %v959_v9  ;;  %v994_v60 = vadd.f32 %v8534_v5, %v962_v10  ;;  %v947_v30 = vmul.f32 %v5671_v50, %v929_v6  ;;  %1810 = vrot.lane.b32.xlu1 %v8516_v38, %s4111_s20  ;;  %v8535_v15 = vld [vmem:[#allocation34_spill] sm:$0xff] }
 0x12b   : > { %v1052_v45 = vadd.f32 %v1044_v3, %v1020_v33  ;;  %v1053_v40 = vadd.f32 %v1045_v23, %v1021_v13  ;;  %v950_v54 = vmul.f32 %v5683_v29, %v923_v32  ;;  %v1077_v57 = vmul.f32 %v8532_v52, %v923_v32  ;;  %1808 = vrot.lane.b32.xlu0 %v8517_v18, %s4111_s20  ;;  %v1103_v20 = vpop.permute.xlu1 %1102  ;;  %v8539_v33 = vld [vmem:[#allocation67_spill] sm:$0xff]  ;;  %v8540_v42 = vld [vmem:[#allocation134_spill] sm:$0xff] }
 0x12c   : > { %v1026_v4 = vadd.f32 %v5898_v17, %v994_v60  ;;  %v1082_v56 = vmul.f32 %v8535_v15, %v930_v12  ;;  %v1089_v51 = vadd.f32 %v1081_v28, %v1057_v24  ;;  %v955_v55 = vadd.f32 %v947_v30, %v899_v39  ;;  %v1101_v29 = vpop.permute.xlu0 %1100  ;;  %v8537_v17 = vld [vmem:[#allocation59_spill] sm:$0xff]  ;;  %v8541_v5 = vld [vmem:[#allocation38_spill] sm:$0xff] }
 0x12d   : > { %v1088_v50 = vadd.f32 %v1080_v61, %v1056_v8  ;;  %v958_v34 = vadd.f32 %v950_v54, %v902_v41  ;;  %v1085_v46 = vadd.f32 %v1077_v57, %v1053_v40  ;;  %v6009_v3 = vsel %vm156_vm10, %v5984_v58, %v1103_v20  ;;  %v8538_v39 = vld [vmem:[#allocation123_spill] sm:$0xff] }
 0x12e   : > { %v1023_v23 = vadd.f32 %v5823_v37, %v991_v36  ;;  %v1058_v62 = vadd.f32 %v1050_v7, %v1026_v4  ;;  %v987_v25 = vadd.f32 %v8536_v48, %v955_v55  ;;  %v1141_v12 = vmul.f32 %v8537_v17, %v6009_v3  ;;  %1814 = vrot.lane.b32.xlu1 %v5636_v59, %s4111_s20  ;;  %v8542_v4 = vld [vmem:[#allocation60_spill] sm:$0xff]  ;;  %v6080_v55 = vld [vmem:[%s4166_s18] sm:$0xff] }
 0x12f   : > { %v1047_v41 = vmul.f32 %v8538_v39, %v5859_v63  ;;  %v1084_v61 = vadd.f32 %v1076_v22, %v1052_v45  ;;  %v990_v11 = vadd.f32 %v8539_v33, %v958_v34  ;;  %v6023_v2 = vsel %vm156_vm10, %v5993_v19, %v1101_v29  ;;  %1812 = vrot.lane.b32.xlu0 %v8523_v26, %s4111_s20  ;;  %v1107_v63 = vpop.permute.xlu1 %1106  ;;  %v8547_v33 = vld [vmem:[#allocation53_spill] sm:$0xff] }
 0x130   : > { %v1090_v37 = vadd.f32 %v1082_v56, %v1058_v62  ;;  %v1019_v7 = vadd.f32 %v5847_v43, %v987_v25  ;;  %v6028_v8 = vadd.f32 %v1141_v12, %v1088_v50  ;;  %v1137_v0 = vmul.f32 %v8537_v17, %v6023_v2  ;;  %v1105_v28 = vpop.permute.xlu0 %1104  ;;  %v8543_v56 = vld [vmem:[#allocation63_spill] sm:$0xff] }
 0x131   : > { %v1043_v22 = vmul.f32 %v8538_v39, %v5864_v21  ;;  %v1046_v9 = vmul.f32 %v8528_v44, %v5927_v16  ;;  %v1022_v10 = vadd.f32 %v5906_v53, %v990_v11  ;;  %v6039_v52 = vsel %vm156_vm10, %v1103_v20, %v1107_v63  ;;  %v8545_v12 = vld [vmem:[#allocation3_spill] sm:$0xff] }
 0x132   : > { %v6041_v43 = vadd.f32 %v1137_v0, %v1084_v61  ;;  %v1142_v13 = vmul.f32 %v5723_v31, %v6039_v52  ;;  %v6047_v32 = vsel %vm156_vm10, %v1101_v29, %v1105_v28  ;;  %1818 = vrot.lane.b32.xlu1 %v5652_v47, %s4111_s20  ;;  %v1055_v21 = vadd.f32 %v1047_v41, %v1023_v23  ;;  %v8546_v61 = vld [vmem:[#allocation44_spill] sm:$0xff] }
 0x133   : > { %v1054_v16 = vadd.f32 %v1046_v9, %v1022_v10  ;;  %v1078_v53 = vmul.f32 %v8535_v15, %v929_v6  ;;  %v1138_v44 = vmul.f32 %v5723_v31, %v6047_v32  ;;  %1816 = vrot.lane.b32.xlu0 %v5667_v1, %s4111_s20  ;;  %v1051_v24 = vadd.f32 %v1043_v22, %v1019_v7  ;;  %v1111_v45 = vpop.permute.xlu1 %1110  ;;  %v8549_v7 = vld [vmem:[#allocation68_spill] sm:$0xff]  ;;  %v8550_v22 = vld [vmem:[#allocation58_spill] sm:$0xff] }
 0x134   : > { %v1079_v36 = vmul.f32 %v8540_v42, %v5921_v35  ;;  %v1075_v60 = vmul.f32 %v8540_v42, %v8541_v5  ;;  %v6060_v30 = vadd.f32 %v1142_v13, %v1089_v51  ;;  %v6066_v31 = vsel %vm156_vm10, %v1107_v63, %v1111_v45  ;;  %v1109_v35 = vpop.permute.xlu0 %1108  ;;  %v8551_v10 = vld [vmem:[#allocation64_spill] sm:$0xff]  ;;  %v8552_v13 = vld [vmem:[#allocation45_spill] sm:$0xff] }
 0x135   : > { %v1086_v40 = vadd.f32 %v1078_v53, %v1054_v16  ;;  %v6062_v6 = vadd.f32 %v1138_v44, %v1085_v46  ;;  %v6071_v54 = vsel %vm156_vm10, %v1111_v45, %v5984_v58  ;;  %v1143_v51 = vmul.f32 %v8543_v56, %v6066_v31  ;;  %v6095_v46 = vld [vmem:[%s4166_s18 + $0x20] sm:$0xff]  ;;  %v3903_v44 = vld [vmem:[%s4166_s18 + $0x8] sm:$0xff] }
 0x136   : > { %v1087_v57 = vadd.f32 %v1079_v36, %v1055_v21  ;;  %v1140_v15 = vmul.f32 %v8542_v4, %v6071_v54  ;;  %1862 = vrot.lane.b32.xlu1 %v8509_v27, %s4112_s21  ;;  %v2044_v20 = vrot.slane %v6080_v55, 3  ;;  %v1083_v50 = vadd.f32 %v1075_v60, %v1051_v24  ;;  %v3904_v42 = vld [vmem:[%s4166_s18 + $0x28] sm:$0xff] }
 0x137   : > { %v6085_v58 = vsel %vm156_vm10, %v1105_v28, %v1109_v35  ;;  %v6090_v34 = vsel %vm156_vm10, %v1109_v35, %v5993_v19  ;;  %1860 = vrot.lane.b32.xlu0 %v8512_v49, %s4112_s21  ;;  %v2048_v29 = vrot.slane %v6095_v46, 3  ;;  %v6100_v62 = vadd.f32 %v1143_v51, %v1090_v37  ;;  %v6106_v19 = vpop.permute.xlu1 %1154  ;;  %v8548_v37 = vld [vmem:[#allocation36_spill] sm:$0xff]  ;;  %v8563_v49 = vld [vmem:[#allocation21_spill] sm:$0xff] }
 0x138   : > { %8544 = vst [vmem:[#allocation66_spill] sm:$0xff] %v6090_v34  ;;  %v6098_v23 = vadd.f32 %v1140_v15, %v1087_v57  ;;  %v1136_v48 = vmul.f32 %v8542_v4, %v6090_v34  ;;  %v1139_v25 = vmul.f32 %v8543_v56, %v6085_v58  ;;  %v6108_v17 = vpop.permute.xlu0 %1152  ;;  %vm2052_vm14 = vcmp.lt.s32.totalorder %v8545_v12, 5 }
 0x139   : > { %v1183_v11 = vrot.slane %v8547_v33, %v8546_v61  ;;  %v6121_v0 = vrot.slane %v8549_v7, %v8548_v37  ;;  %v6125_v63 = vrot.slane %v8547_v33, %v8548_v37  ;;  %v6129_v9 = vrot.slane %v8550_v22, %v8548_v37 }
 0x13a   : > { %v6111_v39 = vadd.f32 %v1136_v48, %v1083_v50  ;;  %v6113_v41 = vadd.f32 %v1139_v25, %v1086_v40  ;;  %1866 = vrot.lane.b32.xlu1 %v8516_v38, %s4112_s21  ;;  %v6133_v28 = vrot.slane %v8551_v10, %v8548_v37  ;;  %v6139_v21 = vrot.slane %v8549_v7, %v8552_v13  ;;  %v8559_v48 = vld [vmem:[#allocation9_spill] sm:$0xff] }
 0x13b   : > { %1864 = vrot.lane.b32.xlu0 %v8517_v18, %s4112_s21  ;;  %v1159_v16 = vpop.permute.xlu1 %1158  ;;  %v2057_v53 = vsel %vm2052_vm14, %v2048_v29, %v2044_v20  ;;  %v2045_v24 = vrot.slane %v3903_v44, 3  ;;  %v2049_v36 = vrot.slane %v3904_v42, 3  ;;  %v1187_v45 = vrot.slane %v8550_v22, %v8546_v61  ;;  %v3906_v37 = vld [vmem:[%s4166_s18 + $0x30] sm:$0xff] }
 0x13c   : > { %8553 = vst [vmem:[#allocation39_spill] sm:$0xff] %v6139_v21  ;;  %v6148_v5 = vsel %vm213_vm11, %v6106_v19, %v1159_v16  ;;  %v1157_v60 = vpop.permute.xlu0 %1156  ;;  %v6154_v40 = vrot.slane %v8547_v33, %v8552_v13  ;;  %v1179_v35 = vrot.slane %v8549_v7, %v8546_v61  ;;  %v1191_v15 = vrot.slane %v8551_v10, %v8546_v61 }
 0x13d   : > { %8554 = vst [vmem:[#allocation72_spill] sm:$0xff] %v6148_v5  ;;  %v1197_v57 = vmul.f32 %v1183_v11, %v6148_v5  ;;  %v6162_v4 = vsel %vm213_vm11, %v6108_v17, %v1157_v60  ;;  %v6170_v56 = vrot.slane %v8550_v22, %v8552_v13  ;;  %v6177_v50 = vrot.slane %v8551_v10, %v8552_v13 }
 0x13e   : > { %8555 = vst [vmem:[#allocation74_spill] sm:$0xff] %v6154_v40  ;;  %8556 = vst [vmem:[#allocation70_spill] sm:$0xff] %v6162_v4  ;;  %1870 = vrot.lane.b32.xlu1 %v5636_v59, %s4112_s21  ;;  %v1193_v51 = vmul.f32 %v1183_v11, %v6162_v4  ;;  %v6180_v25 = vmul.f32 %v8559_v48, %v2057_v53  ;;  %v6184_v27 = vsel %vm2052_vm14, %v2044_v20, %v2048_v29  ;;  %v3905_v29 = vld [vmem:[%s4166_s18 + $0x10] sm:$0xff] }
 0x13f   : > { %8557 = vst [vmem:[#allocation71_spill] sm:$0xff] %v6170_v56  ;;  %1868 = vrot.lane.b32.xlu0 %v8523_v26, %s4112_s21  ;;  %8558 = vst [vmem:[#allocation73_spill] sm:$0xff] %v6177_v50  ;;  %v6187_v59 = vadd.f32 %v1197_v57, %v6028_v8  ;;  %v1163_v38 = vpop.permute.xlu1 %1162  ;;  %v2058_v11 = vsel %vm2052_vm14, %v2049_v36, %v2045_v24  ;;  %v8562_v26 = vld [vmem:[#allocation51_spill] sm:$0xff]  ;;  %v1271_v53 = vrot.slane %v8547_v33, %v8563_v49  ;;  %v3908_v56 = vld [vmem:[%s4166_s18 + $0x38] sm:$0xff] }
 0x140   : > { %8560 = vst [vmem:[#allocation83_spill] sm:$0xff] %v6180_v25  ;;  %8561 = vst [vmem:[#allocation35_spill] sm:$0xff] %v6184_v27  ;;  %v6193_v18 = vrot.slane %v8547_v33, %v8562_v26  ;;  %v6198_v13 = vadd.f32 %v1193_v51, %v6041_v43  ;;  %v6202_v20 = vsel %vm213_vm11, %v1159_v16, %v1163_v38  ;;  %v1161_v8 = vpop.permute.xlu0 %1160  ;;  %v2046_v57 = vrot.slane %v3905_v29, 3  ;;  %v3907_v43 = vld [vmem:[%s4166_s18 + $0x18] sm:$0xff]  ;;  %s7436_s18 = scalar_lea.vmem [#allocation2], %s3855_s15 }
 0x141   : > { %8565 = vst [vmem:[#allocation77_spill] sm:$0xff] %v6202_v20  ;;  %v2050_v61 = vrot.slane %v3906_v37, 3  ;;  %v1198_v4 = vmul.f32 %v1187_v45, %v6202_v20  ;;  %v6209_v50 = vsel %vm213_vm11, %v1157_v60, %v1161_v8  ;;  %v2047_v51 = vrot.slane %v3907_v43, 3  ;;  %v8568_v60 = vld [vmem:[#allocation52_spill] sm:$0xff] }
 0x142   : > { %8564 = vst [vmem:[#allocation136_spill] sm:$0xff] %v6198_v13  ;;  %1874 = vrot.lane.b32.xlu1 %v5652_v47, %s4112_s21  ;;  %v2051_v40 = vrot.slane %v3908_v56, 3  ;;  %v1194_v16 = vmul.f32 %v1187_v45, %v6209_v50  ;;  %v6219_v13 = vmul.f32 %v8559_v48, %v2058_v11  ;;  %v6223_v20 = vsel %vm2052_vm14, %v2045_v24, %v2049_v36 }
 0x143   : > { %1872 = vrot.lane.b32.xlu0 %v5667_v1, %s4112_s21  ;;  %8567 = vst [vmem:[#allocation14_spill] sm:$0xff] %v6223_v20  ;;  %v6227_v21 = vrot.slane %v8549_v7, %v8568_v60  ;;  %v6230_v47 = vadd.f32 %v1198_v4, %v6060_v30  ;;  %v1167_v5 = vpop.permute.xlu1 %1166  ;;  %v6232_v34 = vmul.f32 %v3904_v42, %v1271_v53 }
 0x144   : > { %8566 = vst [vmem:[#allocation22_spill] sm:$0xff] %v6219_v13  ;;  %v6234_v45 = vmul.f32 %v3903_v44, %v1271_v53  ;;  %v6238_v11 = vrot.slane %v8550_v22, %v8562_v26  ;;  %v6241_v1 = vadd.f32 %v1194_v16, %v6062_v6  ;;  %v6245_v24 = vsel %vm213_vm11, %v1163_v38, %v1167_v5  ;;  %v1165_v42 = vpop.permute.xlu0 %1164 }
 0x145   : > { %8569 = vst [vmem:[#allocation115_spill] sm:$0xff] %v6227_v21  ;;  %v6250_v30 = vsel %vm213_vm11, %v1167_v5, %v6106_v19  ;;  %v1275_v44 = vrot.slane %v8550_v22, %v8563_v49  ;;  %v1199_v4 = vmul.f32 %v1191_v15, %v6245_v24  ;;  %v2059_v38 = vsel %vm2052_vm14, %v2050_v61, %v2046_v57 }
 0x146   : > { %8570 = vst [vmem:[#allocation132_spill] sm:$0xff] %v6250_v30  ;;  %v1196_v36 = vmul.f32 %v1179_v35, %v6250_v30  ;;  %2076 = vrot.lane.b32.xlu1 %v6180_v25, %s4110_s19  ;;  %v2060_v6 = vsel %vm2052_vm14, %v2051_v40, %v2047_v51  ;;  %v6264_v19 = vsel %vm213_vm11, %v1161_v8, %v1165_v42 }
 0x147   : > { %v6269_v5 = vsel %vm213_vm11, %v1165_v42, %v6108_v17  ;;  %2074 = vrot.lane.b32.xlu0 %v6184_v27, %s4110_s19  ;;  %v1267_v53 = vrot.slane %v8549_v7, %v8563_v49  ;;  %v1279_v16 = vrot.slane %v8551_v10, %v8563_v49  ;;  %v6281_v8 = vadd.f32 %v1199_v4, %v6100_v62  ;;  %v6285_v42 = vpop.permute.xlu1 %1210  ;;  %v6290_v27 = vld [vmem:[%s7963_s1 + $0x88] sm:$0x7f] }
 0x148   : > { %v6278_v21 = vadd.f32 %v1196_v36, %v6098_v23  ;;  %v1192_v30 = vmul.f32 %v1179_v35, %v6269_v5  ;;  %v1195_v17 = vmul.f32 %v1191_v15, %v6264_v19  ;;  %8571 = vst [vmem:[#allocation86_spill] sm:$0xff] %v6290_v27  ;;  %v6292_v25 = vpop.permute.xlu0 %1208  ;;  %v6295_v49 = vmul.f32 %v8559_v48, %v2059_v38  ;;  %v6310_v15 = vld [vmem:[%s7963_s1 + $0x90] sm:$0x7f] }
 0x149   : > { %v6299_v23 = vsel %vm2052_vm14, %v2046_v57, %v2050_v61  ;;  %v6301_v62 = vmul.f32 %v3906_v37, %v1275_v44  ;;  %v6305_v35 = vrot.slane %v8547_v33, %v8568_v60  ;;  %8574 = vst [vmem:[#allocation16_spill] sm:$0xff] %v6310_v15  ;;  %v6320_v61 = vmul.f32 %v3905_v29, %v1275_v44  ;;  %v6359_v44 = vld [vmem:[%s7963_s1 + $0x80] sm:$0x7f] }
 0x14a   : > { %8572 = vst [vmem:[#allocation97_spill] sm:$0xff] %v6295_v49  ;;  %8573 = vst [vmem:[#allocation17_spill] sm:$0xff] %v6299_v23  ;;  %v6313_v36 = vadd.f32 %v1192_v30, %v6111_v39  ;;  %v6316_v4 = vadd.f32 %v1195_v17, %v6113_v41  ;;  %2080 = vrot.lane.b32.xlu1 %v6219_v13, %s4110_s19  ;;  %v6324_v33 = vsel %vm2052_vm14, %v2047_v51, %v2051_v40 }
 0x14b   : > { %8575 = vst [vmem:[#allocation99_spill] sm:$0xff] %v6324_v33  ;;  %2078 = vrot.lane.b32.xlu0 %v6223_v20, %s4110_s19  ;;  %v6329_v37 = vmul.f32 %v8559_v48, %v2060_v6  ;;  %v6333_v39 = vrot.slane %v8549_v7, %v8562_v26  ;;  %v6337_v41 = vrot.slane %v8551_v10, %v8562_v26  ;;  %v1215_v12 = vpop.permute.xlu1 %1214  ;;  %v8577_v7 = vld [vmem:[#allocation24_spill] sm:$0xff]  ;;  %8578 = vst [vmem:[#allocation19_spill] sm:$0xff] %v6359_v44 }
 0x14c   : > { %v6341_v29 = vrot.slane %v8550_v22, %v8568_v60  ;;  %v6344_v40 = vmul.f32 %v6095_v46, %v1267_v53  ;;  %v6346_v57 = vmul.f32 %v3908_v56, %v1279_v16  ;;  %v6350_v51 = vrot.slane %v8551_v10, %v8568_v60  ;;  %v1213_v22 = vpop.permute.xlu0 %1212 }
 0x14d   : > { %8576 = vst [vmem:[#allocation102_spill] sm:$0xff] %v6329_v37  ;;  %v6354_v30 = vrot.slane %v6290_v27, %v8577_v7  ;;  %v6364_v46 = vsel %vm270_vm12, %v6285_v42, %v1215_v12  ;;  %v6367_v56 = vmul.f32 %v6080_v55, %v1267_v53  ;;  %v6369_v10 = vmul.f32 %v3907_v43, %v1279_v16  ;;  %v8584_v27 = vld [vmem:[#allocation136_spill] sm:$0xff] }
 0x14e   : > { %v6373_v38 = vrot.slane %v6310_v15, %v8577_v7  ;;  %v6377_v6 = vmul.f32 %v6121_v0, %v6009_v3  ;;  %v1253_v17 = vmul.f32 %v6193_v18, %v6364_v46  ;;  %v6384_v48 = vsel %vm270_vm12, %v6292_v25, %v1213_v22  ;;  %2084 = vrot.lane.b32.xlu1 %v6295_v49, %s4110_s19 }
 0x14f   : > { %8579 = vst [vmem:[#allocation79_spill] sm:$0xff] %v6384_v48  ;;  %v6390_v55 = vrot.slane %v6359_v44, %v8577_v7  ;;  %v6394_v43 = vmul.f32 %v6121_v0, %v6023_v2  ;;  %v1317_v3 = vmul.f32 %v6125_v63, %v6039_v52  ;;  %v1313_v53 = vmul.f32 %v6125_v63, %v6047_v32  ;;  %v1219_v0 = vpop.permute.xlu1 %1218  ;;  %v8581_v44 = vld [vmem:[#allocation66_spill] sm:$0xff]  ;;  %v8583_v63 = vld [vmem:[#allocation39_spill] sm:$0xff] }
 0x150   : > { %v1249_v16 = vmul.f32 %v6193_v18, %v6384_v48  ;;  %2082 = vrot.lane.b32.xlu0 %v6299_v23, %s4110_s19  ;;  %v1318_v60 = vmul.f32 %v6129_v9, %v6066_v31  ;;  %v1319_v26 = vmul.f32 %v6133_v28, %v6071_v54  ;;  %v1314_v2 = vmul.f32 %v6129_v9, %v6085_v58  ;;  %v8582_v18 = vld [vmem:[#allocation72_spill] sm:$0xff]  ;;  %v1217_v54 = vpop.permute.xlu0 %1216  ;;  %v8585_v48 = vld [vmem:[#allocation77_spill] sm:$0xff]  ;;  %v8586_v7 = vld [vmem:[#allocation74_spill] sm:$0xff] }
 0x151   : > { %8580 = vst [vmem:[#allocation80_spill] sm:$0xff] %v6390_v55  ;;  %v1261_v52 = vadd.f32 %v1253_v17, %v6187_v59  ;;  %v6413_v32 = vmul.f32 %v6133_v28, %v8581_v44  ;;  %v6417_v15 = vmul.f32 %v8583_v63, %v8582_v18  ;;  %v1227_v31 = vsel %vm270_vm12, %v1215_v12, %v1219_v0  ;;  %v8587_v44 = vld [vmem:[#allocation71_spill] sm:$0xff] }
 0x152   : > { %v1257_v55 = vadd.f32 %v1249_v16, %v8584_v27  ;;  %v1349_v58 = vmul.f32 %v8586_v7, %v8585_v48  ;;  %v1254_v9 = vmul.f32 %v6238_v11, %v1227_v31  ;;  %v1226_v28 = vsel %vm270_vm12, %v1213_v22, %v1217_v54  ;;  %2088 = vrot.lane.b32.xlu1 %v6329_v37, %s4110_s19 }
 0x153   : > { %v1293_v59 = vadd.f32 %v6232_v34, %v1261_v52  ;;  %v1345_v27 = vmul.f32 %v8586_v7, %v6209_v50  ;;  %v1350_v12 = vmul.f32 %v8587_v44, %v6245_v24  ;;  %v1250_v48 = vmul.f32 %v6238_v11, %v1226_v28  ;;  %v1223_v18 = vpop.permute.xlu1 %1222 }
 0x154   : > { %v1289_v17 = vadd.f32 %v6234_v45, %v1257_v55  ;;  %2086 = vrot.lane.b32.xlu0 %v6324_v33, %s4110_s19  ;;  %v1346_v34 = vmul.f32 %v8587_v44, %v6264_v19  ;;  %v1262_v22 = vadd.f32 %v1254_v9, %v6230_v47  ;;  %v1381_v52 = vmul.f32 %v6305_v35, %v1227_v31  ;;  %v1221_v24 = vpop.permute.xlu0 %1220  ;;  %v8588_v31 = vld [vmem:[#allocation83_spill] sm:$0xff] }
 0x155   : > { %v1325_v16 = vadd.f32 %v1317_v3, %v1293_v59  ;;  %v1258_v7 = vadd.f32 %v1250_v48, %v6241_v1  ;;  %v1225_v45 = vsel %vm270_vm12, %v1219_v0, %v1223_v18  ;;  %v1231_v11 = vsel %vm270_vm12, %v1223_v18, %v6285_v42  ;;  %v8589_v42 = vld [vmem:[#allocation35_spill] sm:$0xff] }
 0x156   : > { %v1321_v50 = vadd.f32 %v1313_v53, %v1289_v17  ;;  %v1294_v55 = vadd.f32 %v6301_v62, %v1262_v22  ;;  %v1252_v47 = vmul.f32 %v6333_v39, %v1231_v11  ;;  %v1255_v3 = vmul.f32 %v6337_v41, %v1225_v45  ;;  %2132 = vrot.lane.b32.xlu1 %v8588_v31, %s4111_s20 }
 0x157   : > { %v1357_v19 = vadd.f32 %v1349_v58, %v1325_v16  ;;  %v1290_v1 = vadd.f32 %v6320_v61, %v1258_v7  ;;  %v1377_v0 = vmul.f32 %v6305_v35, %v1226_v28  ;;  %v1382_v59 = vmul.f32 %v6341_v29, %v1225_v45  ;;  %v6460_v17 = vpop.permute.xlu1 %1424  ;;  %v8591_v16 = vld [vmem:[#allocation73_spill] sm:$0xff]  ;;  %v8592_v7 = vld [vmem:[#allocation70_spill] sm:$0xff] }
 0x158   : > { %v1353_v53 = vadd.f32 %v1345_v27, %v1321_v50  ;;  %2130 = vrot.lane.b32.xlu0 %v8589_v42, %s4111_s20  ;;  %v1326_v62 = vadd.f32 %v1318_v60, %v1294_v55  ;;  %v1260_v58 = vadd.f32 %v1252_v47, %v6278_v21  ;;  %v1263_v44 = vadd.f32 %v1255_v3, %v6281_v8  ;;  %v6467_v28 = vpop.permute.xlu0 %1422 }
 0x159   : > { %v1389_v9 = vadd.f32 %v1381_v52, %v1357_v19  ;;  %v1322_v22 = vadd.f32 %v1314_v2, %v1290_v1  ;;  %v1224_v61 = vsel %vm270_vm12, %v1217_v54, %v1221_v24  ;;  %v1230_v35 = vsel %vm270_vm12, %v1221_v24, %v6292_v25  ;;  %v8590_v2 = vld [vmem:[#allocation132_spill] sm:$0xff] }
 0x15a   : > { %v1385_v48 = vadd.f32 %v1377_v0, %v1353_v53  ;;  %v1358_v27 = vadd.f32 %v1350_v12, %v1326_v62  ;;  %v1292_v60 = vadd.f32 %v6344_v40, %v1260_v58  ;;  %v1295_v21 = vadd.f32 %v6346_v57, %v1263_v44  ;;  %2136 = vrot.lane.b32.xlu1 %v6219_v13, %s4111_s20 }
 0x15b   : > { %v1248_v8 = vmul.f32 %v6333_v39, %v1230_v35  ;;  %v1351_v52 = vmul.f32 %v8591_v16, %v8590_v2  ;;  %v1354_v54 = vadd.f32 %v1346_v34, %v1322_v22  ;;  %v1251_v18 = vmul.f32 %v6337_v41, %v1224_v61  ;;  %v1429_v50 = vpop.permute.xlu1 %1428 }
 0x15c   : > { %v1378_v25 = vmul.f32 %v6341_v29, %v1224_v61  ;;  %2134 = vrot.lane.b32.xlu0 %v6223_v20, %s4111_s20  ;;  %v1324_v40 = vadd.f32 %v6377_v6, %v1292_v60  ;;  %v1327_v12 = vadd.f32 %v1319_v26, %v1295_v21  ;;  %v1390_v57 = vadd.f32 %v1382_v59, %v1358_v27  ;;  %v1427_v29 = vpop.permute.xlu0 %1426  ;;  %v8595_v27 = vld [vmem:[#allocation79_spill] sm:$0xff] }
 0x15d   : > { %v1256_v39 = vadd.f32 %v1248_v8, %v6313_v36  ;;  %v1344_v45 = vmul.f32 %v8583_v63, %v8592_v7  ;;  %v1259_v24 = vadd.f32 %v1251_v18, %v6316_v4  ;;  %v6488_v41 = vsel %vm156_vm10, %v6460_v17, %v1429_v50  ;;  %v6499_v4 = vld [vmem:[%s7963_s1 + $0x98] sm:$0x7f]  ;;  %v8593_v63 = vld [vmem:[#allocation115_spill] sm:$0xff] }
 0x15e   : > { %v1386_v34 = vadd.f32 %v1378_v25, %v1354_v54  ;;  %v1359_v55 = vadd.f32 %v1351_v52, %v1327_v12  ;;  %v1383_v6 = vmul.f32 %v6350_v51, %v1231_v11  ;;  %v1467_v36 = vmul.f32 %v6354_v30, %v6488_v41  ;;  %2140 = vrot.lane.b32.xlu1 %v6295_v49, %s4111_s20 }
 0x15f   : > { %v1288_v26 = vadd.f32 %v6367_v56, %v1256_v39  ;;  %v1380_v19 = vmul.f32 %v8593_v63, %v6364_v46  ;;  %v1291_v47 = vadd.f32 %v6369_v10, %v1259_v24  ;;  %v6507_v56 = vsel %vm156_vm10, %v6467_v28, %v1427_v29  ;;  %v1433_v46 = vpop.permute.xlu1 %1432 }
 0x160   : > { %2138 = vrot.lane.b32.xlu0 %v6299_v23, %s4111_s20  ;;  %v1356_v11 = vadd.f32 %v6417_v15, %v1324_v40  ;;  %v1391_v3 = vadd.f32 %v1383_v6, %v1359_v55  ;;  %v1475_v1 = vadd.f32 %v1467_v36, %v1389_v9  ;;  %v1463_v0 = vmul.f32 %v6354_v30, %v6507_v56  ;;  %v1431_v58 = vpop.permute.xlu0 %1430 }
 0x161   : > { %v1320_v53 = vadd.f32 %v6394_v43, %v1288_v26  ;;  %v1347_v10 = vmul.f32 %v8591_v16, %v6269_v5  ;;  %v1323_v59 = vadd.f32 %v6413_v32, %v1291_v47  ;;  %v6520_v62 = vsel %vm156_vm10, %v1429_v50, %v1433_v46  ;;  %v8594_v5 = vld [vmem:[#allocation24_spill] sm:$0xff] }
 0x162   : > { %v1388_v44 = vadd.f32 %v1380_v19, %v1356_v11  ;;  %v1471_v15 = vadd.f32 %v1463_v0, %v1385_v48  ;;  %v1468_v43 = vmul.f32 %v6373_v38, %v6520_v62  ;;  %v6526_v9 = vsel %vm156_vm10, %v1427_v29, %v1431_v58  ;;  %2144 = vrot.lane.b32.xlu1 %v6329_v37, %s4111_s20  ;;  %v8597_v29 = vld [vmem:[#allocation44_spill] sm:$0xff] }
 0x163   : > { %v1461_v30 = vrot.slane %v6499_v4, %v8594_v5  ;;  %v1355_v32 = vadd.f32 %v1347_v10, %v1323_v59  ;;  %v1379_v22 = vmul.f32 %v6350_v51, %v1230_v35  ;;  %v1464_v61 = vmul.f32 %v6373_v38, %v6526_v9  ;;  %v1437_v8 = vpop.permute.xlu1 %1436  ;;  %v8596_v35 = vld [vmem:[#allocation80_spill] sm:$0xff] }
 0x164   : > { %2142 = vrot.lane.b32.xlu0 %v6324_v33, %s4111_s20  ;;  %v1352_v48 = vadd.f32 %v1344_v45, %v1320_v53  ;;  %v1376_v60 = vmul.f32 %v8593_v63, %v8595_v27  ;;  %v1476_v21 = vadd.f32 %v1468_v43, %v1390_v57  ;;  %v6541_v52 = vsel %vm156_vm10, %v1433_v46, %v1437_v8  ;;  %v1435_v38 = vpop.permute.xlu0 %1434  ;;  %v8599_v47 = vld [vmem:[#allocation16_spill] sm:$0xff]  ;;  %v8601_v53 = vld [vmem:[#allocation19_spill] sm:$0xff]  ;;  %v8602_v27 = vld [vmem:[#allocation94_spill] sm:$0xff] }
 0x165   : > { %v1387_v2 = vadd.f32 %v1379_v22, %v1355_v32  ;;  %v1472_v16 = vadd.f32 %v1464_v61, %v1386_v34  ;;  %v6546_v51 = vsel %vm156_vm10, %v1437_v8, %v6460_v17  ;;  %v1469_v18 = vmul.f32 %v1461_v30, %v6541_v52 }
 0x166   : > { %v1466_v54 = vmul.f32 %v8596_v35, %v6546_v51  ;;  %2188 = vrot.lane.b32.xlu1 %v8588_v31, %s4112_s21  ;;  %v1384_v25 = vadd.f32 %v1376_v60, %v1352_v48  ;;  %v6555_v40 = vsel %vm156_vm10, %v1431_v58, %v1435_v38  ;;  %v6560_v12 = vsel %vm156_vm10, %v1435_v38, %v6467_v28  ;;  %v8598_v28 = vld [vmem:[#allocation86_spill] sm:$0xff] }
 0x167   : > { %v1477_v57 = vadd.f32 %v1469_v18, %v1391_v3  ;;  %v1462_v39 = vmul.f32 %v8596_v35, %v6560_v12  ;;  %v1465_v50 = vmul.f32 %v1461_v30, %v6555_v40  ;;  %v1481_v7 = vpop.permute.xlu1 %1480  ;;  %v1509_v55 = vrot.slane %v8598_v28, %v8597_v29  ;;  %v8600_v3 = vld [vmem:[#allocation21_spill] sm:$0xff]  ;;  %v8605_v18 = vld [vmem:[#allocation106_spill] sm:$0xff] }
 0x168   : > { %2186 = vrot.lane.b32.xlu0 %v8589_v42, %s4112_s21  ;;  %v1474_v17 = vadd.f32 %v1466_v54, %v1388_v44  ;;  %v1479_v45 = vpop.permute.xlu0 %1478  ;;  %v1513_v11 = vrot.slane %v8599_v47, %v8597_v29  ;;  %v1593_v0 = vrot.slane %v8601_v53, %v8600_v3  ;;  %v1597_v10 = vrot.slane %v8598_v28, %v8600_v3  ;;  %v8604_v35 = vld [vmem:[#allocation101_spill] sm:$0xff] }
 0x169   : > { %v1470_v24 = vadd.f32 %v1462_v39, %v1384_v25  ;;  %v1473_v34 = vadd.f32 %v1465_v50, %v1387_v2  ;;  %v1601_v59 = vrot.slane %v8599_v47, %v8600_v3  ;;  %v1605_v58 = vrot.slane %v6499_v4, %v8600_v3  ;;  %v8603_v2 = vld [vmem:[#allocation96_spill] sm:$0xff] }
 0x16a   : > { %2192 = vrot.lane.b32.xlu1 %v6219_v13, %s4112_s21  ;;  %v6617_v60 = vmul.f32 %v1593_v0, %v8602_v27  ;;  %v6623_v38 = vmul.f32 %v1597_v10, %v8603_v2 }
 0x16b   : > { %v1485_v6 = vpop.permute.xlu1 %1484  ;;  %v6626_v54 = vmul.f32 %v1601_v59, %v8604_v35  ;;  %v6629_v25 = vmul.f32 %v1605_v58, %v8605_v18 }
 0x16c   : > { %2190 = vrot.lane.b32.xlu0 %v6223_v20, %s4112_s21  ;;  %v6575_v26 = vsel %vm213_vm11, %v1481_v7, %v1485_v6  ;;  %v1483_v36 = vpop.permute.xlu0 %1482 }
 0x16d   : > { %v1523_v63 = vmul.f32 %v1509_v55, %v6575_v26  ;;  %v6580_v19 = vsel %vm213_vm11, %v1479_v45, %v1483_v36  ;;  %8606 = vst [vmem:[#allocation18_spill] sm:$0xff] %v6629_v25 }
 0x16e   : > { %2196 = vrot.lane.b32.xlu1 %v6295_v49, %s4112_s21  ;;  %v1519_v46 = vmul.f32 %v1509_v55, %v6580_v19  ;;  %v8607_v55 = vld [vmem:[#allocation36_spill] sm:$0xff] }
 0x16f   : > { %v6597_v44 = vadd.f32 %v1523_v63, %v1475_v1  ;;  %v1489_v43 = vpop.permute.xlu1 %1488  ;;  %v1505_v1 = vrot.slane %v8601_v53, %v8597_v29  ;;  %v1629_v27 = vrot.slane %v8598_v28, %v8607_v55 }
 0x170   : > { %2194 = vrot.lane.b32.xlu0 %v6299_v23, %s4112_s21  ;;  %v6599_v30 = vadd.f32 %v1519_v46, %v1471_v15  ;;  %v6603_v32 = vsel %vm213_vm11, %v1485_v6, %v1489_v43  ;;  %v1487_v22 = vpop.permute.xlu0 %1486  ;;  %v1517_v15 = vrot.slane %v6499_v4, %v8597_v29  ;;  %v1625_v6 = vrot.slane %v8601_v53, %v8607_v55  ;;  %v8614_v23 = vld [vmem:[#allocation52_spill] sm:$0xff] }
 0x171   : > { %v1524_v61 = vmul.f32 %v1513_v11, %v6603_v32  ;;  %v6608_v48 = vsel %vm213_vm11, %v1483_v36, %v1487_v22  ;;  %v6697_v20 = vrot.slane %v8601_v53, %v8614_v23  ;;  %v1693_v3 = vrot.slane %v8598_v28, %v8614_v23 }
 0x172   : > { %2200 = vrot.lane.b32.xlu1 %v6329_v37, %s4112_s21  ;;  %v1520_v8 = vmul.f32 %v1513_v11, %v6608_v48 }
 0x173   : > { %v6631_v39 = vadd.f32 %v1524_v61, %v1476_v21  ;;  %v1493_v50 = vpop.permute.xlu1 %1492  ;;  %v1633_v21 = vrot.slane %v8599_v47, %v8607_v55  ;;  %8615 = vst [vmem:[#allocation107_spill] sm:$0xff] %v6697_v20 }
 0x174   : > { %2198 = vrot.lane.b32.xlu0 %v6324_v33, %s4112_s21  ;;  %v6635_v36 = vadd.f32 %v1520_v8, %v1472_v16  ;;  %v6639_v63 = vsel %vm213_vm11, %v1489_v43, %v1493_v50  ;;  %v6643_v11 = vsel %vm213_vm11, %v1493_v50, %v1481_v7  ;;  %v1491_v46 = vpop.permute.xlu0 %1490  ;;  %v1637_v8 = vrot.slane %v6499_v4, %v8607_v55  ;;  %v8608_v43 = vld [vmem:[#allocation45_spill] sm:$0xff]  ;;  %v8616_v55 = vld [vmem:[#allocation100_spill] sm:$0xff] }
 0x175   : > { %v1522_v61 = vmul.f32 %v1505_v1, %v6643_v11  ;;  %v1525_v16 = vmul.f32 %v1517_v15, %v6639_v63  ;;  %v6655_v2 = vrot.slane %v8601_v53, %v8608_v43  ;;  %v1494_v7 = vsel %vm213_vm11, %v1487_v22, %v1491_v46 }
 0x176   : > { %v6661_v35 = vsel %vm213_vm11, %v1491_v46, %v1479_v45  ;;  %v1521_v31 = vmul.f32 %v1517_v15, %v1494_v7  ;;  %v1661_v13 = vrot.slane %v8598_v28, %v8608_v43  ;;  %v1665_v33 = vrot.slane %v8599_v47, %v8608_v43  ;;  %v6688_v15 = vld [vmem:[%s7963_s1 + $0xb0] sm:$0x7f] }
 0x177   : > { %8609 = vst [vmem:[#allocation89_spill] sm:$0xff] %v6661_v35  ;;  %v6663_v18 = vadd.f32 %v1522_v61, %v1474_v17  ;;  %v6665_v50 = vadd.f32 %v1525_v16, %v1477_v57  ;;  %v1518_v37 = vmul.f32 %v1505_v1, %v6661_v35  ;;  %v1537_v49 = vpop.permute.xlu1 %1536  ;;  %v6674_v22 = vrot.slane %v6499_v4, %v8608_v43  ;;  %v8610_v17 = vld [vmem:[#allocation51_spill] sm:$0xff]  ;;  %v6683_v1 = vld [vmem:[%s7963_s1 + $0xa8] sm:$0x7f] }
 0x178   : > { %v6676_v45 = vpop.permute.xlu0 %1534  ;;  %v1565_v57 = vrot.slane %v8598_v28, %v8610_v17  ;;  %8611 = vst [vmem:[#allocation90_spill] sm:$0xff] %v6683_v1  ;;  %8612 = vst [vmem:[#allocation104_spill] sm:$0xff] %v6688_v15  ;;  %v6692_v61 = vadd.f32 %v1521_v31, %v1473_v34  ;;  %v8613_v16 = vld [vmem:[#allocation95_spill] sm:$0xff]  ;;  %v1569_v42 = vrot.slane %v8599_v47, %v8610_v17  ;;  %v8617_v34 = vld [vmem:[#allocation93_spill] sm:$0xff] }
 0x179   : > { %v6690_v46 = vadd.f32 %v1518_v37, %v1470_v24  ;;  %v1611_v43 = vmul.f32 %v1597_v10, %v8613_v16  ;;  %v1612_v29 = vmul.f32 %v1601_v59, %v8616_v55  ;;  %v6706_v37 = vrot.slane %v8601_v53, %v8610_v17  ;;  %v8618_v16 = vld [vmem:[#allocation105_spill] sm:$0xff]  ;;  %v6725_v28 = vld [vmem:[%s7963_s1 + $0xa0] sm:$0x7f] }
 0x17a   : > { %v6710_v24 = vrot.slane %v6499_v4, %v8610_v17  ;;  %v6713_v10 = vmul.f32 %v1593_v0, %v8617_v34  ;;  %v6716_v35 = vmul.f32 %v1605_v58, %v8618_v16  ;;  %v6720_v59 = vrot.slane %v8599_v47, %v8614_v23  ;;  %8619 = vst [vmem:[#allocation108_spill] sm:$0xff] %v6725_v28 }
 0x17b   : > { %v1541_v31 = vpop.permute.xlu1 %1540  ;;  %v6733_v0 = vrot.slane %v6499_v4, %v8614_v23  ;;  %v6737_v58 = vrot.slane %v6683_v1, %v8594_v5  ;;  %v6741_v47 = vrot.slane %v6688_v15, %v8594_v5  ;;  %v1642_v34 = vmul.f32 %v1625_v6, %v6488_v41 }
 0x17c   : > { %v6729_v53 = vsel %vm270_vm12, %v1537_v49, %v1541_v31  ;;  %v1539_v55 = vpop.permute.xlu0 %1538  ;;  %v6752_v4 = vrot.slane %v6725_v28, %v8594_v5  ;;  %v6755_v23 = vmul.f32 %v1625_v6, %v6507_v56  ;;  %v1643_v1 = vmul.f32 %v1629_v27, %v6520_v62 }
 0x17d   : > { %8620 = vst [vmem:[#allocation111_spill] sm:$0xff] %v6729_v53  ;;  %8621 = vst [vmem:[#allocation112_spill] sm:$0xff] %v6737_v58  ;;  %v1579_v16 = vmul.f32 %v1565_v57, %v6729_v53  ;;  %v6748_v17 = vsel %vm270_vm12, %v6676_v45, %v1539_v55  ;;  %v1639_v15 = vmul.f32 %v1629_v27, %v6526_v9 }
 0x17e   : > { %8622 = vst [vmem:[#allocation23_spill] sm:$0xff] %v6741_v47  ;;  %v1575_v41 = vmul.f32 %v1565_v57, %v6748_v17  ;;  %v1644_v47 = vmul.f32 %v1633_v21, %v6541_v52  ;;  %v1645_v25 = vmul.f32 %v1637_v8, %v6546_v51  ;;  %v1640_v20 = vmul.f32 %v1633_v21, %v6555_v40 }
 0x17f   : > { %v1587_v53 = vadd.f32 %v1579_v16, %v6597_v44  ;;  %v1545_v58 = vpop.permute.xlu1 %1544  ;;  %v6765_v28 = vmul.f32 %v1637_v8, %v6560_v12  ;;  %v6769_v56 = vmul.f32 %v6655_v2, %v6575_v26  ;;  %v1675_v51 = vmul.f32 %v1661_v13, %v6603_v32 }
 0x180   : > { %v1583_v62 = vadd.f32 %v1575_v41, %v6599_v30  ;;  %v1553_v9 = vsel %vm270_vm12, %v1541_v31, %v1545_v58  ;;  %v1543_v52 = vpop.permute.xlu0 %1542  ;;  %v1671_v12 = vmul.f32 %v1661_v13, %v6608_v48  ;;  %v1676_v27 = vmul.f32 %v1665_v33, %v6639_v63 }
 0x181   : > { %v1619_v6 = vadd.f32 %v1611_v43, %v1587_v53  ;;  %v1580_v40 = vmul.f32 %v1569_v42, %v1553_v9  ;;  %v1552_v44 = vsel %vm270_vm12, %v1539_v55, %v1543_v52  ;;  %v1672_v8 = vmul.f32 %v1665_v33, %v1494_v7 }
 0x182   : > { %v1615_v26 = vadd.f32 %v6623_v38, %v1583_v62  ;;  %v1576_v21 = vmul.f32 %v1569_v42, %v1552_v44  ;;  %v1707_v31 = vmul.f32 %v1693_v3, %v1553_v9  ;;  %v1703_v7 = vmul.f32 %v1693_v3, %v1552_v44 }
 0x183   : > { %v1588_v30 = vadd.f32 %v1580_v40, %v6631_v39  ;;  %v1651_v57 = vadd.f32 %v1643_v1, %v1619_v6  ;;  %v1549_v16 = vpop.permute.xlu1 %1548 }
 0x184   : > { %v1647_v41 = vadd.f32 %v1639_v15, %v1615_v26  ;;  %v1584_v32 = vadd.f32 %v1576_v21, %v6635_v36  ;;  %v1551_v43 = vsel %vm270_vm12, %v1545_v58, %v1549_v16  ;;  %v1557_v13 = vsel %vm270_vm12, %v1549_v16, %v1537_v49  ;;  %v1547_v48 = vpop.permute.xlu0 %1546 }
 0x185   : > { %v1620_v63 = vadd.f32 %v1612_v29, %v1588_v30  ;;  %v1683_v53 = vadd.f32 %v1675_v51, %v1651_v57  ;;  %v1578_v42 = vmul.f32 %v6706_v37, %v1557_v13  ;;  %v1581_v33 = vmul.f32 %v6710_v24, %v1551_v43  ;;  %v8627_v30 = vld [vmem:[#allocation18_spill] sm:$0xff] }
 0x186   : > { %v1679_v38 = vadd.f32 %v1671_v12, %v1647_v41  ;;  %v1616_v39 = vadd.f32 %v6626_v54, %v1584_v32  ;;  %v1708_v1 = vmul.f32 %v6720_v59, %v1551_v43  ;;  %v1550_v9 = vsel %vm270_vm12, %v1543_v52, %v1547_v48 }
 0x187   : > { %v1715_v36 = vadd.f32 %v1707_v31, %v1683_v53  ;;  %v1652_v15 = vadd.f32 %v1644_v47, %v1620_v63  ;;  %v1586_v55 = vadd.f32 %v1578_v42, %v6663_v18  ;;  %v1589_v58 = vadd.f32 %v1581_v33, %v6665_v50 }
 0x188   : > { %v1751_v49 = vpop.permute.xlu1 %1750  ;;  %v1711_v62 = vadd.f32 %v1703_v7, %v1679_v38  ;;  %v1648_v29 = vadd.f32 %v1640_v20, %v1616_v39  ;;  %v1556_v51 = vsel %vm270_vm12, %v1547_v48, %v6676_v45  ;;  %v1677_v50 = vmul.f32 %v6674_v22, %v6643_v11  ;;  %v8628_v48 = vld [vmem:[#allocation89_spill] sm:$0xff] }
 0x189   : > { %v1749_v54 = vpop.permute.xlu0 %1748  ;;  %v1684_v3 = vadd.f32 %v1676_v27, %v1652_v15  ;;  %v1618_v6 = vadd.f32 %v6713_v10, %v1586_v55  ;;  %v1621_v47 = vadd.f32 %v6716_v35, %v1589_v58  ;;  %v1574_v18 = vmul.f32 %v6706_v37, %v1556_v51 }
 0x18a   : > { %v1680_v40 = vadd.f32 %v1672_v8, %v1648_v29  ;;  %v1577_v20 = vmul.f32 %v6710_v24, %v1550_v9  ;;  %v1704_v52 = vmul.f32 %v6720_v59, %v1550_v9  ;;  %v1670_v10 = vmul.f32 %v6655_v2, %v6580_v19  ;;  %v6819_v19 = vld [vmem:[%s7963_s1 + $0xb8] sm:$0x7f]  ;;  %v8625_v2 = vld [vmem:[#allocation111_spill] sm:$0xff] }
 0x18b   : > { %v1650_v44 = vadd.f32 %v1642_v34, %v1618_v6  ;;  %v1653_v12 = vadd.f32 %v1645_v25, %v1621_v47  ;;  %v1716_v26 = vadd.f32 %v1708_v1, %v1684_v3  ;;  %v1582_v45 = vadd.f32 %v1574_v18, %v6690_v46  ;;  %v8623_v34 = vld [vmem:[#allocation112_spill] sm:$0xff]  ;;  %8624 = vst [vmem:[#allocation29_spill] sm:$0xff] %v6819_v19 }
 0x18c   : > { %v1755_v27 = vpop.permute.xlu1 %1754  ;;  %v1585_v35 = vadd.f32 %v1577_v20, %v6692_v61  ;;  %v1712_v37 = vadd.f32 %v1704_v52, %v1680_v40  ;;  %v1709_v59 = vmul.f32 %v6733_v0, %v1557_v13  ;;  %v8626_v61 = vld [vmem:[#allocation107_spill] sm:$0xff]  ;;  %v1673_v63 = vmul.f32 %v6674_v22, %v8628_v48 }
 0x18d   : > { %v6810_v11 = vsel %vm156_vm10, %v1751_v49, %v1755_v27  ;;  %v1753_v21 = vpop.permute.xlu0 %1752  ;;  %v1685_v24 = vadd.f32 %v1677_v50, %v1653_v12  ;;  %v1614_v25 = vadd.f32 %v6617_v60, %v1582_v45  ;;  %v1706_v8 = vmul.f32 %v8626_v61, %v8625_v2 }
 0x18e   : > { %v1793_v46 = vmul.f32 %v8623_v34, %v6810_v11  ;;  %v1617_v57 = vadd.f32 %v8627_v30, %v1585_v35  ;;  %v6826_v31 = vsel %vm156_vm10, %v1749_v54, %v1753_v21  ;;  %v1682_v16 = vadd.f32 %v6769_v56, %v1650_v44  ;;  %v8635_v30 = vld [vmem:[#allocation129_spill] sm:$0xff] }
 0x18f   : > { %v1717_v60 = vadd.f32 %v1709_v59, %v1685_v24  ;;  %v1646_v41 = vadd.f32 %v6755_v23, %v1614_v25  ;;  %v1789_v43 = vmul.f32 %v8623_v34, %v6826_v31  ;;  %v8629_v23 = vld [vmem:[#allocation23_spill] sm:$0xff]  ;;  %v1787_v22 = vrot.slane %v6819_v19, %v8594_v5  ;;  %v8632_v59 = vld [vmem:[#allocation90_spill] sm:$0xff] }
 0x190   : > { %v6830_v32 = vadd.f32 %v1793_v46, %v1715_v36  ;;  %v1759_v13 = vpop.permute.xlu1 %1758  ;;  %v1649_v53 = vadd.f32 %v6765_v28, %v1617_v57  ;;  %v1714_v56 = vadd.f32 %v1706_v8, %v1682_v16  ;;  %v1705_v28 = vmul.f32 %v6733_v0, %v1556_v51  ;;  %v8636_v16 = vld [vmem:[#allocation133_spill] sm:$0xff] }
 0x191   : > { %v6839_v42 = vsel %vm156_vm10, %v1755_v27, %v1759_v13  ;;  %v1757_v33 = vpop.permute.xlu0 %1756  ;;  %v6841_v38 = vadd.f32 %v1789_v43, %v1711_v62  ;;  %v1678_v15 = vadd.f32 %v1670_v10, %v1646_v41  ;;  %v1702_v55 = vmul.f32 %v8626_v61, %v6748_v17  ;;  %v8634_v61 = vld [vmem:[#allocation44_spill] sm:$0xff]  ;;  %v8637_v41 = vld [vmem:[#allocation11_spill] sm:$0xff] }
 0x192   : > { %v1794_v39 = vmul.f32 %v8629_v23, %v6839_v42  ;;  %v6847_v7 = vsel %vm156_vm10, %v1753_v21, %v1757_v33  ;;  %v1681_v1 = vadd.f32 %v1673_v63, %v1649_v53  ;;  %v8631_v21 = vld [vmem:[#allocation108_spill] sm:$0xff]  ;;  %v1835_v8 = vrot.slane %v8632_v59, %v8634_v61 }
 0x193   : > { %v1790_v36 = vmul.f32 %v8629_v23, %v6847_v7  ;;  %v1710_v47 = vadd.f32 %v1702_v55, %v1678_v15  ;;  %v8639_v63 = vld [vmem:[#allocation36_spill] sm:$0xff] }
 0x194   : > { %v6856_v58 = vadd.f32 %v1794_v39, %v1716_v26  ;;  %v1763_v62 = vpop.permute.xlu1 %1762  ;;  %v1713_v29 = vadd.f32 %v1705_v28, %v1681_v1  ;;  %v6917_v53 = vrot.slane %v8631_v21, %v8639_v63  ;;  %v1831_v28 = vrot.slane %v8631_v21, %v8634_v61 }
 0x195   : > { %v6858_v9 = vadd.f32 %v1790_v36, %v1712_v37  ;;  %v6862_v3 = vsel %vm156_vm10, %v1759_v13, %v1763_v62  ;;  %v6866_v0 = vsel %vm156_vm10, %v1763_v62, %v1751_v49  ;;  %v1761_v51 = vpop.permute.xlu0 %1760  ;;  %v8630_v37 = vld [vmem:[#allocation21_spill] sm:$0xff]  ;;  %v1843_v62 = vrot.slane %v6819_v19, %v8634_v61 }
 0x196   : > { %v1792_v6 = vmul.f32 %v6752_v4, %v6866_v0  ;;  %v1795_v17 = vmul.f32 %v1787_v22, %v6862_v3  ;;  %v6873_v18 = vsel %vm156_vm10, %v1757_v33, %v1761_v51  ;;  %v6877_v50 = vsel %vm156_vm10, %v1761_v51, %v1749_v54 }
 0x197   : > { %v1788_v49 = vmul.f32 %v6752_v4, %v6877_v50  ;;  %v1791_v52 = vmul.f32 %v1787_v22, %v6873_v18  ;;  %v1919_v24 = vrot.slane %v8631_v21, %v8630_v37  ;;  %v1923_v25 = vrot.slane %v8632_v59, %v8630_v37  ;;  %v8633_v4 = vld [vmem:[#allocation104_spill] sm:$0xff] }
 0x198   : > { %v6879_v40 = vadd.f32 %v1792_v6, %v1714_v56  ;;  %v6881_v20 = vadd.f32 %v1795_v17, %v1717_v60  ;;  %v1807_v44 = vpop.permute.xlu1 %1806  ;;  %v1927_v34 = vrot.slane %v8633_v4, %v8630_v37  ;;  %v6913_v48 = vrot.slane %v6819_v19, %v8630_v37 }
 0x199   : > { %v6886_v12 = vpop.permute.xlu0 %1804  ;;  %v6888_v26 = vadd.f32 %v1788_v49, %v1710_v47  ;;  %v6890_v45 = vadd.f32 %v1791_v52, %v1713_v29  ;;  %v6901_v57 = vmul.f32 %v1919_v24, %v8635_v30  ;;  %v1933_v60 = vmul.f32 %v1923_v25, %v8636_v16  ;;  %v8642_v29 = vld [vmem:[#allocation51_spill] sm:$0xff] }
 0x19a   : > { %v6905_v43 = vmul.f32 %v1927_v34, %v8637_v41  ;;  %v1955_v33 = vrot.slane %v8632_v59, %v8639_v63  ;;  %v6928_v39 = vrot.slane %v8633_v4, %v8639_v63  ;;  %v6932_v22 = vrot.slane %v6819_v19, %v8639_v63  ;;  %v8644_v47 = vld [vmem:[#allocation135_spill] sm:$0xff] }
 0x19b   : > { %v1839_v1 = vrot.slane %v8633_v4, %v8634_v61  ;;  %v1891_v51 = vrot.slane %v8632_v59, %v8642_v29  ;;  %v1937_v49 = vmul.f32 %v1923_v25, %v8644_v47  ;;  %v1895_v52 = vrot.slane %v8633_v4, %v8642_v29  ;;  %v8648_v61 = vld [vmem:[#allocation84_spill] sm:$0xff] }
 0x19c   : > { %v1811_v27 = vpop.permute.xlu1 %1810  ;;  %v6960_v41 = vrot.slane %v8631_v21, %v8642_v29  ;;  %v1939_v63 = vmul.f32 %v6913_v48, %v8648_v61  ;;  %v1970_v5 = vmul.f32 %v6928_v39, %v6862_v3 }
 0x19d   : > { %v1809_v10 = vpop.permute.xlu0 %1808  ;;  %v6909_v13 = vsel %vm213_vm11, %v1807_v44, %v1811_v27 }
 0x19e   : > { %8638 = vst [vmem:[#allocation12_spill] sm:$0xff] %v6909_v13  ;;  %v6924_v56 = vsel %vm213_vm11, %v6886_v12, %v1809_v10  ;;  %v1849_v15 = vmul.f32 %v1835_v8, %v6909_v13  ;;  %v6964_v13 = vrot.slane %v6819_v19, %v8642_v29 }
 0x19f   : > { %8640 = vst [vmem:[#allocation32_spill] sm:$0xff] %v6924_v56  ;;  %v1845_v6 = vmul.f32 %v1835_v8, %v6924_v56  ;;  %v8646_v8 = vld [vmem:[#allocation130_spill] sm:$0xff] }
 0x1a0   : > { %v1815_v54 = vpop.permute.xlu1 %1814  ;;  %v6967_v56 = vmul.f32 %v1919_v24, %v8646_v8  ;;  %v1857_v29 = vadd.f32 %v1849_v15, %v6830_v32  ;;  %v1965_v32 = vmul.f32 %v1955_v33, %v6847_v7 }
 0x1a1   : > { %v1813_v35 = vpop.permute.xlu0 %1812  ;;  %v6943_v55 = vsel %vm213_vm11, %v1811_v27, %v1815_v54  ;;  %v8645_v27 = vld [vmem:[#allocation54_spill] sm:$0xff] }
 0x1a2   : > { %8641 = vst [vmem:[#allocation20_spill] sm:$0xff] %v6943_v55  ;;  %v6952_v17 = vsel %vm213_vm11, %v1809_v10, %v1813_v35  ;;  %v1938_v16 = vmul.f32 %v1927_v34, %v8645_v27  ;;  %v1850_v10 = vmul.f32 %v1839_v1, %v6943_v55  ;;  %v1969_v55 = vmul.f32 %v1955_v33, %v6839_v42 }
 0x1a3   : > { %8643 = vst [vmem:[#allocation26_spill] sm:$0xff] %v6952_v17  ;;  %v1846_v24 = vmul.f32 %v1839_v1, %v6952_v17 }
 0x1a4   : > { %v1819_v46 = vpop.permute.xlu1 %1818  ;;  %v1858_v42 = vadd.f32 %v1850_v10, %v6856_v58 }
 0x1a5   : > { %v1817_v2 = vpop.permute.xlu0 %1816  ;;  %v6972_v25 = vsel %vm213_vm11, %v1815_v54, %v1819_v46  ;;  %v6976_v34 = vsel %vm213_vm11, %v1819_v46, %v1807_v44  ;;  %v1853_v44 = vadd.f32 %v1845_v6, %v6841_v38  ;;  %v1854_v61 = vadd.f32 %v1846_v24, %v6858_v9 }
 0x1a6   : > { %v1848_v1 = vmul.f32 %v1831_v28, %v6976_v34  ;;  %v1851_v15 = vmul.f32 %v1843_v62, %v6972_v25  ;;  %v7013_v3 = vsel %vm213_vm11, %v1813_v35, %v1817_v2  ;;  %v7018_v58 = vsel %vm213_vm11, %v1817_v2, %v6886_v12 }
 0x1a8   : > { %v1863_v23 = vpop.permute.xlu1 %1862  ;;  %v1856_v9 = vadd.f32 %v1848_v1, %v6879_v40  ;;  %v1844_v40 = vmul.f32 %v1831_v28, %v7018_v58  ;;  %v1968_v28 = vmul.f32 %v6917_v53, %v6810_v11  ;;  %v7070_v11 = vld [vmem:[%s7963_s1 + $0xc0] sm:$0x7f] }
 0x1a9   : > { %v6938_v36 = vpop.permute.xlu0 %1860 }
 0x1ac   : > { %v1867_v30 = vpop.permute.xlu1 %1866 }
 0x1ad   : > { %v6980_v47 = vsel %vm270_vm12, %v1863_v23, %v1867_v30  ;;  %v1865_v27 = vpop.permute.xlu0 %1864 }
 0x1ae   : > { %8647 = vst [vmem:[#allocation41_spill] sm:$0xff] %v6980_v47  ;;  %v1905_v8 = vmul.f32 %v1891_v51, %v6980_v47  ;;  %v6988_v54 = vsel %vm270_vm12, %v6938_v36, %v1865_v27 }
 0x1af   : > { %v1901_v46 = vmul.f32 %v1891_v51, %v6988_v54 }
 0x1b0   : > { %v1913_v47 = vadd.f32 %v1905_v8, %v1857_v29  ;;  %v1871_v17 = vpop.permute.xlu1 %1870 }
 0x1b1   : > { %v1909_v19 = vadd.f32 %v1901_v46, %v1853_v44  ;;  %v7003_v38 = vsel %vm270_vm12, %v1867_v30, %v1871_v17  ;;  %v1869_v51 = vpop.permute.xlu0 %1868  ;;  %v1847_v44 = vmul.f32 %v1843_v62, %v7013_v3 }
 0x1b2   : > { %v1945_v7 = vadd.f32 %v1937_v49, %v1913_v47  ;;  %v1906_v33 = vmul.f32 %v1895_v52, %v7003_v38  ;;  %v7009_v29 = vsel %vm270_vm12, %v1865_v27, %v1869_v51  ;;  %v1859_v49 = vadd.f32 %v1851_v15, %v6881_v20 }
 0x1b3   : > { %v1941_v6 = vadd.f32 %v1933_v60, %v1909_v19  ;;  %v1902_v30 = vmul.f32 %v1895_v52, %v7009_v29  ;;  %v1971_v15 = vmul.f32 %v6932_v22, %v6866_v0  ;;  %v7075_v0 = vld [vmem:[%s7963_s1 + $0xc8] sm:$0x7f] }
 0x1b4   : > { %v1914_v10 = vadd.f32 %v1906_v33, %v1858_v42  ;;  %v7023_v47 = vadd.f32 %v1969_v55, %v1945_v7  ;;  %v1875_v27 = vpop.permute.xlu1 %1874  ;;  %v8649_v55 = vld [vmem:[#allocation56_spill] sm:$0xff]  ;;  %v7088_v7 = vld [vmem:[%s7963_s1 + $0xd0] sm:$0x7f]  ;;  %v1855_v33 = vadd.f32 %v1847_v44, %v6890_v45 }
 0x1b5   : > { %v7025_v24 = vadd.f32 %v1965_v32, %v1941_v6  ;;  %v1910_v35 = vadd.f32 %v1902_v30, %v1854_v61  ;;  %v7029_v8 = vsel %vm270_vm12, %v1871_v17, %v1875_v27  ;;  %v7033_v19 = vsel %vm270_vm12, %v1875_v27, %v1863_v23  ;;  %v1873_v12 = vpop.permute.xlu0 %1872 }
 0x1b6   : > { %v1946_v2 = vadd.f32 %v1938_v16, %v1914_v10  ;;  %v1904_v20 = vmul.f32 %v6960_v41, %v7033_v19  ;;  %v1907_v60 = vmul.f32 %v6964_v13, %v7029_v8  ;;  %v1935_v52 = vmul.f32 %v6913_v48, %v8649_v55  ;;  %v8654_v55 = vld [vmem:[#allocation17_spill] sm:$0xff] }
 0x1b7   : > { %v1966_v17 = vmul.f32 %v6928_v39, %v6873_v18  ;;  %v1942_v23 = vadd.f32 %v6905_v43, %v1910_v35  ;;  %v7058_v18 = vsel %vm270_vm12, %v1869_v51, %v1873_v12  ;;  %v7063_v43 = vsel %vm270_vm12, %v1873_v12, %v6938_v36 }
 0x1b8   : > { %v7048_v16 = vadd.f32 %v1970_v5, %v1946_v2  ;;  %v1912_v46 = vadd.f32 %v1904_v20, %v1856_v9  ;;  %v1915_v32 = vadd.f32 %v1907_v60, %v1859_v49  ;;  %v7050_v1 = vpop.permute.xlu1 %2076  ;;  %v1852_v39 = vadd.f32 %v1844_v40, %v6888_v26  ;;  %v8650_v40 = vld [vmem:[#allocation35_spill] sm:$0xff]  ;;  %v8652_v20 = vld [vmem:[#allocation14_spill] sm:$0xff] }
 0x1b9   : > { %v7054_v48 = vadd.f32 %v1966_v17, %v1942_v23  ;;  %v7065_v5 = vpop.permute.xlu0 %2074  ;;  %v1900_v36 = vmul.f32 %v6960_v41, %v7063_v43  ;;  %v2245_v51 = vrot.slane %v7070_v11, %v8630_v37  ;;  %v2249_v61 = vrot.slane %v7075_v0, %v8630_v37 }
 0x1ba   : > { %v1944_v62 = vadd.f32 %v6967_v56, %v1912_v46  ;;  %v1947_v42 = vadd.f32 %v1939_v63, %v1915_v32  ;;  %v1903_v26 = vmul.f32 %v6964_v13, %v7058_v18  ;;  %v2253_v63 = vrot.slane %v7088_v7, %v8630_v37  ;;  %v3725_v56 = vld [vmem:[%s7963_s1 + $0xd8] sm:$0x7f]  ;;  %v8659_v46 = vld [vmem:[#allocation29_spill] sm:$0xff] }
 0x1bb   : > { %v1908_v30 = vadd.f32 %v1900_v36, %v1852_v39  ;;  %v2257_v49 = vrot.slane %v3725_v56, %v8630_v37  ;;  %v1964_v13 = vmul.f32 %v6917_v53, %v6826_v31  ;;  %v1967_v35 = vmul.f32 %v6932_v22, %v6877_v50  ;;  %v8656_v31 = vld [vmem:[#allocation99_spill] sm:$0xff] }
 0x1bc   : > { %v7098_v41 = vadd.f32 %v1968_v28, %v1944_v62  ;;  %v7100_v6 = vadd.f32 %v1971_v15, %v1947_v42  ;;  %v7102_v9 = vpop.permute.xlu1 %2080  ;;  %v1911_v45 = vadd.f32 %v1903_v26, %v1855_v33  ;;  %v7113_v2 = vmul.f32 %v2245_v51, %v8650_v40  ;;  %v8660_v15 = vld [vmem:[#allocation52_spill] sm:$0xff] }
 0x1bd   : > { %v7105_v10 = vpop.permute.xlu0 %2078  ;;  %v1940_v27 = vadd.f32 %v6901_v57, %v1908_v30  ;;  %v7116_v60 = vmul.f32 %v2249_v61, %v8652_v20  ;;  %v7119_v37 = vmul.f32 %v2253_v63, %v8654_v55  ;;  %v7126_v53 = vmul.f32 %v2257_v49, %v8656_v31  ;;  %v8658_v57 = vld [vmem:[#allocation45_spill] sm:$0xff]  ;;  %v8661_v33 = vld [vmem:[#allocation24_spill] sm:$0xff] }
 0x1be   : > { %v1943_v12 = vadd.f32 %v1935_v52, %v1911_v45  ;;  %8651 = vst [vmem:[#allocation31_spill] sm:$0xff] %v7113_v2  ;;  %v1983_v50 = vrot.slane %v8631_v21, %v8658_v57  ;;  %v1987_v22 = vrot.slane %v8632_v59, %v8658_v57  ;;  %v1991_v28 = vrot.slane %v8633_v4, %v8658_v57  ;;  %v8662_v30 = vld [vmem:[#allocation36_spill] sm:$0xff] }
 0x1bf   : > { %8653 = vst [vmem:[#allocation30_spill] sm:$0xff] %v7116_v60  ;;  %8655 = vst [vmem:[#allocation10_spill] sm:$0xff] %v7119_v37  ;;  %v7121_v17 = vadd.f32 %v1964_v13, %v1940_v27  ;;  %v1995_v32 = vrot.slane %v8659_v46, %v8658_v57  ;;  %v2015_v39 = vrot.slane %v8631_v21, %v8660_v15  ;;  %v8665_v20 = vld [vmem:[#allocation44_spill] sm:$0xff]  ;;  %v8673_v60 = vld [vmem:[#allocation51_spill] sm:$0xff] }
 0x1c0   : > { %v7123_v44 = vpop.permute.xlu1 %2084  ;;  %8657 = vst [vmem:[#allocation28_spill] sm:$0xff] %v7126_v53  ;;  %v7132_v52 = vadd.f32 %v1967_v35, %v1943_v12  ;;  %v2019_v62 = vrot.slane %v8632_v59, %v8660_v15  ;;  %v2023_v42 = vrot.slane %v8633_v4, %v8660_v15  ;;  %v7148_v36 = vrot.slane %v8659_v46, %v8660_v15 }
 0x1c1   : > { %v2105_v26 = vrot.slane %v7075_v0, %v8661_v33  ;;  %v7154_v45 = vrot.slane %v7070_v11, %v8662_v30  ;;  %v7158_v21 = vrot.slane %v7088_v7, %v8661_v33  ;;  %v7162_v59 = vrot.slane %v7075_v0, %v8662_v30 }
 0x1c2   : > { %v7134_v23 = vpop.permute.xlu0 %2082  ;;  %v7166_v4 = vrot.slane %v7070_v11, %v8661_v33  ;;  %v7169_v13 = vrot.slane %v3725_v56, %v8661_v33  ;;  %v7175_v35 = vrot.slane %v7088_v7, %v8662_v30  ;;  %v7178_v12 = vrot.slane %v3725_v56, %v8662_v30 }
 0x1c3   : > { %v7184_v55 = vrot.slane %v7075_v0, %v8665_v20  ;;  %v7188_v31 = vrot.slane %v7070_v11, %v8658_v57  ;;  %v7192_v46 = vrot.slane %v7088_v7, %v8665_v20  ;;  %v7196_v33 = vrot.slane %v7075_v0, %v8658_v57 }
 0x1c4   : > { %v7171_v27 = vpop.permute.xlu1 %2088  ;;  %8663 = vst [vmem:[#allocation13_spill] sm:$0xff] %v7175_v35  ;;  %8664 = vst [vmem:[#allocation33_spill] sm:$0xff] %v7178_v12  ;;  %v7200_v30 = vrot.slane %v7070_v11, %v8665_v20  ;;  %v7203_v53 = vrot.slane %v3725_v56, %v8665_v20  ;;  %v7207_v2 = vrot.slane %v7088_v7, %v8658_v57 }
 0x1c5   : > { %8666 = vst [vmem:[#allocation78_spill] sm:$0xff] %v7188_v31  ;;  %8667 = vst [vmem:[#allocation76_spill] sm:$0xff] %v7192_v46  ;;  %v7210_v37 = vrot.slane %v3725_v56, %v8658_v57  ;;  %v7214_v31 = vrot.slane %v7075_v0, %v8673_v60  ;;  %v8675_v46 = vld [vmem:[#allocation22_spill] sm:$0xff]  ;;  %v7223_v20 = vrot.slane %v7070_v11, %v8660_v15 }
 0x1c6   : > { %v7180_v40 = vpop.permute.xlu0 %2086  ;;  %8668 = vst [vmem:[#allocation42_spill] sm:$0xff] %v7196_v33  ;;  %8669 = vst [vmem:[#allocation43_spill] sm:$0xff] %v7200_v30  ;;  %v7217_v33 = vmul.f32 %v2249_v61, %v8675_v46  ;;  %v7240_v61 = vrot.slane %v7070_v11, %v8673_v60  ;;  %v7243_v46 = vrot.slane %v3725_v56, %v8673_v60 }
 0x1c7   : > { %8670 = vst [vmem:[#allocation61_spill] sm:$0xff] %v7203_v53  ;;  %8671 = vst [vmem:[#allocation81_spill] sm:$0xff] %v7207_v2  ;;  %v7227_v53 = vrot.slane %v7088_v7, %v8673_v60  ;;  %v8679_v2 = vld [vmem:[#allocation97_spill] sm:$0xff]  ;;  %v7258_v11 = vrot.slane %v3725_v56, %v8660_v15 }
 0x1c8   : > { %8672 = vst [vmem:[#allocation82_spill] sm:$0xff] %v7210_v37  ;;  %8674 = vst [vmem:[#allocation62_spill] sm:$0xff] %v7214_v31  ;;  %v7219_v12 = vpop.permute.xlu1 %2132  ;;  %v7230_v57 = vmul.f32 %v2253_v63, %v8679_v2  ;;  %v7234_v37 = vrot.slane %v7075_v0, %v8660_v15  ;;  %v8687_v63 = vld [vmem:[#allocation12_spill] sm:$0xff] }
 0x1c9   : > { %8676 = vst [vmem:[#allocation85_spill] sm:$0xff] %v7217_v33  ;;  %8677 = vst [vmem:[#allocation75_spill] sm:$0xff] %v7223_v20  ;;  %v8684_v20 = vld [vmem:[#allocation83_spill] sm:$0xff]  ;;  %v2000_v2 = vmul.f32 %v1983_v50, %v8687_v63 }
 0x1ca   : > { %8678 = vst [vmem:[#allocation87_spill] sm:$0xff] %v7227_v53  ;;  %8680 = vst [vmem:[#allocation65_spill] sm:$0xff] %v7230_v57  ;;  %v7236_v31 = vpop.permute.xlu0 %2130  ;;  %v7246_v33 = vmul.f32 %v2245_v51, %v8684_v20  ;;  %v8685_v53 = vld [vmem:[#allocation102_spill] sm:$0xff]  ;;  %v8688_v57 = vld [vmem:[#allocation20_spill] sm:$0xff]  ;;  %v2002_v51 = vmul.f32 %v1991_v28, %v6972_v25  ;;  %v1999_v20 = vmul.f32 %v1995_v32, %v7018_v58 }
 0x1cb   : > { %8681 = vst [vmem:[#allocation40_spill] sm:$0xff] %v7234_v37  ;;  %8682 = vst [vmem:[#allocation88_spill] sm:$0xff] %v7240_v61  ;;  %v7249_v30 = vmul.f32 %v2257_v49, %v8685_v53  ;;  %v2001_v0 = vmul.f32 %v1987_v22, %v8688_v57  ;;  %v7255_v37 = vrot.slane %v7088_v7, %v8660_v15  ;;  %v8689_v61 = vld [vmem:[#allocation32_spill] sm:$0xff]  ;;  %v8691_v57 = vld [vmem:[#allocation41_spill] sm:$0xff] }
 0x1cc   : > { %8683 = vst [vmem:[#allocation91_spill] sm:$0xff] %v7243_v46  ;;  %v1996_v60 = vmul.f32 %v1983_v50, %v8689_v61  ;;  %v8690_v46 = vld [vmem:[#allocation26_spill] sm:$0xff]  ;;  %v2003_v49 = vmul.f32 %v1995_v32, %v6976_v34  ;;  %v1998_v53 = vmul.f32 %v1991_v28, %v7013_v3  ;;  %v2032_v63 = vmul.f32 %v2015_v39, %v8691_v57 }
 0x1cd   : > { %8686 = vst [vmem:[#allocation92_spill] sm:$0xff] %v7249_v30  ;;  %v1997_v35 = vmul.f32 %v1987_v22, %v8690_v46  ;;  %v2009_v7 = vadd.f32 %v2001_v0, %v7023_v47  ;;  %v2137_v30 = vpop.permute.xlu1 %2136  ;;  %v2010_v15 = vadd.f32 %v2002_v51, %v7048_v16  ;;  %v2095_v25 = vsel %vm156_vm10, %v7050_v1, %v7102_v9 }
 0x1ce   : > { %v7278_v34 = vsel %vm156_vm10, %v7065_v5, %v7105_v10  ;;  %v2135_v3 = vpop.permute.xlu0 %2134  ;;  %v2028_v58 = vmul.f32 %v2015_v39, %v6988_v54  ;;  %v2033_v47 = vmul.f32 %v2019_v62, %v7003_v38  ;;  %v2006_v16 = vadd.f32 %v1998_v53, %v7054_v48 }
 0x1cf   : > { %v2005_v56 = vadd.f32 %v1997_v35, %v7025_v24  ;;  %v2011_v24 = vadd.f32 %v2003_v49, %v7100_v6  ;;  %v2029_v50 = vmul.f32 %v2019_v62, %v7009_v29  ;;  %v2034_v22 = vmul.f32 %v2023_v42, %v7029_v8 }
 0x1d0   : > { %v2035_v28 = vmul.f32 %v7148_v36, %v7033_v19  ;;  %v2030_v32 = vmul.f32 %v2023_v42, %v7058_v18  ;;  %v2119_v35 = vmul.f32 %v2105_v26, %v2095_v25  ;;  %v2115_v61 = vmul.f32 %v2105_v26, %v7278_v34 }
 0x1d1   : > { %v2093_v54 = vsel %vm156_vm10, %v7102_v9, %v7123_v44  ;;  %v2008_v38 = vadd.f32 %v2000_v2, %v7098_v41  ;;  %v2141_v48 = vpop.permute.xlu1 %2140  ;;  %v2041_v6 = vadd.f32 %v2033_v47, %v2009_v7  ;;  %v2037_v29 = vadd.f32 %v2029_v50, %v2005_v56  ;;  %v8692_v47 = vld [vmem:[#allocation13_spill] sm:$0xff] }
 0x1d2   : > { %v2042_v39 = vadd.f32 %v2034_v22, %v2010_v15  ;;  %v2031_v8 = vmul.f32 %v7148_v36, %v7063_v43  ;;  %v7297_v19 = vpop.permute.xlu0 %2138  ;;  %v2043_v18 = vadd.f32 %v2035_v28, %v2011_v24  ;;  %v2038_v62 = vadd.f32 %v2030_v32, %v2006_v16  ;;  %v8694_v32 = vld [vmem:[#allocation76_spill] sm:$0xff] }
 0x1d3   : > { %v7300_v42 = vmul.f32 %v7154_v45, %v2095_v25  ;;  %v2092_v9 = vsel %vm156_vm10, %v7105_v10, %v7134_v23  ;;  %v2007_v41 = vadd.f32 %v1999_v20, %v7132_v52  ;;  %v2120_v26 = vmul.f32 %v7158_v21, %v2093_v54 }
 0x1d4   : > { %v2091_v43 = vsel %vm156_vm10, %v7123_v44, %v7171_v27  ;;  %v2097_v36 = vsel %vm156_vm10, %v7171_v27, %v7050_v1  ;;  %v2127_v46 = vadd.f32 %v2119_v35, %v2041_v6  ;;  %v2123_v2 = vadd.f32 %v2115_v61, %v2037_v29  ;;  %v8695_v29 = vld [vmem:[#allocation78_spill] sm:$0xff] }
 0x1d5   : > { %v2040_v0 = vadd.f32 %v2032_v63, %v2008_v38  ;;  %v7320_v10 = vsel %vm156_vm10, %v7180_v40, %v7065_v5  ;;  %v2145_v52 = vpop.permute.xlu1 %2144  ;;  %v7323_v51 = vmul.f32 %v7162_v59, %v2093_v54  ;;  %v2116_v44 = vmul.f32 %v7158_v21, %v2092_v9 }
 0x1d6   : > { %v2090_v1 = vsel %vm156_vm10, %v7134_v23, %v7180_v40  ;;  %v2151_v27 = vsel %vm213_vm11, %v7219_v12, %v2137_v30  ;;  %v2143_v49 = vpop.permute.xlu0 %2142  ;;  %v2118_v53 = vmul.f32 %v7166_v4, %v2097_v36  ;;  %v2121_v5 = vmul.f32 %v7169_v13, %v2091_v43 }
 0x1d7   : > { %v2004_v20 = vadd.f32 %v1996_v60, %v7121_v17  ;;  %v7339_v21 = vsel %vm213_vm11, %v7236_v31, %v2135_v3  ;;  %v2039_v57 = vadd.f32 %v2031_v8, %v2007_v41  ;;  %v2128_v63 = vadd.f32 %v2120_v26, %v2042_v39  ;;  %v8697_v41 = vld [vmem:[#allocation42_spill] sm:$0xff] }
 0x1d8   : > { %v2291_v23 = vmul.f32 %v7162_v59, %v2092_v9  ;;  %v2114_v40 = vmul.f32 %v7166_v4, %v7320_v10  ;;  %v2117_v7 = vmul.f32 %v7169_v13, %v2090_v1  ;;  %v2175_v56 = vmul.f32 %v7184_v55, %v2151_v27  ;;  %v8693_v59 = vld [vmem:[#allocation33_spill] sm:$0xff] }
 0x1d9   : > { %v2149_v15 = vsel %vm213_vm11, %v2137_v30, %v2141_v48  ;;  %v2148_v17 = vsel %vm213_vm11, %v2135_v3, %v7297_v19  ;;  %v2189_v60 = vpop.permute.xlu1 %2188  ;;  %v2124_v25 = vadd.f32 %v2116_v44, %v2038_v62  ;;  %v7352_v24 = vmul.f32 %v8692_v47, %v2091_v43  ;;  %v8698_v43 = vld [vmem:[#allocation61_spill] sm:$0xff] }
 0x1da   : > { %v7355_v16 = vmul.f32 %v8693_v59, %v2097_v36  ;;  %v2171_v4 = vmul.f32 %v7184_v55, %v7339_v21  ;;  %v7359_v13 = vpop.permute.xlu0 %2186  ;;  %v2126_v50 = vadd.f32 %v2118_v53, %v2040_v0  ;;  %v2129_v22 = vadd.f32 %v2121_v5, %v2043_v18 }
 0x1db   : > { %v2036_v30 = vadd.f32 %v2028_v58, %v2004_v20  ;;  %v2153_v3 = vsel %vm213_vm11, %v2145_v52, %v7219_v12  ;;  %v7365_v28 = vmul.f32 %v8692_v47, %v2090_v1  ;;  %v2176_v35 = vmul.f32 %v8694_v32, %v2149_v15  ;;  %v8696_v12 = vld [vmem:[#allocation43_spill] sm:$0xff] }
 0x1dc   : > { %v2172_v61 = vmul.f32 %v8694_v32, %v2148_v17  ;;  %v2147_v54 = vsel %vm213_vm11, %v2141_v48, %v2145_v52  ;;  %v7371_v38 = vadd.f32 %v2117_v7, %v2039_v57  ;;  %v2183_v6 = vadd.f32 %v2175_v56, %v2127_v46  ;;  %v8699_v46 = vld [vmem:[#allocation62_spill] sm:$0xff]  ;;  %v8703_v32 = vld [vmem:[#allocation87_spill] sm:$0xff] }
 0x1dd   : > { %v2122_v55 = vadd.f32 %v2114_v40, %v2036_v30  ;;  %v7374_v58 = vmul.f32 %v8695_v29, %v2151_v27  ;;  %v2193_v39 = vpop.permute.xlu1 %2192  ;;  %v2179_v8 = vadd.f32 %v2171_v4, %v2123_v2  ;;  %v2174_v18 = vmul.f32 %v8696_v12, %v2153_v3  ;;  %v8700_v27 = vld [vmem:[#allocation81_spill] sm:$0xff]  ;;  %v8701_v56 = vld [vmem:[#allocation82_spill] sm:$0xff] }
 0x1de   : > { %v7380_v62 = vsel %vm213_vm11, %v2143_v49, %v7236_v31  ;;  %v7384_v9 = vsel %vm270_vm12, %v2189_v60, %v2193_v39  ;;  %v2191_v48 = vpop.permute.xlu0 %2190  ;;  %v2327_v26 = vmul.f32 %v8697_v41, %v2149_v15  ;;  %v2177_v36 = vmul.f32 %v8698_v43, %v2147_v54  ;;  %v8702_v4 = vld [vmem:[#allocation85_spill] sm:$0xff] }
 0x1df   : > { %v2231_v0 = vmul.f32 %v8699_v46, %v7384_v9  ;;  %v7393_v2 = vsel %vm270_vm12, %v7359_v13, %v2191_v48  ;;  %v2184_v52 = vadd.f32 %v2176_v35, %v2128_v63  ;;  %v2180_v31 = vadd.f32 %v2172_v61, %v2124_v25 }
 0x1e0   : > { %v2323_v44 = vmul.f32 %v8697_v41, %v2148_v17  ;;  %v2227_v1 = vmul.f32 %v8699_v46, %v7393_v2  ;;  %v2328_v53 = vmul.f32 %v8700_v27, %v2147_v54  ;;  %v2146_v5 = vsel %vm213_vm11, %v7297_v19, %v2143_v49  ;;  %v8706_v46 = vld [vmem:[#allocation65_spill] sm:$0xff] }
 0x1e1   : > { %v2170_v20 = vmul.f32 %v8696_v12, %v7380_v62  ;;  %v2239_v57 = vadd.f32 %v2231_v0, %v2183_v6  ;;  %v2197_v40 = vpop.permute.xlu1 %2196  ;;  %v2182_v7 = vadd.f32 %v2174_v18, %v2126_v50  ;;  %v2329_v63 = vmul.f32 %v8701_v56, %v2153_v3  ;;  %v8704_v50 = vld [vmem:[#allocation30_spill] sm:$0xff] }
 0x1e2   : > { %v2235_v15 = vadd.f32 %v2227_v1, %v2179_v8  ;;  %v2205_v17 = vsel %vm270_vm12, %v2193_v39, %v2197_v40  ;;  %v2195_v25 = vpop.permute.xlu0 %2194  ;;  %v2185_v47 = vadd.f32 %v2177_v36, %v2129_v22  ;;  %v2173_v49 = vmul.f32 %v8698_v43, %v2146_v5  ;;  %v8705_v22 = vld [vmem:[#allocation40_spill] sm:$0xff] }
 0x1e3   : > { %v2271_v30 = vadd.f32 %v8702_v4, %v2239_v57  ;;  %v2232_v35 = vmul.f32 %v8703_v32, %v2205_v17  ;;  %v2204_v19 = vsel %vm270_vm12, %v2191_v48, %v2195_v25  ;;  %v2324_v61 = vmul.f32 %v8700_v27, %v2146_v5  ;;  %v8707_v27 = vld [vmem:[#allocation88_spill] sm:$0xff]  ;;  %v8709_v57 = vld [vmem:[#allocation10_spill] sm:$0xff] }
 0x1e4   : > { %v2267_v54 = vadd.f32 %v8704_v50, %v2235_v15  ;;  %v2228_v3 = vmul.f32 %v8703_v32, %v2204_v19  ;;  %v2178_v6 = vadd.f32 %v2170_v20, %v2122_v55  ;;  %v2359_v12 = vmul.f32 %v8705_v22, %v2205_v17 }
 0x1e5   : > { %v2240_v8 = vadd.f32 %v2232_v35, %v2184_v52  ;;  %v2303_v39 = vadd.f32 %v7323_v51, %v2271_v30  ;;  %v2201_v18 = vpop.permute.xlu1 %2200  ;;  %v8708_v52 = vld [vmem:[#allocation91_spill] sm:$0xff] }
 0x1e6   : > { %v2299_v41 = vadd.f32 %v2291_v23, %v2267_v54  ;;  %v2236_v36 = vadd.f32 %v2228_v3, %v2180_v31  ;;  %v2203_v48 = vsel %vm270_vm12, %v2197_v40, %v2201_v18  ;;  %v2209_v43 = vsel %vm270_vm12, %v2201_v18, %v2189_v60  ;;  %v2199_v51 = vpop.permute.xlu0 %2198 }
 0x1e7   : > { %v2272_v0 = vadd.f32 %v8706_v46, %v2240_v8  ;;  %v2335_v1 = vadd.f32 %v2327_v26, %v2303_v39  ;;  %v2230_v55 = vmul.f32 %v8707_v27, %v2209_v43  ;;  %v2233_v5 = vmul.f32 %v8708_v52, %v2203_v48  ;;  %v8711_v8 = vld [vmem:[#allocation75_spill] sm:$0xff] }
 0x1e8   : > { %v2331_v20 = vadd.f32 %v2323_v44, %v2299_v41  ;;  %v2268_v15 = vadd.f32 %v8709_v57, %v2236_v36  ;;  %v2355_v23 = vmul.f32 %v8705_v22, %v2204_v19  ;;  %v2360_v31 = vmul.f32 %v7255_v37, %v2203_v48  ;;  %v3931_v57 = vld [vmem:[%s7964_s2 + $0x60] ss:$16 sps:$4 sm:$0xff] (%p91_p0)  }
 0x1e9   : > { %v2367_v40 = vadd.f32 %v2359_v12, %v2335_v1  ;;  %v2304_v17 = vadd.f32 %v7352_v24, %v2272_v0  ;;  %v2238_v60 = vadd.f32 %v2230_v55, %v2182_v7  ;;  %v2241_v4 = vadd.f32 %v2233_v5, %v2185_v47  ;;  %v8710_v7 = vld [vmem:[#allocation92_spill] sm:$0xff]  ;;  %v3919_v0 = vld [vmem:[%s7964_s2 + $0x20] ss:$16 sps:$4 sm:$0xff] (%p91_p0)  }
 0x1ea   : > { %v2363_v30 = vadd.f32 %v2355_v23, %v2331_v20  ;;  %v2300_v26 = vadd.f32 %v7365_v28, %v2268_v15  ;;  %v2202_v32 = vsel %vm270_vm12, %v2195_v25, %v2199_v51  ;;  %v2208_v44 = vsel %vm270_vm12, %v2199_v51, %v7359_v13  ;;  %v8713_v12 = vld [vmem:[#allocation28_spill] sm:$0xff]  ;;  %v3927_v51 = vld [vmem:[%s7964_s2 + $0x64] ss:$16 sps:$4 sm:$0xff] (%p91_p0)  }
 0x1eb   : > { %2377 = vst [vmem:[%s7436_s18 + $0x28] sm:$0xff] %v2367_v40  ;;  %v2336_v35 = vadd.f32 %v2328_v53, %v2304_v17  ;;  %v2270_v24 = vadd.f32 %v7246_v33, %v2238_v60  ;;  %v2273_v47 = vadd.f32 %v8710_v7, %v2241_v4  ;;  %v2226_v28 = vmul.f32 %v8707_v27, %v2208_v44  ;;  %v3920_v1 = vld [vmem:[%s7964_s2 + $0x28] ss:$16 sps:$4 sm:$0xff] (%p91_p0)   ;;  %v3921_v27 = vld [vmem:[%s7964_s2 + $0x44] ss:$16 sps:$4 sm:$0xff] (%p91_p0)  }
 0x1ec   : > { %v2181_v19 = vadd.f32 %v2173_v49, %v7371_v38  ;;  %2373 = vst [vmem:[%s7436_s18 + $0x8] sm:$0xff] %v2363_v30  ;;  %v2332_v25 = vadd.f32 %v2324_v61, %v2300_v26  ;;  %v2229_v14 = vmul.f32 %v8708_v52, %v2202_v32  ;;  %v2356_v13 = vmul.f32 %v7255_v37, %v2202_v32  ;;  %v3923_v55 = vld [vmem:[%s7964_s2 + $0x4c] ss:$16 sps:$4 sm:$0xff] (%p91_p0)   ;;  %v3925_v52 = vld [vmem:[%s7964_s2 + $0x40] ss:$16 sps:$4 sm:$0xff] (%p91_p0)  }
 0x1ed   : > { %v2302_v50 = vadd.f32 %v7300_v42, %v2270_v24  ;;  %v2305_v53 = vadd.f32 %v7355_v16, %v2273_v47  ;;  %v2368_v54 = vadd.f32 %v2360_v31, %v2336_v35  ;;  %v2234_v33 = vadd.f32 %v2226_v28, %v2178_v6  ;;  %v8712_v42 = vld [vmem:[#allocation31_spill] sm:$0xff]  ;;  %v3926_v5 = vld [vmem:[%s7964_s2 + $0x48] ss:$16 sps:$4 sm:$0xff] (%p91_p0)   ;;  %v3929_v20 = vld [vmem:[%s7964_s2 + $0x6c] ss:$16 sps:$4 sm:$0xff] (%p91_p0)  }
 0x1ee   : > { %v2290_v3 = vmul.f32 %v7154_v45, %v7278_v34  ;;  %v2358_v38 = vmul.f32 %v8711_v8, %v7384_v9  ;;  %v2237_v49 = vadd.f32 %v2229_v14, %v2181_v19  ;;  %v2364_v39 = vadd.f32 %v2356_v13, %v2332_v25  ;;  %v3932_v15 = vld [vmem:[%s7964_s2 + $0x68] ss:$16 sps:$4 sm:$0xff] (%p91_p0)   ;;  %v3933_v23 = vld [vmem:[%s7964_s2 + $0x84] ss:$16 sps:$4 sm:$0xff] (%p91_p0)   ;;  %v3935_v31 = vld [vmem:[%s7964_s2 + $0x8c] ss:$16 sps:$4 sm:$0xff] (%p91_p0)  }
 0x1ef   : > { %v2334_v61 = vadd.f32 %v7374_v58, %v2302_v50  ;;  %v2337_v37 = vadd.f32 %v2329_v63, %v2305_v53  ;;  %v2361_v22 = vmul.f32 %v7258_v11, %v2209_v43  ;;  %2378 = vst [vmem:[%s7436_s18 + $0x30] sm:$0xff] %v2368_v54  ;;  %v2266_v16 = vadd.f32 %v8712_v42, %v2234_v33  ;;  %v3937_v40 = vld [vmem:[%s7964_s2 + $0x80] ss:$16 sps:$4 sm:$0xff] (%p91_p0)   ;;  %v3938_v17 = vld [vmem:[%s7964_s2 + $0x88] ss:$16 sps:$4 sm:$0xff] (%p91_p0)  }
 0x1f0   : > { %v2293_v6 = vmul.f32 %v8693_v59, %v7320_v10  ;;  %v2269_v45 = vadd.f32 %v8713_v12, %v2237_v49  ;;  %2374 = vst [vmem:[%s7436_s18 + $0x10] sm:$0xff] %v2364_v39  ;;  %v2322_v34 = vmul.f32 %v8695_v29, %v7339_v21  ;;  %v2325_v63 = vmul.f32 %v8701_v56, %v7380_v62  ;;  %v3909_v21 = vld [vmem:[%s7964_s2 + $0x4] ss:$16 sps:$4 sm:$0xff] (%p91_p0)   ;;  %v3911_v29 = vld [vmem:[%s7964_s2 + $0xc] ss:$16 sps:$4 sm:$0xff] (%p91_p0)  }
 0x1f1   : > { %v2366_v9 = vadd.f32 %v2358_v38, %v2334_v61  ;;  %v2369_v58 = vadd.f32 %v2361_v22, %v2337_v37  ;;  %v2298_v18 = vadd.f32 %v2290_v3, %v2266_v16  ;;  %v2354_v36 = vmul.f32 %v8711_v8, %v7393_v2  ;;  %3196 = vmatprep.subr.bf16.mxu0 (%p91_p0), %v3909_v21  ;;  %v3914_v62 = vld [vmem:[%s7964_s2 + $0x8] ss:$16 sps:$4 sm:$0xff] (%p91_p0)   ;;  %v3915_v2 = vld [vmem:[%s7964_s2 + $0x24] ss:$16 sps:$4 sm:$0xff] (%p91_p0)   ;;  %v3917_v56 = vld [vmem:[%s7964_s2 + $0x2c] ss:$16 sps:$4 sm:$0xff] (%p91_p0)  }
 0x1f2   : > { %v2301_v41 = vadd.f32 %v2293_v6, %v2269_v45  ;;  %v2357_v48 = vmul.f32 %v7258_v11, %v2208_v44  ;;  %93 = sbr.rel (!%p91_p0) target bundleno = 13 (0xd), region = 47  ;;  %v3913_v11 = vld [vmem:[%s7964_s2] ss:$16 sps:$4 sm:$0xff] (%p91_p0)   ;;  %3342 = vmatprep.subr.bf16.mxu1 (%p91_p0), %v3911_v29  ;;  %v3939_v60 = vld [vmem:[%s7964_s2 + $0xa4] ss:$16 sps:$4 sm:$0xff] (%p91_p0)  }
 0x1f3   : > { %2376 = vst [vmem:[%s7436_s18 + $0x20] sm:$0xff] %v2366_v9  ;;  %2379 = vst [vmem:[%s7436_s18 + $0x38] sm:$0xff] %v2369_v58  ;;  %v2330_v10 = vadd.f32 %v2322_v34, %v2298_v18  ;;  %3197 = vmatpush1.bf16.msra.mxu0 (%p91_p0), %v3913_v11  ;;  %3343 = vmatpush1.bf16.msra.mxu1 (%p91_p0), %v3914_v62  ;;  %v3941_v4 = vld [vmem:[%s7964_s2 + $0xac] ss:$16 sps:$4 sm:$0xff] (%p91_p0)   ;;  %v3943_v30 = vld [vmem:[%s7964_s2 + $0xa0] ss:$16 sps:$4 sm:$0xff] (%p91_p0)  }
 0x1f4   : > { %v2333_v59 = vadd.f32 %v2325_v63, %v2301_v41  ;;  %3198 = vmatprep.subr.bf16.mxu0 (%p91_p0), %v3915_v2  ;;  %3344 = vmatprep.subr.bf16.mxu1 (%p91_p0), %v3917_v56  ;;  %v3944_v26 = vld [vmem:[%s7964_s2 + $0xa8] ss:$16 sps:$4 sm:$0xff] (%p91_p0)   ;;  %v3945_v32 = vld [vmem:[%s7964_s2 + $0xc4] ss:$16 sps:$4 sm:$0xff] (%p91_p0)   ;;  %v3947_v44 = vld [vmem:[%s7964_s2 + $0xcc] ss:$16 sps:$4 sm:$0xff] (%p91_p0)  }
 0x1f5   : > { %v2362_v43 = vadd.f32 %v2354_v36, %v2330_v10  ;;  %v3949_v35 = vld [vmem:[%s7964_s2 + $0xc0] ss:$16 sps:$4 sm:$0xff] (%p91_p0)   ;;  %v3950_v24 = vld [vmem:[%s7964_s2 + $0xc8] ss:$16 sps:$4 sm:$0xff] (%p91_p0)   ;;  %v3951_v7 = vld [vmem:[%s7964_s2 + $0xe4] ss:$16 sps:$4 sm:$0xff] (%p91_p0)  }
 0x1f6   : > { %v2365_v46 = vadd.f32 %v2357_v48, %v2333_v59  ;;  %v3953_v47 = vld [vmem:[%s7964_s2 + $0xec] ss:$16 sps:$4 sm:$0xff] (%p91_p0)   ;;  %v3955_v28 = vld [vmem:[%s7964_s2 + $0xe0] ss:$16 sps:$4 sm:$0xff] (%p91_p0)   ;;  %v3956_v19 = vld [vmem:[%s7964_s2 + $0xe8] ss:$16 sps:$4 sm:$0xff] (%p91_p0)  }
 0x1f7   : > { %2372 = vst [vmem:[%s7436_s18] sm:$0xff] %v2362_v43  ;;  %3199 = vmatpush1.bf16.msra.mxu0 (%p91_p0), %v3919_v0  ;;  %3345 = vmatpush1.bf16.msra.mxu1 (%p91_p0), %v3920_v1  ;;  %v3957_v25 = vld [vmem:[%s7964_s2 + $0x104] ss:$16 sps:$4 sm:$0xff] (%p91_p0)   ;;  %v3959_v14 = vld [vmem:[%s7964_s2 + $0x10c] ss:$16 sps:$4 sm:$0xff] (%p91_p0)   ;;  %v3961_v13 = vld [vmem:[%s7964_s2 + $0x100] ss:$16 sps:$4 sm:$0xff] (%p91_p0)  }
 0x1f8   : > { %2375 = vst [vmem:[%s7436_s18 + $0x18] sm:$0xff] %v2365_v46  ;;  %3200 = vmatprep.subr.bf16.mxu0 (%p91_p0), %v3921_v27  ;;  %3346 = vmatprep.subr.bf16.mxu1 (%p91_p0), %v3923_v55  ;;  %v3962_v50 = vld [vmem:[%s7964_s2 + $0x108] ss:$16 sps:$4 sm:$0xff] (%p91_p0)   ;;  %v3963_v53 = vld [vmem:[%s7964_s2 + $0x124] ss:$16 sps:$4 sm:$0xff] (%p91_p0)  }
 0x1f9   :  { %v3965_v54 = vld [vmem:[%s7964_s2 + $0x12c] ss:$16 sps:$4 sm:$0xff]   ;;  %v3967_v33 = vld [vmem:[%s7964_s2 + $0x120] ss:$16 sps:$4 sm:$0xff]   ;;  %v3968_v3 = vld [vmem:[%s7964_s2 + $0x128] ss:$16 sps:$4 sm:$0xff]  }
 0x1fa   :  { %v3969_v8 = vld [vmem:[%s7964_s2 + $0x144] ss:$16 sps:$4 sm:$0xff]   ;;  %v3971_v38 = vld [vmem:[%s7964_s2 + $0x14c] ss:$16 sps:$4 sm:$0xff]   ;;  %v3973_v49 = vld [vmem:[%s7964_s2 + $0x140] ss:$16 sps:$4 sm:$0xff]  }
 0x1fb   :  { %3201 = vmatpush1.bf16.msra.mxu0 %v3925_v52  ;;  %3347 = vmatpush1.bf16.msra.mxu1 %v3926_v5  ;;  %v3974_v39 = vld [vmem:[%s7964_s2 + $0x148] ss:$16 sps:$4 sm:$0xff]   ;;  %v3975_v61 = vld [vmem:[%s7964_s2 + $0x164] ss:$16 sps:$4 sm:$0xff]   ;;  %v3977_v37 = vld [vmem:[%s7964_s2 + $0x16c] ss:$16 sps:$4 sm:$0xff]  }
 0x1fc   :  { %3202 = vmatprep.subr.bf16.mxu0 %v3927_v51  ;;  %3348 = vmatprep.subr.bf16.mxu1 %v3929_v20  ;;  %v3979_v16 = vld [vmem:[%s7964_s2 + $0x160] ss:$16 sps:$4 sm:$0xff]   ;;  %v3980_v6 = vld [vmem:[%s7964_s2 + $0x168] ss:$16 sps:$4 sm:$0xff]   ;;  %v3981_v45 = vld [vmem:[%s7964_s2 + $0x184] ss:$16 sps:$4 sm:$0xff]  }
 0x1fd   :  { %v3983_v34 = vld [vmem:[%s7964_s2 + $0x18c] ss:$16 sps:$4 sm:$0xff]   ;;  %v3985_v9 = vld [vmem:[%s7964_s2 + $0x180] ss:$16 sps:$4 sm:$0xff]   ;;  %v3986_v58 = vld [vmem:[%s7964_s2 + $0x188] ss:$16 sps:$4 sm:$0xff]  }
 0x1fe   :  { %v3987_v18 = vld [vmem:[%s7964_s2 + $0x1a4] ss:$16 sps:$4 sm:$0xff]   ;;  %v3989_v63 = vld [vmem:[%s7964_s2 + $0x1ac] ss:$16 sps:$4 sm:$0xff]   ;;  %v3991_v41 = vld [vmem:[%s7964_s2 + $0x1a0] ss:$16 sps:$4 sm:$0xff]  }
 0x1ff   :  { %3203 = vmatpush1.bf16.msra.mxu0 %v3931_v57  ;;  %3349 = vmatpush1.bf16.msra.mxu1 %v3932_v15  ;;  %v2381_v22 = vld [vmem:[#allocation2 + $0x8] sm:$0xff]  ;;  %v3993_v10 = vld [vmem:[%s7964_s2 + $0x1c4] ss:$16 sps:$4 sm:$0xff]   ;;  %v3997_v48 = vld [vmem:[%s7964_s2 + $0x1c0] ss:$16 sps:$4 sm:$0xff]  }
 0x200   :  { %3204 = vmatprep.subr.bf16.mxu0 %v3933_v23  ;;  %3350 = vmatprep.subr.bf16.mxu1 %v3935_v31  ;;  %v2385_v42 = vld [vmem:[#allocation2 + $0x28] sm:$0xff]  ;;  %v3999_v46 = vld [vmem:[%s7964_s2 + $0x1e4] ss:$16 sps:$4 sm:$0xff]   ;;  %v4003_v29 = vld [vmem:[%s7964_s2 + $0x1e0] ss:$16 sps:$4 sm:$0xff]  }
 0x201   :  { %v2413_v12 = vpack.c.bf16 %v2385_v42, %v2381_v22  ;;  %v3992_v36 = vld [vmem:[%s7964_s2 + $0x1a8] ss:$16 sps:$4 sm:$0xff]   ;;  %v3995_v59 = vld [vmem:[%s7964_s2 + $0x1cc] ss:$16 sps:$4 sm:$0xff]   ;;  %v4007_v62 = vld [vmem:[%s7964_s2 + $0x204] ss:$16 sps:$4 sm:$0xff]  }
 0x202   :  { %v3998_v43 = vld [vmem:[%s7964_s2 + $0x1c8] ss:$16 sps:$4 sm:$0xff]   ;;  %v4001_v21 = vld [vmem:[%s7964_s2 + $0x1ec] ss:$16 sps:$4 sm:$0xff]   ;;  %v2380_v2 = vld [vmem:[#allocation2] sm:$0xff] }
 0x203   :  { %3205 = vmatpush1.bf16.msra.mxu0 %v3937_v40  ;;  %3351 = vmatpush1.bf16.msra.mxu1 %v3938_v17  ;;  %v4004_v11 = vld [vmem:[%s7964_s2 + $0x1e8] ss:$16 sps:$4 sm:$0xff]   ;;  %v2384_v56 = vld [vmem:[#allocation2 + $0x20] sm:$0xff]  ;;  %v4010_v0 = vld [vmem:[%s7964_s2 + $0x20c] ss:$16 sps:$4 sm:$0xff]  }
 0x204   :  { %3206 = vmatprep.subr.bf16.mxu0 %v3939_v60  ;;  %3352 = vmatprep.subr.bf16.mxu1 %v3941_v4  ;;  %v4005_v1 = vld [vmem:[%s7964_s2 + $0x200] ss:$16 sps:$4 sm:$0xff]   ;;  %v4008_v27 = vld [vmem:[%s7964_s2 + $0x208] ss:$16 sps:$4 sm:$0xff]   ;;  %v2412_v55 = vpack.c.bf16 %v2384_v56, %v2380_v2  ;;  %v4013_v52 = vld [vmem:[%s7964_s2 + $0x224] ss:$16 sps:$4 sm:$0xff]  }
 0x205   :  { %3228 = vmatprep.mubr.bf16.mxu0 %v2413_v12  ;;  %3374 = vmatprep.mubr.bf16.mxu1 %v2413_v12  ;;  %v4016_v5 = vld [vmem:[%s7964_s2 + $0x22c] ss:$16 sps:$4 sm:$0xff]   ;;  %v4011_v51 = vld [vmem:[%s7964_s2 + $0x220] ss:$16 sps:$4 sm:$0xff]   ;;  %v4014_v20 = vld [vmem:[%s7964_s2 + $0x228] ss:$16 sps:$4 sm:$0xff]  }
 0x206   :  { %v4019_v57 = vld [vmem:[%s7964_s2 + $0x244] ss:$16 sps:$4 sm:$0xff]   ;;  %v4022_v15 = vld [vmem:[%s7964_s2 + $0x24c] ss:$16 sps:$4 sm:$0xff]   ;;  %v4017_v23 = vld [vmem:[%s7964_s2 + $0x240] ss:$16 sps:$4 sm:$0xff]  }
 0x207   :  { %3207 = vmatpush1.bf16.msra.mxu0 %v3943_v30  ;;  %3353 = vmatpush1.bf16.msra.mxu1 %v3944_v26  ;;  %v4020_v31 = vld [vmem:[%s7964_s2 + $0x248] ss:$16 sps:$4 sm:$0xff]   ;;  %v2388_v60 = vld [vmem:[#allocation2 + $0x40] sm:$0xff]  ;;  %v4070_v2 = vld [vmem:[%s7964_s2 + $0x34c] ss:$16 sps:$4 sm:$0xff]  }
 0x208   :  { %3208 = vmatprep.subr.bf16.mxu0 %v3945_v32  ;;  %3354 = vmatprep.subr.bf16.mxu1 %v3947_v44  ;;  %v2389_v40 = vld [vmem:[#allocation2 + $0x48] sm:$0xff]  ;;  %v2392_v4 = vld [vmem:[#allocation2 + $0x60] sm:$0xff] }
 0x209   :  { %v2393_v17 = vld [vmem:[#allocation2 + $0x68] sm:$0xff]  ;;  %v4025_v30 = vld [vmem:[%s7964_s2 + $0x264] ss:$16 sps:$4 sm:$0xff]   ;;  %v2416_v32 = vpack.c.bf16 %v2392_v4, %v2388_v60  ;;  %v4065_v56 = vld [vmem:[%s7964_s2 + $0x340] ss:$16 sps:$4 sm:$0xff]  }
 0x20a   :  { %v2417_v26 = vpack.c.bf16 %v2393_v17, %v2389_v40  ;;  %v4028_v44 = vld [vmem:[%s7964_s2 + $0x26c] ss:$16 sps:$4 sm:$0xff]   ;;  %v2404_v22 = vld [vmem:[#allocation2 + $0xc0] sm:$0xff]  ;;  %v4044_v12 = vld [vmem:[%s7964_s2 + $0x2c8] ss:$16 sps:$4 sm:$0xff]  }
 0x20b   :  { %3209 = vmatpush1.bf16.msra.mxu0 %v3949_v35  ;;  %3355 = vmatpush1.bf16.msra.mxu1 %v3950_v24  ;;  %v4023_v35 = vld [vmem:[%s7964_s2 + $0x260] ss:$16 sps:$4 sm:$0xff]   ;;  %v4026_v24 = vld [vmem:[%s7964_s2 + $0x268] ss:$16 sps:$4 sm:$0xff]   ;;  %v4091_v17 = vld [vmem:[%s7964_s2 + $0x3c4] ss:$16 sps:$4 sm:$0xff]  }
 0x20c   :  { %3210 = vmatprep.subr.bf16.mxu0 %v3951_v7  ;;  %3356 = vmatprep.subr.bf16.mxu1 %v3953_v47  ;;  %v4031_v7 = vld [vmem:[%s7964_s2 + $0x284] ss:$16 sps:$4 sm:$0xff]   ;;  %v4034_v47 = vld [vmem:[%s7964_s2 + $0x28c] ss:$16 sps:$4 sm:$0xff]   ;;  %v4086_v40 = vld [vmem:[%s7964_s2 + $0x3a8] ss:$16 sps:$4 sm:$0xff]  }
 0x20d   :  { %v4094_v60 = vld [vmem:[%s7964_s2 + $0x3cc] ss:$16 sps:$4 sm:$0xff]   ;;  %v4089_v4 = vld [vmem:[%s7964_s2 + $0x3c0] ss:$16 sps:$4 sm:$0xff]  }
 0x20f   :  { %3211 = vmatpush1.bf16.msra.mxu0 %v3955_v28  ;;  %3357 = vmatpush1.bf16.msra.mxu1 %v3956_v19  ;;  %v2397_v28 = vld [vmem:[#allocation2 + $0x88] sm:$0xff] }
 0x210   :  { %3212 = vmatprep.subr.bf16.mxu0 %v3957_v25  ;;  %3358 = vmatprep.subr.bf16.mxu1 %v3959_v14  ;;  %v2401_v19 = vld [vmem:[#allocation2 + $0xa8] sm:$0xff]  ;;  %v2396_v14 = vld [vmem:[#allocation2 + $0x80] sm:$0xff] }
 0x211   :  { %v2421_v25 = vpack.c.bf16 %v2401_v19, %v2397_v28  ;;  %v2395_v28 = vld [vmem:[#allocation2 + $0x78] sm:$0xff] }
 0x213   :  { %3213 = vmatpush1.bf16.msra.mxu0 %v3961_v13  ;;  %3359 = vmatpush1.bf16.msra.mxu1 %v3962_v50  ;;  %v2400_v13 = vld [vmem:[#allocation2 + $0xa0] sm:$0xff] }
 0x214   :  { %3214 = vmatprep.subr.bf16.mxu0 %v3963_v53  ;;  %3360 = vmatprep.subr.bf16.mxu1 %v3965_v54  ;;  %v4029_v50 = vld [vmem:[%s7964_s2 + $0x280] ss:$16 sps:$4 sm:$0xff]   ;;  %v4032_v53 = vld [vmem:[%s7964_s2 + $0x288] ss:$16 sps:$4 sm:$0xff]   ;;  %v2420_v54 = vpack.c.bf16 %v2400_v13, %v2396_v14 }
 0x215   :  { %v2390_v14 = vld [vmem:[#allocation2 + $0x50] sm:$0xff] }
 0x216   :  { %v2394_v13 = vld [vmem:[#allocation2 + $0x70] sm:$0xff] }
 0x217   :  { %3215 = vmatpush1.bf16.msra.mxu0 %v3967_v33  ;;  %3361 = vmatpush1.bf16.msra.mxu1 %v3968_v3  ;;  %v4037_v33 = vld [vmem:[%s7964_s2 + $0x2a4] ss:$16 sps:$4 sm:$0xff]   ;;  %v4040_v3 = vld [vmem:[%s7964_s2 + $0x2ac] ss:$16 sps:$4 sm:$0xff]  }
 0x218   :  { %3216 = vmatprep.subr.bf16.mxu0 %v3969_v8  ;;  %3362 = vmatprep.subr.bf16.mxu1 %v3971_v38  ;;  %v4035_v8 = vld [vmem:[%s7964_s2 + $0x2a0] ss:$16 sps:$4 sm:$0xff]   ;;  %v4038_v38 = vld [vmem:[%s7964_s2 + $0x2a8] ss:$16 sps:$4 sm:$0xff]  }
 0x21b   :  { %3217 = vmatpush1.bf16.msra.mxu0 %v3973_v49  ;;  %3363 = vmatpush1.bf16.msra.mxu1 %v3974_v39  ;;  %v4043_v49 = vld [vmem:[%s7964_s2 + $0x2c4] ss:$16 sps:$4 sm:$0xff]   ;;  %v4046_v39 = vld [vmem:[%s7964_s2 + $0x2cc] ss:$16 sps:$4 sm:$0xff]  }
 0x21c   :  { %3218 = vmatprep.subr.bf16.mxu0 %v3975_v61  ;;  %3364 = vmatprep.subr.bf16.mxu1 %v3977_v37  ;;  %v2405_v61 = vld [vmem:[#allocation2 + $0xc8] sm:$0xff] }
 0x21d   :  { %v2409_v37 = vld [vmem:[#allocation2 + $0xe8] sm:$0xff] }
 0x21e   :  { %v2425_v42 = vpack.c.bf16 %v2409_v37, %v2405_v61  ;;  %v2406_v37 = vld [vmem:[#allocation2 + $0xd0] sm:$0xff] }
 0x21f   :  { %3219 = vmatpush1.bf16.msra.mxu0 %v3979_v16  ;;  %3365 = vmatpush1.bf16.msra.mxu1 %v3980_v6  ;;  %v2408_v16 = vld [vmem:[#allocation2 + $0xe0] sm:$0xff] }
 0x220   :  { %3220 = vmatprep.subr.bf16.mxu0 %v3981_v45  ;;  %3366 = vmatprep.subr.bf16.mxu1 %v3983_v34  ;;  %v4041_v6 = vld [vmem:[%s7964_s2 + $0x2c0] ss:$16 sps:$4 sm:$0xff]   ;;  %v2424_v45 = vpack.c.bf16 %v2408_v16, %v2404_v22  ;;  %v4049_v34 = vld [vmem:[%s7964_s2 + $0x2e4] ss:$16 sps:$4 sm:$0xff]  }
 0x221   :  { %v2410_v22 = vld [vmem:[#allocation2 + $0xf0] sm:$0xff] }
 0x223   :  { %3221 = vmatpush1.bf16.msra.mxu0 %v3985_v9  ;;  %3367 = vmatpush1.bf16.msra.mxu1 %v3986_v58  ;;  %v4052_v9 = vld [vmem:[%s7964_s2 + $0x2ec] ss:$16 sps:$4 sm:$0xff]  }
 0x224   :  { %3222 = vmatprep.subr.bf16.mxu0 %v3987_v18  ;;  %3368 = vmatprep.subr.bf16.mxu1 %v3989_v63  ;;  %v2383_v58 = vld [vmem:[#allocation2 + $0x18] sm:$0xff]  ;;  %v4047_v63 = vld [vmem:[%s7964_s2 + $0x2e0] ss:$16 sps:$4 sm:$0xff]  }
 0x225   :  { %v2387_v18 = vld [vmem:[#allocation2 + $0x38] sm:$0xff] }
 0x227   :  { %3223 = vmatpush1.bf16.msra.mxu0 %v3991_v41  ;;  %3369 = vmatpush1.bf16.msra.mxu1 %v3992_v36  ;;  %v4050_v41 = vld [vmem:[%s7964_s2 + $0x2e8] ss:$16 sps:$4 sm:$0xff]   ;;  %v2415_v36 = vpack.c.bf16 %v2387_v18, %v2383_v58 }
 0x228   :  { %3224 = vmatprep.subr.bf16.mxu0 %v3993_v10  ;;  %3370 = vmatprep.subr.bf16.mxu1 %v3995_v59  ;;  %v4055_v10 = vld [vmem:[%s7964_s2 + $0x304] ss:$16 sps:$4 sm:$0xff]   ;;  %v4058_v59 = vld [vmem:[%s7964_s2 + $0x30c] ss:$16 sps:$4 sm:$0xff]  }
 0x22b   :  { %3225 = vmatpush1.bf16.msra.mxu0 %v3997_v48  ;;  %3371 = vmatpush1.bf16.msra.mxu1 %v3998_v43  ;;  %v4053_v48 = vld [vmem:[%s7964_s2 + $0x300] ss:$16 sps:$4 sm:$0xff]   ;;  %v4056_v43 = vld [vmem:[%s7964_s2 + $0x308] ss:$16 sps:$4 sm:$0xff]  }
 0x22c   :  { %3226 = vmatprep.subr.bf16.mxu0 %v3999_v46  ;;  %3372 = vmatprep.subr.bf16.mxu1 %v4001_v21  ;;  %v4061_v46 = vld [vmem:[%s7964_s2 + $0x324] ss:$16 sps:$4 sm:$0xff]   ;;  %v4064_v21 = vld [vmem:[%s7964_s2 + $0x32c] ss:$16 sps:$4 sm:$0xff]  }
 0x22f   :  { %3227 = vmatpush1.bf16.msra.mxu0 %v4003_v29  ;;  %3373 = vmatpush1.bf16.msra.mxu1 %v4004_v11  ;;  %v4059_v29 = vld [vmem:[%s7964_s2 + $0x320] ss:$16 sps:$4 sm:$0xff]   ;;  %v4062_v11 = vld [vmem:[%s7964_s2 + $0x328] ss:$16 sps:$4 sm:$0xff]  }
 0x230   :  { %3269 = vmatprep.subr.bf16.mxu0 %v4007_v62  ;;  %3415 = vmatprep.subr.bf16.mxu1 %v4010_v0  ;;  %v4067_v62 = vld [vmem:[%s7964_s2 + $0x344] ss:$16 sps:$4 sm:$0xff]   ;;  %v4068_v0 = vld [vmem:[%s7964_s2 + $0x348] ss:$16 sps:$4 sm:$0xff]  }
 0x232   :  { %3229 = vmatmul.mubr.bf16.vlgmr.msra.gmra.mrb[0].mxu0 %v2412_v55  ;;  %3375 = vmatmul.mubr.bf16.vlgmr.msra.gmra.mrb[0].mxu1 %v2412_v55  ;;  %v4071_v55 = vld [vmem:[%s7964_s2 + $0x360] ss:$16 sps:$4 sm:$0xff]  }
 0x233   :  { %3270 = vmatpush1.bf16.msra.mxu0 %v4005_v1  ;;  %3416 = vmatpush1.bf16.msra.mxu1 %v4008_v27  ;;  %v4073_v1 = vld [vmem:[%s7964_s2 + $0x364] ss:$16 sps:$4 sm:$0xff]   ;;  %v4076_v27 = vld [vmem:[%s7964_s2 + $0x36c] ss:$16 sps:$4 sm:$0xff]  }
 0x234   :  { %3271 = vmatprep.subr.bf16.mxu0 %v4013_v52  ;;  %3417 = vmatprep.subr.bf16.mxu1 %v4016_v5  ;;  %v4074_v52 = vld [vmem:[%s7964_s2 + $0x368] ss:$16 sps:$4 sm:$0xff]   ;;  %v4079_v5 = vld [vmem:[%s7964_s2 + $0x384] ss:$16 sps:$4 sm:$0xff]  }
 0x235   :  { %3238 = vmatprep.mubr.bf16.mxu0 %v2417_v26  ;;  %3384 = vmatprep.mubr.bf16.mxu1 %v2417_v26  ;;  %v4097_v26 = vld [vmem:[%s7964_s2 + $0x3e4] ss:$16 sps:$4 sm:$0xff]  }
 0x237   :  { %3272 = vmatpush1.bf16.msra.mxu0 %v4011_v51  ;;  %3418 = vmatpush1.bf16.msra.mxu1 %v4014_v20  ;;  %v4082_v51 = vld [vmem:[%s7964_s2 + $0x38c] ss:$16 sps:$4 sm:$0xff]   ;;  %v4077_v20 = vld [vmem:[%s7964_s2 + $0x380] ss:$16 sps:$4 sm:$0xff]  }
 0x238   :  { %3273 = vmatprep.subr.bf16.mxu0 %v4019_v57  ;;  %3419 = vmatprep.subr.bf16.mxu1 %v4022_v15  ;;  %v4080_v57 = vld [vmem:[%s7964_s2 + $0x388] ss:$16 sps:$4 sm:$0xff]   ;;  %v4085_v15 = vld [vmem:[%s7964_s2 + $0x3a4] ss:$16 sps:$4 sm:$0xff]  }
 0x23a   :  { %3239 = vmatmul.mubr.bf16.gmra.mrb[4].mxu0 %v2416_v32  ;;  %3385 = vmatmul.mubr.bf16.gmra.mrb[4].mxu1 %v2416_v32  ;;  %v4100_v32 = vld [vmem:[%s7964_s2 + $0x3ec] ss:$16 sps:$4 sm:$0xff]  }
 0x23b   :  { %3274 = vmatpush1.bf16.msra.mxu0 %v4017_v23  ;;  %3420 = vmatpush1.bf16.msra.mxu1 %v4020_v31  ;;  %v4088_v23 = vld [vmem:[%s7964_s2 + $0x3ac] ss:$16 sps:$4 sm:$0xff]   ;;  %v4083_v31 = vld [vmem:[%s7964_s2 + $0x3a0] ss:$16 sps:$4 sm:$0xff]  }
 0x23c   :  { %3275 = vmatprep.subr.bf16.mxu0 %v4025_v30  ;;  %3421 = vmatprep.subr.bf16.mxu1 %v4028_v44  ;;  %v4092_v30 = vld [vmem:[%s7964_s2 + $0x3c8] ss:$16 sps:$4 sm:$0xff]   ;;  %v4095_v44 = vld [vmem:[%s7964_s2 + $0x3e0] ss:$16 sps:$4 sm:$0xff]  }
 0x23d   :  { %3248 = vmatprep.mubr.bf16.mxu0 %v2421_v25  ;;  %3394 = vmatprep.mubr.bf16.mxu1 %v2421_v25 }
 0x23f   :  { %3276 = vmatpush1.bf16.msra.mxu0 %v4023_v35  ;;  %3422 = vmatpush1.bf16.msra.mxu1 %v4026_v24  ;;  %v4098_v35 = vld [vmem:[%s7964_s2 + $0x3e8] ss:$16 sps:$4 sm:$0xff]   ;;  %v2382_v24 = vld [vmem:[#allocation2 + $0x10] sm:$0xff] }
 0x240   :  { %3277 = vmatprep.subr.bf16.mxu0 %v4031_v7  ;;  %3423 = vmatprep.subr.bf16.mxu1 %v4034_v47  ;;  %v2386_v7 = vld [vmem:[#allocation2 + $0x30] sm:$0xff]  ;;  %v2391_v47 = vld [vmem:[#allocation2 + $0x58] sm:$0xff] }
 0x241   :  { %v2414_v19 = vpack.c.bf16 %v2386_v7, %v2382_v24  ;;  %v2419_v25 = vpack.c.bf16 %v2395_v28, %v2391_v47 }
 0x242   :  { %3249 = vmatmul.mubr.bf16.gmra.mrb[8].mxu0 %v2420_v54  ;;  %3395 = vmatmul.mubr.bf16.gmra.mrb[8].mxu1 %v2420_v54  ;;  %v2418_v54 = vpack.c.bf16 %v2394_v13, %v2390_v14 }
 0x243   :  { %3278 = vmatpush1.bf16.msra.mxu0 %v4029_v50  ;;  %3424 = vmatpush1.bf16.msra.mxu1 %v4032_v53  ;;  %v2399_v50 = vld [vmem:[#allocation2 + $0x98] sm:$0xff] }
 0x244   :  { %3279 = vmatprep.subr.bf16.mxu0 %v4037_v33  ;;  %3425 = vmatprep.subr.bf16.mxu1 %v4040_v3  ;;  %v2403_v53 = vld [vmem:[#allocation2 + $0xb8] sm:$0xff]  ;;  %v2398_v3 = vld [vmem:[#allocation2 + $0x90] sm:$0xff] }
 0x245   :  { %3258 = vmatprep.mubr.bf16.mxu0 %v2425_v42  ;;  %3404 = vmatprep.mubr.bf16.mxu1 %v2425_v42  ;;  %v2423_v33 = vpack.c.bf16 %v2403_v53, %v2399_v50  ;;  %v2426_v42 = vpack.c.bf16 %v2410_v22, %v2406_v37 }
 0x247   :  { %3280 = vmatpush1.bf16.msra.mxu0 %v4035_v8  ;;  %3426 = vmatpush1.bf16.msra.mxu1 %v4038_v38  ;;  %v2402_v8 = vld [vmem:[#allocation2 + $0xb0] sm:$0xff]  ;;  %v2407_v38 = vld [vmem:[#allocation2 + $0xd8] sm:$0xff] }
 0x248   :  { %3281 = vmatprep.subr.bf16.mxu0 %v4043_v49  ;;  %3427 = vmatprep.subr.bf16.mxu1 %v4046_v39  ;;  %v2411_v49 = vld [vmem:[#allocation2 + $0xf8] sm:$0xff]  ;;  %v2422_v39 = vpack.c.bf16 %v2402_v8, %v2398_v3 }
 0x249   :  { %v2427_v61 = vpack.c.bf16 %v2411_v49, %v2407_v38 }
 0x24a   :  { %3259 = vmatmul.mubr.bf16.gmra.mrb[12].mxu0 %v2424_v45  ;;  %3405 = vmatmul.mubr.bf16.gmra.mrb[12].mxu1 %v2424_v45 }
 0x24b   :  { %3282 = vmatpush1.bf16.msra.mxu0 %v4041_v6  ;;  %3428 = vmatpush1.bf16.msra.mxu1 %v4044_v12 }
 0x24c   :  { %3283 = vmatprep.subr.bf16.mxu0 %v4049_v34  ;;  %3429 = vmatprep.subr.bf16.mxu1 %v4052_v9 }
 0x24d   :  { %3301 = vmatprep.mubr.bf16.mxu0 %v2415_v36  ;;  %3447 = vmatprep.mubr.bf16.mxu1 %v2415_v36 }
 0x24f   :  { %3284 = vmatpush1.bf16.msra.mxu0 %v4047_v63  ;;  %3430 = vmatpush1.bf16.msra.mxu1 %v4050_v41 }
 0x250   :  { %3285 = vmatprep.subr.bf16.mxu0 %v4055_v10  ;;  %3431 = vmatprep.subr.bf16.mxu1 %v4058_v59 }
 0x253   :  { %3286 = vmatpush1.bf16.msra.mxu0 %v4053_v48  ;;  %3432 = vmatpush1.bf16.msra.mxu1 %v4056_v43 }
 0x254   :  { %3287 = vmatprep.subr.bf16.mxu0 %v4061_v46  ;;  %3433 = vmatprep.subr.bf16.mxu1 %v4064_v21 }
 0x257   :  { %3288 = vmatpush1.bf16.msra.mxu0 %v4059_v29  ;;  %3434 = vmatpush1.bf16.msra.mxu1 %v4062_v11 }
 0x258   :  { %3289 = vmatprep.subr.bf16.mxu0 %v4067_v62  ;;  %3435 = vmatprep.subr.bf16.mxu1 %v4070_v2 }
 0x25b   :  { %3290 = vmatpush1.bf16.msra.mxu0 %v4065_v56  ;;  %3436 = vmatpush1.bf16.msra.mxu1 %v4068_v0 }
 0x25c   :  { %3291 = vmatprep.subr.bf16.mxu0 %v4073_v1  ;;  %3437 = vmatprep.subr.bf16.mxu1 %v4076_v27 }
 0x25f   :  { %3292 = vmatpush1.bf16.msra.mxu0 %v4071_v55  ;;  %3438 = vmatpush1.bf16.msra.mxu1 %v4074_v52 }
 0x260   :  { %3293 = vmatprep.subr.bf16.mxu0 %v4079_v5  ;;  %3439 = vmatprep.subr.bf16.mxu1 %v4082_v51 }
 0x263   :  { %3294 = vmatpush1.bf16.msra.mxu0 %v4077_v20  ;;  %3440 = vmatpush1.bf16.msra.mxu1 %v4080_v57 }
 0x264   :  { %3295 = vmatprep.subr.bf16.mxu0 %v4085_v15  ;;  %3441 = vmatprep.subr.bf16.mxu1 %v4088_v23 }
 0x267   :  { %3296 = vmatpush1.bf16.msra.mxu0 %v4083_v31  ;;  %3442 = vmatpush1.bf16.msra.mxu1 %v4086_v40 }
 0x268   :  { %3297 = vmatprep.subr.bf16.mxu0 %v4091_v17  ;;  %3443 = vmatprep.subr.bf16.mxu1 %v4094_v60 }
 0x26b   :  { %3298 = vmatpush1.bf16.msra.mxu0 %v4089_v4  ;;  %3444 = vmatpush1.bf16.msra.mxu1 %v4092_v30 }
 0x26c   :  { %3299 = vmatprep.subr.bf16.mxu0 %v4097_v26  ;;  %3445 = vmatprep.subr.bf16.mxu1 %v4100_v32 }
 0x26f   :  { %3300 = vmatpush1.bf16.msra.mxu0 %v4095_v44  ;;  %3446 = vmatpush1.bf16.msra.mxu1 %v4098_v35 }
 0x272   :  { %3302 = vmatmul.mubr.bf16.vlgmr.msra.gmra.mrb[0].mxu0 %v2414_v19  ;;  %3448 = vmatmul.mubr.bf16.vlgmr.msra.gmra.mrb[0].mxu1 %v2414_v19 }
 0x273   :  { %3311 = vmatprep.mubr.bf16.mxu0 %v2419_v25  ;;  %3457 = vmatprep.mubr.bf16.mxu1 %v2419_v25 }
 0x27a   :  { %3312 = vmatmul.mubr.bf16.gmra.mrb[4].mxu0 %v2418_v54  ;;  %3458 = vmatmul.mubr.bf16.gmra.mrb[4].mxu1 %v2418_v54 }
 0x27b   :  { %3321 = vmatprep.mubr.bf16.mxu0 %v2423_v33  ;;  %3467 = vmatprep.mubr.bf16.mxu1 %v2423_v33 }
 0x282   :  { %3322 = vmatmul.mubr.bf16.gmra.mrb[8].mxu0 %v2422_v39  ;;  %3468 = vmatmul.mubr.bf16.gmra.mrb[8].mxu1 %v2422_v39 }
 0x283   :  { %3331 = vmatprep.mubr.bf16.mxu0 %v2427_v61  ;;  %3477 = vmatprep.mubr.bf16.mxu1 %v2427_v61 }
 0x28a   :  { %3332 = vmatmul.mubr.bf16.gmra.mrb[12].mxu0 %v2426_v42  ;;  %3478 = vmatmul.mubr.bf16.gmra.mrb[12].mxu1 %v2426_v42 }
 0x345   :  { %v3303_v16 = vpop.f32.mrb[0].mxu0  ;;  %v3449_v6 = vpop.f32.mrb[0].mxu1 }
 0x346   :  { %v3488_v12 = vadd.f32 3.0, %v3303_v16  ;;  %v3490_v45 = vadd.f32 3.0, %v3449_v6  ;;  %v3305_v34 = vpop.f32.mrb[1].mxu0  ;;  %v3451_v9 = vpop.f32.mrb[1].mxu1 }
 0x347   :  { %v3489_v58 = vadd.f32 3.0, %v3305_v34  ;;  %v3491_v18 = vadd.f32 3.0, %v3451_v9  ;;  %v3307_v63 = vpop.f32.mrb[2].mxu0  ;;  %v3453_v41 = vpop.f32.mrb[2].mxu1 }
 0x348   :  { %v3520_v36 = vmax.f32 %v3488_v12, 0.0  ;;  %v3522_v10 = vmax.f32 %v3490_v45, 0.0  ;;  %v3492_v59 = vadd.f32 3.0, %v3307_v63  ;;  %v3494_v48 = vadd.f32 3.0, %v3453_v41  ;;  %v3309_v43 = vpop.f32.mrb[3].mxu0  ;;  %v3455_v46 = vpop.f32.mrb[3].mxu1 }
 0x349   :  { %v3521_v21 = vmax.f32 %v3489_v58, 0.0  ;;  %v3523_v29 = vmax.f32 %v3491_v18, 0.0  ;;  %v3493_v11 = vadd.f32 3.0, %v3309_v43  ;;  %v3495_v62 = vadd.f32 3.0, %v3455_v46 }
 0x34a   :  { %v3552_v2 = vmin.f32 %v3520_v36, 6.0  ;;  %v3554_v56 = vmin.f32 %v3522_v10, 6.0  ;;  %v3524_v0 = vmax.f32 %v3492_v59, 0.0  ;;  %v3526_v1 = vmax.f32 %v3494_v48, 0.0 }
 0x34b   :  { %v3553_v27 = vmin.f32 %v3521_v21, 6.0  ;;  %v3555_v55 = vmin.f32 %v3523_v29, 6.0  ;;  %v3525_v52 = vmax.f32 %v3493_v11, 0.0  ;;  %v3527_v5 = vmax.f32 %v3495_v62, 0.0 }
 0x34c   :  { %v3584_v51 = vmul.f32 %v3552_v2, %v3303_v16  ;;  %v3586_v20 = vmul.f32 %v3554_v56, %v3449_v6  ;;  %v3556_v57 = vmin.f32 %v3524_v0, 6.0  ;;  %v3558_v15 = vmin.f32 %v3526_v1, 6.0 }
 0x34d   :  { %v3585_v23 = vmul.f32 %v3553_v27, %v3305_v34  ;;  %v3587_v31 = vmul.f32 %v3555_v55, %v3451_v9  ;;  %v3557_v40 = vmin.f32 %v3525_v52, 6.0  ;;  %v3559_v17 = vmin.f32 %v3527_v5, 6.0  ;;  %v3313_v60 = vpop.f32.mrb[4].mxu0  ;;  %v3459_v4 = vpop.f32.mrb[4].mxu1 }
 0x34e   :  { %v3616_v30 = vmul.f32 0.16666667, %v3584_v51  ;;  %v3618_v26 = vmul.f32 0.16666667, %v3586_v20  ;;  %v3588_v32 = vmul.f32 %v3556_v57, %v3307_v63  ;;  %v3590_v44 = vmul.f32 %v3558_v15, %v3453_v41  ;;  %v3315_v35 = vpop.f32.mrb[5].mxu0  ;;  %v3461_v24 = vpop.f32.mrb[5].mxu1 }
 0x34f   :  { %v3617_v7 = vmul.f32 0.16666667, %v3585_v23  ;;  %v3619_v47 = vmul.f32 0.16666667, %v3587_v31  ;;  %v3589_v28 = vmul.f32 %v3557_v40, %v3309_v43  ;;  %v3591_v19 = vmul.f32 %v3559_v17, %v3455_v46  ;;  %v3317_v25 = vpop.f32.mrb[6].mxu0  ;;  %v3463_v14 = vpop.f32.mrb[6].mxu1 }
 0x350   :  { %3648 = vst [vmem:[%s7965_s3] sm:$0xff] %v3616_v30  ;;  %3650 = vst [vmem:[%s7965_s3 + $0x10] sm:$0xff] %v3618_v26  ;;  %v3620_v13 = vmul.f32 0.16666667, %v3588_v32  ;;  %v3622_v50 = vmul.f32 0.16666667, %v3590_v44  ;;  %v3496_v53 = vadd.f32 3.0, %v3313_v60 }
 0x351   :  { %v3498_v54 = vadd.f32 3.0, %v3459_v4  ;;  %3649 = vst [vmem:[%s7965_s3 + $0x8] sm:$0xff] %v3617_v7  ;;  %3651 = vst [vmem:[%s7965_s3 + $0x18] sm:$0xff] %v3619_v47  ;;  %v3621_v33 = vmul.f32 0.16666667, %v3589_v28  ;;  %v3497_v8 = vadd.f32 3.0, %v3315_v35 }
 0x352   :  { %v3623_v3 = vmul.f32 0.16666667, %v3591_v19  ;;  %v3499_v38 = vadd.f32 3.0, %v3461_v24  ;;  %3652 = vst [vmem:[%s7965_s3 + $0x20] sm:$0xff] %v3620_v13  ;;  %3654 = vst [vmem:[%s7965_s3 + $0x30] sm:$0xff] %v3622_v50  ;;  %v3528_v49 = vmax.f32 %v3496_v53, 0.0 }
 0x353   :  { %v3530_v39 = vmax.f32 %v3498_v54, 0.0  ;;  %v3500_v61 = vadd.f32 3.0, %v3317_v25  ;;  %v3502_v37 = vadd.f32 3.0, %v3463_v14  ;;  %v3319_v22 = vpop.f32.mrb[7].mxu0  ;;  %v3465_v42 = vpop.f32.mrb[7].mxu1  ;;  %3653 = vst [vmem:[%s7965_s3 + $0x28] sm:$0xff] %v3621_v33 }
 0x354   :  { %3655 = vst [vmem:[%s7965_s3 + $0x38] sm:$0xff] %v3623_v3  ;;  %v3529_v16 = vmax.f32 %v3497_v8, 0.0  ;;  %v3531_v6 = vmax.f32 %v3499_v38, 0.0  ;;  %v3501_v12 = vadd.f32 3.0, %v3319_v22  ;;  %v3503_v45 = vadd.f32 3.0, %v3465_v42 }
 0x355   :  { %v3560_v34 = vmin.f32 %v3528_v49, 6.0  ;;  %v3562_v9 = vmin.f32 %v3530_v39, 6.0  ;;  %v3532_v58 = vmax.f32 %v3500_v61, 0.0  ;;  %v3534_v18 = vmax.f32 %v3502_v37, 0.0  ;;  %v3323_v59 = vpop.f32.mrb[8].mxu0  ;;  %v3469_v48 = vpop.f32.mrb[8].mxu1 }
 0x356   :  { %v3561_v63 = vmin.f32 %v3529_v16, 6.0  ;;  %v3563_v41 = vmin.f32 %v3531_v6, 6.0  ;;  %v3533_v36 = vmax.f32 %v3501_v12, 0.0  ;;  %v3535_v10 = vmax.f32 %v3503_v45, 0.0  ;;  %v3325_v11 = vpop.f32.mrb[9].mxu0  ;;  %v3471_v62 = vpop.f32.mrb[9].mxu1 }
 0x357   :  { %v3592_v43 = vmul.f32 %v3560_v34, %v3313_v60  ;;  %v3594_v46 = vmul.f32 %v3562_v9, %v3459_v4  ;;  %v3564_v21 = vmin.f32 %v3532_v58, 6.0  ;;  %v3566_v29 = vmin.f32 %v3534_v18, 6.0  ;;  %v3327_v27 = vpop.f32.mrb[10].mxu0  ;;  %v3473_v55 = vpop.f32.mrb[10].mxu1 }
 0x358   :  { %v3593_v2 = vmul.f32 %v3561_v63, %v3315_v35  ;;  %v3595_v56 = vmul.f32 %v3563_v41, %v3461_v24  ;;  %v3565_v0 = vmin.f32 %v3533_v36, 6.0  ;;  %v3567_v1 = vmin.f32 %v3535_v10, 6.0  ;;  %v3329_v57 = vpop.f32.mrb[11].mxu0  ;;  %v3475_v15 = vpop.f32.mrb[11].mxu1 }
 0x359   :  { %v3624_v52 = vmul.f32 0.16666667, %v3592_v43  ;;  %v3626_v5 = vmul.f32 0.16666667, %v3594_v46  ;;  %v3596_v51 = vmul.f32 %v3564_v21, %v3317_v25  ;;  %v3598_v20 = vmul.f32 %v3566_v29, %v3463_v14 }
 0x35a   :  { %v3625_v23 = vmul.f32 0.16666667, %v3593_v2  ;;  %v3627_v31 = vmul.f32 0.16666667, %v3595_v56  ;;  %v3597_v40 = vmul.f32 %v3565_v0, %v3319_v22  ;;  %v3599_v17 = vmul.f32 %v3567_v1, %v3465_v42 }
 0x35b   :  { %3656 = vst [vmem:[%s7965_s3 + $0x40] sm:$0xff] %v3624_v52  ;;  %3658 = vst [vmem:[%s7965_s3 + $0x50] sm:$0xff] %v3626_v5  ;;  %v3628_v60 = vmul.f32 0.16666667, %v3596_v51  ;;  %v3630_v4 = vmul.f32 0.16666667, %v3598_v20 }
 0x35c   :  { %v3504_v30 = vadd.f32 3.0, %v3323_v59  ;;  %v3506_v26 = vadd.f32 3.0, %v3469_v48  ;;  %3657 = vst [vmem:[%s7965_s3 + $0x48] sm:$0xff] %v3625_v23  ;;  %3659 = vst [vmem:[%s7965_s3 + $0x58] sm:$0xff] %v3627_v31  ;;  %v3629_v32 = vmul.f32 0.16666667, %v3597_v40 }
 0x35d   :  { %v3631_v44 = vmul.f32 0.16666667, %v3599_v17  ;;  %v3505_v35 = vadd.f32 3.0, %v3325_v11  ;;  %v3507_v24 = vadd.f32 3.0, %v3471_v62  ;;  %3660 = vst [vmem:[%s7965_s3 + $0x60] sm:$0xff] %v3628_v60  ;;  %3662 = vst [vmem:[%s7965_s3 + $0x70] sm:$0xff] %v3630_v4 }
 0x35e   :  { %v3536_v7 = vmax.f32 %v3504_v30, 0.0  ;;  %v3538_v47 = vmax.f32 %v3506_v26, 0.0  ;;  %v3508_v28 = vadd.f32 3.0, %v3327_v27  ;;  %v3510_v19 = vadd.f32 3.0, %v3473_v55  ;;  %3661 = vst [vmem:[%s7965_s3 + $0x68] sm:$0xff] %v3629_v32  ;;  %v7906_v53 = vpop.f32.mrb[12].mxu0 }
 0x35f   :  { %3663 = vst [vmem:[%s7965_s3 + $0x78] sm:$0xff] %v3631_v44  ;;  %v3537_v25 = vmax.f32 %v3505_v35, 0.0  ;;  %v3539_v14 = vmax.f32 %v3507_v24, 0.0  ;;  %v3509_v13 = vadd.f32 3.0, %v3329_v57  ;;  %v3511_v50 = vadd.f32 3.0, %v3475_v15  ;;  %v7908_v54 = vpop.f32.mrb[12].mxu1 }
 0x360   :  { %v3568_v33 = vmin.f32 %v3536_v7, 6.0  ;;  %v3570_v3 = vmin.f32 %v3538_v47, 6.0  ;;  %v3540_v8 = vmax.f32 %v3508_v28, 0.0  ;;  %v3542_v38 = vmax.f32 %v3510_v19, 0.0  ;;  %v3335_v49 = vpop.f32.mrb[13].mxu0  ;;  %v3481_v39 = vpop.f32.mrb[13].mxu1 }
 0x361   :  { %v3569_v61 = vmin.f32 %v3537_v25, 6.0  ;;  %v3571_v37 = vmin.f32 %v3539_v14, 6.0  ;;  %v3541_v22 = vmax.f32 %v3509_v13, 0.0  ;;  %v3543_v42 = vmax.f32 %v3511_v50, 0.0  ;;  %v3337_v16 = vpop.f32.mrb[14].mxu0  ;;  %v3483_v6 = vpop.f32.mrb[14].mxu1 }
 0x362   :  { %v3600_v12 = vmul.f32 %v3568_v33, %v3323_v59  ;;  %v3602_v45 = vmul.f32 %v3570_v3, %v3469_v48  ;;  %v3572_v34 = vmin.f32 %v3540_v8, 6.0  ;;  %v3574_v9 = vmin.f32 %v3542_v38, 6.0  ;;  %v3339_v58 = vpop.f32.mrb[15].mxu0  ;;  %v3485_v18 = vpop.f32.mrb[15].mxu1 }
 0x363   :  { %v3601_v63 = vmul.f32 %v3569_v61, %v3325_v11  ;;  %v3603_v41 = vmul.f32 %v3571_v37, %v3471_v62  ;;  %v3573_v36 = vmin.f32 %v3541_v22, 6.0  ;;  %v3575_v10 = vmin.f32 %v3543_v42, 6.0 }
 0x364   :  { %v3632_v43 = vmul.f32 0.16666667, %v3600_v12  ;;  %v3634_v46 = vmul.f32 0.16666667, %v3602_v45  ;;  %v3604_v21 = vmul.f32 %v3572_v34, %v3327_v27  ;;  %v3606_v29 = vmul.f32 %v3574_v9, %v3473_v55 }
 0x365   :  { %v3633_v2 = vmul.f32 0.16666667, %v3601_v63  ;;  %v3635_v56 = vmul.f32 0.16666667, %v3603_v41  ;;  %v3605_v0 = vmul.f32 %v3573_v36, %v3329_v57  ;;  %v3607_v1 = vmul.f32 %v3575_v10, %v3475_v15 }
 0x366   :  { %3664 = vst [vmem:[%s7965_s3 + $0x80] sm:$0xff] %v3632_v43  ;;  %3666 = vst [vmem:[%s7965_s3 + $0x90] sm:$0xff] %v3634_v46  ;;  %v3636_v59 = vmul.f32 0.16666667, %v3604_v21  ;;  %v3638_v48 = vmul.f32 0.16666667, %v3606_v29 }
 0x367   :  { %v3512_v11 = vadd.f32 3.0, %v7906_v53  ;;  %v3514_v62 = vadd.f32 3.0, %v7908_v54  ;;  %3665 = vst [vmem:[%s7965_s3 + $0x88] sm:$0xff] %v3633_v2  ;;  %3667 = vst [vmem:[%s7965_s3 + $0x98] sm:$0xff] %v3635_v56  ;;  %v3637_v27 = vmul.f32 0.16666667, %v3605_v0 }
 0x368   :  { %v3639_v55 = vmul.f32 0.16666667, %v3607_v1  ;;  %v3513_v52 = vadd.f32 3.0, %v3335_v49  ;;  %v3515_v5 = vadd.f32 3.0, %v3481_v39  ;;  %3668 = vst [vmem:[%s7965_s3 + $0xa0] sm:$0xff] %v3636_v59  ;;  %3670 = vst [vmem:[%s7965_s3 + $0xb0] sm:$0xff] %v3638_v48 }
 0x369   :  { %v3544_v51 = vmax.f32 %v3512_v11, 0.0  ;;  %v3546_v20 = vmax.f32 %v3514_v62, 0.0  ;;  %v3516_v57 = vadd.f32 3.0, %v3337_v16  ;;  %v3518_v15 = vadd.f32 3.0, %v3483_v6  ;;  %3669 = vst [vmem:[%s7965_s3 + $0xa8] sm:$0xff] %v3637_v27 }
 0x36a   :  { %3671 = vst [vmem:[%s7965_s3 + $0xb8] sm:$0xff] %v3639_v55  ;;  %v3545_v23 = vmax.f32 %v3513_v52, 0.0  ;;  %v3547_v31 = vmax.f32 %v3515_v5, 0.0  ;;  %v3517_v40 = vadd.f32 3.0, %v3339_v58  ;;  %v3519_v17 = vadd.f32 3.0, %v3485_v18 }
 0x36b   :  { %v3576_v60 = vmin.f32 %v3544_v51, 6.0  ;;  %v3578_v4 = vmin.f32 %v3546_v20, 6.0  ;;  %v3548_v30 = vmax.f32 %v3516_v57, 0.0  ;;  %v3550_v26 = vmax.f32 %v3518_v15, 0.0 }
 0x36c   :  { %v3577_v32 = vmin.f32 %v3545_v23, 6.0  ;;  %v3579_v44 = vmin.f32 %v3547_v31, 6.0  ;;  %v3549_v35 = vmax.f32 %v3517_v40, 0.0  ;;  %v3551_v24 = vmax.f32 %v3519_v17, 0.0 }
 0x36d   :  { %v3608_v7 = vmul.f32 %v3576_v60, %v7906_v53  ;;  %v3610_v47 = vmul.f32 %v3578_v4, %v7908_v54  ;;  %v3580_v28 = vmin.f32 %v3548_v30, 6.0  ;;  %v3582_v19 = vmin.f32 %v3550_v26, 6.0 }
 0x36e   :  { %v3609_v25 = vmul.f32 %v3577_v32, %v3335_v49  ;;  %v3611_v14 = vmul.f32 %v3579_v44, %v3481_v39  ;;  %v3581_v13 = vmin.f32 %v3549_v35, 6.0  ;;  %v3583_v50 = vmin.f32 %v3551_v24, 6.0 }
 0x36f   :  { %v3640_v33 = vmul.f32 0.16666667, %v3608_v7  ;;  %v3642_v3 = vmul.f32 0.16666667, %v3610_v47  ;;  %v3612_v8 = vmul.f32 %v3580_v28, %v3337_v16  ;;  %v3614_v38 = vmul.f32 %v3582_v19, %v3483_v6 }
 0x370   :  { %v3641_v61 = vmul.f32 0.16666667, %v3609_v25  ;;  %v3643_v37 = vmul.f32 0.16666667, %v3611_v14  ;;  %v3613_v22 = vmul.f32 %v3581_v13, %v3339_v58  ;;  %v3615_v42 = vmul.f32 %v3583_v50, %v3485_v18 }
 0x371   :  { %3672 = vst [vmem:[%s7965_s3 + $0xc0] sm:$0xff] %v3640_v33  ;;  %3674 = vst [vmem:[%s7965_s3 + $0xd0] sm:$0xff] %v3642_v3  ;;  %v3644_v53 = vmul.f32 0.16666667, %v3612_v8  ;;  %v3646_v54 = vmul.f32 0.16666667, %v3614_v38 }
 0x372   :  { %3673 = vst [vmem:[%s7965_s3 + $0xc8] sm:$0xff] %v3641_v61  ;;  %3675 = vst [vmem:[%s7965_s3 + $0xd8] sm:$0xff] %v3643_v37  ;;  %v3645_v49 = vmul.f32 0.16666667, %v3613_v22  ;;  %v3647_v39 = vmul.f32 0.16666667, %v3615_v42 }
 0x373   :  { %3676 = vst [vmem:[%s7965_s3 + $0xe0] sm:$0xff] %v3644_v53  ;;  %3678 = vst [vmem:[%s7965_s3 + $0xf0] sm:$0xff] %v3646_v54 }
 0x374   :  { %3677 = vst [vmem:[%s7965_s3 + $0xe8] sm:$0xff] %v3645_v49  ;;  %3679 = vst [vmem:[%s7965_s3 + $0xf8] sm:$0xff] %v3647_v39 }

</bundles_post_ra>
